<compile_context>
chip_gen: v7x
topology: tpu7x:2x2x1
jax: 0.10.0
libtpu: 0.0.40
codegen_flags: <defaults>
</compile_context>

<pallas_src>
import jax
import jax.numpy as jnp
from jax.experimental import pallas as pl
from jax.experimental.pallas import tpu as pltpu


# bf16 matmul operands (f32 accumulation).  Set False for pure-f32 operands.
USE_BF16_MATMUL = True


def _pick_rows_per_tile(m_rows, target=560):
    """Largest divisor of m_rows that is a multiple of 8 and <= target,
    preferring an even grid-step count (v7x megacore balance)."""
    best = best_even = None
    for d in range(8, min(target, m_rows) + 1, 8):
        if m_rows % d == 0:
            best = d
            if (m_rows // d) % 2 == 0:
                best_even = d
    if best_even is not None:
        return best_even
    return best if best is not None else m_rows


# --------------------------------------------------------------------------
# Pallas kernels
# --------------------------------------------------------------------------
def _conv_relu_pool_kernel(p_ref, w_ref, b_ref, o_ref):
    """Fused conv-as-matmul + 3x3 max-pool + bias + ReLU.

    p_ref: [9, bm, K]  (leading axis = 3x3 (do, ho) pool-window member)
    w_ref: [K, Cout]   b_ref: [1, Cout]   o_ref: [bm, Cout]
    """
    w = w_ref[...]
    m = None
    for k in range(p_ref.shape[0]):                      # 9 members, unrolled
        acc = jnp.dot(p_ref[k], w, preferred_element_type=jnp.float32)
        m = acc if m is None else jnp.maximum(m, acc)    # fused max-pool
    # bias + ReLU hoisted out of the member loop: exact because the bias is
    # constant across the pool window and ReLU is monotone.
    o_ref[...] = jnp.maximum(m + b_ref[...], 0.0).astype(o_ref.dtype)


def _layer2_fc_kernel(p_ref, w2_ref, b2_ref, w1_ref, b1_ref, w3_ref, b3_ref,
                      o_ref):
    """Fused layer2 (conv+bias+ReLU+pool) + fc1 + fc2.

    p_ref : [9, M2, K2]  layer-2 pool-member patches, rows ordered (p, n) with
                         p = dp*Hp*Wo + hp*Wo + wo (torch NCDHW flatten order).
    w2_ref: [K2, C2]     b2_ref: [1, C2]
    w1_ref: [P*C2, F1]   fc1 weight, rows ordered (p, c)    b1_ref: [1, F1]
    w3_ref: [F1, F2]     fc2 weight                         b3_ref: [1, F2]
    o_ref : [N, F2]
    """
    w2 = w2_ref[...]
    m = None
    for k in range(p_ref.shape[0]):                      # pool-window members
        acc = jnp.dot(p_ref[k], w2, preferred_element_type=jnp.float32)
        m = acc if m is None else jnp.maximum(m, acc)
    act = jnp.maximum(m + b2_ref[...], 0.0)              # [M2, C2] f32

    n_batch = o_ref.shape[0]
    c2 = act.shape[1]
    n_pos = act.shape[0] // n_batch                      # P = Dp*Hp*Wo
    w1 = w1_ref[...]
    # Flatten-free fc1: activation rows are grouped per spatial position p, so
    # fc1(flatten(act)) == sum_p act[p-block] @ w1[p-th C2-row block].
    h = None
    for p in range(n_pos):
        blk = jnp.dot(act[p * n_batch:(p + 1) * n_batch, :],
                      w1[p * c2:(p + 1) * c2, :],
                      preferred_element_type=jnp.float32)
        h = blk if h is None else h + blk
    h = h + b1_ref[...]                                  # [N, F1]
    out = jnp.dot(h, w3_ref[...], preferred_element_type=jnp.float32)
    o_ref[...] = (out + b3_ref[...]).astype(o_ref.dtype)


# --------------------------------------------------------------------------
# JAX glue: direct per-pool-member im2col (no transpose copy)
# --------------------------------------------------------------------------
def _build_pool_member_patches(x, kdims, strides, pool=(3, 3),
                               batch_last=False):
    """x: [N, D, H, W, C] channels-last.

    Returns patches [pD*pH, M, K] where the leading axis runs over the (i, j)
    members of the (pD, pH) max-pool window and K order is (kd, kh, kw, c).
    M rows are ordered (n, dp, hp, wo) (or (dp, hp, wo, n) if batch_last).
    Each member is sliced out *directly* with stride stride*pool, so the
    tensor is written by XLA in its final layout (no transpose copy).
    Floor-mode pool cropping (Dp = Do // pD, Hp = Ho // pH) is baked in.
    """
    N, D, H, W, C = x.shape
    kD, kH, kW = kdims
    sD, sH, sW = strides
    pD, pH = pool
    Do = (D - kD) // sD + 1
    Ho = (H - kH) // sH + 1
    Wo = (W - kW) // sW + 1
    Dp, Hp = Do // pD, Ho // pH
    K = kD * kH * kW * C

    # Fast path: when kW == sW the W taps tile W exactly, so (kw, c) folds via
    # a free reshape and the gather has 3x longer contiguous runs.
    fold_w = (kW == sW)
    if fold_w:
        xr = x[:, :, :, :sW * Wo, :].reshape(N, D, H, Wo, kW * C)

    members = []
    for i in range(pD):
        for j in range(pH):
            taps = []
            for kd in range(kD):
                for kh in range(kH):
                    d0 = sD * i + kd
                    h0 = sH * j + kh
                    dsl = slice(d0, d0 + sD * pD * (Dp - 1) + 1, sD * pD)
                    hsl = slice(h0, h0 + sH * pH * (Hp - 1) + 1, sH * pH)
                    if fold_w:
                        taps.append(xr[:, dsl, hsl, :, :])      # [N,Dp,Hp,Wo,kW*C]
                    else:
                        for kw in range(kW):
                            wsl = slice(kw, kw + sW * (Wo - 1) + 1, sW)
                            taps.append(x[:, dsl, hsl, wsl, :])  # [N,Dp,Hp,Wo,C]
            p = jnp.stack(taps, axis=-2)                         # [N,Dp,Hp,Wo,T,cc]
            if batch_last:
                p = jnp.transpose(p, (1, 2, 3, 0, 4, 5))         # [Dp,Hp,Wo,N,T,cc]
            members.append(p.reshape(-1, K))
    patches = jnp.stack(members, axis=0)                         # [9, M, K]
    return patches, (N, Dp, Hp, Wo)


# --------------------------------------------------------------------------
# Pallas wrappers
# --------------------------------------------------------------------------
def conv_relu_pool_layer(x, w, b, strides, compute_dtype, out_dtype):
    """Fused Conv3d(stride=strides) + bias + ReLU + MaxPool3d((3,3,1),(3,3,1)).

    x: [N,D,H,W,Cin] channels-last; w: torch [Cout,Cin,kD,kH,kW]; b: [Cout].
    Returns channels-last pooled activations [N, Dp, Hp, Wo, Cout].
    """
    cout, cin, kD, kH, kW = w.shape
    patches, (n, dp, hp, wo) = _build_pool_member_patches(
        x.astype(compute_dtype), (kD, kH, kW), strides)
    k_dim = patches.shape[-1]
    m_rows = patches.shape[1]
    # Weight columns in (kd, kh, kw, cin) order to match the patch K order.
    w_mat = jnp.transpose(w, (2, 3, 4, 1, 0)).reshape(k_dim, cout)
    w_mat = w_mat.astype(compute_dtype)

    bm = _pick_rows_per_tile(m_rows)
    y = pl.pallas_call(
        _conv_relu_pool_kernel,
        out_shape=jax.ShapeDtypeStruct((m_rows, cout), out_dtype),
        grid=(m_rows // bm,),
        in_specs=[
            pl.BlockSpec((9, bm, k_dim), lambda i: (0, i, 0)),
            pl.BlockSpec((k_dim, cout), lambda i: (0, 0)),
            pl.BlockSpec((1, cout), lambda i: (0, 0)),
        ],
        out_specs=pl.BlockSpec((bm, cout), lambda i: (i, 0)),
        compiler_params=pltpu.CompilerParams(
            dimension_semantics=("parallel",),
            vmem_limit_bytes=32 * 1024 * 1024),
    )(patches, w_mat, b.astype(jnp.float32).reshape(1, cout))
    return y.reshape(n, dp, hp, wo, cout)


def layer2_fc_call(x1, conv_w, conv_b, fc1_w, fc1_b, fc2_w, fc2_b,
                   compute_dtype):
    """Fused layer2 conv+bias+ReLU+pool + flatten + fc1 + fc2 -> [N, 1]."""
    cout, cin, kD, kH, kW = conv_w.shape
    patches, (n, dp, hp, wo) = _build_pool_member_patches(
        x1.astype(compute_dtype), (kD, kH, kW), (3, 3, 3), batch_last=True)
    k_dim = patches.shape[-1]
    m2 = patches.shape[1]
    n_pos = dp * hp * wo
    w2_mat = jnp.transpose(conv_w, (2, 3, 4, 1, 0)).reshape(k_dim, cout)
    w2_mat = w2_mat.astype(compute_dtype)

    f1 = fc1_w.shape[0]
    f2 = fc2_w.shape[0]
    # fc1 columns are in torch NCDHW flatten order (c, p); activations arrive
    # grouped by p, so permute fc1's weight once to row order (p, c).
    w1_pc = jnp.transpose(fc1_w.reshape(f1, cout, n_pos), (2, 1, 0))
    w1_pc = w1_pc.reshape(n_pos * cout, f1).astype(jnp.float32)

    return pl.pallas_call(
        _layer2_fc_kernel,
        out_shape=jax.ShapeDtypeStruct((n, f2), jnp.float32),
        grid=(1,),
        in_specs=[
            pl.BlockSpec((9, m2, k_dim), lambda i: (0, 0, 0)),
            pl.BlockSpec((k_dim, cout), lambda i: (0, 0)),
            pl.BlockSpec((1, cout), lambda i: (0, 0)),
            pl.BlockSpec((n_pos * cout, f1), lambda i: (0, 0)),
            pl.BlockSpec((1, f1), lambda i: (0, 0)),
            pl.BlockSpec((f1, f2), lambda i: (0, 0)),
            pl.BlockSpec((1, f2), lambda i: (0, 0)),
        ],
        out_specs=pl.BlockSpec((n, f2), lambda i: (0, 0)),
        compiler_params=pltpu.CompilerParams(
            dimension_semantics=("arbitrary",)),
    )(patches, w2_mat, conv_b.astype(jnp.float32).reshape(1, cout),
      w1_pc, fc1_b.astype(jnp.float32).reshape(1, f1),
      fc2_w.T.astype(jnp.float32), fc2_b.astype(jnp.float32).reshape(1, f2))


# --------------------------------------------------------------------------
# Parameters (deterministic, PyTorch-default-style uniform init)
# --------------------------------------------------------------------------
def init_params(key):
    ks = jax.random.split(key, 5)

    def conv_init(k, cout, cin, kd, kh, kw):
        fan_in = cin * kd * kh * kw
        bound = 1.0 / jnp.sqrt(float(fan_in))
        kw_, kb_ = jax.random.split(k)
        w = jax.random.uniform(kw_, (cout, cin, kd, kh, kw), jnp.float32,
                               -bound, bound)
        b = jax.random.uniform(kb_, (cout,), jnp.float32, -bound, bound)
        return w, b

    def linear_init(k, in_f, out_f):
        bound = 1.0 / jnp.sqrt(float(in_f))
        kw_, kb_ = jax.random.split(k)
        w = jax.random.uniform(kw_, (out_f, in_f), jnp.float32, -bound, bound)
        b = jax.random.uniform(kb_, (out_f,), jnp.float32, -bound, bound)
        return w, b

    return {
        "conv1": conv_init(ks[0], 32, 2, 5, 5, 3),
        "conv2": conv_init(ks[1], 64, 32, 5, 5, 1),
        "conv3": conv_init(ks[2], 64, 64, 5, 5, 1),  # defined but unused (as in torch)
        "fc1": linear_init(ks[3], 768, 100),
        "fc2": linear_init(ks[4], 100, 1),
    }


# --------------------------------------------------------------------------
# Forward pass (mirrors State_net.forward; layer3 is NOT used, as in torch)
# --------------------------------------------------------------------------
def state_net_forward(params, input_o):
    compute_dtype = jnp.bfloat16 if USE_BF16_MATMUL else jnp.float32

    # input_o: [N, 2, D, H, W] (PyTorch NCDHW) -> channels-last [N, D, H, W, 2]
    # (single fused transpose + cast pass).
    x = jnp.transpose(input_o, (0, 2, 3, 4, 1)).astype(compute_dtype)

    w1, b1 = params["conv1"]
    x = conv_relu_pool_layer(x, w1, b1, (3, 3, 3), compute_dtype,
                             compute_dtype)                       # layer1

    # TODO(synk): nn.Dropout() is identity in eval mode; training-mode p=0.5
    # random masking (pltpu.prng_random_bits) intentionally omitted.

    w2, b2 = params["conv2"]
    wf1, bf1 = params["fc1"]
    wf2, bf2 = params["fc2"]
    # layer2 + flatten + fc1 + fc2 fused in a single pallas_call.
    return layer2_fc_call(x, w2, b2, wf1, bf1, wf2, bf2, compute_dtype)


if __name__ == "__main__":
    key = jax.random.PRNGKey(0)
    pkey, xkey = jax.random.split(key)
    params = init_params(pkey)

    # Smallest NCDHW input whose flatten is exactly 768 (= 64 * 2*2*3):
    # [batch=2, channels=2, D=182, H=182, W=21].
    input_o = jax.random.normal(xkey, (2, 2, 182, 182, 21), dtype=jnp.float32)

    fwd = jax.jit(state_net_forward)
    out = jax.block_until_ready(fwd(params, input_o))
    assert out.shape == (2, 1), out.shape
    assert out.dtype == jnp.float32
    print("KERNEL_OK")
</pallas_src>

<mosaic_0001>
module attributes {stable_mosaic.version = 11 : i64} {
  func.func @_conv_relu_pool_kernel(%arg0: i32, %arg1: memref<9x560x150xbf16, #tpu.memory_space<vmem>>, %arg2: memref<150x32xbf16, #tpu.memory_space<vmem>>, %arg3: memref<1x32xf32, #tpu.memory_space<vmem>>, %arg4: memref<560x32xbf16, #tpu.memory_space<vmem>>) attributes {dimension_semantics = [#tpu.dimension_semantics<parallel>], iteration_bounds = array<i64: 10>, scalar_prefetch = 0 : i64, scratch_operands = 0 : i64, tpu.core_type = #tpu.core_type<tc>, window_params = [{transform_indices = @transform_0, window_bounds = array<i64: 9, 560, 150>}, {pipeline_mode = #tpu.pipeline_mode<synchronous>, transform_indices = @transform_1, window_bounds = array<i64: 150, 32>}, {pipeline_mode = #tpu.pipeline_mode<synchronous>, transform_indices = @transform_2, window_bounds = array<i64: 1, 32>}, {transform_indices = @transform_3, window_bounds = array<i64: 560, 32>}]} {
    %c0 = arith.constant 0 : index
    %c0_0 = arith.constant 0 : index
    %0 = vector.load %arg2[%c0, %c0_0] : memref<150x32xbf16, #tpu.memory_space<vmem>>, vector<150x32xbf16>
    %c0_1 = arith.constant 0 : index
    %c0_2 = arith.constant 0 : index
    %c0_3 = arith.constant 0 : index
    %1 = vector.load %arg1[%c0_1, %c0_2, %c0_3] : memref<9x560x150xbf16, #tpu.memory_space<vmem>>, vector<1x560x150xbf16>
    %2 = vector.shape_cast %1 : vector<1x560x150xbf16> to vector<560x150xbf16>
    %cst = arith.constant dense<0.000000e+00> : vector<560x32xf32>
    %3 = tpu.matmul %2, %0, %cst {dimension_numbers = #tpu.dot_dimension_numbers<[1], [0], [0], [1], [0, 0, 1, 1], [], []>} : vector<560x150xbf16>, vector<150x32xbf16>, vector<560x32xf32> -> vector<560x32xf32>
    %c1 = arith.constant 1 : index
    %c0_4 = arith.constant 0 : index
    %c0_5 = arith.constant 0 : index
    %4 = vector.load %arg1[%c1, %c0_4, %c0_5] : memref<9x560x150xbf16, #tpu.memory_space<vmem>>, vector<1x560x150xbf16>
    %5 = vector.shape_cast %4 : vector<1x560x150xbf16> to vector<560x150xbf16>
    %cst_6 = arith.constant dense<0.000000e+00> : vector<560x32xf32>
    %6 = tpu.matmul %5, %0, %cst_6 {dimension_numbers = #tpu.dot_dimension_numbers<[1], [0], [0], [1], [0, 0, 1, 1], [], []>} : vector<560x150xbf16>, vector<150x32xbf16>, vector<560x32xf32> -> vector<560x32xf32>
    %7 = arith.maximumf %3, %6 : vector<560x32xf32>
    %c2 = arith.constant 2 : index
    %c0_7 = arith.constant 0 : index
    %c0_8 = arith.constant 0 : index
    %8 = vector.load %arg1[%c2, %c0_7, %c0_8] : memref<9x560x150xbf16, #tpu.memory_space<vmem>>, vector<1x560x150xbf16>
    %9 = vector.shape_cast %8 : vector<1x560x150xbf16> to vector<560x150xbf16>
    %cst_9 = arith.constant dense<0.000000e+00> : vector<560x32xf32>
    %10 = tpu.matmul %9, %0, %cst_9 {dimension_numbers = #tpu.dot_dimension_numbers<[1], [0], [0], [1], [0, 0, 1, 1], [], []>} : vector<560x150xbf16>, vector<150x32xbf16>, vector<560x32xf32> -> vector<560x32xf32>
    %11 = arith.maximumf %7, %10 : vector<560x32xf32>
    %c3 = arith.constant 3 : index
    %c0_10 = arith.constant 0 : index
    %c0_11 = arith.constant 0 : index
    %12 = vector.load %arg1[%c3, %c0_10, %c0_11] : memref<9x560x150xbf16, #tpu.memory_space<vmem>>, vector<1x560x150xbf16>
    %13 = vector.shape_cast %12 : vector<1x560x150xbf16> to vector<560x150xbf16>
    %cst_12 = arith.constant dense<0.000000e+00> : vector<560x32xf32>
    %14 = tpu.matmul %13, %0, %cst_12 {dimension_numbers = #tpu.dot_dimension_numbers<[1], [0], [0], [1], [0, 0, 1, 1], [], []>} : vector<560x150xbf16>, vector<150x32xbf16>, vector<560x32xf32> -> vector<560x32xf32>
    %15 = arith.maximumf %11, %14 : vector<560x32xf32>
    %c4 = arith.constant 4 : index
    %c0_13 = arith.constant 0 : index
    %c0_14 = arith.constant 0 : index
    %16 = vector.load %arg1[%c4, %c0_13, %c0_14] : memref<9x560x150xbf16, #tpu.memory_space<vmem>>, vector<1x560x150xbf16>
    %17 = vector.shape_cast %16 : vector<1x560x150xbf16> to vector<560x150xbf16>
    %cst_15 = arith.constant dense<0.000000e+00> : vector<560x32xf32>
    %18 = tpu.matmul %17, %0, %cst_15 {dimension_numbers = #tpu.dot_dimension_numbers<[1], [0], [0], [1], [0, 0, 1, 1], [], []>} : vector<560x150xbf16>, vector<150x32xbf16>, vector<560x32xf32> -> vector<560x32xf32>
    %19 = arith.maximumf %15, %18 : vector<560x32xf32>
    %c5 = arith.constant 5 : index
    %c0_16 = arith.constant 0 : index
    %c0_17 = arith.constant 0 : index
    %20 = vector.load %arg1[%c5, %c0_16, %c0_17] : memref<9x560x150xbf16, #tpu.memory_space<vmem>>, vector<1x560x150xbf16>
    %21 = vector.shape_cast %20 : vector<1x560x150xbf16> to vector<560x150xbf16>
    %cst_18 = arith.constant dense<0.000000e+00> : vector<560x32xf32>
    %22 = tpu.matmul %21, %0, %cst_18 {dimension_numbers = #tpu.dot_dimension_numbers<[1], [0], [0], [1], [0, 0, 1, 1], [], []>} : vector<560x150xbf16>, vector<150x32xbf16>, vector<560x32xf32> -> vector<560x32xf32>
    %23 = arith.maximumf %19, %22 : vector<560x32xf32>
    %c6 = arith.constant 6 : index
    %c0_19 = arith.constant 0 : index
    %c0_20 = arith.constant 0 : index
    %24 = vector.load %arg1[%c6, %c0_19, %c0_20] : memref<9x560x150xbf16, #tpu.memory_space<vmem>>, vector<1x560x150xbf16>
    %25 = vector.shape_cast %24 : vector<1x560x150xbf16> to vector<560x150xbf16>
    %cst_21 = arith.constant dense<0.000000e+00> : vector<560x32xf32>
    %26 = tpu.matmul %25, %0, %cst_21 {dimension_numbers = #tpu.dot_dimension_numbers<[1], [0], [0], [1], [0, 0, 1, 1], [], []>} : vector<560x150xbf16>, vector<150x32xbf16>, vector<560x32xf32> -> vector<560x32xf32>
    %27 = arith.maximumf %23, %26 : vector<560x32xf32>
    %c7 = arith.constant 7 : index
    %c0_22 = arith.constant 0 : index
    %c0_23 = arith.constant 0 : index
    %28 = vector.load %arg1[%c7, %c0_22, %c0_23] : memref<9x560x150xbf16, #tpu.memory_space<vmem>>, vector<1x560x150xbf16>
    %29 = vector.shape_cast %28 : vector<1x560x150xbf16> to vector<560x150xbf16>
    %cst_24 = arith.constant dense<0.000000e+00> : vector<560x32xf32>
    %30 = tpu.matmul %29, %0, %cst_24 {dimension_numbers = #tpu.dot_dimension_numbers<[1], [0], [0], [1], [0, 0, 1, 1], [], []>} : vector<560x150xbf16>, vector<150x32xbf16>, vector<560x32xf32> -> vector<560x32xf32>
    %31 = arith.maximumf %27, %30 : vector<560x32xf32>
    %c8 = arith.constant 8 : index
    %c0_25 = arith.constant 0 : index
    %c0_26 = arith.constant 0 : index
    %32 = vector.load %arg1[%c8, %c0_25, %c0_26] : memref<9x560x150xbf16, #tpu.memory_space<vmem>>, vector<1x560x150xbf16>
    %33 = vector.shape_cast %32 : vector<1x560x150xbf16> to vector<560x150xbf16>
    %cst_27 = arith.constant dense<0.000000e+00> : vector<560x32xf32>
    %34 = tpu.matmul %33, %0, %cst_27 {dimension_numbers = #tpu.dot_dimension_numbers<[1], [0], [0], [1], [0, 0, 1, 1], [], []>} : vector<560x150xbf16>, vector<150x32xbf16>, vector<560x32xf32> -> vector<560x32xf32>
    %35 = arith.maximumf %31, %34 : vector<560x32xf32>
    %c0_28 = arith.constant 0 : index
    %c0_29 = arith.constant 0 : index
    %36 = vector.load %arg3[%c0_28, %c0_29] : memref<1x32xf32, #tpu.memory_space<vmem>>, vector<1x32xf32>
    %37 = vector.broadcast %36 : vector<1x32xf32> to vector<560x32xf32>
    %38 = arith.addf %35, %37 : vector<560x32xf32>
    %cst_30 = arith.constant 0.000000e+00 : f32
    %39 = vector.broadcast %cst_30 : f32 to vector<560x32xf32>
    %40 = arith.maximumf %38, %39 : vector<560x32xf32>
    %41 = arith.truncf %40 : vector<560x32xf32> to vector<560x32xbf16>
    %c0_31 = arith.constant 0 : index
    %c0_32 = arith.constant 0 : index
    %42 = vector.load %arg4[%c0_31, %c0_32] : memref<560x32xbf16, #tpu.memory_space<vmem>>, vector<560x32xbf16>
    tpu.vector_store %arg4[%c0_31, %c0_32], %41 {strides = array<i32>} : memref<560x32xbf16, #tpu.memory_space<vmem>>, vector<560x32xbf16>,
    return
  }
  func.func @transform_0(%arg0: i32) -> (i32, i32, i32) {
    %c0_i32 = arith.constant 0 : i32
    %c0_i32_0 = arith.constant 0 : i32
    %c0_i32_1 = arith.constant 0 : i32
    return %c0_i32, %arg0, %c0_i32_0 : i32, i32, i32
  }
  func.func @transform_1(%arg0: i32) -> (i32, i32) {
    %c0_i32 = arith.constant 0 : i32
    %c0_i32_0 = arith.constant 0 : i32
    %c0_i32_1 = arith.constant 0 : i32
    return %c0_i32, %c0_i32_0 : i32, i32
  }
  func.func @transform_2(%arg0: i32) -> (i32, i32) {
    %c0_i32 = arith.constant 0 : i32
    %c0_i32_0 = arith.constant 0 : i32
    %c0_i32_1 = arith.constant 0 : i32
    return %c0_i32, %c0_i32_0 : i32, i32
  }
  func.func @transform_3(%arg0: i32) -> (i32, i32) {
    %c0_i32 = arith.constant 0 : i32
    %c0_i32_0 = arith.constant 0 : i32
    return %arg0, %c0_i32 : i32, i32
  }
}

module attributes {stable_mosaic.version = 11 : i64} {
  func.func @_layer2_fc_kernel(%arg0: i32, %arg1: memref<9x24x800xbf16, #tpu.memory_space<vmem>>, %arg2: memref<800x64xbf16, #tpu.memory_space<vmem>>, %arg3: memref<1x64xf32, #tpu.memory_space<vmem>>, %arg4: memref<768x100xf32, #tpu.memory_space<vmem>>, %arg5: memref<1x100xf32, #tpu.memory_space<vmem>>, %arg6: memref<100x1xf32, #tpu.memory_space<vmem>>, %arg7: memref<1x1xf32, #tpu.memory_space<vmem>>, %arg8: memref<2x1xf32, #tpu.memory_space<vmem>>) attributes {dimension_semantics = [#tpu.dimension_semantics<arbitrary>], iteration_bounds = array<i64: 1>, scalar_prefetch = 0 : i64, scratch_operands = 0 : i64, tpu.core_type = #tpu.core_type<tc>, window_params = [{pipeline_mode = #tpu.pipeline_mode<synchronous>, transform_indices = @transform_0, window_bounds = array<i64: 9, 24, 800>}, {pipeline_mode = #tpu.pipeline_mode<synchronous>, transform_indices = @transform_1, window_bounds = array<i64: 800, 64>}, {pipeline_mode = #tpu.pipeline_mode<synchronous>, transform_indices = @transform_2, window_bounds = array<i64: 1, 64>}, {pipeline_mode = #tpu.pipeline_mode<synchronous>, transform_indices = @transform_3, window_bounds = array<i64: 768, 100>}, {pipeline_mode = #tpu.pipeline_mode<synchronous>, transform_indices = @transform_4, window_bounds = array<i64: 1, 100>}, {pipeline_mode = #tpu.pipeline_mode<synchronous>, transform_indices = @transform_5, window_bounds = array<i64: 100, 1>}, {pipeline_mode = #tpu.pipeline_mode<synchronous>, transform_indices = @transform_6, window_bounds = array<i64: 1, 1>}, {pipeline_mode = #tpu.pipeline_mode<synchronous>, transform_indices = @transform_7, window_bounds = array<i64: 2, 1>}]} {
    %c0 = arith.constant 0 : index
    %c0_0 = arith.constant 0 : index
    %0 = vector.load %arg2[%c0, %c0_0] : memref<800x64xbf16, #tpu.memory_space<vmem>>, vector<800x64xbf16>
    %c0_1 = arith.constant 0 : index
    %c0_2 = arith.constant 0 : index
    %c0_3 = arith.constant 0 : index
    %1 = vector.load %arg1[%c0_1, %c0_2, %c0_3] : memref<9x24x800xbf16, #tpu.memory_space<vmem>>, vector<1x24x800xbf16>
    %2 = vector.shape_cast %1 : vector<1x24x800xbf16> to vector<24x800xbf16>
    %cst = arith.constant dense<0.000000e+00> : vector<24x64xf32>
    %3 = tpu.matmul %2, %0, %cst {dimension_numbers = #tpu.dot_dimension_numbers<[1], [0], [0], [1], [0, 0, 1, 1], [], []>} : vector<24x800xbf16>, vector<800x64xbf16>, vector<24x64xf32> -> vector<24x64xf32>
    %c1 = arith.constant 1 : index
    %c0_4 = arith.constant 0 : index
    %c0_5 = arith.constant 0 : index
    %4 = vector.load %arg1[%c1, %c0_4, %c0_5] : memref<9x24x800xbf16, #tpu.memory_space<vmem>>, vector<1x24x800xbf16>
    %5 = vector.shape_cast %4 : vector<1x24x800xbf16> to vector<24x800xbf16>
    %cst_6 = arith.constant dense<0.000000e+00> : vector<24x64xf32>
    %6 = tpu.matmul %5, %0, %cst_6 {dimension_numbers = #tpu.dot_dimension_numbers<[1], [0], [0], [1], [0, 0, 1, 1], [], []>} : vector<24x800xbf16>, vector<800x64xbf16>, vector<24x64xf32> -> vector<24x64xf32>
    %7 = arith.maximumf %3, %6 : vector<24x64xf32>
    %c2 = arith.constant 2 : index
    %c0_7 = arith.constant 0 : index
    %c0_8 = arith.constant 0 : index
    %8 = vector.load %arg1[%c2, %c0_7, %c0_8] : memref<9x24x800xbf16, #tpu.memory_space<vmem>>, vector<1x24x800xbf16>
    %9 = vector.shape_cast %8 : vector<1x24x800xbf16> to vector<24x800xbf16>
    %cst_9 = arith.constant dense<0.000000e+00> : vector<24x64xf32>
    %10 = tpu.matmul %9, %0, %cst_9 {dimension_numbers = #tpu.dot_dimension_numbers<[1], [0], [0], [1], [0, 0, 1, 1], [], []>} : vector<24x800xbf16>, vector<800x64xbf16>, vector<24x64xf32> -> vector<24x64xf32>
    %11 = arith.maximumf %7, %10 : vector<24x64xf32>
    %c3 = arith.constant 3 : index
    %c0_10 = arith.constant 0 : index
    %c0_11 = arith.constant 0 : index
    %12 = vector.load %arg1[%c3, %c0_10, %c0_11] : memref<9x24x800xbf16, #tpu.memory_space<vmem>>, vector<1x24x800xbf16>
    %13 = vector.shape_cast %12 : vector<1x24x800xbf16> to vector<24x800xbf16>
    %cst_12 = arith.constant dense<0.000000e+00> : vector<24x64xf32>
    %14 = tpu.matmul %13, %0, %cst_12 {dimension_numbers = #tpu.dot_dimension_numbers<[1], [0], [0], [1], [0, 0, 1, 1], [], []>} : vector<24x800xbf16>, vector<800x64xbf16>, vector<24x64xf32> -> vector<24x64xf32>
    %15 = arith.maximumf %11, %14 : vector<24x64xf32>
    %c4 = arith.constant 4 : index
    %c0_13 = arith.constant 0 : index
    %c0_14 = arith.constant 0 : index
    %16 = vector.load %arg1[%c4, %c0_13, %c0_14] : memref<9x24x800xbf16, #tpu.memory_space<vmem>>, vector<1x24x800xbf16>
    %17 = vector.shape_cast %16 : vector<1x24x800xbf16> to vector<24x800xbf16>
    %cst_15 = arith.constant dense<0.000000e+00> : vector<24x64xf32>
    %18 = tpu.matmul %17, %0, %cst_15 {dimension_numbers = #tpu.dot_dimension_numbers<[1], [0], [0], [1], [0, 0, 1, 1], [], []>} : vector<24x800xbf16>, vector<800x64xbf16>, vector<24x64xf32> -> vector<24x64xf32>
    %19 = arith.maximumf %15, %18 : vector<24x64xf32>
    %c5 = arith.constant 5 : index
    %c0_16 = arith.constant 0 : index
    %c0_17 = arith.constant 0 : index
    %20 = vector.load %arg1[%c5, %c0_16, %c0_17] : memref<9x24x800xbf16, #tpu.memory_space<vmem>>, vector<1x24x800xbf16>
    %21 = vector.shape_cast %20 : vector<1x24x800xbf16> to vector<24x800xbf16>
    %cst_18 = arith.constant dense<0.000000e+00> : vector<24x64xf32>
    %22 = tpu.matmul %21, %0, %cst_18 {dimension_numbers = #tpu.dot_dimension_numbers<[1], [0], [0], [1], [0, 0, 1, 1], [], []>} : vector<24x800xbf16>, vector<800x64xbf16>, vector<24x64xf32> -> vector<24x64xf32>
    %23 = arith.maximumf %19, %22 : vector<24x64xf32>
    %c6 = arith.constant 6 : index
    %c0_19 = arith.constant 0 : index
    %c0_20 = arith.constant 0 : index
    %24 = vector.load %arg1[%c6, %c0_19, %c0_20] : memref<9x24x800xbf16, #tpu.memory_space<vmem>>, vector<1x24x800xbf16>
    %25 = vector.shape_cast %24 : vector<1x24x800xbf16> to vector<24x800xbf16>
    %cst_21 = arith.constant dense<0.000000e+00> : vector<24x64xf32>
    %26 = tpu.matmul %25, %0, %cst_21 {dimension_numbers = #tpu.dot_dimension_numbers<[1], [0], [0], [1], [0, 0, 1, 1], [], []>} : vector<24x800xbf16>, vector<800x64xbf16>, vector<24x64xf32> -> vector<24x64xf32>
    %27 = arith.maximumf %23, %26 : vector<24x64xf32>
    %c7 = arith.constant 7 : index
    %c0_22 = arith.constant 0 : index
    %c0_23 = arith.constant 0 : index
    %28 = vector.load %arg1[%c7, %c0_22, %c0_23] : memref<9x24x800xbf16, #tpu.memory_space<vmem>>, vector<1x24x800xbf16>
    %29 = vector.shape_cast %28 : vector<1x24x800xbf16> to vector<24x800xbf16>
    %cst_24 = arith.constant dense<0.000000e+00> : vector<24x64xf32>
    %30 = tpu.matmul %29, %0, %cst_24 {dimension_numbers = #tpu.dot_dimension_numbers<[1], [0], [0], [1], [0, 0, 1, 1], [], []>} : vector<24x800xbf16>, vector<800x64xbf16>, vector<24x64xf32> -> vector<24x64xf32>
    %31 = arith.maximumf %27, %30 : vector<24x64xf32>
    %c8 = arith.constant 8 : index
    %c0_25 = arith.constant 0 : index
    %c0_26 = arith.constant 0 : index
    %32 = vector.load %arg1[%c8, %c0_25, %c0_26] : memref<9x24x800xbf16, #tpu.memory_space<vmem>>, vector<1x24x800xbf16>
    %33 = vector.shape_cast %32 : vector<1x24x800xbf16> to vector<24x800xbf16>
    %cst_27 = arith.constant dense<0.000000e+00> : vector<24x64xf32>
    %34 = tpu.matmul %33, %0, %cst_27 {dimension_numbers = #tpu.dot_dimension_numbers<[1], [0], [0], [1], [0, 0, 1, 1], [], []>} : vector<24x800xbf16>, vector<800x64xbf16>, vector<24x64xf32> -> vector<24x64xf32>
    %35 = arith.maximumf %31, %34 : vector<24x64xf32>
    %c0_28 = arith.constant 0 : index
    %c0_29 = arith.constant 0 : index
    %36 = vector.load %arg3[%c0_28, %c0_29] : memref<1x64xf32, #tpu.memory_space<vmem>>, vector<1x64xf32>
    %37 = vector.broadcast %36 : vector<1x64xf32> to vector<24x64xf32>
    %38 = arith.addf %35, %37 : vector<24x64xf32>
    %cst_30 = arith.constant 0.000000e+00 : f32
    %39 = vector.broadcast %cst_30 : f32 to vector<24x64xf32>
    %40 = arith.maximumf %38, %39 : vector<24x64xf32>
    %c0_31 = arith.constant 0 : index
    %c0_32 = arith.constant 0 : index
    %41 = vector.load %arg4[%c0_31, %c0_32] : memref<768x100xf32, #tpu.memory_space<vmem>>, vector<768x100xf32>
    %42 = vector.extract_strided_slice %40 {offsets = [0, 0], sizes = [2, 64], strides = [1, 1]} : vector<24x64xf32> to vector<2x64xf32>
    %43 = vector.extract_strided_slice %41 {offsets = [0, 0], sizes = [64, 100], strides = [1, 1]} : vector<768x100xf32> to vector<64x100xf32>
    %cst_33 = arith.constant dense<0.000000e+00> : vector<2x100xf32>
    %44 = tpu.matmul %42, %43, %cst_33 {dimension_numbers = #tpu.dot_dimension_numbers<[1], [0], [0], [1], [0, 0, 1, 1], [], []>} : vector<2x64xf32>, vector<64x100xf32>, vector<2x100xf32> -> vector<2x100xf32>
    %45 = vector.extract_strided_slice %40 {offsets = [2, 0], sizes = [2, 64], strides = [1, 1]} : vector<24x64xf32> to vector<2x64xf32>
    %46 = vector.extract_strided_slice %41 {offsets = [64, 0], sizes = [64, 100], strides = [1, 1]} : vector<768x100xf32> to vector<64x100xf32>
    %cst_34 = arith.constant dense<0.000000e+00> : vector<2x100xf32>
    %47 = tpu.matmul %45, %46, %cst_34 {dimension_numbers = #tpu.dot_dimension_numbers<[1], [0], [0], [1], [0, 0, 1, 1], [], []>} : vector<2x64xf32>, vector<64x100xf32>, vector<2x100xf32> -> vector<2x100xf32>
    %48 = arith.addf %44, %47 : vector<2x100xf32>
    %49 = vector.extract_strided_slice %40 {offsets = [4, 0], sizes = [2, 64], strides = [1, 1]} : vector<24x64xf32> to vector<2x64xf32>
    %50 = vector.extract_strided_slice %41 {offsets = [128, 0], sizes = [64, 100], strides = [1, 1]} : vector<768x100xf32> to vector<64x100xf32>
    %cst_35 = arith.constant dense<0.000000e+00> : vector<2x100xf32>
    %51 = tpu.matmul %49, %50, %cst_35 {dimension_numbers = #tpu.dot_dimension_numbers<[1], [0], [0], [1], [0, 0, 1, 1], [], []>} : vector<2x64xf32>, vector<64x100xf32>, vector<2x100xf32> -> vector<2x100xf32>
    %52 = arith.addf %48, %51 : vector<2x100xf32>
    %53 = vector.extract_strided_slice %40 {offsets = [6, 0], sizes = [2, 64], strides = [1, 1]} : vector<24x64xf32> to vector<2x64xf32>
    %54 = vector.extract_strided_slice %41 {offsets = [192, 0], sizes = [64, 100], strides = [1, 1]} : vector<768x100xf32> to vector<64x100xf32>
    %cst_36 = arith.constant dense<0.000000e+00> : vector<2x100xf32>
    %55 = tpu.matmul %53, %54, %cst_36 {dimension_numbers = #tpu.dot_dimension_numbers<[1], [0], [0], [1], [0, 0, 1, 1], [], []>} : vector<2x64xf32>, vector<64x100xf32>, vector<2x100xf32> -> vector<2x100xf32>
    %56 = arith.addf %52, %55 : vector<2x100xf32>
    %57 = vector.extract_strided_slice %40 {offsets = [8, 0], sizes = [2, 64], strides = [1, 1]} : vector<24x64xf32> to vector<2x64xf32>
    %58 = vector.extract_strided_slice %41 {offsets = [256, 0], sizes = [64, 100], strides = [1, 1]} : vector<768x100xf32> to vector<64x100xf32>
    %cst_37 = arith.constant dense<0.000000e+00> : vector<2x100xf32>
    %59 = tpu.matmul %57, %58, %cst_37 {dimension_numbers = #tpu.dot_dimension_numbers<[1], [0], [0], [1], [0, 0, 1, 1], [], []>} : vector<2x64xf32>, vector<64x100xf32>, vector<2x100xf32> -> vector<2x100xf32>
    %60 = arith.addf %56, %59 : vector<2x100xf32>
    %61 = vector.extract_strided_slice %40 {offsets = [10, 0], sizes = [2, 64], strides = [1, 1]} : vector<24x64xf32> to vector<2x64xf32>
    %62 = vector.extract_strided_slice %41 {offsets = [320, 0], sizes = [64, 100], strides = [1, 1]} : vector<768x100xf32> to vector<64x100xf32>
    %cst_38 = arith.constant dense<0.000000e+00> : vector<2x100xf32>
    %63 = tpu.matmul %61, %62, %cst_38 {dimension_numbers = #tpu.dot_dimension_numbers<[1], [0], [0], [1], [0, 0, 1, 1], [], []>} : vector<2x64xf32>, vector<64x100xf32>, vector<2x100xf32> -> vector<2x100xf32>
    %64 = arith.addf %60, %63 : vector<2x100xf32>
    %65 = vector.extract_strided_slice %40 {offsets = [12, 0], sizes = [2, 64], strides = [1, 1]} : vector<24x64xf32> to vector<2x64xf32>
    %66 = vector.extract_strided_slice %41 {offsets = [384, 0], sizes = [64, 100], strides = [1, 1]} : vector<768x100xf32> to vector<64x100xf32>
    %cst_39 = arith.constant dense<0.000000e+00> : vector<2x100xf32>
    %67 = tpu.matmul %65, %66, %cst_39 {dimension_numbers = #tpu.dot_dimension_numbers<[1], [0], [0], [1], [0, 0, 1, 1], [], []>} : vector<2x64xf32>, vector<64x100xf32>, vector<2x100xf32> -> vector<2x100xf32>
    %68 = arith.addf %64, %67 : vector<2x100xf32>
    %69 = vector.extract_strided_slice %40 {offsets = [14, 0], sizes = [2, 64], strides = [1, 1]} : vector<24x64xf32> to vector<2x64xf32>
    %70 = vector.extract_strided_slice %41 {offsets = [448, 0], sizes = [64, 100], strides = [1, 1]} : vector<768x100xf32> to vector<64x100xf32>
    %cst_40 = arith.constant dense<0.000000e+00> : vector<2x100xf32>
    %71 = tpu.matmul %69, %70, %cst_40 {dimension_numbers = #tpu.dot_dimension_numbers<[1], [0], [0], [1], [0, 0, 1, 1], [], []>} : vector<2x64xf32>, vector<64x100xf32>, vector<2x100xf32> -> vector<2x100xf32>
    %72 = arith.addf %68, %71 : vector<2x100xf32>
    %73 = vector.extract_strided_slice %40 {offsets = [16, 0], sizes = [2, 64], strides = [1, 1]} : vector<24x64xf32> to vector<2x64xf32>
    %74 = vector.extract_strided_slice %41 {offsets = [512, 0], sizes = [64, 100], strides = [1, 1]} : vector<768x100xf32> to vector<64x100xf32>
    %cst_41 = arith.constant dense<0.000000e+00> : vector<2x100xf32>
    %75 = tpu.matmul %73, %74, %cst_41 {dimension_numbers = #tpu.dot_dimension_numbers<[1], [0], [0], [1], [0, 0, 1, 1], [], []>} : vector<2x64xf32>, vector<64x100xf32>, vector<2x100xf32> -> vector<2x100xf32>
    %76 = arith.addf %72, %75 : vector<2x100xf32>
    %77 = vector.extract_strided_slice %40 {offsets = [18, 0], sizes = [2, 64], strides = [1, 1]} : vector<24x64xf32> to vector<2x64xf32>
    %78 = vector.extract_strided_slice %41 {offsets = [576, 0], sizes = [64, 100], strides = [1, 1]} : vector<768x100xf32> to vector<64x100xf32>
    %cst_42 = arith.constant dense<0.000000e+00> : vector<2x100xf32>
    %79 = tpu.matmul %77, %78, %cst_42 {dimension_numbers = #tpu.dot_dimension_numbers<[1], [0], [0], [1], [0, 0, 1, 1], [], []>} : vector<2x64xf32>, vector<64x100xf32>, vector<2x100xf32> -> vector<2x100xf32>
    %80 = arith.addf %76, %79 : vector<2x100xf32>
    %81 = vector.extract_strided_slice %40 {offsets = [20, 0], sizes = [2, 64], strides = [1, 1]} : vector<24x64xf32> to vector<2x64xf32>
    %82 = vector.extract_strided_slice %41 {offsets = [640, 0], sizes = [64, 100], strides = [1, 1]} : vector<768x100xf32> to vector<64x100xf32>
    %cst_43 = arith.constant dense<0.000000e+00> : vector<2x100xf32>
    %83 = tpu.matmul %81, %82, %cst_43 {dimension_numbers = #tpu.dot_dimension_numbers<[1], [0], [0], [1], [0, 0, 1, 1], [], []>} : vector<2x64xf32>, vector<64x100xf32>, vector<2x100xf32> -> vector<2x100xf32>
    %84 = arith.addf %80, %83 : vector<2x100xf32>
    %85 = vector.extract_strided_slice %40 {offsets = [22, 0], sizes = [2, 64], strides = [1, 1]} : vector<24x64xf32> to vector<2x64xf32>
    %86 = vector.extract_strided_slice %41 {offsets = [704, 0], sizes = [64, 100], strides = [1, 1]} : vector<768x100xf32> to vector<64x100xf32>
    %cst_44 = arith.constant dense<0.000000e+00> : vector<2x100xf32>
    %87 = tpu.matmul %85, %86, %cst_44 {dimension_numbers = #tpu.dot_dimension_numbers<[1], [0], [0], [1], [0, 0, 1, 1], [], []>} : vector<2x64xf32>, vector<64x100xf32>, vector<2x100xf32> -> vector<2x100xf32>
    %88 = arith.addf %84, %87 : vector<2x100xf32>
    %c0_45 = arith.constant 0 : index
    %c0_46 = arith.constant 0 : index
    %89 = vector.load %arg5[%c0_45, %c0_46] : memref<1x100xf32, #tpu.memory_space<vmem>>, vector<1x100xf32>
    %90 = vector.broadcast %89 : vector<1x100xf32> to vector<2x100xf32>
    %91 = arith.addf %88, %90 : vector<2x100xf32>
    %c0_47 = arith.constant 0 : index
    %c0_48 = arith.constant 0 : index
    %92 = vector.load %arg6[%c0_47, %c0_48] : memref<100x1xf32, #tpu.memory_space<vmem>>, vector<100x1xf32>
    %cst_49 = arith.constant dense<0.000000e+00> : vector<2x1xf32>
    %93 = tpu.matmul %91, %92, %cst_49 {dimension_numbers = #tpu.dot_dimension_numbers<[1], [0], [0], [1], [0, 0, 1, 1], [], []>} : vector<2x100xf32>, vector<100x1xf32>, vector<2x1xf32> -> vector<2x1xf32>
    %c0_50 = arith.constant 0 : index
    %c0_51 = arith.constant 0 : index
    %94 = vector.load %arg7[%c0_50, %c0_51] : memref<1x1xf32, #tpu.memory_space<vmem>>, vector<1x1xf32>
    %95 = vector.broadcast %94 : vector<1x1xf32> to vector<2x1xf32>
    %96 = arith.addf %93, %95 : vector<2x1xf32>
    %c0_52 = arith.constant 0 : index
    %c0_53 = arith.constant 0 : index
    %97 = vector.load %arg8[%c0_52, %c0_53] : memref<2x1xf32, #tpu.memory_space<vmem>>, vector<2x1xf32>
    tpu.vector_store %arg8[%c0_52, %c0_53], %96 {strides = array<i32>} : memref<2x1xf32, #tpu.memory_space<vmem>>, vector<2x1xf32>,
    return
  }
  func.func @transform_0(%arg0: i32) -> (i32, i32, i32) {
    %c0_i32 = arith.constant 0 : i32
    %c0_i32_0 = arith.constant 0 : i32
    %c0_i32_1 = arith.constant 0 : i32
    %c0_i32_2 = arith.constant 0 : i32
    return %c0_i32, %c0_i32_0, %c0_i32_1 : i32, i32, i32
  }
  func.func @transform_1(%arg0: i32) -> (i32, i32) {
    %c0_i32 = arith.constant 0 : i32
    %c0_i32_0 = arith.constant 0 : i32
    %c0_i32_1 = arith.constant 0 : i32
    return %c0_i32, %c0_i32_0 : i32, i32
  }
  func.func @transform_2(%arg0: i32) -> (i32, i32) {
    %c0_i32 = arith.constant 0 : i32
    %c0_i32_0 = arith.constant 0 : i32
    %c0_i32_1 = arith.constant 0 : i32
    return %c0_i32, %c0_i32_0 : i32, i32
  }
  func.func @transform_3(%arg0: i32) -> (i32, i32) {
    %c0_i32 = arith.constant 0 : i32
    %c0_i32_0 = arith.constant 0 : i32
    %c0_i32_1 = arith.constant 0 : i32
    return %c0_i32, %c0_i32_0 : i32, i32
  }
  func.func @transform_4(%arg0: i32) -> (i32, i32) {
    %c0_i32 = arith.constant 0 : i32
    %c0_i32_0 = arith.constant 0 : i32
    %c0_i32_1 = arith.constant 0 : i32
    return %c0_i32, %c0_i32_0 : i32, i32
  }
  func.func @transform_5(%arg0: i32) -> (i32, i32) {
    %c0_i32 = arith.constant 0 : i32
    %c0_i32_0 = arith.constant 0 : i32
    %c0_i32_1 = arith.constant 0 : i32
    return %c0_i32, %c0_i32_0 : i32, i32
  }
  func.func @transform_6(%arg0: i32) -> (i32, i32) {
    %c0_i32 = arith.constant 0 : i32
    %c0_i32_0 = arith.constant 0 : i32
    %c0_i32_1 = arith.constant 0 : i32
    return %c0_i32, %c0_i32_0 : i32, i32
  }
  func.func @transform_7(%arg0: i32) -> (i32, i32) {
    %c0_i32 = arith.constant 0 : i32
    %c0_i32_0 = arith.constant 0 : i32
    %c0_i32_1 = arith.constant 0 : i32
    return %c0_i32, %c0_i32_0 : i32, i32
  }
}

</mosaic_0001>

<bundles_post_ra>
// kernel: state_net_forward.2
= control target key start
LH: loop header
LB: loop body
LE: loop exit
PB: predicated region body
PF: predicated region fallthrough
CT: control target
= control target key end

     0   :  { %s16474_s12 = smov 0   ;;  %s16476_s13 = smov 0   ;;  %s20076_s0 = inlined_call_operand.vmem [shape: bf16[9,5600,150], index: 0, kind: input, shape index: {}]   ;;  %s20077_s1 = inlined_call_operand.vmem [shape: bf16[150,32], index: 1, kind: input, shape index: {}]   ;;  %s20078_s2 = inlined_call_operand.vmem [shape: f32[1,32], index: 2, kind: input, shape index: {}]   ;;  %s20079_s3 = inlined_call_operand.vmem [shape: bf16[5600,32], index: 3, kind: output, shape index: {}]  }
   0x1   :  { %s16478_s14 = smov 0  }
   0x2 LB: > { %s13730_s15 = sadd.s32 4294967295, %s16451_s14   ;;  %s16491_s16 = sadd.s32 1, %s16451_s14   ;;  %s16451_s14 = sphi %s16478_s14, %s20273_s14   ;;  %s16447_s13 = sphi %s16476_s13, %s20272_s13   ;;  %s16443_s12 = sphi %s16474_s12, %s20271_s12  }
   0x3   : > { %s17_s17 = ssub.s32 %s16451_s14, %s16491_s16  ;;  %s20_s18 = sadd.s32 1, %s16447_s13 }
   0x4   : > { %p18_p0 = scmp.eq.s32.totalorder %s17_s17, 0  ;;  %p27_p1 = scmp.ne.s32.totalorder %s16447_s13, %s16443_s12 }
   0x5   : > { %p28_p2 = scmp.eq.s32.totalorder %s16451_s14, 0  ;;  %p13733_p4 = scmp.ge.s32.totalorder %s16451_s14, 10 }
   0x6   : > { %s16500_s19 = scalar_select %p18_p0, %s16447_s13, %s20_s18  }
   0x7   : > { %p29_p3 = por %p28_p2, %p27_p1  ;;  %127 = sbr.rel (%p13733_p4) target bundleno = 334 (0x14e), region = 24 }
   0xe   : > { %130 = sbr.rel (!%p29_p3) target bundleno = 334 (0x14e), region = 28  ;;  %s132_s20 = sand.u32 (%p29_p3), 1, %s16447_s13  }
   0xf   : > { %s15398_s21 = smul.u32 (%p29_p3), 560, %s16451_s14 }
  0x10   : > { %s15419_s22 = smul.u32 (%p29_p3), 5040, %s132_s20 }
  0x11   : > { %s16508_s25 = scalar_lea.vmem (%p29_p3), %s20076_s0, %s15398_s21 }
  0x12   : > { %v1427_v0 = vld [vmem:[%s16508_s25] sm:$0xff] (%p29_p3)  ;;  %v1429_v1 = vld [vmem:[%s16508_s25 + $0x8] sm:$0xff] (%p29_p3)  ;;  %v1431_v2 = vld [vmem:[%s16508_s25 + $0x10] sm:$0xff] (%p29_p3)  ;;  %s16513_s26 = scalar_lea.vmem (%p29_p3), [#allocation2], %s15419_s22 }
  0x13   : > { %1428 = vst [vmem:[%s16513_s26] sm:$0xff] (%p29_p3), %v1427_v0  ;;  %1430 = vst [vmem:[%s16513_s26 + $0x8] sm:$0xff] (%p29_p3), %v1429_v1  ;;  %v1433_v3 = vld [vmem:[%s16508_s25 + $0x18] sm:$0xff] (%p29_p3)  ;;  %v1435_v4 = vld [vmem:[%s16508_s25 + $0x20] sm:$0xff] (%p29_p3) }
  0x14   : > { %1432 = vst [vmem:[%s16513_s26 + $0x10] sm:$0xff] (%p29_p3), %v1431_v2  ;;  %v1437_v5 = vld [vmem:[%s16508_s25 + $0x28] sm:$0xff] (%p29_p3)  ;;  %1434 = vst [vmem:[%s16513_s26 + $0x18] sm:$0xff] (%p29_p3), %v1433_v3  ;;  %v1439_v6 = vld [vmem:[%s16508_s25 + $0x30] sm:$0xff] (%p29_p3) }
  0x15   : > { %1436 = vst [vmem:[%s16513_s26 + $0x20] sm:$0xff] %v1435_v4  ;;  %1438 = vst [vmem:[%s16513_s26 + $0x28] sm:$0xff] %v1437_v5  ;;  %v1441_v7 = vld [vmem:[%s16508_s25 + $0x38] sm:$0xff]  ;;  %v1443_v8 = vld [vmem:[%s16508_s25 + $0x40] sm:$0xff] }
  0x16   : > { %1440 = vst [vmem:[%s16513_s26 + $0x30] sm:$0xff] %v1439_v6  ;;  %1442 = vst [vmem:[%s16513_s26 + $0x38] sm:$0xff] %v1441_v7  ;;  %v1445_v9 = vld [vmem:[%s16508_s25 + $0x48] sm:$0xff]  ;;  %v1447_v10 = vld [vmem:[%s16508_s25 + $0x50] sm:$0xff] }
  0x17   : > { %1444 = vst [vmem:[%s16513_s26 + $0x40] sm:$0xff] %v1443_v8  ;;  %v1449_v11 = vld [vmem:[%s16508_s25 + $0x58] sm:$0xff]  ;;  %1446 = vst [vmem:[%s16513_s26 + $0x48] sm:$0xff] %v1445_v9  ;;  %v1451_v12 = vld [vmem:[%s16508_s25 + $0x60] sm:$0xff] }
  0x18   : > { %1448 = vst [vmem:[%s16513_s26 + $0x50] sm:$0xff] %v1447_v10  ;;  %1450 = vst [vmem:[%s16513_s26 + $0x58] sm:$0xff] %v1449_v11  ;;  %v1453_v13 = vld [vmem:[%s16508_s25 + $0x68] sm:$0xff]  ;;  %v1455_v14 = vld [vmem:[%s16508_s25 + $0x70] sm:$0xff] }
  0x19   : > { %1452 = vst [vmem:[%s16513_s26 + $0x60] sm:$0xff] %v1451_v12  ;;  %1454 = vst [vmem:[%s16513_s26 + $0x68] sm:$0xff] %v1453_v13  ;;  %v1457_v15 = vld [vmem:[%s16508_s25 + $0x78] sm:$0xff]  ;;  %v1459_v16 = vld [vmem:[%s16508_s25 + $0x80] sm:$0xff] }
  0x1a   : > { %1456 = vst [vmem:[%s16513_s26 + $0x70] sm:$0xff] %v1455_v14  ;;  %v1461_v17 = vld [vmem:[%s16508_s25 + $0x88] sm:$0xff]  ;;  %1458 = vst [vmem:[%s16513_s26 + $0x78] sm:$0xff] %v1457_v15  ;;  %v1463_v18 = vld [vmem:[%s16508_s25 + $0x90] sm:$0xff] }
  0x1b   : > { %1460 = vst [vmem:[%s16513_s26 + $0x80] sm:$0xff] %v1459_v16  ;;  %1462 = vst [vmem:[%s16513_s26 + $0x88] sm:$0xff] %v1461_v17  ;;  %v1465_v19 = vld [vmem:[%s16508_s25 + $0x98] sm:$0xff]  ;;  %v1467_v20 = vld [vmem:[%s16508_s25 + $0xa0] sm:$0xff] }
  0x1c   : > { %1464 = vst [vmem:[%s16513_s26 + $0x90] sm:$0xff] %v1463_v18  ;;  %1466 = vst [vmem:[%s16513_s26 + $0x98] sm:$0xff] %v1465_v19  ;;  %v1469_v21 = vld [vmem:[%s16508_s25 + $0xa8] sm:$0xff]  ;;  %v1471_v22 = vld [vmem:[%s16508_s25 + $0xb0] sm:$0xff] }
  0x1d   : > { %1468 = vst [vmem:[%s16513_s26 + $0xa0] sm:$0xff] %v1467_v20  ;;  %v1473_v23 = vld [vmem:[%s16508_s25 + $0xb8] sm:$0xff]  ;;  %1470 = vst [vmem:[%s16513_s26 + $0xa8] sm:$0xff] %v1469_v21  ;;  %v1475_v24 = vld [vmem:[%s16508_s25 + $0xc0] sm:$0xff] }
  0x1e   : > { %1472 = vst [vmem:[%s16513_s26 + $0xb0] sm:$0xff] %v1471_v22  ;;  %1474 = vst [vmem:[%s16513_s26 + $0xb8] sm:$0xff] %v1473_v23  ;;  %v1477_v25 = vld [vmem:[%s16508_s25 + $0xc8] sm:$0xff]  ;;  %v1479_v26 = vld [vmem:[%s16508_s25 + $0xd0] sm:$0xff] }
  0x1f   : > { %1476 = vst [vmem:[%s16513_s26 + $0xc0] sm:$0xff] %v1475_v24  ;;  %1478 = vst [vmem:[%s16513_s26 + $0xc8] sm:$0xff] %v1477_v25  ;;  %v1481_v27 = vld [vmem:[%s16508_s25 + $0xd8] sm:$0xff]  ;;  %v1483_v28 = vld [vmem:[%s16508_s25 + $0xe0] sm:$0xff] }
  0x20   : > { %1480 = vst [vmem:[%s16513_s26 + $0xd0] sm:$0xff] %v1479_v26  ;;  %v1485_v29 = vld [vmem:[%s16508_s25 + $0xe8] sm:$0xff]  ;;  %1482 = vst [vmem:[%s16513_s26 + $0xd8] sm:$0xff] %v1481_v27  ;;  %v1487_v30 = vld [vmem:[%s16508_s25 + $0xf0] sm:$0xff] }
  0x21   : > { %1484 = vst [vmem:[%s16513_s26 + $0xe0] sm:$0xff] %v1483_v28  ;;  %1486 = vst [vmem:[%s16513_s26 + $0xe8] sm:$0xff] %v1485_v29  ;;  %v1489_v31 = vld [vmem:[%s16508_s25 + $0xf8] sm:$0xff]  ;;  %v1491_v32 = vld [vmem:[%s16508_s25 + $0x100] sm:$0xff] }
  0x22   : > { %1488 = vst [vmem:[%s16513_s26 + $0xf0] sm:$0xff] %v1487_v30  ;;  %1490 = vst [vmem:[%s16513_s26 + $0xf8] sm:$0xff] %v1489_v31  ;;  %v1493_v33 = vld [vmem:[%s16508_s25 + $0x108] sm:$0xff]  ;;  %v1495_v34 = vld [vmem:[%s16508_s25 + $0x110] sm:$0xff] }
  0x23   : > { %1492 = vst [vmem:[%s16513_s26 + $0x100] sm:$0xff] %v1491_v32  ;;  %v1497_v35 = vld [vmem:[%s16508_s25 + $0x118] sm:$0xff]  ;;  %1494 = vst [vmem:[%s16513_s26 + $0x108] sm:$0xff] %v1493_v33  ;;  %v1499_v36 = vld [vmem:[%s16508_s25 + $0x120] sm:$0xff] }
  0x24   : > { %1496 = vst [vmem:[%s16513_s26 + $0x110] sm:$0xff] %v1495_v34  ;;  %1498 = vst [vmem:[%s16513_s26 + $0x118] sm:$0xff] %v1497_v35  ;;  %v1501_v37 = vld [vmem:[%s16508_s25 + $0x128] sm:$0xff]  ;;  %v1503_v38 = vld [vmem:[%s16508_s25 + $0x130] sm:$0xff] }
  0x25   : > { %1500 = vst [vmem:[%s16513_s26 + $0x120] sm:$0xff] %v1499_v36  ;;  %1502 = vst [vmem:[%s16513_s26 + $0x128] sm:$0xff] %v1501_v37  ;;  %v1505_v39 = vld [vmem:[%s16508_s25 + $0x138] sm:$0xff]  ;;  %v1507_v40 = vld [vmem:[%s16508_s25 + $0x140] sm:$0xff] }
  0x26   : > { %1504 = vst [vmem:[%s16513_s26 + $0x130] sm:$0xff] %v1503_v38  ;;  %v1509_v41 = vld [vmem:[%s16508_s25 + $0x148] sm:$0xff]  ;;  %1506 = vst [vmem:[%s16513_s26 + $0x138] sm:$0xff] %v1505_v39  ;;  %v1511_v42 = vld [vmem:[%s16508_s25 + $0x150] sm:$0xff] }
  0x27   : > { %1508 = vst [vmem:[%s16513_s26 + $0x140] sm:$0xff] %v1507_v40  ;;  %1510 = vst [vmem:[%s16513_s26 + $0x148] sm:$0xff] %v1509_v41  ;;  %v1513_v43 = vld [vmem:[%s16508_s25 + $0x158] sm:$0xff]  ;;  %v1515_v44 = vld [vmem:[%s16508_s25 + $0x160] sm:$0xff] }
  0x28   : > { %1512 = vst [vmem:[%s16513_s26 + $0x150] sm:$0xff] %v1511_v42  ;;  %1514 = vst [vmem:[%s16513_s26 + $0x158] sm:$0xff] %v1513_v43  ;;  %v1517_v45 = vld [vmem:[%s16508_s25 + $0x168] sm:$0xff]  ;;  %v1519_v46 = vld [vmem:[%s16508_s25 + $0x170] sm:$0xff] }
  0x29   : > { %1516 = vst [vmem:[%s16513_s26 + $0x160] sm:$0xff] %v1515_v44  ;;  %v1521_v47 = vld [vmem:[%s16508_s25 + $0x178] sm:$0xff]  ;;  %1518 = vst [vmem:[%s16513_s26 + $0x168] sm:$0xff] %v1517_v45  ;;  %v1523_v48 = vld [vmem:[%s16508_s25 + $0x180] sm:$0xff] }
  0x2a   : > { %1520 = vst [vmem:[%s16513_s26 + $0x170] sm:$0xff] %v1519_v46  ;;  %1522 = vst [vmem:[%s16513_s26 + $0x178] sm:$0xff] %v1521_v47  ;;  %v1525_v49 = vld [vmem:[%s16508_s25 + $0x188] sm:$0xff]  ;;  %v1527_v50 = vld [vmem:[%s16508_s25 + $0x190] sm:$0xff] }
  0x2b   : > { %1524 = vst [vmem:[%s16513_s26 + $0x180] sm:$0xff] %v1523_v48  ;;  %1526 = vst [vmem:[%s16513_s26 + $0x188] sm:$0xff] %v1525_v49  ;;  %v1529_v51 = vld [vmem:[%s16508_s25 + $0x198] sm:$0xff]  ;;  %v1531_v52 = vld [vmem:[%s16508_s25 + $0x1a0] sm:$0xff] }
  0x2c   : > { %1528 = vst [vmem:[%s16513_s26 + $0x190] sm:$0xff] %v1527_v50  ;;  %v1533_v53 = vld [vmem:[%s16508_s25 + $0x1a8] sm:$0xff]  ;;  %1530 = vst [vmem:[%s16513_s26 + $0x198] sm:$0xff] %v1529_v51  ;;  %v1535_v54 = vld [vmem:[%s16508_s25 + $0x1b0] sm:$0xff] }
  0x2d   : > { %1532 = vst [vmem:[%s16513_s26 + $0x1a0] sm:$0xff] %v1531_v52  ;;  %1534 = vst [vmem:[%s16513_s26 + $0x1a8] sm:$0xff] %v1533_v53  ;;  %v1537_v55 = vld [vmem:[%s16508_s25 + $0x1b8] sm:$0xff]  ;;  %v1539_v56 = vld [vmem:[%s16508_s25 + $0x1c0] sm:$0xff] }
  0x2e   : > { %1536 = vst [vmem:[%s16513_s26 + $0x1b0] sm:$0xff] %v1535_v54  ;;  %1538 = vst [vmem:[%s16513_s26 + $0x1b8] sm:$0xff] %v1537_v55  ;;  %v1541_v57 = vld [vmem:[%s16508_s25 + $0x1c8] sm:$0xff]  ;;  %v1543_v58 = vld [vmem:[%s16508_s25 + $0x1d0] sm:$0xff] }
  0x2f   : > { %1540 = vst [vmem:[%s16513_s26 + $0x1c0] sm:$0xff] %v1539_v56  ;;  %v1545_v59 = vld [vmem:[%s16508_s25 + $0x1d8] sm:$0xff]  ;;  %1542 = vst [vmem:[%s16513_s26 + $0x1c8] sm:$0xff] %v1541_v57  ;;  %v1547_v60 = vld [vmem:[%s16508_s25 + $0x1e0] sm:$0xff] }
  0x30   : > { %1544 = vst [vmem:[%s16513_s26 + $0x1d0] sm:$0xff] %v1543_v58  ;;  %1546 = vst [vmem:[%s16513_s26 + $0x1d8] sm:$0xff] %v1545_v59  ;;  %v1549_v61 = vld [vmem:[%s16508_s25 + $0x1e8] sm:$0xff]  ;;  %v1551_v62 = vld [vmem:[%s16508_s25 + $0x1f0] sm:$0xff] }
  0x31   : > { %1548 = vst [vmem:[%s16513_s26 + $0x1e0] sm:$0xff] %v1547_v60  ;;  %1550 = vst [vmem:[%s16513_s26 + $0x1e8] sm:$0xff] %v1549_v61  ;;  %v1553_v63 = vld [vmem:[%s16508_s25 + $0x1f8] sm:$0xff]  ;;  %v1555_v0 = vld [vmem:[%s16508_s25 + $0x200] sm:$0xff] }
  0x32   : > { %1552 = vst [vmem:[%s16513_s26 + $0x1f0] sm:$0xff] %v1551_v62  ;;  %v1557_v1 = vld [vmem:[%s16508_s25 + $0x208] sm:$0xff]  ;;  %1554 = vst [vmem:[%s16513_s26 + $0x1f8] sm:$0xff] %v1553_v63  ;;  %v1559_v2 = vld [vmem:[%s16508_s25 + $0x210] sm:$0xff] }
  0x33   : > { %1556 = vst [vmem:[%s16513_s26 + $0x200] sm:$0xff] %v1555_v0  ;;  %1558 = vst [vmem:[%s16513_s26 + $0x208] sm:$0xff] %v1557_v1  ;;  %v1561_v3 = vld [vmem:[%s16508_s25 + $0x218] sm:$0xff]  ;;  %v1563_v4 = vld [vmem:[%s16508_s25 + $0x220] sm:$0xff] }
  0x34   : > { %1560 = vst [vmem:[%s16513_s26 + $0x210] sm:$0xff] %v1559_v2  ;;  %1562 = vst [vmem:[%s16513_s26 + $0x218] sm:$0xff] %v1561_v3  ;;  %v1565_v5 = vld [vmem:[%s16508_s25 + $0x228] sm:$0xff]  ;;  %v1567_v6 = vld [vmem:[%s16508_s25 + $0x15e0] sm:$0xff] }
  0x35   : > { %1564 = vst [vmem:[%s16513_s26 + $0x220] sm:$0xff] %v1563_v4  ;;  %v1569_v7 = vld [vmem:[%s16508_s25 + $0x15e8] sm:$0xff]  ;;  %1566 = vst [vmem:[%s16513_s26 + $0x228] sm:$0xff] %v1565_v5  ;;  %v1571_v8 = vld [vmem:[%s16508_s25 + $0x15f0] sm:$0xff] }
  0x36   : > { %1568 = vst [vmem:[%s16513_s26 + $0x230] sm:$0xff] %v1567_v6  ;;  %1570 = vst [vmem:[%s16513_s26 + $0x238] sm:$0xff] %v1569_v7  ;;  %v1573_v9 = vld [vmem:[%s16508_s25 + $0x15f8] sm:$0xff]  ;;  %v1575_v10 = vld [vmem:[%s16508_s25 + $0x1600] sm:$0xff] }
  0x37   : > { %1572 = vst [vmem:[%s16513_s26 + $0x240] sm:$0xff] %v1571_v8  ;;  %1574 = vst [vmem:[%s16513_s26 + $0x248] sm:$0xff] %v1573_v9  ;;  %v1577_v11 = vld [vmem:[%s16508_s25 + $0x1608] sm:$0xff]  ;;  %v1579_v12 = vld [vmem:[%s16508_s25 + $0x1610] sm:$0xff] }
  0x38   : > { %1576 = vst [vmem:[%s16513_s26 + $0x250] sm:$0xff] %v1575_v10  ;;  %v1581_v13 = vld [vmem:[%s16508_s25 + $0x1618] sm:$0xff]  ;;  %1578 = vst [vmem:[%s16513_s26 + $0x258] sm:$0xff] %v1577_v11  ;;  %v1583_v14 = vld [vmem:[%s16508_s25 + $0x1620] sm:$0xff] }
  0x39   : > { %1580 = vst [vmem:[%s16513_s26 + $0x260] sm:$0xff] %v1579_v12  ;;  %1582 = vst [vmem:[%s16513_s26 + $0x268] sm:$0xff] %v1581_v13  ;;  %v1585_v15 = vld [vmem:[%s16508_s25 + $0x1628] sm:$0xff]  ;;  %v1587_v16 = vld [vmem:[%s16508_s25 + $0x1630] sm:$0xff] }
  0x3a   : > { %1584 = vst [vmem:[%s16513_s26 + $0x270] sm:$0xff] %v1583_v14  ;;  %1586 = vst [vmem:[%s16513_s26 + $0x278] sm:$0xff] %v1585_v15  ;;  %v1589_v17 = vld [vmem:[%s16508_s25 + $0x1638] sm:$0xff]  ;;  %v1591_v18 = vld [vmem:[%s16508_s25 + $0x1640] sm:$0xff] }
  0x3b   : > { %1588 = vst [vmem:[%s16513_s26 + $0x280] sm:$0xff] %v1587_v16  ;;  %v1593_v19 = vld [vmem:[%s16508_s25 + $0x1648] sm:$0xff]  ;;  %1590 = vst [vmem:[%s16513_s26 + $0x288] sm:$0xff] %v1589_v17  ;;  %v1595_v20 = vld [vmem:[%s16508_s25 + $0x1650] sm:$0xff] }
  0x3c   : > { %1592 = vst [vmem:[%s16513_s26 + $0x290] sm:$0xff] %v1591_v18  ;;  %1594 = vst [vmem:[%s16513_s26 + $0x298] sm:$0xff] %v1593_v19  ;;  %v1597_v21 = vld [vmem:[%s16508_s25 + $0x1658] sm:$0xff]  ;;  %v1599_v22 = vld [vmem:[%s16508_s25 + $0x1660] sm:$0xff] }
  0x3d   : > { %1596 = vst [vmem:[%s16513_s26 + $0x2a0] sm:$0xff] %v1595_v20  ;;  %1598 = vst [vmem:[%s16513_s26 + $0x2a8] sm:$0xff] %v1597_v21  ;;  %v1601_v23 = vld [vmem:[%s16508_s25 + $0x1668] sm:$0xff]  ;;  %v1603_v24 = vld [vmem:[%s16508_s25 + $0x1670] sm:$0xff] }
  0x3e   : > { %1600 = vst [vmem:[%s16513_s26 + $0x2b0] sm:$0xff] %v1599_v22  ;;  %v1605_v25 = vld [vmem:[%s16508_s25 + $0x1678] sm:$0xff]  ;;  %1602 = vst [vmem:[%s16513_s26 + $0x2b8] sm:$0xff] %v1601_v23  ;;  %v1607_v26 = vld [vmem:[%s16508_s25 + $0x1680] sm:$0xff] }
  0x3f   : > { %1604 = vst [vmem:[%s16513_s26 + $0x2c0] sm:$0xff] %v1603_v24  ;;  %1606 = vst [vmem:[%s16513_s26 + $0x2c8] sm:$0xff] %v1605_v25  ;;  %v1609_v27 = vld [vmem:[%s16508_s25 + $0x1688] sm:$0xff]  ;;  %v1611_v28 = vld [vmem:[%s16508_s25 + $0x1690] sm:$0xff] }
  0x40   : > { %1608 = vst [vmem:[%s16513_s26 + $0x2d0] sm:$0xff] %v1607_v26  ;;  %1610 = vst [vmem:[%s16513_s26 + $0x2d8] sm:$0xff] %v1609_v27  ;;  %v1613_v29 = vld [vmem:[%s16508_s25 + $0x1698] sm:$0xff]  ;;  %v1615_v30 = vld [vmem:[%s16508_s25 + $0x16a0] sm:$0xff] }
  0x41   : > { %1612 = vst [vmem:[%s16513_s26 + $0x2e0] sm:$0xff] %v1611_v28  ;;  %v1617_v31 = vld [vmem:[%s16508_s25 + $0x16a8] sm:$0xff]  ;;  %1614 = vst [vmem:[%s16513_s26 + $0x2e8] sm:$0xff] %v1613_v29  ;;  %v1619_v32 = vld [vmem:[%s16508_s25 + $0x16b0] sm:$0xff] }
  0x42   : > { %1616 = vst [vmem:[%s16513_s26 + $0x2f0] sm:$0xff] %v1615_v30  ;;  %1618 = vst [vmem:[%s16513_s26 + $0x2f8] sm:$0xff] %v1617_v31  ;;  %v1621_v33 = vld [vmem:[%s16508_s25 + $0x16b8] sm:$0xff]  ;;  %v1623_v34 = vld [vmem:[%s16508_s25 + $0x16c0] sm:$0xff] }
  0x43   : > { %1620 = vst [vmem:[%s16513_s26 + $0x300] sm:$0xff] %v1619_v32  ;;  %1622 = vst [vmem:[%s16513_s26 + $0x308] sm:$0xff] %v1621_v33  ;;  %v1625_v35 = vld [vmem:[%s16508_s25 + $0x16c8] sm:$0xff]  ;;  %v1627_v36 = vld [vmem:[%s16508_s25 + $0x16d0] sm:$0xff] }
  0x44   : > { %1624 = vst [vmem:[%s16513_s26 + $0x310] sm:$0xff] %v1623_v34  ;;  %v1629_v37 = vld [vmem:[%s16508_s25 + $0x16d8] sm:$0xff]  ;;  %1626 = vst [vmem:[%s16513_s26 + $0x318] sm:$0xff] %v1625_v35  ;;  %v1631_v38 = vld [vmem:[%s16508_s25 + $0x16e0] sm:$0xff] }
  0x45   : > { %1628 = vst [vmem:[%s16513_s26 + $0x320] sm:$0xff] %v1627_v36  ;;  %1630 = vst [vmem:[%s16513_s26 + $0x328] sm:$0xff] %v1629_v37  ;;  %v1633_v39 = vld [vmem:[%s16508_s25 + $0x16e8] sm:$0xff]  ;;  %v1635_v40 = vld [vmem:[%s16508_s25 + $0x16f0] sm:$0xff] }
  0x46   : > { %1632 = vst [vmem:[%s16513_s26 + $0x330] sm:$0xff] %v1631_v38  ;;  %1634 = vst [vmem:[%s16513_s26 + $0x338] sm:$0xff] %v1633_v39  ;;  %v1637_v41 = vld [vmem:[%s16508_s25 + $0x16f8] sm:$0xff]  ;;  %v1639_v42 = vld [vmem:[%s16508_s25 + $0x1700] sm:$0xff] }
  0x47   : > { %1636 = vst [vmem:[%s16513_s26 + $0x340] sm:$0xff] %v1635_v40  ;;  %v1641_v43 = vld [vmem:[%s16508_s25 + $0x1708] sm:$0xff]  ;;  %1638 = vst [vmem:[%s16513_s26 + $0x348] sm:$0xff] %v1637_v41  ;;  %v1643_v44 = vld [vmem:[%s16508_s25 + $0x1710] sm:$0xff] }
  0x48   : > { %1640 = vst [vmem:[%s16513_s26 + $0x350] sm:$0xff] %v1639_v42  ;;  %1642 = vst [vmem:[%s16513_s26 + $0x358] sm:$0xff] %v1641_v43  ;;  %v1645_v45 = vld [vmem:[%s16508_s25 + $0x1718] sm:$0xff]  ;;  %v1647_v46 = vld [vmem:[%s16508_s25 + $0x1720] sm:$0xff] }
  0x49   : > { %1644 = vst [vmem:[%s16513_s26 + $0x360] sm:$0xff] %v1643_v44  ;;  %1646 = vst [vmem:[%s16513_s26 + $0x368] sm:$0xff] %v1645_v45  ;;  %v1649_v47 = vld [vmem:[%s16508_s25 + $0x1728] sm:$0xff]  ;;  %v1651_v48 = vld [vmem:[%s16508_s25 + $0x1730] sm:$0xff] }
  0x4a   : > { %1648 = vst [vmem:[%s16513_s26 + $0x370] sm:$0xff] %v1647_v46  ;;  %v1653_v49 = vld [vmem:[%s16508_s25 + $0x1738] sm:$0xff]  ;;  %1650 = vst [vmem:[%s16513_s26 + $0x378] sm:$0xff] %v1649_v47  ;;  %v1655_v50 = vld [vmem:[%s16508_s25 + $0x1740] sm:$0xff] }
  0x4b   : > { %1652 = vst [vmem:[%s16513_s26 + $0x380] sm:$0xff] %v1651_v48  ;;  %1654 = vst [vmem:[%s16513_s26 + $0x388] sm:$0xff] %v1653_v49  ;;  %v1657_v51 = vld [vmem:[%s16508_s25 + $0x1748] sm:$0xff]  ;;  %v1659_v52 = vld [vmem:[%s16508_s25 + $0x1750] sm:$0xff] }
  0x4c   : > { %1656 = vst [vmem:[%s16513_s26 + $0x390] sm:$0xff] %v1655_v50  ;;  %1658 = vst [vmem:[%s16513_s26 + $0x398] sm:$0xff] %v1657_v51  ;;  %v1661_v53 = vld [vmem:[%s16508_s25 + $0x1758] sm:$0xff]  ;;  %v1663_v54 = vld [vmem:[%s16508_s25 + $0x1760] sm:$0xff] }
  0x4d   : > { %1660 = vst [vmem:[%s16513_s26 + $0x3a0] sm:$0xff] %v1659_v52  ;;  %v1665_v55 = vld [vmem:[%s16508_s25 + $0x1768] sm:$0xff]  ;;  %1662 = vst [vmem:[%s16513_s26 + $0x3a8] sm:$0xff] %v1661_v53  ;;  %v1667_v56 = vld [vmem:[%s16508_s25 + $0x1770] sm:$0xff] }
  0x4e   : > { %1664 = vst [vmem:[%s16513_s26 + $0x3b0] sm:$0xff] %v1663_v54  ;;  %1666 = vst [vmem:[%s16513_s26 + $0x3b8] sm:$0xff] %v1665_v55  ;;  %v1669_v57 = vld [vmem:[%s16508_s25 + $0x1778] sm:$0xff]  ;;  %v1671_v58 = vld [vmem:[%s16508_s25 + $0x1780] sm:$0xff] }
  0x4f   : > { %1668 = vst [vmem:[%s16513_s26 + $0x3c0] sm:$0xff] %v1667_v56  ;;  %1670 = vst [vmem:[%s16513_s26 + $0x3c8] sm:$0xff] %v1669_v57  ;;  %v1673_v59 = vld [vmem:[%s16508_s25 + $0x1788] sm:$0xff]  ;;  %v1675_v60 = vld [vmem:[%s16508_s25 + $0x1790] sm:$0xff] }
  0x50   : > { %1672 = vst [vmem:[%s16513_s26 + $0x3d0] sm:$0xff] %v1671_v58  ;;  %v1677_v61 = vld [vmem:[%s16508_s25 + $0x1798] sm:$0xff]  ;;  %1674 = vst [vmem:[%s16513_s26 + $0x3d8] sm:$0xff] %v1673_v59  ;;  %v1679_v62 = vld [vmem:[%s16508_s25 + $0x17a0] sm:$0xff] }
  0x51   : > { %1676 = vst [vmem:[%s16513_s26 + $0x3e0] sm:$0xff] %v1675_v60  ;;  %1678 = vst [vmem:[%s16513_s26 + $0x3e8] sm:$0xff] %v1677_v61  ;;  %v1681_v63 = vld [vmem:[%s16508_s25 + $0x17a8] sm:$0xff]  ;;  %v1683_v0 = vld [vmem:[%s16508_s25 + $0x17b0] sm:$0xff] }
  0x52   : > { %1680 = vst [vmem:[%s16513_s26 + $0x3f0] sm:$0xff] %v1679_v62  ;;  %1682 = vst [vmem:[%s16513_s26 + $0x3f8] sm:$0xff] %v1681_v63  ;;  %v1685_v1 = vld [vmem:[%s16508_s25 + $0x17b8] sm:$0xff]  ;;  %v1687_v2 = vld [vmem:[%s16508_s25 + $0x17c0] sm:$0xff] }
  0x53   : > { %1684 = vst [vmem:[%s16513_s26 + $0x400] sm:$0xff] %v1683_v0  ;;  %v1689_v3 = vld [vmem:[%s16508_s25 + $0x17c8] sm:$0xff]  ;;  %1686 = vst [vmem:[%s16513_s26 + $0x408] sm:$0xff] %v1685_v1  ;;  %v1691_v4 = vld [vmem:[%s16508_s25 + $0x17d0] sm:$0xff] }
  0x54   : > { %1688 = vst [vmem:[%s16513_s26 + $0x410] sm:$0xff] %v1687_v2  ;;  %1690 = vst [vmem:[%s16513_s26 + $0x418] sm:$0xff] %v1689_v3  ;;  %v1693_v5 = vld [vmem:[%s16508_s25 + $0x17d8] sm:$0xff]  ;;  %v1695_v6 = vld [vmem:[%s16508_s25 + $0x17e0] sm:$0xff] }
  0x55   : > { %1692 = vst [vmem:[%s16513_s26 + $0x420] sm:$0xff] %v1691_v4  ;;  %1694 = vst [vmem:[%s16513_s26 + $0x428] sm:$0xff] %v1693_v5  ;;  %v1697_v7 = vld [vmem:[%s16508_s25 + $0x17e8] sm:$0xff]  ;;  %v1699_v8 = vld [vmem:[%s16508_s25 + $0x17f0] sm:$0xff] }
  0x56   : > { %1696 = vst [vmem:[%s16513_s26 + $0x430] sm:$0xff] %v1695_v6  ;;  %v1701_v9 = vld [vmem:[%s16508_s25 + $0x17f8] sm:$0xff]  ;;  %1698 = vst [vmem:[%s16513_s26 + $0x438] sm:$0xff] %v1697_v7  ;;  %v1703_v10 = vld [vmem:[%s16508_s25 + $0x1800] sm:$0xff] }
  0x57   : > { %1700 = vst [vmem:[%s16513_s26 + $0x440] sm:$0xff] %v1699_v8  ;;  %1702 = vst [vmem:[%s16513_s26 + $0x448] sm:$0xff] %v1701_v9  ;;  %v1705_v11 = vld [vmem:[%s16508_s25 + $0x1808] sm:$0xff]  ;;  %v1707_v12 = vld [vmem:[%s16508_s25 + $0x2bc0] sm:$0xff] }
  0x58   : > { %1704 = vst [vmem:[%s16513_s26 + $0x450] sm:$0xff] %v1703_v10  ;;  %1706 = vst [vmem:[%s16513_s26 + $0x458] sm:$0xff] %v1705_v11  ;;  %v1709_v13 = vld [vmem:[%s16508_s25 + $0x2bc8] sm:$0xff]  ;;  %v1711_v14 = vld [vmem:[%s16508_s25 + $0x2bd0] sm:$0xff] }
  0x59   : > { %1708 = vst [vmem:[%s16513_s26 + $0x460] sm:$0xff] %v1707_v12  ;;  %v1713_v15 = vld [vmem:[%s16508_s25 + $0x2bd8] sm:$0xff]  ;;  %1710 = vst [vmem:[%s16513_s26 + $0x468] sm:$0xff] %v1709_v13  ;;  %v1715_v16 = vld [vmem:[%s16508_s25 + $0x2be0] sm:$0xff] }
  0x5a   : > { %1712 = vst [vmem:[%s16513_s26 + $0x470] sm:$0xff] %v1711_v14  ;;  %1714 = vst [vmem:[%s16513_s26 + $0x478] sm:$0xff] %v1713_v15  ;;  %v1717_v17 = vld [vmem:[%s16508_s25 + $0x2be8] sm:$0xff]  ;;  %v1719_v18 = vld [vmem:[%s16508_s25 + $0x2bf0] sm:$0xff] }
  0x5b   : > { %1716 = vst [vmem:[%s16513_s26 + $0x480] sm:$0xff] %v1715_v16  ;;  %1718 = vst [vmem:[%s16513_s26 + $0x488] sm:$0xff] %v1717_v17  ;;  %v1721_v19 = vld [vmem:[%s16508_s25 + $0x2bf8] sm:$0xff]  ;;  %v1723_v20 = vld [vmem:[%s16508_s25 + $0x2c00] sm:$0xff] }
  0x5c   : > { %1720 = vst [vmem:[%s16513_s26 + $0x490] sm:$0xff] %v1719_v18  ;;  %v1725_v21 = vld [vmem:[%s16508_s25 + $0x2c08] sm:$0xff]  ;;  %1722 = vst [vmem:[%s16513_s26 + $0x498] sm:$0xff] %v1721_v19  ;;  %v1727_v22 = vld [vmem:[%s16508_s25 + $0x2c10] sm:$0xff] }
  0x5d   : > { %1724 = vst [vmem:[%s16513_s26 + $0x4a0] sm:$0xff] %v1723_v20  ;;  %1726 = vst [vmem:[%s16513_s26 + $0x4a8] sm:$0xff] %v1725_v21  ;;  %v1729_v23 = vld [vmem:[%s16508_s25 + $0x2c18] sm:$0xff]  ;;  %v1731_v24 = vld [vmem:[%s16508_s25 + $0x2c20] sm:$0xff] }
  0x5e   : > { %1728 = vst [vmem:[%s16513_s26 + $0x4b0] sm:$0xff] %v1727_v22  ;;  %1730 = vst [vmem:[%s16513_s26 + $0x4b8] sm:$0xff] %v1729_v23  ;;  %v1733_v25 = vld [vmem:[%s16508_s25 + $0x2c28] sm:$0xff]  ;;  %v1735_v26 = vld [vmem:[%s16508_s25 + $0x2c30] sm:$0xff] }
  0x5f   : > { %1732 = vst [vmem:[%s16513_s26 + $0x4c0] sm:$0xff] %v1731_v24  ;;  %v1737_v27 = vld [vmem:[%s16508_s25 + $0x2c38] sm:$0xff]  ;;  %1734 = vst [vmem:[%s16513_s26 + $0x4c8] sm:$0xff] %v1733_v25  ;;  %v1739_v28 = vld [vmem:[%s16508_s25 + $0x2c40] sm:$0xff] }
  0x60   : > { %1736 = vst [vmem:[%s16513_s26 + $0x4d0] sm:$0xff] %v1735_v26  ;;  %1738 = vst [vmem:[%s16513_s26 + $0x4d8] sm:$0xff] %v1737_v27  ;;  %v1741_v29 = vld [vmem:[%s16508_s25 + $0x2c48] sm:$0xff]  ;;  %v1743_v30 = vld [vmem:[%s16508_s25 + $0x2c50] sm:$0xff] }
  0x61   : > { %1740 = vst [vmem:[%s16513_s26 + $0x4e0] sm:$0xff] %v1739_v28  ;;  %1742 = vst [vmem:[%s16513_s26 + $0x4e8] sm:$0xff] %v1741_v29  ;;  %v1745_v31 = vld [vmem:[%s16508_s25 + $0x2c58] sm:$0xff]  ;;  %v1747_v32 = vld [vmem:[%s16508_s25 + $0x2c60] sm:$0xff] }
  0x62   : > { %1744 = vst [vmem:[%s16513_s26 + $0x4f0] sm:$0xff] %v1743_v30  ;;  %v1749_v33 = vld [vmem:[%s16508_s25 + $0x2c68] sm:$0xff]  ;;  %1746 = vst [vmem:[%s16513_s26 + $0x4f8] sm:$0xff] %v1745_v31  ;;  %v1751_v34 = vld [vmem:[%s16508_s25 + $0x2c70] sm:$0xff] }
  0x63   : > { %1748 = vst [vmem:[%s16513_s26 + $0x500] sm:$0xff] %v1747_v32  ;;  %1750 = vst [vmem:[%s16513_s26 + $0x508] sm:$0xff] %v1749_v33  ;;  %v1753_v35 = vld [vmem:[%s16508_s25 + $0x2c78] sm:$0xff]  ;;  %v1755_v36 = vld [vmem:[%s16508_s25 + $0x2c80] sm:$0xff] }
  0x64   : > { %1752 = vst [vmem:[%s16513_s26 + $0x510] sm:$0xff] %v1751_v34  ;;  %1754 = vst [vmem:[%s16513_s26 + $0x518] sm:$0xff] %v1753_v35  ;;  %v1757_v37 = vld [vmem:[%s16508_s25 + $0x2c88] sm:$0xff]  ;;  %v1759_v38 = vld [vmem:[%s16508_s25 + $0x2c90] sm:$0xff] }
  0x65   : > { %1756 = vst [vmem:[%s16513_s26 + $0x520] sm:$0xff] %v1755_v36  ;;  %v1761_v39 = vld [vmem:[%s16508_s25 + $0x2c98] sm:$0xff]  ;;  %1758 = vst [vmem:[%s16513_s26 + $0x528] sm:$0xff] %v1757_v37  ;;  %v1763_v40 = vld [vmem:[%s16508_s25 + $0x2ca0] sm:$0xff] }
  0x66   : > { %1760 = vst [vmem:[%s16513_s26 + $0x530] sm:$0xff] %v1759_v38  ;;  %1762 = vst [vmem:[%s16513_s26 + $0x538] sm:$0xff] %v1761_v39  ;;  %v1765_v41 = vld [vmem:[%s16508_s25 + $0x2ca8] sm:$0xff]  ;;  %v1767_v42 = vld [vmem:[%s16508_s25 + $0x2cb0] sm:$0xff] }
  0x67   : > { %1764 = vst [vmem:[%s16513_s26 + $0x540] sm:$0xff] %v1763_v40  ;;  %1766 = vst [vmem:[%s16513_s26 + $0x548] sm:$0xff] %v1765_v41  ;;  %v1769_v43 = vld [vmem:[%s16508_s25 + $0x2cb8] sm:$0xff]  ;;  %v1771_v44 = vld [vmem:[%s16508_s25 + $0x2cc0] sm:$0xff] }
  0x68   : > { %1768 = vst [vmem:[%s16513_s26 + $0x550] sm:$0xff] %v1767_v42  ;;  %v1773_v45 = vld [vmem:[%s16508_s25 + $0x2cc8] sm:$0xff]  ;;  %1770 = vst [vmem:[%s16513_s26 + $0x558] sm:$0xff] %v1769_v43  ;;  %v1775_v46 = vld [vmem:[%s16508_s25 + $0x2cd0] sm:$0xff] }
  0x69   : > { %1772 = vst [vmem:[%s16513_s26 + $0x560] sm:$0xff] %v1771_v44  ;;  %1774 = vst [vmem:[%s16513_s26 + $0x568] sm:$0xff] %v1773_v45  ;;  %v1777_v47 = vld [vmem:[%s16508_s25 + $0x2cd8] sm:$0xff]  ;;  %v1779_v48 = vld [vmem:[%s16508_s25 + $0x2ce0] sm:$0xff] }
  0x6a   : > { %1776 = vst [vmem:[%s16513_s26 + $0x570] sm:$0xff] %v1775_v46  ;;  %1778 = vst [vmem:[%s16513_s26 + $0x578] sm:$0xff] %v1777_v47  ;;  %v1781_v49 = vld [vmem:[%s16508_s25 + $0x2ce8] sm:$0xff]  ;;  %v1783_v50 = vld [vmem:[%s16508_s25 + $0x2cf0] sm:$0xff] }
  0x6b   : > { %1780 = vst [vmem:[%s16513_s26 + $0x580] sm:$0xff] %v1779_v48  ;;  %v1785_v51 = vld [vmem:[%s16508_s25 + $0x2cf8] sm:$0xff]  ;;  %1782 = vst [vmem:[%s16513_s26 + $0x588] sm:$0xff] %v1781_v49  ;;  %v1787_v52 = vld [vmem:[%s16508_s25 + $0x2d00] sm:$0xff] }
  0x6c   : > { %1784 = vst [vmem:[%s16513_s26 + $0x590] sm:$0xff] %v1783_v50  ;;  %1786 = vst [vmem:[%s16513_s26 + $0x598] sm:$0xff] %v1785_v51  ;;  %v1789_v53 = vld [vmem:[%s16508_s25 + $0x2d08] sm:$0xff]  ;;  %v1791_v54 = vld [vmem:[%s16508_s25 + $0x2d10] sm:$0xff] }
  0x6d   : > { %1788 = vst [vmem:[%s16513_s26 + $0x5a0] sm:$0xff] %v1787_v52  ;;  %1790 = vst [vmem:[%s16513_s26 + $0x5a8] sm:$0xff] %v1789_v53  ;;  %v1793_v55 = vld [vmem:[%s16508_s25 + $0x2d18] sm:$0xff]  ;;  %v1795_v56 = vld [vmem:[%s16508_s25 + $0x2d20] sm:$0xff] }
  0x6e   : > { %1792 = vst [vmem:[%s16513_s26 + $0x5b0] sm:$0xff] %v1791_v54  ;;  %v1797_v57 = vld [vmem:[%s16508_s25 + $0x2d28] sm:$0xff]  ;;  %1794 = vst [vmem:[%s16513_s26 + $0x5b8] sm:$0xff] %v1793_v55  ;;  %v1799_v58 = vld [vmem:[%s16508_s25 + $0x2d30] sm:$0xff] }
  0x6f   : > { %1796 = vst [vmem:[%s16513_s26 + $0x5c0] sm:$0xff] %v1795_v56  ;;  %1798 = vst [vmem:[%s16513_s26 + $0x5c8] sm:$0xff] %v1797_v57  ;;  %v1801_v59 = vld [vmem:[%s16508_s25 + $0x2d38] sm:$0xff]  ;;  %v1803_v60 = vld [vmem:[%s16508_s25 + $0x2d40] sm:$0xff] }
  0x70   : > { %1800 = vst [vmem:[%s16513_s26 + $0x5d0] sm:$0xff] %v1799_v58  ;;  %1802 = vst [vmem:[%s16513_s26 + $0x5d8] sm:$0xff] %v1801_v59  ;;  %v1805_v61 = vld [vmem:[%s16508_s25 + $0x2d48] sm:$0xff]  ;;  %v1807_v62 = vld [vmem:[%s16508_s25 + $0x2d50] sm:$0xff] }
  0x71   : > { %1804 = vst [vmem:[%s16513_s26 + $0x5e0] sm:$0xff] %v1803_v60  ;;  %v1809_v63 = vld [vmem:[%s16508_s25 + $0x2d58] sm:$0xff]  ;;  %1806 = vst [vmem:[%s16513_s26 + $0x5e8] sm:$0xff] %v1805_v61  ;;  %v1811_v0 = vld [vmem:[%s16508_s25 + $0x2d60] sm:$0xff] }
  0x72   : > { %1808 = vst [vmem:[%s16513_s26 + $0x5f0] sm:$0xff] %v1807_v62  ;;  %1810 = vst [vmem:[%s16513_s26 + $0x5f8] sm:$0xff] %v1809_v63  ;;  %v1813_v1 = vld [vmem:[%s16508_s25 + $0x2d68] sm:$0xff]  ;;  %v1815_v2 = vld [vmem:[%s16508_s25 + $0x2d70] sm:$0xff] }
  0x73   : > { %1812 = vst [vmem:[%s16513_s26 + $0x600] sm:$0xff] %v1811_v0  ;;  %1814 = vst [vmem:[%s16513_s26 + $0x608] sm:$0xff] %v1813_v1  ;;  %v1817_v3 = vld [vmem:[%s16508_s25 + $0x2d78] sm:$0xff]  ;;  %v1819_v4 = vld [vmem:[%s16508_s25 + $0x2d80] sm:$0xff] }
  0x74   : > { %1816 = vst [vmem:[%s16513_s26 + $0x610] sm:$0xff] %v1815_v2  ;;  %v1821_v5 = vld [vmem:[%s16508_s25 + $0x2d88] sm:$0xff]  ;;  %1818 = vst [vmem:[%s16513_s26 + $0x618] sm:$0xff] %v1817_v3  ;;  %v1823_v6 = vld [vmem:[%s16508_s25 + $0x2d90] sm:$0xff] }
  0x75   : > { %1820 = vst [vmem:[%s16513_s26 + $0x620] sm:$0xff] %v1819_v4  ;;  %1822 = vst [vmem:[%s16513_s26 + $0x628] sm:$0xff] %v1821_v5  ;;  %v1825_v7 = vld [vmem:[%s16508_s25 + $0x2d98] sm:$0xff]  ;;  %v1827_v8 = vld [vmem:[%s16508_s25 + $0x2da0] sm:$0xff] }
  0x76   : > { %1824 = vst [vmem:[%s16513_s26 + $0x630] sm:$0xff] %v1823_v6  ;;  %1826 = vst [vmem:[%s16513_s26 + $0x638] sm:$0xff] %v1825_v7  ;;  %v1829_v9 = vld [vmem:[%s16508_s25 + $0x2da8] sm:$0xff]  ;;  %v1831_v10 = vld [vmem:[%s16508_s25 + $0x2db0] sm:$0xff] }
  0x77   : > { %1828 = vst [vmem:[%s16513_s26 + $0x640] sm:$0xff] %v1827_v8  ;;  %v1833_v11 = vld [vmem:[%s16508_s25 + $0x2db8] sm:$0xff]  ;;  %1830 = vst [vmem:[%s16513_s26 + $0x648] sm:$0xff] %v1829_v9  ;;  %v1835_v12 = vld [vmem:[%s16508_s25 + $0x2dc0] sm:$0xff] }
  0x78   : > { %1832 = vst [vmem:[%s16513_s26 + $0x650] sm:$0xff] %v1831_v10  ;;  %1834 = vst [vmem:[%s16513_s26 + $0x658] sm:$0xff] %v1833_v11  ;;  %v1837_v13 = vld [vmem:[%s16508_s25 + $0x2dc8] sm:$0xff]  ;;  %v1839_v14 = vld [vmem:[%s16508_s25 + $0x2dd0] sm:$0xff] }
  0x79   : > { %1836 = vst [vmem:[%s16513_s26 + $0x660] sm:$0xff] %v1835_v12  ;;  %1838 = vst [vmem:[%s16513_s26 + $0x668] sm:$0xff] %v1837_v13  ;;  %v1841_v15 = vld [vmem:[%s16508_s25 + $0x2dd8] sm:$0xff]  ;;  %v1843_v16 = vld [vmem:[%s16508_s25 + $0x2de0] sm:$0xff] }
  0x7a   : > { %1840 = vst [vmem:[%s16513_s26 + $0x670] sm:$0xff] %v1839_v14  ;;  %v1845_v17 = vld [vmem:[%s16508_s25 + $0x2de8] sm:$0xff]  ;;  %1842 = vst [vmem:[%s16513_s26 + $0x678] sm:$0xff] %v1841_v15  ;;  %v1847_v18 = vld [vmem:[%s16508_s25 + $0x41a0] sm:$0xff] }
  0x7b   : > { %1844 = vst [vmem:[%s16513_s26 + $0x680] sm:$0xff] %v1843_v16  ;;  %1846 = vst [vmem:[%s16513_s26 + $0x688] sm:$0xff] %v1845_v17  ;;  %v1849_v19 = vld [vmem:[%s16508_s25 + $0x41a8] sm:$0xff]  ;;  %v1851_v20 = vld [vmem:[%s16508_s25 + $0x41b0] sm:$0xff] }
  0x7c   : > { %1848 = vst [vmem:[%s16513_s26 + $0x690] sm:$0xff] %v1847_v18  ;;  %1850 = vst [vmem:[%s16513_s26 + $0x698] sm:$0xff] %v1849_v19  ;;  %v1853_v21 = vld [vmem:[%s16508_s25 + $0x41b8] sm:$0xff]  ;;  %v1855_v22 = vld [vmem:[%s16508_s25 + $0x41c0] sm:$0xff] }
  0x7d   : > { %1852 = vst [vmem:[%s16513_s26 + $0x6a0] sm:$0xff] %v1851_v20  ;;  %v1857_v23 = vld [vmem:[%s16508_s25 + $0x41c8] sm:$0xff]  ;;  %1854 = vst [vmem:[%s16513_s26 + $0x6a8] sm:$0xff] %v1853_v21  ;;  %v1859_v24 = vld [vmem:[%s16508_s25 + $0x41d0] sm:$0xff] }
  0x7e   : > { %1856 = vst [vmem:[%s16513_s26 + $0x6b0] sm:$0xff] %v1855_v22  ;;  %1858 = vst [vmem:[%s16513_s26 + $0x6b8] sm:$0xff] %v1857_v23  ;;  %v1861_v25 = vld [vmem:[%s16508_s25 + $0x41d8] sm:$0xff]  ;;  %v1863_v26 = vld [vmem:[%s16508_s25 + $0x41e0] sm:$0xff] }
  0x7f   : > { %1860 = vst [vmem:[%s16513_s26 + $0x6c0] sm:$0xff] %v1859_v24  ;;  %1862 = vst [vmem:[%s16513_s26 + $0x6c8] sm:$0xff] %v1861_v25  ;;  %v1865_v27 = vld [vmem:[%s16508_s25 + $0x41e8] sm:$0xff]  ;;  %v1867_v28 = vld [vmem:[%s16508_s25 + $0x41f0] sm:$0xff] }
  0x80   : > { %1864 = vst [vmem:[%s16513_s26 + $0x6d0] sm:$0xff] %v1863_v26  ;;  %v1869_v29 = vld [vmem:[%s16508_s25 + $0x41f8] sm:$0xff]  ;;  %1866 = vst [vmem:[%s16513_s26 + $0x6d8] sm:$0xff] %v1865_v27  ;;  %v1871_v30 = vld [vmem:[%s16508_s25 + $0x4200] sm:$0xff] }
  0x81   : > { %1868 = vst [vmem:[%s16513_s26 + $0x6e0] sm:$0xff] %v1867_v28  ;;  %1870 = vst [vmem:[%s16513_s26 + $0x6e8] sm:$0xff] %v1869_v29  ;;  %v1873_v31 = vld [vmem:[%s16508_s25 + $0x4208] sm:$0xff]  ;;  %v1875_v32 = vld [vmem:[%s16508_s25 + $0x4210] sm:$0xff] }
  0x82   : > { %1872 = vst [vmem:[%s16513_s26 + $0x6f0] sm:$0xff] %v1871_v30  ;;  %1874 = vst [vmem:[%s16513_s26 + $0x6f8] sm:$0xff] %v1873_v31  ;;  %v1877_v33 = vld [vmem:[%s16508_s25 + $0x4218] sm:$0xff]  ;;  %v1879_v34 = vld [vmem:[%s16508_s25 + $0x4220] sm:$0xff] }
  0x83   : > { %1876 = vst [vmem:[%s16513_s26 + $0x700] sm:$0xff] %v1875_v32  ;;  %v1881_v35 = vld [vmem:[%s16508_s25 + $0x4228] sm:$0xff]  ;;  %1878 = vst [vmem:[%s16513_s26 + $0x708] sm:$0xff] %v1877_v33  ;;  %v1883_v36 = vld [vmem:[%s16508_s25 + $0x4230] sm:$0xff] }
  0x84   : > { %1880 = vst [vmem:[%s16513_s26 + $0x710] sm:$0xff] %v1879_v34  ;;  %1882 = vst [vmem:[%s16513_s26 + $0x718] sm:$0xff] %v1881_v35  ;;  %v1885_v37 = vld [vmem:[%s16508_s25 + $0x4238] sm:$0xff]  ;;  %v1887_v38 = vld [vmem:[%s16508_s25 + $0x4240] sm:$0xff] }
  0x85   : > { %1884 = vst [vmem:[%s16513_s26 + $0x720] sm:$0xff] %v1883_v36  ;;  %1886 = vst [vmem:[%s16513_s26 + $0x728] sm:$0xff] %v1885_v37  ;;  %v1889_v39 = vld [vmem:[%s16508_s25 + $0x4248] sm:$0xff]  ;;  %v1891_v40 = vld [vmem:[%s16508_s25 + $0x4250] sm:$0xff] }
  0x86   : > { %1888 = vst [vmem:[%s16513_s26 + $0x730] sm:$0xff] %v1887_v38  ;;  %v1893_v41 = vld [vmem:[%s16508_s25 + $0x4258] sm:$0xff]  ;;  %1890 = vst [vmem:[%s16513_s26 + $0x738] sm:$0xff] %v1889_v39  ;;  %v1895_v42 = vld [vmem:[%s16508_s25 + $0x4260] sm:$0xff] }
  0x87   : > { %1892 = vst [vmem:[%s16513_s26 + $0x740] sm:$0xff] %v1891_v40  ;;  %1894 = vst [vmem:[%s16513_s26 + $0x748] sm:$0xff] %v1893_v41  ;;  %v1897_v43 = vld [vmem:[%s16508_s25 + $0x4268] sm:$0xff]  ;;  %v1899_v44 = vld [vmem:[%s16508_s25 + $0x4270] sm:$0xff] }
  0x88   : > { %1896 = vst [vmem:[%s16513_s26 + $0x750] sm:$0xff] %v1895_v42  ;;  %1898 = vst [vmem:[%s16513_s26 + $0x758] sm:$0xff] %v1897_v43  ;;  %v1901_v45 = vld [vmem:[%s16508_s25 + $0x4278] sm:$0xff]  ;;  %v1903_v46 = vld [vmem:[%s16508_s25 + $0x4280] sm:$0xff] }
  0x89   : > { %1900 = vst [vmem:[%s16513_s26 + $0x760] sm:$0xff] %v1899_v44  ;;  %v1905_v47 = vld [vmem:[%s16508_s25 + $0x4288] sm:$0xff]  ;;  %1902 = vst [vmem:[%s16513_s26 + $0x768] sm:$0xff] %v1901_v45  ;;  %v1907_v48 = vld [vmem:[%s16508_s25 + $0x4290] sm:$0xff] }
  0x8a   : > { %1904 = vst [vmem:[%s16513_s26 + $0x770] sm:$0xff] %v1903_v46  ;;  %1906 = vst [vmem:[%s16513_s26 + $0x778] sm:$0xff] %v1905_v47  ;;  %v1909_v49 = vld [vmem:[%s16508_s25 + $0x4298] sm:$0xff]  ;;  %v1911_v50 = vld [vmem:[%s16508_s25 + $0x42a0] sm:$0xff] }
  0x8b   : > { %1908 = vst [vmem:[%s16513_s26 + $0x780] sm:$0xff] %v1907_v48  ;;  %1910 = vst [vmem:[%s16513_s26 + $0x788] sm:$0xff] %v1909_v49  ;;  %v1913_v51 = vld [vmem:[%s16508_s25 + $0x42a8] sm:$0xff]  ;;  %v1915_v52 = vld [vmem:[%s16508_s25 + $0x42b0] sm:$0xff] }
  0x8c   : > { %1912 = vst [vmem:[%s16513_s26 + $0x790] sm:$0xff] %v1911_v50  ;;  %v1917_v53 = vld [vmem:[%s16508_s25 + $0x42b8] sm:$0xff]  ;;  %1914 = vst [vmem:[%s16513_s26 + $0x798] sm:$0xff] %v1913_v51  ;;  %v1919_v54 = vld [vmem:[%s16508_s25 + $0x42c0] sm:$0xff] }
  0x8d   : > { %1916 = vst [vmem:[%s16513_s26 + $0x7a0] sm:$0xff] %v1915_v52  ;;  %1918 = vst [vmem:[%s16513_s26 + $0x7a8] sm:$0xff] %v1917_v53  ;;  %v1921_v55 = vld [vmem:[%s16508_s25 + $0x42c8] sm:$0xff]  ;;  %v1923_v56 = vld [vmem:[%s16508_s25 + $0x42d0] sm:$0xff] }
  0x8e   : > { %1920 = vst [vmem:[%s16513_s26 + $0x7b0] sm:$0xff] %v1919_v54  ;;  %1922 = vst [vmem:[%s16513_s26 + $0x7b8] sm:$0xff] %v1921_v55  ;;  %v1925_v57 = vld [vmem:[%s16508_s25 + $0x42d8] sm:$0xff]  ;;  %v1927_v58 = vld [vmem:[%s16508_s25 + $0x42e0] sm:$0xff] }
  0x8f   : > { %1924 = vst [vmem:[%s16513_s26 + $0x7c0] sm:$0xff] %v1923_v56  ;;  %v1929_v59 = vld [vmem:[%s16508_s25 + $0x42e8] sm:$0xff]  ;;  %1926 = vst [vmem:[%s16513_s26 + $0x7c8] sm:$0xff] %v1925_v57  ;;  %v1931_v60 = vld [vmem:[%s16508_s25 + $0x42f0] sm:$0xff] }
  0x90   : > { %1928 = vst [vmem:[%s16513_s26 + $0x7d0] sm:$0xff] %v1927_v58  ;;  %1930 = vst [vmem:[%s16513_s26 + $0x7d8] sm:$0xff] %v1929_v59  ;;  %v1933_v61 = vld [vmem:[%s16508_s25 + $0x42f8] sm:$0xff]  ;;  %v1935_v62 = vld [vmem:[%s16508_s25 + $0x4300] sm:$0xff] }
  0x91   : > { %1932 = vst [vmem:[%s16513_s26 + $0x7e0] sm:$0xff] %v1931_v60  ;;  %1934 = vst [vmem:[%s16513_s26 + $0x7e8] sm:$0xff] %v1933_v61  ;;  %v1937_v63 = vld [vmem:[%s16508_s25 + $0x4308] sm:$0xff]  ;;  %v1939_v0 = vld [vmem:[%s16508_s25 + $0x4310] sm:$0xff] }
  0x92   : > { %1936 = vst [vmem:[%s16513_s26 + $0x7f0] sm:$0xff] %v1935_v62  ;;  %v1941_v1 = vld [vmem:[%s16508_s25 + $0x4318] sm:$0xff]  ;;  %1938 = vst [vmem:[%s16513_s26 + $0x7f8] sm:$0xff] %v1937_v63  ;;  %v1943_v2 = vld [vmem:[%s16508_s25 + $0x4320] sm:$0xff] }
  0x93   : > { %1940 = vst [vmem:[%s16513_s26 + $0x800] sm:$0xff] %v1939_v0  ;;  %1942 = vst [vmem:[%s16513_s26 + $0x808] sm:$0xff] %v1941_v1  ;;  %v1945_v3 = vld [vmem:[%s16508_s25 + $0x4328] sm:$0xff]  ;;  %v1947_v4 = vld [vmem:[%s16508_s25 + $0x4330] sm:$0xff] }
  0x94   : > { %1944 = vst [vmem:[%s16513_s26 + $0x810] sm:$0xff] %v1943_v2  ;;  %1946 = vst [vmem:[%s16513_s26 + $0x818] sm:$0xff] %v1945_v3  ;;  %v1949_v5 = vld [vmem:[%s16508_s25 + $0x4338] sm:$0xff]  ;;  %v1951_v6 = vld [vmem:[%s16508_s25 + $0x4340] sm:$0xff] }
  0x95   : > { %1948 = vst [vmem:[%s16513_s26 + $0x820] sm:$0xff] %v1947_v4  ;;  %v1953_v7 = vld [vmem:[%s16508_s25 + $0x4348] sm:$0xff]  ;;  %1950 = vst [vmem:[%s16513_s26 + $0x828] sm:$0xff] %v1949_v5  ;;  %v1955_v8 = vld [vmem:[%s16508_s25 + $0x4350] sm:$0xff] }
  0x96   : > { %1952 = vst [vmem:[%s16513_s26 + $0x830] sm:$0xff] %v1951_v6  ;;  %1954 = vst [vmem:[%s16513_s26 + $0x838] sm:$0xff] %v1953_v7  ;;  %v1957_v9 = vld [vmem:[%s16508_s25 + $0x4358] sm:$0xff]  ;;  %v1959_v10 = vld [vmem:[%s16508_s25 + $0x4360] sm:$0xff] }
  0x97   : > { %1956 = vst [vmem:[%s16513_s26 + $0x840] sm:$0xff] %v1955_v8  ;;  %1958 = vst [vmem:[%s16513_s26 + $0x848] sm:$0xff] %v1957_v9  ;;  %v1961_v11 = vld [vmem:[%s16508_s25 + $0x4368] sm:$0xff]  ;;  %v1963_v12 = vld [vmem:[%s16508_s25 + $0x4370] sm:$0xff] }
  0x98   : > { %1960 = vst [vmem:[%s16513_s26 + $0x850] sm:$0xff] %v1959_v10  ;;  %v1965_v13 = vld [vmem:[%s16508_s25 + $0x4378] sm:$0xff]  ;;  %1962 = vst [vmem:[%s16513_s26 + $0x858] sm:$0xff] %v1961_v11  ;;  %v1967_v14 = vld [vmem:[%s16508_s25 + $0x4380] sm:$0xff] }
  0x99   : > { %1964 = vst [vmem:[%s16513_s26 + $0x860] sm:$0xff] %v1963_v12  ;;  %1966 = vst [vmem:[%s16513_s26 + $0x868] sm:$0xff] %v1965_v13  ;;  %v1969_v15 = vld [vmem:[%s16508_s25 + $0x4388] sm:$0xff]  ;;  %v1971_v16 = vld [vmem:[%s16508_s25 + $0x4390] sm:$0xff] }
  0x9a   : > { %1968 = vst [vmem:[%s16513_s26 + $0x870] sm:$0xff] %v1967_v14  ;;  %1970 = vst [vmem:[%s16513_s26 + $0x878] sm:$0xff] %v1969_v15  ;;  %v1973_v17 = vld [vmem:[%s16508_s25 + $0x4398] sm:$0xff]  ;;  %v1975_v18 = vld [vmem:[%s16508_s25 + $0x43a0] sm:$0xff] }
  0x9b   : > { %1972 = vst [vmem:[%s16513_s26 + $0x880] sm:$0xff] %v1971_v16  ;;  %v1977_v19 = vld [vmem:[%s16508_s25 + $0x43a8] sm:$0xff]  ;;  %1974 = vst [vmem:[%s16513_s26 + $0x888] sm:$0xff] %v1973_v17  ;;  %v1979_v20 = vld [vmem:[%s16508_s25 + $0x43b0] sm:$0xff] }
  0x9c   : > { %1976 = vst [vmem:[%s16513_s26 + $0x890] sm:$0xff] %v1975_v18  ;;  %1978 = vst [vmem:[%s16513_s26 + $0x898] sm:$0xff] %v1977_v19  ;;  %v1981_v21 = vld [vmem:[%s16508_s25 + $0x43b8] sm:$0xff]  ;;  %v1983_v22 = vld [vmem:[%s16508_s25 + $0x43c0] sm:$0xff] }
  0x9d   : > { %1980 = vst [vmem:[%s16513_s26 + $0x8a0] sm:$0xff] %v1979_v20  ;;  %1982 = vst [vmem:[%s16513_s26 + $0x8a8] sm:$0xff] %v1981_v21  ;;  %v1985_v23 = vld [vmem:[%s16508_s25 + $0x43c8] sm:$0xff]  ;;  %v1987_v24 = vld [vmem:[%s16508_s25 + $0x5780] sm:$0xff] }
  0x9e   : > { %1984 = vst [vmem:[%s16513_s26 + $0x8b0] sm:$0xff] %v1983_v22  ;;  %v1989_v25 = vld [vmem:[%s16508_s25 + $0x5788] sm:$0xff]  ;;  %1986 = vst [vmem:[%s16513_s26 + $0x8b8] sm:$0xff] %v1985_v23  ;;  %v1991_v26 = vld [vmem:[%s16508_s25 + $0x5790] sm:$0xff] }
  0x9f   : > { %1988 = vst [vmem:[%s16513_s26 + $0x8c0] sm:$0xff] %v1987_v24  ;;  %1990 = vst [vmem:[%s16513_s26 + $0x8c8] sm:$0xff] %v1989_v25  ;;  %v1993_v27 = vld [vmem:[%s16508_s25 + $0x5798] sm:$0xff]  ;;  %v1995_v28 = vld [vmem:[%s16508_s25 + $0x57a0] sm:$0xff] }
  0xa0   : > { %1992 = vst [vmem:[%s16513_s26 + $0x8d0] sm:$0xff] %v1991_v26  ;;  %1994 = vst [vmem:[%s16513_s26 + $0x8d8] sm:$0xff] %v1993_v27  ;;  %v1997_v29 = vld [vmem:[%s16508_s25 + $0x57a8] sm:$0xff]  ;;  %v1999_v30 = vld [vmem:[%s16508_s25 + $0x57b0] sm:$0xff] }
  0xa1   : > { %1996 = vst [vmem:[%s16513_s26 + $0x8e0] sm:$0xff] %v1995_v28  ;;  %v2001_v31 = vld [vmem:[%s16508_s25 + $0x57b8] sm:$0xff]  ;;  %1998 = vst [vmem:[%s16513_s26 + $0x8e8] sm:$0xff] %v1997_v29  ;;  %v2003_v32 = vld [vmem:[%s16508_s25 + $0x57c0] sm:$0xff] }
  0xa2   : > { %2000 = vst [vmem:[%s16513_s26 + $0x8f0] sm:$0xff] %v1999_v30  ;;  %2002 = vst [vmem:[%s16513_s26 + $0x8f8] sm:$0xff] %v2001_v31  ;;  %v2005_v33 = vld [vmem:[%s16508_s25 + $0x57c8] sm:$0xff]  ;;  %v2007_v34 = vld [vmem:[%s16508_s25 + $0x57d0] sm:$0xff] }
  0xa3   : > { %2004 = vst [vmem:[%s16513_s26 + $0x900] sm:$0xff] %v2003_v32  ;;  %2006 = vst [vmem:[%s16513_s26 + $0x908] sm:$0xff] %v2005_v33  ;;  %v2009_v35 = vld [vmem:[%s16508_s25 + $0x57d8] sm:$0xff]  ;;  %v2011_v36 = vld [vmem:[%s16508_s25 + $0x57e0] sm:$0xff] }
  0xa4   : > { %2008 = vst [vmem:[%s16513_s26 + $0x910] sm:$0xff] %v2007_v34  ;;  %v2013_v37 = vld [vmem:[%s16508_s25 + $0x57e8] sm:$0xff]  ;;  %2010 = vst [vmem:[%s16513_s26 + $0x918] sm:$0xff] %v2009_v35  ;;  %v2015_v38 = vld [vmem:[%s16508_s25 + $0x57f0] sm:$0xff] }
  0xa5   : > { %2012 = vst [vmem:[%s16513_s26 + $0x920] sm:$0xff] %v2011_v36  ;;  %2014 = vst [vmem:[%s16513_s26 + $0x928] sm:$0xff] %v2013_v37  ;;  %v2017_v39 = vld [vmem:[%s16508_s25 + $0x57f8] sm:$0xff]  ;;  %v2019_v40 = vld [vmem:[%s16508_s25 + $0x5800] sm:$0xff] }
  0xa6   : > { %2016 = vst [vmem:[%s16513_s26 + $0x930] sm:$0xff] %v2015_v38  ;;  %2018 = vst [vmem:[%s16513_s26 + $0x938] sm:$0xff] %v2017_v39  ;;  %v2021_v41 = vld [vmem:[%s16508_s25 + $0x5808] sm:$0xff]  ;;  %v2023_v42 = vld [vmem:[%s16508_s25 + $0x5810] sm:$0xff] }
  0xa7   : > { %2020 = vst [vmem:[%s16513_s26 + $0x940] sm:$0xff] %v2019_v40  ;;  %v2025_v43 = vld [vmem:[%s16508_s25 + $0x5818] sm:$0xff]  ;;  %2022 = vst [vmem:[%s16513_s26 + $0x948] sm:$0xff] %v2021_v41  ;;  %v2027_v44 = vld [vmem:[%s16508_s25 + $0x5820] sm:$0xff] }
  0xa8   : > { %2024 = vst [vmem:[%s16513_s26 + $0x950] sm:$0xff] %v2023_v42  ;;  %2026 = vst [vmem:[%s16513_s26 + $0x958] sm:$0xff] %v2025_v43  ;;  %v2029_v45 = vld [vmem:[%s16508_s25 + $0x5828] sm:$0xff]  ;;  %v2031_v46 = vld [vmem:[%s16508_s25 + $0x5830] sm:$0xff] }
  0xa9   : > { %2028 = vst [vmem:[%s16513_s26 + $0x960] sm:$0xff] %v2027_v44  ;;  %2030 = vst [vmem:[%s16513_s26 + $0x968] sm:$0xff] %v2029_v45  ;;  %v2033_v47 = vld [vmem:[%s16508_s25 + $0x5838] sm:$0xff]  ;;  %v2035_v48 = vld [vmem:[%s16508_s25 + $0x5840] sm:$0xff] }
  0xaa   : > { %2032 = vst [vmem:[%s16513_s26 + $0x970] sm:$0xff] %v2031_v46  ;;  %v2037_v49 = vld [vmem:[%s16508_s25 + $0x5848] sm:$0xff]  ;;  %2034 = vst [vmem:[%s16513_s26 + $0x978] sm:$0xff] %v2033_v47  ;;  %v2039_v50 = vld [vmem:[%s16508_s25 + $0x5850] sm:$0xff] }
  0xab   : > { %2036 = vst [vmem:[%s16513_s26 + $0x980] sm:$0xff] %v2035_v48  ;;  %2038 = vst [vmem:[%s16513_s26 + $0x988] sm:$0xff] %v2037_v49  ;;  %v2041_v51 = vld [vmem:[%s16508_s25 + $0x5858] sm:$0xff]  ;;  %v2043_v52 = vld [vmem:[%s16508_s25 + $0x5860] sm:$0xff] }
  0xac   : > { %2040 = vst [vmem:[%s16513_s26 + $0x990] sm:$0xff] %v2039_v50  ;;  %2042 = vst [vmem:[%s16513_s26 + $0x998] sm:$0xff] %v2041_v51  ;;  %v2045_v53 = vld [vmem:[%s16508_s25 + $0x5868] sm:$0xff]  ;;  %v2047_v54 = vld [vmem:[%s16508_s25 + $0x5870] sm:$0xff] }
  0xad   : > { %2044 = vst [vmem:[%s16513_s26 + $0x9a0] sm:$0xff] %v2043_v52  ;;  %v2049_v55 = vld [vmem:[%s16508_s25 + $0x5878] sm:$0xff]  ;;  %2046 = vst [vmem:[%s16513_s26 + $0x9a8] sm:$0xff] %v2045_v53  ;;  %v2051_v56 = vld [vmem:[%s16508_s25 + $0x5880] sm:$0xff] }
  0xae   : > { %2048 = vst [vmem:[%s16513_s26 + $0x9b0] sm:$0xff] %v2047_v54  ;;  %2050 = vst [vmem:[%s16513_s26 + $0x9b8] sm:$0xff] %v2049_v55  ;;  %v2053_v57 = vld [vmem:[%s16508_s25 + $0x5888] sm:$0xff]  ;;  %v2055_v58 = vld [vmem:[%s16508_s25 + $0x5890] sm:$0xff] }
  0xaf   : > { %2052 = vst [vmem:[%s16513_s26 + $0x9c0] sm:$0xff] %v2051_v56  ;;  %2054 = vst [vmem:[%s16513_s26 + $0x9c8] sm:$0xff] %v2053_v57  ;;  %v2057_v59 = vld [vmem:[%s16508_s25 + $0x5898] sm:$0xff]  ;;  %v2059_v60 = vld [vmem:[%s16508_s25 + $0x58a0] sm:$0xff] }
  0xb0   : > { %2056 = vst [vmem:[%s16513_s26 + $0x9d0] sm:$0xff] %v2055_v58  ;;  %v2061_v61 = vld [vmem:[%s16508_s25 + $0x58a8] sm:$0xff]  ;;  %2058 = vst [vmem:[%s16513_s26 + $0x9d8] sm:$0xff] %v2057_v59  ;;  %v2063_v62 = vld [vmem:[%s16508_s25 + $0x58b0] sm:$0xff] }
  0xb1   : > { %2060 = vst [vmem:[%s16513_s26 + $0x9e0] sm:$0xff] %v2059_v60  ;;  %2062 = vst [vmem:[%s16513_s26 + $0x9e8] sm:$0xff] %v2061_v61  ;;  %v2065_v63 = vld [vmem:[%s16508_s25 + $0x58b8] sm:$0xff]  ;;  %v2067_v0 = vld [vmem:[%s16508_s25 + $0x58c0] sm:$0xff] }
  0xb2   : > { %2064 = vst [vmem:[%s16513_s26 + $0x9f0] sm:$0xff] %v2063_v62  ;;  %2066 = vst [vmem:[%s16513_s26 + $0x9f8] sm:$0xff] %v2065_v63  ;;  %v2069_v1 = vld [vmem:[%s16508_s25 + $0x58c8] sm:$0xff]  ;;  %v2071_v2 = vld [vmem:[%s16508_s25 + $0x58d0] sm:$0xff] }
  0xb3   : > { %2068 = vst [vmem:[%s16513_s26 + $0xa00] sm:$0xff] %v2067_v0  ;;  %v2073_v3 = vld [vmem:[%s16508_s25 + $0x58d8] sm:$0xff]  ;;  %2070 = vst [vmem:[%s16513_s26 + $0xa08] sm:$0xff] %v2069_v1  ;;  %v2075_v4 = vld [vmem:[%s16508_s25 + $0x58e0] sm:$0xff] }
  0xb4   : > { %2072 = vst [vmem:[%s16513_s26 + $0xa10] sm:$0xff] %v2071_v2  ;;  %2074 = vst [vmem:[%s16513_s26 + $0xa18] sm:$0xff] %v2073_v3  ;;  %v2077_v5 = vld [vmem:[%s16508_s25 + $0x58e8] sm:$0xff]  ;;  %v2079_v6 = vld [vmem:[%s16508_s25 + $0x58f0] sm:$0xff] }
  0xb5   : > { %2076 = vst [vmem:[%s16513_s26 + $0xa20] sm:$0xff] %v2075_v4  ;;  %2078 = vst [vmem:[%s16513_s26 + $0xa28] sm:$0xff] %v2077_v5  ;;  %v2081_v7 = vld [vmem:[%s16508_s25 + $0x58f8] sm:$0xff]  ;;  %v2083_v8 = vld [vmem:[%s16508_s25 + $0x5900] sm:$0xff] }
  0xb6   : > { %2080 = vst [vmem:[%s16513_s26 + $0xa30] sm:$0xff] %v2079_v6  ;;  %v2085_v9 = vld [vmem:[%s16508_s25 + $0x5908] sm:$0xff]  ;;  %2082 = vst [vmem:[%s16513_s26 + $0xa38] sm:$0xff] %v2081_v7  ;;  %v2087_v10 = vld [vmem:[%s16508_s25 + $0x5910] sm:$0xff] }
  0xb7   : > { %2084 = vst [vmem:[%s16513_s26 + $0xa40] sm:$0xff] %v2083_v8  ;;  %2086 = vst [vmem:[%s16513_s26 + $0xa48] sm:$0xff] %v2085_v9  ;;  %v2089_v11 = vld [vmem:[%s16508_s25 + $0x5918] sm:$0xff]  ;;  %v2091_v12 = vld [vmem:[%s16508_s25 + $0x5920] sm:$0xff] }
  0xb8   : > { %2088 = vst [vmem:[%s16513_s26 + $0xa50] sm:$0xff] %v2087_v10  ;;  %2090 = vst [vmem:[%s16513_s26 + $0xa58] sm:$0xff] %v2089_v11  ;;  %v2093_v13 = vld [vmem:[%s16508_s25 + $0x5928] sm:$0xff]  ;;  %v2095_v14 = vld [vmem:[%s16508_s25 + $0x5930] sm:$0xff] }
  0xb9   : > { %2092 = vst [vmem:[%s16513_s26 + $0xa60] sm:$0xff] %v2091_v12  ;;  %v2097_v15 = vld [vmem:[%s16508_s25 + $0x5938] sm:$0xff]  ;;  %2094 = vst [vmem:[%s16513_s26 + $0xa68] sm:$0xff] %v2093_v13  ;;  %v2099_v16 = vld [vmem:[%s16508_s25 + $0x5940] sm:$0xff] }
  0xba   : > { %2096 = vst [vmem:[%s16513_s26 + $0xa70] sm:$0xff] %v2095_v14  ;;  %2098 = vst [vmem:[%s16513_s26 + $0xa78] sm:$0xff] %v2097_v15  ;;  %v2101_v17 = vld [vmem:[%s16508_s25 + $0x5948] sm:$0xff]  ;;  %v2103_v18 = vld [vmem:[%s16508_s25 + $0x5950] sm:$0xff] }
  0xbb   : > { %2100 = vst [vmem:[%s16513_s26 + $0xa80] sm:$0xff] %v2099_v16  ;;  %2102 = vst [vmem:[%s16513_s26 + $0xa88] sm:$0xff] %v2101_v17  ;;  %v2105_v19 = vld [vmem:[%s16508_s25 + $0x5958] sm:$0xff]  ;;  %v2107_v20 = vld [vmem:[%s16508_s25 + $0x5960] sm:$0xff] }
  0xbc   : > { %2104 = vst [vmem:[%s16513_s26 + $0xa90] sm:$0xff] %v2103_v18  ;;  %v2109_v21 = vld [vmem:[%s16508_s25 + $0x5968] sm:$0xff]  ;;  %2106 = vst [vmem:[%s16513_s26 + $0xa98] sm:$0xff] %v2105_v19  ;;  %v2111_v22 = vld [vmem:[%s16508_s25 + $0x5970] sm:$0xff] }
  0xbd   : > { %2108 = vst [vmem:[%s16513_s26 + $0xaa0] sm:$0xff] %v2107_v20  ;;  %2110 = vst [vmem:[%s16513_s26 + $0xaa8] sm:$0xff] %v2109_v21  ;;  %v2113_v23 = vld [vmem:[%s16508_s25 + $0x5978] sm:$0xff]  ;;  %v2115_v24 = vld [vmem:[%s16508_s25 + $0x5980] sm:$0xff] }
  0xbe   : > { %2112 = vst [vmem:[%s16513_s26 + $0xab0] sm:$0xff] %v2111_v22  ;;  %2114 = vst [vmem:[%s16513_s26 + $0xab8] sm:$0xff] %v2113_v23  ;;  %v2117_v25 = vld [vmem:[%s16508_s25 + $0x5988] sm:$0xff]  ;;  %v2119_v26 = vld [vmem:[%s16508_s25 + $0x5990] sm:$0xff] }
  0xbf   : > { %2116 = vst [vmem:[%s16513_s26 + $0xac0] sm:$0xff] %v2115_v24  ;;  %v2121_v27 = vld [vmem:[%s16508_s25 + $0x5998] sm:$0xff]  ;;  %2118 = vst [vmem:[%s16513_s26 + $0xac8] sm:$0xff] %v2117_v25  ;;  %v2123_v28 = vld [vmem:[%s16508_s25 + $0x59a0] sm:$0xff] }
  0xc0   : > { %2120 = vst [vmem:[%s16513_s26 + $0xad0] sm:$0xff] %v2119_v26  ;;  %2122 = vst [vmem:[%s16513_s26 + $0xad8] sm:$0xff] %v2121_v27  ;;  %v2125_v29 = vld [vmem:[%s16508_s25 + $0x59a8] sm:$0xff]  ;;  %v2127_v30 = vld [vmem:[%s16508_s25 + $0x6d60] sm:$0xff] }
  0xc1   : > { %2124 = vst [vmem:[%s16513_s26 + $0xae0] sm:$0xff] %v2123_v28  ;;  %2126 = vst [vmem:[%s16513_s26 + $0xae8] sm:$0xff] %v2125_v29  ;;  %v2129_v31 = vld [vmem:[%s16508_s25 + $0x6d68] sm:$0xff]  ;;  %v2131_v32 = vld [vmem:[%s16508_s25 + $0x6d70] sm:$0xff] }
  0xc2   : > { %2128 = vst [vmem:[%s16513_s26 + $0xaf0] sm:$0xff] %v2127_v30  ;;  %v2133_v33 = vld [vmem:[%s16508_s25 + $0x6d78] sm:$0xff]  ;;  %2130 = vst [vmem:[%s16513_s26 + $0xaf8] sm:$0xff] %v2129_v31  ;;  %v2135_v34 = vld [vmem:[%s16508_s25 + $0x6d80] sm:$0xff] }
  0xc3   : > { %2132 = vst [vmem:[%s16513_s26 + $0xb00] sm:$0xff] %v2131_v32  ;;  %2134 = vst [vmem:[%s16513_s26 + $0xb08] sm:$0xff] %v2133_v33  ;;  %v2137_v35 = vld [vmem:[%s16508_s25 + $0x6d88] sm:$0xff]  ;;  %v2139_v36 = vld [vmem:[%s16508_s25 + $0x6d90] sm:$0xff] }
  0xc4   : > { %2136 = vst [vmem:[%s16513_s26 + $0xb10] sm:$0xff] %v2135_v34  ;;  %2138 = vst [vmem:[%s16513_s26 + $0xb18] sm:$0xff] %v2137_v35  ;;  %v2141_v37 = vld [vmem:[%s16508_s25 + $0x6d98] sm:$0xff]  ;;  %v2143_v38 = vld [vmem:[%s16508_s25 + $0x6da0] sm:$0xff] }
  0xc5   : > { %2140 = vst [vmem:[%s16513_s26 + $0xb20] sm:$0xff] %v2139_v36  ;;  %v2145_v39 = vld [vmem:[%s16508_s25 + $0x6da8] sm:$0xff]  ;;  %2142 = vst [vmem:[%s16513_s26 + $0xb28] sm:$0xff] %v2141_v37  ;;  %v2147_v40 = vld [vmem:[%s16508_s25 + $0x6db0] sm:$0xff] }
  0xc6   : > { %2144 = vst [vmem:[%s16513_s26 + $0xb30] sm:$0xff] %v2143_v38  ;;  %2146 = vst [vmem:[%s16513_s26 + $0xb38] sm:$0xff] %v2145_v39  ;;  %v2149_v41 = vld [vmem:[%s16508_s25 + $0x6db8] sm:$0xff]  ;;  %v2151_v42 = vld [vmem:[%s16508_s25 + $0x6dc0] sm:$0xff] }
  0xc7   : > { %2148 = vst [vmem:[%s16513_s26 + $0xb40] sm:$0xff] %v2147_v40  ;;  %2150 = vst [vmem:[%s16513_s26 + $0xb48] sm:$0xff] %v2149_v41  ;;  %v2153_v43 = vld [vmem:[%s16508_s25 + $0x6dc8] sm:$0xff]  ;;  %v2155_v44 = vld [vmem:[%s16508_s25 + $0x6dd0] sm:$0xff] }
  0xc8   : > { %2152 = vst [vmem:[%s16513_s26 + $0xb50] sm:$0xff] %v2151_v42  ;;  %v2157_v45 = vld [vmem:[%s16508_s25 + $0x6dd8] sm:$0xff]  ;;  %2154 = vst [vmem:[%s16513_s26 + $0xb58] sm:$0xff] %v2153_v43  ;;  %v2159_v46 = vld [vmem:[%s16508_s25 + $0x6de0] sm:$0xff] }
  0xc9   : > { %2156 = vst [vmem:[%s16513_s26 + $0xb60] sm:$0xff] %v2155_v44  ;;  %2158 = vst [vmem:[%s16513_s26 + $0xb68] sm:$0xff] %v2157_v45  ;;  %v2161_v47 = vld [vmem:[%s16508_s25 + $0x6de8] sm:$0xff]  ;;  %v2163_v48 = vld [vmem:[%s16508_s25 + $0x6df0] sm:$0xff] }
  0xca   : > { %2160 = vst [vmem:[%s16513_s26 + $0xb70] sm:$0xff] %v2159_v46  ;;  %2162 = vst [vmem:[%s16513_s26 + $0xb78] sm:$0xff] %v2161_v47  ;;  %v2165_v49 = vld [vmem:[%s16508_s25 + $0x6df8] sm:$0xff]  ;;  %v2167_v50 = vld [vmem:[%s16508_s25 + $0x6e00] sm:$0xff] }
  0xcb   : > { %2164 = vst [vmem:[%s16513_s26 + $0xb80] sm:$0xff] %v2163_v48  ;;  %v2169_v51 = vld [vmem:[%s16508_s25 + $0x6e08] sm:$0xff]  ;;  %2166 = vst [vmem:[%s16513_s26 + $0xb88] sm:$0xff] %v2165_v49  ;;  %v2171_v52 = vld [vmem:[%s16508_s25 + $0x6e10] sm:$0xff] }
  0xcc   : > { %2168 = vst [vmem:[%s16513_s26 + $0xb90] sm:$0xff] %v2167_v50  ;;  %2170 = vst [vmem:[%s16513_s26 + $0xb98] sm:$0xff] %v2169_v51  ;;  %v2173_v53 = vld [vmem:[%s16508_s25 + $0x6e18] sm:$0xff]  ;;  %v2175_v54 = vld [vmem:[%s16508_s25 + $0x6e20] sm:$0xff] }
  0xcd   : > { %2172 = vst [vmem:[%s16513_s26 + $0xba0] sm:$0xff] %v2171_v52  ;;  %2174 = vst [vmem:[%s16513_s26 + $0xba8] sm:$0xff] %v2173_v53  ;;  %v2177_v55 = vld [vmem:[%s16508_s25 + $0x6e28] sm:$0xff]  ;;  %v2179_v56 = vld [vmem:[%s16508_s25 + $0x6e30] sm:$0xff] }
  0xce   : > { %2176 = vst [vmem:[%s16513_s26 + $0xbb0] sm:$0xff] %v2175_v54  ;;  %v2181_v57 = vld [vmem:[%s16508_s25 + $0x6e38] sm:$0xff]  ;;  %2178 = vst [vmem:[%s16513_s26 + $0xbb8] sm:$0xff] %v2177_v55  ;;  %v2183_v58 = vld [vmem:[%s16508_s25 + $0x6e40] sm:$0xff] }
  0xcf   : > { %2180 = vst [vmem:[%s16513_s26 + $0xbc0] sm:$0xff] %v2179_v56  ;;  %2182 = vst [vmem:[%s16513_s26 + $0xbc8] sm:$0xff] %v2181_v57  ;;  %v2185_v59 = vld [vmem:[%s16508_s25 + $0x6e48] sm:$0xff]  ;;  %v2187_v60 = vld [vmem:[%s16508_s25 + $0x6e50] sm:$0xff] }
  0xd0   : > { %2184 = vst [vmem:[%s16513_s26 + $0xbd0] sm:$0xff] %v2183_v58  ;;  %2186 = vst [vmem:[%s16513_s26 + $0xbd8] sm:$0xff] %v2185_v59  ;;  %v2189_v61 = vld [vmem:[%s16508_s25 + $0x6e58] sm:$0xff]  ;;  %v2191_v62 = vld [vmem:[%s16508_s25 + $0x6e60] sm:$0xff] }
  0xd1   : > { %2188 = vst [vmem:[%s16513_s26 + $0xbe0] sm:$0xff] %v2187_v60  ;;  %v2193_v63 = vld [vmem:[%s16508_s25 + $0x6e68] sm:$0xff]  ;;  %2190 = vst [vmem:[%s16513_s26 + $0xbe8] sm:$0xff] %v2189_v61  ;;  %v2195_v0 = vld [vmem:[%s16508_s25 + $0x6e70] sm:$0xff] }
  0xd2   : > { %2192 = vst [vmem:[%s16513_s26 + $0xbf0] sm:$0xff] %v2191_v62  ;;  %2194 = vst [vmem:[%s16513_s26 + $0xbf8] sm:$0xff] %v2193_v63  ;;  %v2197_v1 = vld [vmem:[%s16508_s25 + $0x6e78] sm:$0xff]  ;;  %v2199_v2 = vld [vmem:[%s16508_s25 + $0x6e80] sm:$0xff] }
  0xd3   : > { %2196 = vst [vmem:[%s16513_s26 + $0xc00] sm:$0xff] %v2195_v0  ;;  %2198 = vst [vmem:[%s16513_s26 + $0xc08] sm:$0xff] %v2197_v1  ;;  %v2201_v3 = vld [vmem:[%s16508_s25 + $0x6e88] sm:$0xff]  ;;  %v2203_v4 = vld [vmem:[%s16508_s25 + $0x6e90] sm:$0xff] }
  0xd4   : > { %2200 = vst [vmem:[%s16513_s26 + $0xc10] sm:$0xff] %v2199_v2  ;;  %v2205_v5 = vld [vmem:[%s16508_s25 + $0x6e98] sm:$0xff]  ;;  %2202 = vst [vmem:[%s16513_s26 + $0xc18] sm:$0xff] %v2201_v3  ;;  %v2207_v6 = vld [vmem:[%s16508_s25 + $0x6ea0] sm:$0xff] }
  0xd5   : > { %2204 = vst [vmem:[%s16513_s26 + $0xc20] sm:$0xff] %v2203_v4  ;;  %2206 = vst [vmem:[%s16513_s26 + $0xc28] sm:$0xff] %v2205_v5  ;;  %v2209_v7 = vld [vmem:[%s16508_s25 + $0x6ea8] sm:$0xff]  ;;  %v2211_v8 = vld [vmem:[%s16508_s25 + $0x6eb0] sm:$0xff] }
  0xd6   : > { %2208 = vst [vmem:[%s16513_s26 + $0xc30] sm:$0xff] %v2207_v6  ;;  %2210 = vst [vmem:[%s16513_s26 + $0xc38] sm:$0xff] %v2209_v7  ;;  %v2213_v9 = vld [vmem:[%s16508_s25 + $0x6eb8] sm:$0xff]  ;;  %v2215_v10 = vld [vmem:[%s16508_s25 + $0x6ec0] sm:$0xff] }
  0xd7   : > { %2212 = vst [vmem:[%s16513_s26 + $0xc40] sm:$0xff] %v2211_v8  ;;  %v2217_v11 = vld [vmem:[%s16508_s25 + $0x6ec8] sm:$0xff]  ;;  %2214 = vst [vmem:[%s16513_s26 + $0xc48] sm:$0xff] %v2213_v9  ;;  %v2219_v12 = vld [vmem:[%s16508_s25 + $0x6ed0] sm:$0xff] }
  0xd8   : > { %2216 = vst [vmem:[%s16513_s26 + $0xc50] sm:$0xff] %v2215_v10  ;;  %2218 = vst [vmem:[%s16513_s26 + $0xc58] sm:$0xff] %v2217_v11  ;;  %v2221_v13 = vld [vmem:[%s16508_s25 + $0x6ed8] sm:$0xff]  ;;  %v2223_v14 = vld [vmem:[%s16508_s25 + $0x6ee0] sm:$0xff] }
  0xd9   : > { %2220 = vst [vmem:[%s16513_s26 + $0xc60] sm:$0xff] %v2219_v12  ;;  %2222 = vst [vmem:[%s16513_s26 + $0xc68] sm:$0xff] %v2221_v13  ;;  %v2225_v15 = vld [vmem:[%s16508_s25 + $0x6ee8] sm:$0xff]  ;;  %v2227_v16 = vld [vmem:[%s16508_s25 + $0x6ef0] sm:$0xff] }
  0xda   : > { %2224 = vst [vmem:[%s16513_s26 + $0xc70] sm:$0xff] %v2223_v14  ;;  %v2229_v17 = vld [vmem:[%s16508_s25 + $0x6ef8] sm:$0xff]  ;;  %2226 = vst [vmem:[%s16513_s26 + $0xc78] sm:$0xff] %v2225_v15  ;;  %v2231_v18 = vld [vmem:[%s16508_s25 + $0x6f00] sm:$0xff] }
  0xdb   : > { %2228 = vst [vmem:[%s16513_s26 + $0xc80] sm:$0xff] %v2227_v16  ;;  %2230 = vst [vmem:[%s16513_s26 + $0xc88] sm:$0xff] %v2229_v17  ;;  %v2233_v19 = vld [vmem:[%s16508_s25 + $0x6f08] sm:$0xff]  ;;  %v2235_v20 = vld [vmem:[%s16508_s25 + $0x6f10] sm:$0xff] }
  0xdc   : > { %2232 = vst [vmem:[%s16513_s26 + $0xc90] sm:$0xff] %v2231_v18  ;;  %2234 = vst [vmem:[%s16513_s26 + $0xc98] sm:$0xff] %v2233_v19  ;;  %v2237_v21 = vld [vmem:[%s16508_s25 + $0x6f18] sm:$0xff]  ;;  %v2239_v22 = vld [vmem:[%s16508_s25 + $0x6f20] sm:$0xff] }
  0xdd   : > { %2236 = vst [vmem:[%s16513_s26 + $0xca0] sm:$0xff] %v2235_v20  ;;  %v2241_v23 = vld [vmem:[%s16508_s25 + $0x6f28] sm:$0xff]  ;;  %2238 = vst [vmem:[%s16513_s26 + $0xca8] sm:$0xff] %v2237_v21  ;;  %v2243_v24 = vld [vmem:[%s16508_s25 + $0x6f30] sm:$0xff] }
  0xde   : > { %2240 = vst [vmem:[%s16513_s26 + $0xcb0] sm:$0xff] %v2239_v22  ;;  %2242 = vst [vmem:[%s16513_s26 + $0xcb8] sm:$0xff] %v2241_v23  ;;  %v2245_v25 = vld [vmem:[%s16508_s25 + $0x6f38] sm:$0xff]  ;;  %v2247_v26 = vld [vmem:[%s16508_s25 + $0x6f40] sm:$0xff] }
  0xdf   : > { %2244 = vst [vmem:[%s16513_s26 + $0xcc0] sm:$0xff] %v2243_v24  ;;  %2246 = vst [vmem:[%s16513_s26 + $0xcc8] sm:$0xff] %v2245_v25  ;;  %v2249_v27 = vld [vmem:[%s16508_s25 + $0x6f48] sm:$0xff]  ;;  %v2251_v28 = vld [vmem:[%s16508_s25 + $0x6f50] sm:$0xff] }
  0xe0   : > { %2248 = vst [vmem:[%s16513_s26 + $0xcd0] sm:$0xff] %v2247_v26  ;;  %v2253_v29 = vld [vmem:[%s16508_s25 + $0x6f58] sm:$0xff]  ;;  %2250 = vst [vmem:[%s16513_s26 + $0xcd8] sm:$0xff] %v2249_v27  ;;  %v2255_v30 = vld [vmem:[%s16508_s25 + $0x6f60] sm:$0xff] }
  0xe1   : > { %2252 = vst [vmem:[%s16513_s26 + $0xce0] sm:$0xff] %v2251_v28  ;;  %2254 = vst [vmem:[%s16513_s26 + $0xce8] sm:$0xff] %v2253_v29  ;;  %v2257_v31 = vld [vmem:[%s16508_s25 + $0x6f68] sm:$0xff]  ;;  %v2259_v32 = vld [vmem:[%s16508_s25 + $0x6f70] sm:$0xff] }
  0xe2   : > { %2256 = vst [vmem:[%s16513_s26 + $0xcf0] sm:$0xff] %v2255_v30  ;;  %2258 = vst [vmem:[%s16513_s26 + $0xcf8] sm:$0xff] %v2257_v31  ;;  %v2261_v33 = vld [vmem:[%s16508_s25 + $0x6f78] sm:$0xff]  ;;  %v2263_v34 = vld [vmem:[%s16508_s25 + $0x6f80] sm:$0xff] }
  0xe3   : > { %2260 = vst [vmem:[%s16513_s26 + $0xd00] sm:$0xff] %v2259_v32  ;;  %v2265_v35 = vld [vmem:[%s16508_s25 + $0x6f88] sm:$0xff]  ;;  %2262 = vst [vmem:[%s16513_s26 + $0xd08] sm:$0xff] %v2261_v33  ;;  %v2267_v36 = vld [vmem:[%s16508_s25 + $0x8340] sm:$0xff] }
  0xe4   : > { %2264 = vst [vmem:[%s16513_s26 + $0xd10] sm:$0xff] %v2263_v34  ;;  %2266 = vst [vmem:[%s16513_s26 + $0xd18] sm:$0xff] %v2265_v35  ;;  %v2269_v37 = vld [vmem:[%s16508_s25 + $0x8348] sm:$0xff]  ;;  %v2271_v38 = vld [vmem:[%s16508_s25 + $0x8350] sm:$0xff] }
  0xe5   : > { %2268 = vst [vmem:[%s16513_s26 + $0xd20] sm:$0xff] %v2267_v36  ;;  %2270 = vst [vmem:[%s16513_s26 + $0xd28] sm:$0xff] %v2269_v37  ;;  %v2273_v39 = vld [vmem:[%s16508_s25 + $0x8358] sm:$0xff]  ;;  %v2275_v40 = vld [vmem:[%s16508_s25 + $0x8360] sm:$0xff] }
  0xe6   : > { %2272 = vst [vmem:[%s16513_s26 + $0xd30] sm:$0xff] %v2271_v38  ;;  %v2277_v41 = vld [vmem:[%s16508_s25 + $0x8368] sm:$0xff]  ;;  %2274 = vst [vmem:[%s16513_s26 + $0xd38] sm:$0xff] %v2273_v39  ;;  %v2279_v42 = vld [vmem:[%s16508_s25 + $0x8370] sm:$0xff] }
  0xe7   : > { %2276 = vst [vmem:[%s16513_s26 + $0xd40] sm:$0xff] %v2275_v40  ;;  %2278 = vst [vmem:[%s16513_s26 + $0xd48] sm:$0xff] %v2277_v41  ;;  %v2281_v43 = vld [vmem:[%s16508_s25 + $0x8378] sm:$0xff]  ;;  %v2283_v44 = vld [vmem:[%s16508_s25 + $0x8380] sm:$0xff] }
  0xe8   : > { %2280 = vst [vmem:[%s16513_s26 + $0xd50] sm:$0xff] %v2279_v42  ;;  %2282 = vst [vmem:[%s16513_s26 + $0xd58] sm:$0xff] %v2281_v43  ;;  %v2285_v45 = vld [vmem:[%s16508_s25 + $0x8388] sm:$0xff]  ;;  %v2287_v46 = vld [vmem:[%s16508_s25 + $0x8390] sm:$0xff] }
  0xe9   : > { %2284 = vst [vmem:[%s16513_s26 + $0xd60] sm:$0xff] %v2283_v44  ;;  %v2289_v47 = vld [vmem:[%s16508_s25 + $0x8398] sm:$0xff]  ;;  %2286 = vst [vmem:[%s16513_s26 + $0xd68] sm:$0xff] %v2285_v45  ;;  %v2291_v48 = vld [vmem:[%s16508_s25 + $0x83a0] sm:$0xff] }
  0xea   : > { %2288 = vst [vmem:[%s16513_s26 + $0xd70] sm:$0xff] %v2287_v46  ;;  %2290 = vst [vmem:[%s16513_s26 + $0xd78] sm:$0xff] %v2289_v47  ;;  %v2293_v49 = vld [vmem:[%s16508_s25 + $0x83a8] sm:$0xff]  ;;  %v2295_v50 = vld [vmem:[%s16508_s25 + $0x83b0] sm:$0xff] }
  0xeb   : > { %2292 = vst [vmem:[%s16513_s26 + $0xd80] sm:$0xff] %v2291_v48  ;;  %2294 = vst [vmem:[%s16513_s26 + $0xd88] sm:$0xff] %v2293_v49  ;;  %v2297_v51 = vld [vmem:[%s16508_s25 + $0x83b8] sm:$0xff]  ;;  %v2299_v52 = vld [vmem:[%s16508_s25 + $0x83c0] sm:$0xff] }
  0xec   : > { %2296 = vst [vmem:[%s16513_s26 + $0xd90] sm:$0xff] %v2295_v50  ;;  %v2301_v53 = vld [vmem:[%s16508_s25 + $0x83c8] sm:$0xff]  ;;  %2298 = vst [vmem:[%s16513_s26 + $0xd98] sm:$0xff] %v2297_v51  ;;  %v2303_v54 = vld [vmem:[%s16508_s25 + $0x83d0] sm:$0xff] }
  0xed   : > { %2300 = vst [vmem:[%s16513_s26 + $0xda0] sm:$0xff] %v2299_v52  ;;  %2302 = vst [vmem:[%s16513_s26 + $0xda8] sm:$0xff] %v2301_v53  ;;  %v2305_v55 = vld [vmem:[%s16508_s25 + $0x83d8] sm:$0xff]  ;;  %v2307_v56 = vld [vmem:[%s16508_s25 + $0x83e0] sm:$0xff] }
  0xee   : > { %2304 = vst [vmem:[%s16513_s26 + $0xdb0] sm:$0xff] %v2303_v54  ;;  %2306 = vst [vmem:[%s16513_s26 + $0xdb8] sm:$0xff] %v2305_v55  ;;  %v2309_v57 = vld [vmem:[%s16508_s25 + $0x83e8] sm:$0xff]  ;;  %v2311_v58 = vld [vmem:[%s16508_s25 + $0x83f0] sm:$0xff] }
  0xef   : > { %2308 = vst [vmem:[%s16513_s26 + $0xdc0] sm:$0xff] %v2307_v56  ;;  %v2313_v59 = vld [vmem:[%s16508_s25 + $0x83f8] sm:$0xff]  ;;  %2310 = vst [vmem:[%s16513_s26 + $0xdc8] sm:$0xff] %v2309_v57  ;;  %v2315_v60 = vld [vmem:[%s16508_s25 + $0x8400] sm:$0xff] }
  0xf0   : > { %2312 = vst [vmem:[%s16513_s26 + $0xdd0] sm:$0xff] %v2311_v58  ;;  %2314 = vst [vmem:[%s16513_s26 + $0xdd8] sm:$0xff] %v2313_v59  ;;  %v2317_v61 = vld [vmem:[%s16508_s25 + $0x8408] sm:$0xff]  ;;  %v2319_v62 = vld [vmem:[%s16508_s25 + $0x8410] sm:$0xff] }
  0xf1   : > { %2316 = vst [vmem:[%s16513_s26 + $0xde0] sm:$0xff] %v2315_v60  ;;  %2318 = vst [vmem:[%s16513_s26 + $0xde8] sm:$0xff] %v2317_v61  ;;  %v2321_v63 = vld [vmem:[%s16508_s25 + $0x8418] sm:$0xff]  ;;  %v2323_v0 = vld [vmem:[%s16508_s25 + $0x8420] sm:$0xff] }
  0xf2   : > { %2320 = vst [vmem:[%s16513_s26 + $0xdf0] sm:$0xff] %v2319_v62  ;;  %v2325_v1 = vld [vmem:[%s16508_s25 + $0x8428] sm:$0xff]  ;;  %2322 = vst [vmem:[%s16513_s26 + $0xdf8] sm:$0xff] %v2321_v63  ;;  %v2327_v2 = vld [vmem:[%s16508_s25 + $0x8430] sm:$0xff] }
  0xf3   : > { %2324 = vst [vmem:[%s16513_s26 + $0xe00] sm:$0xff] %v2323_v0  ;;  %2326 = vst [vmem:[%s16513_s26 + $0xe08] sm:$0xff] %v2325_v1  ;;  %v2329_v3 = vld [vmem:[%s16508_s25 + $0x8438] sm:$0xff]  ;;  %v2331_v4 = vld [vmem:[%s16508_s25 + $0x8440] sm:$0xff] }
  0xf4   : > { %2328 = vst [vmem:[%s16513_s26 + $0xe10] sm:$0xff] %v2327_v2  ;;  %2330 = vst [vmem:[%s16513_s26 + $0xe18] sm:$0xff] %v2329_v3  ;;  %v2333_v5 = vld [vmem:[%s16508_s25 + $0x8448] sm:$0xff]  ;;  %v2335_v6 = vld [vmem:[%s16508_s25 + $0x8450] sm:$0xff] }
  0xf5   : > { %2332 = vst [vmem:[%s16513_s26 + $0xe20] sm:$0xff] %v2331_v4  ;;  %v2337_v7 = vld [vmem:[%s16508_s25 + $0x8458] sm:$0xff]  ;;  %2334 = vst [vmem:[%s16513_s26 + $0xe28] sm:$0xff] %v2333_v5  ;;  %v2339_v8 = vld [vmem:[%s16508_s25 + $0x8460] sm:$0xff] }
  0xf6   : > { %2336 = vst [vmem:[%s16513_s26 + $0xe30] sm:$0xff] %v2335_v6  ;;  %2338 = vst [vmem:[%s16513_s26 + $0xe38] sm:$0xff] %v2337_v7  ;;  %v2341_v9 = vld [vmem:[%s16508_s25 + $0x8468] sm:$0xff]  ;;  %v2343_v10 = vld [vmem:[%s16508_s25 + $0x8470] sm:$0xff] }
  0xf7   : > { %2340 = vst [vmem:[%s16513_s26 + $0xe40] sm:$0xff] %v2339_v8  ;;  %2342 = vst [vmem:[%s16513_s26 + $0xe48] sm:$0xff] %v2341_v9  ;;  %v2345_v11 = vld [vmem:[%s16508_s25 + $0x8478] sm:$0xff]  ;;  %v2347_v12 = vld [vmem:[%s16508_s25 + $0x8480] sm:$0xff] }
  0xf8   : > { %2344 = vst [vmem:[%s16513_s26 + $0xe50] sm:$0xff] %v2343_v10  ;;  %v2349_v13 = vld [vmem:[%s16508_s25 + $0x8488] sm:$0xff]  ;;  %2346 = vst [vmem:[%s16513_s26 + $0xe58] sm:$0xff] %v2345_v11  ;;  %v2351_v14 = vld [vmem:[%s16508_s25 + $0x8490] sm:$0xff] }
  0xf9   : > { %2348 = vst [vmem:[%s16513_s26 + $0xe60] sm:$0xff] %v2347_v12  ;;  %2350 = vst [vmem:[%s16513_s26 + $0xe68] sm:$0xff] %v2349_v13  ;;  %v2353_v15 = vld [vmem:[%s16508_s25 + $0x8498] sm:$0xff]  ;;  %v2355_v16 = vld [vmem:[%s16508_s25 + $0x84a0] sm:$0xff] }
  0xfa   : > { %2352 = vst [vmem:[%s16513_s26 + $0xe70] sm:$0xff] %v2351_v14  ;;  %2354 = vst [vmem:[%s16513_s26 + $0xe78] sm:$0xff] %v2353_v15  ;;  %v2357_v17 = vld [vmem:[%s16508_s25 + $0x84a8] sm:$0xff]  ;;  %v2359_v18 = vld [vmem:[%s16508_s25 + $0x84b0] sm:$0xff] }
  0xfb   : > { %2356 = vst [vmem:[%s16513_s26 + $0xe80] sm:$0xff] %v2355_v16  ;;  %v2361_v19 = vld [vmem:[%s16508_s25 + $0x84b8] sm:$0xff]  ;;  %2358 = vst [vmem:[%s16513_s26 + $0xe88] sm:$0xff] %v2357_v17  ;;  %v2363_v20 = vld [vmem:[%s16508_s25 + $0x84c0] sm:$0xff] }
  0xfc   : > { %2360 = vst [vmem:[%s16513_s26 + $0xe90] sm:$0xff] %v2359_v18  ;;  %2362 = vst [vmem:[%s16513_s26 + $0xe98] sm:$0xff] %v2361_v19  ;;  %v2365_v21 = vld [vmem:[%s16508_s25 + $0x84c8] sm:$0xff]  ;;  %v2367_v22 = vld [vmem:[%s16508_s25 + $0x84d0] sm:$0xff] }
  0xfd   : > { %2364 = vst [vmem:[%s16513_s26 + $0xea0] sm:$0xff] %v2363_v20  ;;  %2366 = vst [vmem:[%s16513_s26 + $0xea8] sm:$0xff] %v2365_v21  ;;  %v2369_v23 = vld [vmem:[%s16508_s25 + $0x84d8] sm:$0xff]  ;;  %v2371_v24 = vld [vmem:[%s16508_s25 + $0x84e0] sm:$0xff] }
  0xfe   : > { %2368 = vst [vmem:[%s16513_s26 + $0xeb0] sm:$0xff] %v2367_v22  ;;  %v2373_v25 = vld [vmem:[%s16508_s25 + $0x84e8] sm:$0xff]  ;;  %2370 = vst [vmem:[%s16513_s26 + $0xeb8] sm:$0xff] %v2369_v23  ;;  %v2375_v26 = vld [vmem:[%s16508_s25 + $0x84f0] sm:$0xff] }
  0xff   : > { %2372 = vst [vmem:[%s16513_s26 + $0xec0] sm:$0xff] %v2371_v24  ;;  %2374 = vst [vmem:[%s16513_s26 + $0xec8] sm:$0xff] %v2373_v25  ;;  %v2377_v27 = vld [vmem:[%s16508_s25 + $0x84f8] sm:$0xff]  ;;  %v2379_v28 = vld [vmem:[%s16508_s25 + $0x8500] sm:$0xff] }
 0x100   : > { %2376 = vst [vmem:[%s16513_s26 + $0xed0] sm:$0xff] %v2375_v26  ;;  %2378 = vst [vmem:[%s16513_s26 + $0xed8] sm:$0xff] %v2377_v27  ;;  %v2381_v29 = vld [vmem:[%s16508_s25 + $0x8508] sm:$0xff]  ;;  %v2383_v30 = vld [vmem:[%s16508_s25 + $0x8510] sm:$0xff] }
 0x101   : > { %2380 = vst [vmem:[%s16513_s26 + $0xee0] sm:$0xff] %v2379_v28  ;;  %v2385_v31 = vld [vmem:[%s16508_s25 + $0x8518] sm:$0xff]  ;;  %2382 = vst [vmem:[%s16513_s26 + $0xee8] sm:$0xff] %v2381_v29  ;;  %v2387_v32 = vld [vmem:[%s16508_s25 + $0x8520] sm:$0xff] }
 0x102   : > { %2384 = vst [vmem:[%s16513_s26 + $0xef0] sm:$0xff] %v2383_v30  ;;  %2386 = vst [vmem:[%s16513_s26 + $0xef8] sm:$0xff] %v2385_v31  ;;  %v2389_v33 = vld [vmem:[%s16508_s25 + $0x8528] sm:$0xff]  ;;  %v2391_v34 = vld [vmem:[%s16508_s25 + $0x8530] sm:$0xff] }
 0x103   : > { %2388 = vst [vmem:[%s16513_s26 + $0xf00] sm:$0xff] %v2387_v32  ;;  %2390 = vst [vmem:[%s16513_s26 + $0xf08] sm:$0xff] %v2389_v33  ;;  %v2393_v35 = vld [vmem:[%s16508_s25 + $0x8538] sm:$0xff]  ;;  %v2395_v36 = vld [vmem:[%s16508_s25 + $0x8540] sm:$0xff] }
 0x104   : > { %2392 = vst [vmem:[%s16513_s26 + $0xf10] sm:$0xff] %v2391_v34  ;;  %v2397_v37 = vld [vmem:[%s16508_s25 + $0x8548] sm:$0xff]  ;;  %2394 = vst [vmem:[%s16513_s26 + $0xf18] sm:$0xff] %v2393_v35  ;;  %v2399_v38 = vld [vmem:[%s16508_s25 + $0x8550] sm:$0xff] }
 0x105   : > { %2396 = vst [vmem:[%s16513_s26 + $0xf20] sm:$0xff] %v2395_v36  ;;  %2398 = vst [vmem:[%s16513_s26 + $0xf28] sm:$0xff] %v2397_v37  ;;  %v2401_v39 = vld [vmem:[%s16508_s25 + $0x8558] sm:$0xff]  ;;  %v2403_v40 = vld [vmem:[%s16508_s25 + $0x8560] sm:$0xff] }
 0x106   : > { %2400 = vst [vmem:[%s16513_s26 + $0xf30] sm:$0xff] %v2399_v38  ;;  %2402 = vst [vmem:[%s16513_s26 + $0xf38] sm:$0xff] %v2401_v39  ;;  %v2405_v41 = vld [vmem:[%s16508_s25 + $0x8568] sm:$0xff]  ;;  %v2407_v42 = vld [vmem:[%s16508_s25 + $0x9920] sm:$0xff] }
 0x107   : > { %2404 = vst [vmem:[%s16513_s26 + $0xf40] sm:$0xff] %v2403_v40  ;;  %v2409_v43 = vld [vmem:[%s16508_s25 + $0x9928] sm:$0xff]  ;;  %2406 = vst [vmem:[%s16513_s26 + $0xf48] sm:$0xff] %v2405_v41  ;;  %v2411_v44 = vld [vmem:[%s16508_s25 + $0x9930] sm:$0xff] }
 0x108   : > { %2408 = vst [vmem:[%s16513_s26 + $0xf50] sm:$0xff] %v2407_v42  ;;  %2410 = vst [vmem:[%s16513_s26 + $0xf58] sm:$0xff] %v2409_v43  ;;  %v2413_v45 = vld [vmem:[%s16508_s25 + $0x9938] sm:$0xff]  ;;  %v2415_v46 = vld [vmem:[%s16508_s25 + $0x9940] sm:$0xff] }
 0x109   : > { %2412 = vst [vmem:[%s16513_s26 + $0xf60] sm:$0xff] %v2411_v44  ;;  %2414 = vst [vmem:[%s16513_s26 + $0xf68] sm:$0xff] %v2413_v45  ;;  %v2417_v47 = vld [vmem:[%s16508_s25 + $0x9948] sm:$0xff]  ;;  %v2419_v48 = vld [vmem:[%s16508_s25 + $0x9950] sm:$0xff] }
 0x10a   : > { %2416 = vst [vmem:[%s16513_s26 + $0xf70] sm:$0xff] %v2415_v46  ;;  %v2421_v49 = vld [vmem:[%s16508_s25 + $0x9958] sm:$0xff]  ;;  %2418 = vst [vmem:[%s16513_s26 + $0xf78] sm:$0xff] %v2417_v47  ;;  %v2423_v50 = vld [vmem:[%s16508_s25 + $0x9960] sm:$0xff] }
 0x10b   : > { %2420 = vst [vmem:[%s16513_s26 + $0xf80] sm:$0xff] %v2419_v48  ;;  %2422 = vst [vmem:[%s16513_s26 + $0xf88] sm:$0xff] %v2421_v49  ;;  %v2425_v51 = vld [vmem:[%s16508_s25 + $0x9968] sm:$0xff]  ;;  %v2427_v52 = vld [vmem:[%s16508_s25 + $0x9970] sm:$0xff] }
 0x10c   : > { %2424 = vst [vmem:[%s16513_s26 + $0xf90] sm:$0xff] %v2423_v50  ;;  %2426 = vst [vmem:[%s16513_s26 + $0xf98] sm:$0xff] %v2425_v51  ;;  %v2429_v53 = vld [vmem:[%s16508_s25 + $0x9978] sm:$0xff]  ;;  %v2431_v54 = vld [vmem:[%s16508_s25 + $0x9980] sm:$0xff] }
 0x10d   : > { %2428 = vst [vmem:[%s16513_s26 + $0xfa0] sm:$0xff] %v2427_v52  ;;  %v2433_v55 = vld [vmem:[%s16508_s25 + $0x9988] sm:$0xff]  ;;  %2430 = vst [vmem:[%s16513_s26 + $0xfa8] sm:$0xff] %v2429_v53  ;;  %v2435_v56 = vld [vmem:[%s16508_s25 + $0x9990] sm:$0xff] }
 0x10e   : > { %2432 = vst [vmem:[%s16513_s26 + $0xfb0] sm:$0xff] %v2431_v54  ;;  %2434 = vst [vmem:[%s16513_s26 + $0xfb8] sm:$0xff] %v2433_v55  ;;  %v2437_v57 = vld [vmem:[%s16508_s25 + $0x9998] sm:$0xff]  ;;  %v2439_v58 = vld [vmem:[%s16508_s25 + $0x99a0] sm:$0xff] }
 0x10f   : > { %2436 = vst [vmem:[%s16513_s26 + $0xfc0] sm:$0xff] %v2435_v56  ;;  %2438 = vst [vmem:[%s16513_s26 + $0xfc8] sm:$0xff] %v2437_v57  ;;  %v2441_v59 = vld [vmem:[%s16508_s25 + $0x99a8] sm:$0xff]  ;;  %v2443_v60 = vld [vmem:[%s16508_s25 + $0x99b0] sm:$0xff] }
 0x110   : > { %2440 = vst [vmem:[%s16513_s26 + $0xfd0] sm:$0xff] %v2439_v58  ;;  %v2445_v61 = vld [vmem:[%s16508_s25 + $0x99b8] sm:$0xff]  ;;  %2442 = vst [vmem:[%s16513_s26 + $0xfd8] sm:$0xff] %v2441_v59  ;;  %v2447_v62 = vld [vmem:[%s16508_s25 + $0x99c0] sm:$0xff] }
 0x111   : > { %2444 = vst [vmem:[%s16513_s26 + $0xfe0] sm:$0xff] %v2443_v60  ;;  %2446 = vst [vmem:[%s16513_s26 + $0xfe8] sm:$0xff] %v2445_v61  ;;  %v2449_v63 = vld [vmem:[%s16508_s25 + $0x99c8] sm:$0xff]  ;;  %v2451_v0 = vld [vmem:[%s16508_s25 + $0x99d0] sm:$0xff] }
 0x112   : > { %2448 = vst [vmem:[%s16513_s26 + $0xff0] sm:$0xff] %v2447_v62  ;;  %2450 = vst [vmem:[%s16513_s26 + $0xff8] sm:$0xff] %v2449_v63  ;;  %v2453_v1 = vld [vmem:[%s16508_s25 + $0x99d8] sm:$0xff]  ;;  %v2455_v2 = vld [vmem:[%s16508_s25 + $0x99e0] sm:$0xff] }
 0x113   : > { %2452 = vst [vmem:[%s16513_s26 + $0x1000] sm:$0xff] %v2451_v0  ;;  %v2457_v3 = vld [vmem:[%s16508_s25 + $0x99e8] sm:$0xff]  ;;  %2454 = vst [vmem:[%s16513_s26 + $0x1008] sm:$0xff] %v2453_v1  ;;  %v2459_v4 = vld [vmem:[%s16508_s25 + $0x99f0] sm:$0xff] }
 0x114   : > { %2456 = vst [vmem:[%s16513_s26 + $0x1010] sm:$0xff] %v2455_v2  ;;  %2458 = vst [vmem:[%s16513_s26 + $0x1018] sm:$0xff] %v2457_v3  ;;  %v2461_v5 = vld [vmem:[%s16508_s25 + $0x99f8] sm:$0xff]  ;;  %v2463_v6 = vld [vmem:[%s16508_s25 + $0x9a00] sm:$0xff] }
 0x115   : > { %2460 = vst [vmem:[%s16513_s26 + $0x1020] sm:$0xff] %v2459_v4  ;;  %2462 = vst [vmem:[%s16513_s26 + $0x1028] sm:$0xff] %v2461_v5  ;;  %v2465_v7 = vld [vmem:[%s16508_s25 + $0x9a08] sm:$0xff]  ;;  %v2467_v8 = vld [vmem:[%s16508_s25 + $0x9a10] sm:$0xff] }
 0x116   : > { %2464 = vst [vmem:[%s16513_s26 + $0x1030] sm:$0xff] %v2463_v6  ;;  %v2469_v9 = vld [vmem:[%s16508_s25 + $0x9a18] sm:$0xff]  ;;  %2466 = vst [vmem:[%s16513_s26 + $0x1038] sm:$0xff] %v2465_v7  ;;  %v2471_v10 = vld [vmem:[%s16508_s25 + $0x9a20] sm:$0xff] }
 0x117   : > { %2468 = vst [vmem:[%s16513_s26 + $0x1040] sm:$0xff] %v2467_v8  ;;  %2470 = vst [vmem:[%s16513_s26 + $0x1048] sm:$0xff] %v2469_v9  ;;  %v2473_v11 = vld [vmem:[%s16508_s25 + $0x9a28] sm:$0xff]  ;;  %v2475_v12 = vld [vmem:[%s16508_s25 + $0x9a30] sm:$0xff] }
 0x118   : > { %2472 = vst [vmem:[%s16513_s26 + $0x1050] sm:$0xff] %v2471_v10  ;;  %2474 = vst [vmem:[%s16513_s26 + $0x1058] sm:$0xff] %v2473_v11  ;;  %v2477_v13 = vld [vmem:[%s16508_s25 + $0x9a38] sm:$0xff]  ;;  %v2479_v14 = vld [vmem:[%s16508_s25 + $0x9a40] sm:$0xff] }
 0x119   : > { %2476 = vst [vmem:[%s16513_s26 + $0x1060] sm:$0xff] %v2475_v12  ;;  %v2481_v15 = vld [vmem:[%s16508_s25 + $0x9a48] sm:$0xff]  ;;  %2478 = vst [vmem:[%s16513_s26 + $0x1068] sm:$0xff] %v2477_v13  ;;  %v2483_v16 = vld [vmem:[%s16508_s25 + $0x9a50] sm:$0xff] }
 0x11a   : > { %2480 = vst [vmem:[%s16513_s26 + $0x1070] sm:$0xff] %v2479_v14  ;;  %2482 = vst [vmem:[%s16513_s26 + $0x1078] sm:$0xff] %v2481_v15  ;;  %v2485_v17 = vld [vmem:[%s16508_s25 + $0x9a58] sm:$0xff]  ;;  %v2487_v18 = vld [vmem:[%s16508_s25 + $0x9a60] sm:$0xff] }
 0x11b   : > { %2484 = vst [vmem:[%s16513_s26 + $0x1080] sm:$0xff] %v2483_v16  ;;  %2486 = vst [vmem:[%s16513_s26 + $0x1088] sm:$0xff] %v2485_v17  ;;  %v2489_v19 = vld [vmem:[%s16508_s25 + $0x9a68] sm:$0xff]  ;;  %v2491_v20 = vld [vmem:[%s16508_s25 + $0x9a70] sm:$0xff] }
 0x11c   : > { %2488 = vst [vmem:[%s16513_s26 + $0x1090] sm:$0xff] %v2487_v18  ;;  %v2493_v21 = vld [vmem:[%s16508_s25 + $0x9a78] sm:$0xff]  ;;  %2490 = vst [vmem:[%s16513_s26 + $0x1098] sm:$0xff] %v2489_v19  ;;  %v2495_v22 = vld [vmem:[%s16508_s25 + $0x9a80] sm:$0xff] }
 0x11d   : > { %2492 = vst [vmem:[%s16513_s26 + $0x10a0] sm:$0xff] %v2491_v20  ;;  %2494 = vst [vmem:[%s16513_s26 + $0x10a8] sm:$0xff] %v2493_v21  ;;  %v2497_v23 = vld [vmem:[%s16508_s25 + $0x9a88] sm:$0xff]  ;;  %v2499_v24 = vld [vmem:[%s16508_s25 + $0x9a90] sm:$0xff] }
 0x11e   : > { %2496 = vst [vmem:[%s16513_s26 + $0x10b0] sm:$0xff] %v2495_v22  ;;  %2498 = vst [vmem:[%s16513_s26 + $0x10b8] sm:$0xff] %v2497_v23  ;;  %v2501_v25 = vld [vmem:[%s16508_s25 + $0x9a98] sm:$0xff]  ;;  %v2503_v26 = vld [vmem:[%s16508_s25 + $0x9aa0] sm:$0xff] }
 0x11f   : > { %2500 = vst [vmem:[%s16513_s26 + $0x10c0] sm:$0xff] %v2499_v24  ;;  %v2505_v27 = vld [vmem:[%s16508_s25 + $0x9aa8] sm:$0xff]  ;;  %2502 = vst [vmem:[%s16513_s26 + $0x10c8] sm:$0xff] %v2501_v25  ;;  %v2507_v28 = vld [vmem:[%s16508_s25 + $0x9ab0] sm:$0xff] }
 0x120   : > { %2504 = vst [vmem:[%s16513_s26 + $0x10d0] sm:$0xff] %v2503_v26  ;;  %2506 = vst [vmem:[%s16513_s26 + $0x10d8] sm:$0xff] %v2505_v27  ;;  %v2509_v29 = vld [vmem:[%s16508_s25 + $0x9ab8] sm:$0xff]  ;;  %v2511_v30 = vld [vmem:[%s16508_s25 + $0x9ac0] sm:$0xff] }
 0x121   : > { %2508 = vst [vmem:[%s16513_s26 + $0x10e0] sm:$0xff] %v2507_v28  ;;  %2510 = vst [vmem:[%s16513_s26 + $0x10e8] sm:$0xff] %v2509_v29  ;;  %v2513_v31 = vld [vmem:[%s16508_s25 + $0x9ac8] sm:$0xff]  ;;  %v2515_v32 = vld [vmem:[%s16508_s25 + $0x9ad0] sm:$0xff] }
 0x122   : > { %2512 = vst [vmem:[%s16513_s26 + $0x10f0] sm:$0xff] %v2511_v30  ;;  %v2517_v33 = vld [vmem:[%s16508_s25 + $0x9ad8] sm:$0xff]  ;;  %2514 = vst [vmem:[%s16513_s26 + $0x10f8] sm:$0xff] %v2513_v31  ;;  %v2519_v34 = vld [vmem:[%s16508_s25 + $0x9ae0] sm:$0xff] }
 0x123   : > { %2516 = vst [vmem:[%s16513_s26 + $0x1100] sm:$0xff] %v2515_v32  ;;  %2518 = vst [vmem:[%s16513_s26 + $0x1108] sm:$0xff] %v2517_v33  ;;  %v2521_v35 = vld [vmem:[%s16508_s25 + $0x9ae8] sm:$0xff]  ;;  %v2523_v36 = vld [vmem:[%s16508_s25 + $0x9af0] sm:$0xff] }
 0x124   : > { %2520 = vst [vmem:[%s16513_s26 + $0x1110] sm:$0xff] %v2519_v34  ;;  %2522 = vst [vmem:[%s16513_s26 + $0x1118] sm:$0xff] %v2521_v35  ;;  %v2525_v37 = vld [vmem:[%s16508_s25 + $0x9af8] sm:$0xff]  ;;  %v2527_v38 = vld [vmem:[%s16508_s25 + $0x9b00] sm:$0xff] }
 0x125   : > { %2524 = vst [vmem:[%s16513_s26 + $0x1120] sm:$0xff] %v2523_v36  ;;  %v2529_v39 = vld [vmem:[%s16508_s25 + $0x9b08] sm:$0xff]  ;;  %2526 = vst [vmem:[%s16513_s26 + $0x1128] sm:$0xff] %v2525_v37  ;;  %v2531_v40 = vld [vmem:[%s16508_s25 + $0x9b10] sm:$0xff] }
 0x126   : > { %2528 = vst [vmem:[%s16513_s26 + $0x1130] sm:$0xff] %v2527_v38  ;;  %2530 = vst [vmem:[%s16513_s26 + $0x1138] sm:$0xff] %v2529_v39  ;;  %v2533_v41 = vld [vmem:[%s16508_s25 + $0x9b18] sm:$0xff]  ;;  %v2535_v42 = vld [vmem:[%s16508_s25 + $0x9b20] sm:$0xff] }
 0x127   : > { %2532 = vst [vmem:[%s16513_s26 + $0x1140] sm:$0xff] %v2531_v40  ;;  %2534 = vst [vmem:[%s16513_s26 + $0x1148] sm:$0xff] %v2533_v41  ;;  %v2537_v43 = vld [vmem:[%s16508_s25 + $0x9b28] sm:$0xff]  ;;  %v2539_v44 = vld [vmem:[%s16508_s25 + $0x9b30] sm:$0xff] }
 0x128   : > { %2536 = vst [vmem:[%s16513_s26 + $0x1150] sm:$0xff] %v2535_v42  ;;  %v2541_v45 = vld [vmem:[%s16508_s25 + $0x9b38] sm:$0xff]  ;;  %2538 = vst [vmem:[%s16513_s26 + $0x1158] sm:$0xff] %v2537_v43  ;;  %v2543_v46 = vld [vmem:[%s16508_s25 + $0x9b40] sm:$0xff] }
 0x129   : > { %2540 = vst [vmem:[%s16513_s26 + $0x1160] sm:$0xff] %v2539_v44  ;;  %2542 = vst [vmem:[%s16513_s26 + $0x1168] sm:$0xff] %v2541_v45  ;;  %v2545_v47 = vld [vmem:[%s16508_s25 + $0x9b48] sm:$0xff]  ;;  %v2547_v48 = vld [vmem:[%s16508_s25 + $0xaf00] sm:$0xff] }
 0x12a   : > { %2544 = vst [vmem:[%s16513_s26 + $0x1170] sm:$0xff] %v2543_v46  ;;  %2546 = vst [vmem:[%s16513_s26 + $0x1178] sm:$0xff] %v2545_v47  ;;  %v2549_v49 = vld [vmem:[%s16508_s25 + $0xaf08] sm:$0xff]  ;;  %v2551_v50 = vld [vmem:[%s16508_s25 + $0xaf10] sm:$0xff] }
 0x12b   : > { %2548 = vst [vmem:[%s16513_s26 + $0x1180] sm:$0xff] %v2547_v48  ;;  %v2553_v51 = vld [vmem:[%s16508_s25 + $0xaf18] sm:$0xff]  ;;  %2550 = vst [vmem:[%s16513_s26 + $0x1188] sm:$0xff] %v2549_v49  ;;  %v2555_v52 = vld [vmem:[%s16508_s25 + $0xaf20] sm:$0xff] }
 0x12c   : > { %2552 = vst [vmem:[%s16513_s26 + $0x1190] sm:$0xff] %v2551_v50  ;;  %2554 = vst [vmem:[%s16513_s26 + $0x1198] sm:$0xff] %v2553_v51  ;;  %v2557_v53 = vld [vmem:[%s16508_s25 + $0xaf28] sm:$0xff]  ;;  %v2559_v54 = vld [vmem:[%s16508_s25 + $0xaf30] sm:$0xff] }
 0x12d   : > { %2556 = vst [vmem:[%s16513_s26 + $0x11a0] sm:$0xff] %v2555_v52  ;;  %2558 = vst [vmem:[%s16513_s26 + $0x11a8] sm:$0xff] %v2557_v53  ;;  %v2561_v55 = vld [vmem:[%s16508_s25 + $0xaf38] sm:$0xff]  ;;  %v2563_v56 = vld [vmem:[%s16508_s25 + $0xaf40] sm:$0xff] }
 0x12e   : > { %2560 = vst [vmem:[%s16513_s26 + $0x11b0] sm:$0xff] %v2559_v54  ;;  %v2565_v57 = vld [vmem:[%s16508_s25 + $0xaf48] sm:$0xff]  ;;  %2562 = vst [vmem:[%s16513_s26 + $0x11b8] sm:$0xff] %v2561_v55  ;;  %v2567_v58 = vld [vmem:[%s16508_s25 + $0xaf50] sm:$0xff] }
 0x12f   : > { %2564 = vst [vmem:[%s16513_s26 + $0x11c0] sm:$0xff] %v2563_v56  ;;  %2566 = vst [vmem:[%s16513_s26 + $0x11c8] sm:$0xff] %v2565_v57  ;;  %v2569_v59 = vld [vmem:[%s16508_s25 + $0xaf58] sm:$0xff]  ;;  %v2571_v60 = vld [vmem:[%s16508_s25 + $0xaf60] sm:$0xff] }
 0x130   : > { %2568 = vst [vmem:[%s16513_s26 + $0x11d0] sm:$0xff] %v2567_v58  ;;  %2570 = vst [vmem:[%s16513_s26 + $0x11d8] sm:$0xff] %v2569_v59  ;;  %v2573_v61 = vld [vmem:[%s16508_s25 + $0xaf68] sm:$0xff]  ;;  %v2575_v62 = vld [vmem:[%s16508_s25 + $0xaf70] sm:$0xff] }
 0x131   : > { %2572 = vst [vmem:[%s16513_s26 + $0x11e0] sm:$0xff] %v2571_v60  ;;  %v2577_v63 = vld [vmem:[%s16508_s25 + $0xaf78] sm:$0xff]  ;;  %2574 = vst [vmem:[%s16513_s26 + $0x11e8] sm:$0xff] %v2573_v61  ;;  %v2579_v0 = vld [vmem:[%s16508_s25 + $0xaf80] sm:$0xff] }
 0x132   : > { %2576 = vst [vmem:[%s16513_s26 + $0x11f0] sm:$0xff] %v2575_v62  ;;  %2578 = vst [vmem:[%s16513_s26 + $0x11f8] sm:$0xff] %v2577_v63  ;;  %v2581_v1 = vld [vmem:[%s16508_s25 + $0xaf88] sm:$0xff]  ;;  %v2583_v2 = vld [vmem:[%s16508_s25 + $0xaf90] sm:$0xff] }
 0x133   : > { %2580 = vst [vmem:[%s16513_s26 + $0x1200] sm:$0xff] %v2579_v0  ;;  %2582 = vst [vmem:[%s16513_s26 + $0x1208] sm:$0xff] %v2581_v1  ;;  %v2585_v3 = vld [vmem:[%s16508_s25 + $0xaf98] sm:$0xff]  ;;  %v2587_v4 = vld [vmem:[%s16508_s25 + $0xafa0] sm:$0xff] }
 0x134   : > { %2584 = vst [vmem:[%s16513_s26 + $0x1210] sm:$0xff] %v2583_v2  ;;  %v2589_v5 = vld [vmem:[%s16508_s25 + $0xafa8] sm:$0xff]  ;;  %2586 = vst [vmem:[%s16513_s26 + $0x1218] sm:$0xff] %v2585_v3  ;;  %v2591_v6 = vld [vmem:[%s16508_s25 + $0xafb0] sm:$0xff] }
 0x135   : > { %2588 = vst [vmem:[%s16513_s26 + $0x1220] sm:$0xff] %v2587_v4  ;;  %2590 = vst [vmem:[%s16513_s26 + $0x1228] sm:$0xff] %v2589_v5  ;;  %v2593_v7 = vld [vmem:[%s16508_s25 + $0xafb8] sm:$0xff]  ;;  %v2595_v8 = vld [vmem:[%s16508_s25 + $0xafc0] sm:$0xff] }
 0x136   : > { %2592 = vst [vmem:[%s16513_s26 + $0x1230] sm:$0xff] %v2591_v6  ;;  %2594 = vst [vmem:[%s16513_s26 + $0x1238] sm:$0xff] %v2593_v7  ;;  %v2597_v9 = vld [vmem:[%s16508_s25 + $0xafc8] sm:$0xff]  ;;  %v2599_v10 = vld [vmem:[%s16508_s25 + $0xafd0] sm:$0xff] }
 0x137   : > { %2596 = vst [vmem:[%s16513_s26 + $0x1240] sm:$0xff] %v2595_v8  ;;  %v2601_v11 = vld [vmem:[%s16508_s25 + $0xafd8] sm:$0xff]  ;;  %2598 = vst [vmem:[%s16513_s26 + $0x1248] sm:$0xff] %v2597_v9  ;;  %v2603_v12 = vld [vmem:[%s16508_s25 + $0xafe0] sm:$0xff] }
 0x138   : > { %2600 = vst [vmem:[%s16513_s26 + $0x1250] sm:$0xff] %v2599_v10  ;;  %2602 = vst [vmem:[%s16513_s26 + $0x1258] sm:$0xff] %v2601_v11  ;;  %v2605_v13 = vld [vmem:[%s16508_s25 + $0xafe8] sm:$0xff]  ;;  %v2607_v14 = vld [vmem:[%s16508_s25 + $0xaff0] sm:$0xff] }
 0x139   : > { %2604 = vst [vmem:[%s16513_s26 + $0x1260] sm:$0xff] %v2603_v12  ;;  %2606 = vst [vmem:[%s16513_s26 + $0x1268] sm:$0xff] %v2605_v13  ;;  %v2609_v15 = vld [vmem:[%s16508_s25 + $0xaff8] sm:$0xff]  ;;  %v2611_v16 = vld [vmem:[%s16508_s25 + $0xb000] sm:$0xff] }
 0x13a   : > { %2608 = vst [vmem:[%s16513_s26 + $0x1270] sm:$0xff] %v2607_v14  ;;  %v2613_v17 = vld [vmem:[%s16508_s25 + $0xb008] sm:$0xff]  ;;  %2610 = vst [vmem:[%s16513_s26 + $0x1278] sm:$0xff] %v2609_v15  ;;  %v2615_v18 = vld [vmem:[%s16508_s25 + $0xb010] sm:$0xff] }
 0x13b   : > { %2612 = vst [vmem:[%s16513_s26 + $0x1280] sm:$0xff] %v2611_v16  ;;  %2614 = vst [vmem:[%s16513_s26 + $0x1288] sm:$0xff] %v2613_v17  ;;  %v2617_v19 = vld [vmem:[%s16508_s25 + $0xb018] sm:$0xff]  ;;  %v2619_v20 = vld [vmem:[%s16508_s25 + $0xb020] sm:$0xff] }
 0x13c   : > { %2616 = vst [vmem:[%s16513_s26 + $0x1290] sm:$0xff] %v2615_v18  ;;  %2618 = vst [vmem:[%s16513_s26 + $0x1298] sm:$0xff] %v2617_v19  ;;  %v2621_v21 = vld [vmem:[%s16508_s25 + $0xb028] sm:$0xff]  ;;  %v2623_v22 = vld [vmem:[%s16508_s25 + $0xb030] sm:$0xff] }
 0x13d   : > { %2620 = vst [vmem:[%s16513_s26 + $0x12a0] sm:$0xff] %v2619_v20  ;;  %v2625_v23 = vld [vmem:[%s16508_s25 + $0xb038] sm:$0xff]  ;;  %2622 = vst [vmem:[%s16513_s26 + $0x12a8] sm:$0xff] %v2621_v21  ;;  %v2627_v24 = vld [vmem:[%s16508_s25 + $0xb040] sm:$0xff] }
 0x13e   : > { %2624 = vst [vmem:[%s16513_s26 + $0x12b0] sm:$0xff] %v2623_v22  ;;  %2626 = vst [vmem:[%s16513_s26 + $0x12b8] sm:$0xff] %v2625_v23  ;;  %v2629_v25 = vld [vmem:[%s16508_s25 + $0xb048] sm:$0xff]  ;;  %v2631_v26 = vld [vmem:[%s16508_s25 + $0xb050] sm:$0xff] }
 0x13f   : > { %2628 = vst [vmem:[%s16513_s26 + $0x12c0] sm:$0xff] %v2627_v24  ;;  %2630 = vst [vmem:[%s16513_s26 + $0x12c8] sm:$0xff] %v2629_v25  ;;  %v2633_v27 = vld [vmem:[%s16508_s25 + $0xb058] sm:$0xff]  ;;  %v2635_v28 = vld [vmem:[%s16508_s25 + $0xb060] sm:$0xff] }
 0x140   : > { %2632 = vst [vmem:[%s16513_s26 + $0x12d0] sm:$0xff] %v2631_v26  ;;  %v2637_v29 = vld [vmem:[%s16508_s25 + $0xb068] sm:$0xff]  ;;  %2634 = vst [vmem:[%s16513_s26 + $0x12d8] sm:$0xff] %v2633_v27  ;;  %v2639_v30 = vld [vmem:[%s16508_s25 + $0xb070] sm:$0xff] }
 0x141   : > { %2636 = vst [vmem:[%s16513_s26 + $0x12e0] sm:$0xff] %v2635_v28  ;;  %2638 = vst [vmem:[%s16513_s26 + $0x12e8] sm:$0xff] %v2637_v29  ;;  %v2641_v31 = vld [vmem:[%s16508_s25 + $0xb078] sm:$0xff]  ;;  %v2643_v32 = vld [vmem:[%s16508_s25 + $0xb080] sm:$0xff] }
 0x142   : > { %2640 = vst [vmem:[%s16513_s26 + $0x12f0] sm:$0xff] %v2639_v30  ;;  %2642 = vst [vmem:[%s16513_s26 + $0x12f8] sm:$0xff] %v2641_v31  ;;  %v2645_v33 = vld [vmem:[%s16508_s25 + $0xb088] sm:$0xff]  ;;  %v2647_v34 = vld [vmem:[%s16508_s25 + $0xb090] sm:$0xff] }
 0x143   : > { %2644 = vst [vmem:[%s16513_s26 + $0x1300] sm:$0xff] %v2643_v32  ;;  %v2649_v35 = vld [vmem:[%s16508_s25 + $0xb098] sm:$0xff]  ;;  %2646 = vst [vmem:[%s16513_s26 + $0x1308] sm:$0xff] %v2645_v33  ;;  %v2651_v36 = vld [vmem:[%s16508_s25 + $0xb0a0] sm:$0xff] }
 0x144   : > { %2648 = vst [vmem:[%s16513_s26 + $0x1310] sm:$0xff] %v2647_v34  ;;  %2650 = vst [vmem:[%s16513_s26 + $0x1318] sm:$0xff] %v2649_v35  ;;  %v2653_v37 = vld [vmem:[%s16508_s25 + $0xb0a8] sm:$0xff]  ;;  %v2655_v38 = vld [vmem:[%s16508_s25 + $0xb0b0] sm:$0xff] }
 0x145   : > { %2652 = vst [vmem:[%s16513_s26 + $0x1320] sm:$0xff] %v2651_v36  ;;  %2654 = vst [vmem:[%s16513_s26 + $0x1328] sm:$0xff] %v2653_v37  ;;  %v2657_v39 = vld [vmem:[%s16508_s25 + $0xb0b8] sm:$0xff]  ;;  %v2659_v40 = vld [vmem:[%s16508_s25 + $0xb0c0] sm:$0xff] }
 0x146   : > { %2656 = vst [vmem:[%s16513_s26 + $0x1330] sm:$0xff] %v2655_v38  ;;  %v2661_v41 = vld [vmem:[%s16508_s25 + $0xb0c8] sm:$0xff]  ;;  %2658 = vst [vmem:[%s16513_s26 + $0x1338] sm:$0xff] %v2657_v39  ;;  %v2663_v42 = vld [vmem:[%s16508_s25 + $0xb0d0] sm:$0xff] }
 0x147   : > { %2660 = vst [vmem:[%s16513_s26 + $0x1340] sm:$0xff] %v2659_v40  ;;  %2662 = vst [vmem:[%s16513_s26 + $0x1348] sm:$0xff] %v2661_v41  ;;  %v2665_v43 = vld [vmem:[%s16508_s25 + $0xb0d8] sm:$0xff]  ;;  %v2667_v44 = vld [vmem:[%s16508_s25 + $0xb0e0] sm:$0xff] }
 0x148   : > { %2664 = vst [vmem:[%s16513_s26 + $0x1350] sm:$0xff] %v2663_v42  ;;  %2666 = vst [vmem:[%s16513_s26 + $0x1358] sm:$0xff] %v2665_v43  ;;  %v2669_v45 = vld [vmem:[%s16508_s25 + $0xb0e8] sm:$0xff]  ;;  %v2671_v46 = vld [vmem:[%s16508_s25 + $0xb0f0] sm:$0xff] }
 0x149   : > { %2668 = vst [vmem:[%s16513_s26 + $0x1360] sm:$0xff] %v2667_v44  ;;  %v2673_v47 = vld [vmem:[%s16508_s25 + $0xb0f8] sm:$0xff]  ;;  %2670 = vst [vmem:[%s16513_s26 + $0x1368] sm:$0xff] %v2669_v45  ;;  %v2675_v48 = vld [vmem:[%s16508_s25 + $0xb100] sm:$0xff] }
 0x14a   : > { %2672 = vst [vmem:[%s16513_s26 + $0x1370] sm:$0xff] %v2671_v46  ;;  %2674 = vst [vmem:[%s16513_s26 + $0x1378] sm:$0xff] %v2673_v47  ;;  %v2677_v49 = vld [vmem:[%s16508_s25 + $0xb108] sm:$0xff]  ;;  %v2679_v50 = vld [vmem:[%s16508_s25 + $0xb110] sm:$0xff] }
 0x14b   : > { %2676 = vst [vmem:[%s16513_s26 + $0x1380] sm:$0xff] %v2675_v48  ;;  %2678 = vst [vmem:[%s16513_s26 + $0x1388] sm:$0xff] %v2677_v49  ;;  %v2681_v51 = vld [vmem:[%s16508_s25 + $0xb118] sm:$0xff]  ;;  %v2683_v52 = vld [vmem:[%s16508_s25 + $0xb120] sm:$0xff] }
 0x14c   : > { %2680 = vst [vmem:[%s16513_s26 + $0x1390] sm:$0xff] %v2679_v50  ;;  %v2685_v53 = vld [vmem:[%s16508_s25 + $0xb128] sm:$0xff]  ;;  %2682 = vst [vmem:[%s16513_s26 + $0x1398] sm:$0xff] %v2681_v51 }
 0x14d   : > { %2684 = vst [vmem:[%s16513_s26 + $0x13a0] sm:$0xff] %v2683_v52  ;;  %2686 = vst [vmem:[%s16513_s26 + $0x13a8] sm:$0xff] %v2685_v53 }
 0x14e PF: > { %p13736_p5 = scmp.ge.s32.totalorder %s16451_s14, 1  ;;  %p5247_p6 = scmp.lt.s32.totalorder %s16451_s14, 11 }
 0x150   : > { %p5248_p7 = pnand %p13736_p5, %p5247_p6 }
 0x152   : > { %5251 = sbr.rel (%p5248_p7) target bundleno = 1865 (0x749), region = 80 }
 0x159   : > { %v17777_v54 = vld [vmem:[%s20077_s1] sm:$0xff]   ;;  %v20080_v55 = vmov 0   ;;  %v17786_v56 = vld [vmem:[%s20077_s1 + $0x8] sm:$0xff]   ;;  %s5254_s4 = sand.u32 1, %s16443_s12   ;;  %v17796_v57 = vld [vmem:[%s20077_s1 + $0x10] sm:$0xff]   ;;  %vm5746_vm0 = vcmask 179200  }
 0x15a   : > { %5856 = vmatprep.subr.bf16.mxu0 %v20080_v55  ;;  %15399 = vmatprep.subr.bf16.mxu1 %v20080_v55  ;;  %s15420_s5 = smul.u32 5040, %s5254_s4  ;;  %v17807_v58 = vld [vmem:[%s20077_s1 + $0x18] sm:$0xff]   ;;  %v17819_v61 = vld [vmem:[%s20077_s1 + $0x20] sm:$0xff]   ;;  %v17829_v62 = vld [vmem:[%s20077_s1 + $0x28] sm:$0xff]   ;;  %vm5852_vm1 = vcmask 1042432   ;;  %vm13588_vm2 = vcmask 257024  }
 0x15b   : > { %5857 = vmatpush1.bf16.msra.mxu0 %v17777_v54  ;;  %15409 = vmatpush1.bf16.msra.mxu1 %v17777_v54  ;;  %v17838_v63 = vld [vmem:[%s20077_s1 + $0x30] sm:$0xff]   ;;  %v17847_v0 = vld [vmem:[%s20077_s1 + $0x38] sm:$0xff]   ;;  %v17856_v1 = vld [vmem:[%s20077_s1 + $0x40] sm:$0xff]   ;;  %s5278_s18 = smul.u32 70, %s13730_s15 }
 0x15c   : > { %5858 = vmatprep.subr.bf16.mxu0 %v20080_v55  ;;  %15400 = vmatprep.subr.bf16.mxu1 %v20080_v55  ;;  %s17800_s8 = scalar_lea.vmem [#allocation2], %s15420_s5  ;;  %v15455_v2 = vld [vmem:[%s20077_s1 + $0x48] ss:$0 sps:$4 sm:$0x77]  }
 0x15d   : > { %v15458_v59 = vld [vmem:[%s17800_s8 + $0x4] ss:$8 sps:$4 sm:$0xff]   ;;  %v17867_v3 = vsel %vm5852_vm1, %v15455_v2, 0  ;;  %v15456_v4 = vld [vmem:[%s17800_s8] ss:$8 sps:$4 sm:$0xff]   ;;  %p5279_p8 = scmp.lt.s32.totalorder %s5278_s18, 699 }
 0x15e   : > { %13818 = vmatprep.mubr.msk.bf16.mxu0 %vm5746_vm0, %v15458_v59  ;;  %v15461_v60 = vld [vmem:[%s17800_s8 + $0x124] ss:$8 sps:$4 sm:$0xff]   ;;  %v15459_v5 = vld [vmem:[%s17800_s8 + $0x120] ss:$8 sps:$4 sm:$0xff]   ;;  %v15462_v6 = vld [vmem:[%s17800_s8 + $0x14] ss:$8 sps:$4 sm:$0xff]  }
 0x15f   : > { %5859 = vmatpush1.bf16.msra.mxu0 %v17786_v56  ;;  %15410 = vmatpush1.bf16.msra.mxu1 %v17786_v56  ;;  %v15464_v7 = vld [vmem:[%s17800_s8 + $0x134] ss:$8 sps:$4 sm:$0xff]   ;;  %v15466_v8 = vld [vmem:[%s17800_s8 + $0x10] ss:$8 sps:$4 sm:$0xff]   ;;  %v15468_v10 = vld [vmem:[%s17800_s8 + $0x24] ss:$8 sps:$4 sm:$0xff]  }
 0x160   : > { %5860 = vmatprep.subr.bf16.mxu0 %v20080_v55  ;;  %15401 = vmatprep.subr.bf16.mxu1 %v20080_v55  ;;  %v15467_v9 = vld [vmem:[%s17800_s8 + $0x130] ss:$8 sps:$4 sm:$0xff]   ;;  %v15470_v11 = vld [vmem:[%s17800_s8 + $0x144] ss:$8 sps:$4 sm:$0xff]   ;;  %v15472_v12 = vld [vmem:[%s17800_s8 + $0x20] ss:$8 sps:$4 sm:$0xff]  }
 0x161   : > { %13836 = vmatprep.mubr.msk.bf16.mxu1 %vm5746_vm0, %v15461_v60  ;;  %v15473_v13 = vld [vmem:[%s17800_s8 + $0x140] ss:$8 sps:$4 sm:$0xff]   ;;  %v15474_v14 = vld [vmem:[%s17800_s8 + $0x34] ss:$8 sps:$4 sm:$0xff]   ;;  %v15478_v16 = vld [vmem:[%s17800_s8 + $0x30] ss:$8 sps:$4 sm:$0xff]  }
 0x162   : > { %v15476_v15 = vld [vmem:[%s17800_s8 + $0x154] ss:$8 sps:$4 sm:$0xff]   ;;  %v15479_v17 = vld [vmem:[%s17800_s8 + $0x150] ss:$8 sps:$4 sm:$0xff]   ;;  %v15480_v18 = vld [vmem:[%s17800_s8 + $0x44] ss:$8 sps:$4 sm:$0xff]  }
 0x163   : > { %5861 = vmatpush1.bf16.msra.mxu0 %v17796_v57  ;;  %15411 = vmatpush1.bf16.msra.mxu1 %v17796_v57  ;;  %v15482_v19 = vld [vmem:[%s17800_s8 + $0x164] ss:$8 sps:$4 sm:$0xff]   ;;  %v15484_v20 = vld [vmem:[%s17800_s8 + $0x40] ss:$8 sps:$4 sm:$0xff]   ;;  %v15486_v22 = vld [vmem:[%s17800_s8 + $0x54] ss:$8 sps:$4 sm:$0xff]  }
 0x164   : > { %5862 = vmatprep.subr.bf16.mxu0 %v20080_v55  ;;  %15402 = vmatprep.subr.bf16.mxu1 %v20080_v55  ;;  %v15485_v21 = vld [vmem:[%s17800_s8 + $0x160] ss:$8 sps:$4 sm:$0xff]   ;;  %v15488_v23 = vld [vmem:[%s17800_s8 + $0x174] ss:$8 sps:$4 sm:$0xff]   ;;  %v15490_v24 = vld [vmem:[%s17800_s8 + $0x50] ss:$8 sps:$4 sm:$0xff]  }
 0x165   : > { %v15491_v25 = vld [vmem:[%s17800_s8 + $0x170] ss:$8 sps:$4 sm:$0xff]   ;;  %v15492_v26 = vld [vmem:[%s17800_s8 + $0x64] ss:$8 sps:$4 sm:$0xff]   ;;  %v15496_v28 = vld [vmem:[%s17800_s8 + $0x60] ss:$8 sps:$4 sm:$0xff]  }
 0x166   : > { %v15494_v27 = vld [vmem:[%s17800_s8 + $0x184] ss:$8 sps:$4 sm:$0xff]   ;;  %v15497_v29 = vld [vmem:[%s17800_s8 + $0x180] ss:$8 sps:$4 sm:$0xff]   ;;  %v15498_v30 = vld [vmem:[%s17800_s8 + $0x74] ss:$8 sps:$4 sm:$0xff]  }
 0x167   : > { %5863 = vmatpush1.bf16.msra.mxu0 %v17807_v58  ;;  %15412 = vmatpush1.bf16.msra.mxu1 %v17807_v58  ;;  %v15500_v31 = vld [vmem:[%s17800_s8 + $0x194] ss:$8 sps:$4 sm:$0xff]   ;;  %v15502_v32 = vld [vmem:[%s17800_s8 + $0x70] ss:$8 sps:$4 sm:$0xff]   ;;  %v15504_v34 = vld [vmem:[%s17800_s8 + $0x84] ss:$8 sps:$4 sm:$0xff]  }
 0x168   : > { %5864 = vmatprep.subr.bf16.mxu0 %v20080_v55  ;;  %15403 = vmatprep.subr.bf16.mxu1 %v20080_v55  ;;  %v15503_v33 = vld [vmem:[%s17800_s8 + $0x190] ss:$8 sps:$4 sm:$0xff]   ;;  %v15506_v35 = vld [vmem:[%s17800_s8 + $0x1a4] ss:$8 sps:$4 sm:$0xff]   ;;  %v15508_v36 = vld [vmem:[%s17800_s8 + $0x80] ss:$8 sps:$4 sm:$0xff]  }
 0x169   : > { %v15509_v37 = vld [vmem:[%s17800_s8 + $0x1a0] ss:$8 sps:$4 sm:$0xff]   ;;  %v15510_v38 = vld [vmem:[%s17800_s8 + $0x94] ss:$8 sps:$4 sm:$0xff]   ;;  %v15514_v40 = vld [vmem:[%s17800_s8 + $0x90] ss:$8 sps:$4 sm:$0xff]  }
 0x16a   : > { %v15512_v39 = vld [vmem:[%s17800_s8 + $0x1b4] ss:$8 sps:$4 sm:$0xff]   ;;  %v15515_v41 = vld [vmem:[%s17800_s8 + $0x1b0] ss:$8 sps:$4 sm:$0xff]   ;;  %v15516_v42 = vld [vmem:[%s17800_s8 + $0xa4] ss:$8 sps:$4 sm:$0xff]  }
 0x16b   : > { %5865 = vmatpush1.bf16.msra.mxu0 %v17819_v61  ;;  %15413 = vmatpush1.bf16.msra.mxu1 %v17819_v61  ;;  %v15518_v43 = vld [vmem:[%s17800_s8 + $0x1c4] ss:$8 sps:$4 sm:$0xff]   ;;  %v15520_v44 = vld [vmem:[%s17800_s8 + $0xa0] ss:$8 sps:$4 sm:$0xff]   ;;  %v15522_v46 = vld [vmem:[%s17800_s8 + $0xb4] ss:$8 sps:$4 sm:$0xff]  }
 0x16c   : > { %5866 = vmatprep.subr.bf16.mxu0 %v20080_v55  ;;  %15404 = vmatprep.subr.bf16.mxu1 %v20080_v55  ;;  %v15521_v45 = vld [vmem:[%s17800_s8 + $0x1c0] ss:$8 sps:$4 sm:$0xff]   ;;  %v15524_v47 = vld [vmem:[%s17800_s8 + $0x1d4] ss:$8 sps:$4 sm:$0xff]   ;;  %v15526_v48 = vld [vmem:[%s17800_s8 + $0xb0] ss:$8 sps:$4 sm:$0xff]  }
 0x16d   : > { %v15527_v49 = vld [vmem:[%s17800_s8 + $0x1d0] ss:$8 sps:$4 sm:$0xff]   ;;  %v15528_v50 = vld [vmem:[%s17800_s8 + $0xc4] ss:$8 sps:$4 sm:$0xff]   ;;  %v15532_v52 = vld [vmem:[%s17800_s8 + $0xc0] ss:$8 sps:$4 sm:$0xff]  }
 0x16e   : > { %v15530_v51 = vld [vmem:[%s17800_s8 + $0x1e4] ss:$8 sps:$4 sm:$0xff]   ;;  %v15533_v53 = vld [vmem:[%s17800_s8 + $0x1e0] ss:$8 sps:$4 sm:$0xff]   ;;  %v15551_v2 = vld [vmem:[%s17800_s8 + $0x210] ss:$8 sps:$4 sm:$0xff]  }
 0x16f   : > { %5867 = vmatpush1.bf16.msra.mxu0 %v17829_v62  ;;  %15414 = vmatpush1.bf16.msra.mxu1 %v17829_v62  ;;  %v15540_v59 = vld [vmem:[%s17800_s8 + $0xe4] ss:$8 sps:$4 sm:$0xff]   ;;  %s20275_s18 = smov (!%p5279_p8, %s5278_s18), 699 }
 0x170   : > { %5868 = vmatprep.subr.bf16.mxu0 %v20080_v55  ;;  %15405 = vmatprep.subr.bf16.mxu1 %v20080_v55  ;;  %v15542_v60 = vld [vmem:[%s17800_s8 + $0x204] ss:$8 sps:$4 sm:$0xff]   ;;  %s13737_s20 = sshll.u32 %s20275_s18, 2 }
 0x171   : > { %s19748_s23 = scalar_lea.vmem %s20079_s3, %s13737_s20 }
 0x173   : > { %5869 = vmatpush1.bf16.msra.mxu0 %v17838_v63  ;;  %15415 = vmatpush1.bf16.msra.mxu1 %v17838_v63 }
 0x174   : > { %5870 = vmatprep.subr.bf16.mxu0 %v20080_v55  ;;  %15406 = vmatprep.subr.bf16.mxu1 %v20080_v55 }
 0x177   : > { %5871 = vmatpush1.bf16.msra.mxu0 %v17847_v0  ;;  %15416 = vmatpush1.bf16.msra.mxu1 %v17847_v0 }
 0x178   : > { %5872 = vmatprep.subr.bf16.mxu0 %v20080_v55  ;;  %15407 = vmatprep.subr.bf16.mxu1 %v20080_v55 }
 0x17b   : > { %5873 = vmatpush1.bf16.msra.mxu0 %v17856_v1  ;;  %15417 = vmatpush1.bf16.msra.mxu1 %v17856_v1 }
 0x17c   : > { %5874 = vmatprep.subr.bf16.mxu0 %v20080_v55  ;;  %15408 = vmatprep.subr.bf16.mxu1 %v20080_v55 }
 0x17f   : > { %5875 = vmatpush1.bf16.msra.mxu0 %v17867_v3  ;;  %15418 = vmatpush1.bf16.msra.mxu1 %v17867_v3 }
 0x180   : > { %7534 = vmatprep.subr.bf16.mxu0 %v20080_v55  ;;  %6660 = vmatprep.subr.bf16.mxu1 %v20080_v55 }
 0x182   : > { %5889 = vmatmul.mubr.bf16.vlgmr.msra.gmra.mrb[0].mxu0 %v15456_v4  ;;  %6033 = vmatmul.mubr.bf16.vlgmr.msra.gmra.mrb[0].mxu1 %v15459_v5  ;;  %v15552_v4 = vld [vmem:[%s17800_s8 + $0x104] ss:$8 sps:$4 sm:$0xff]  }
 0x183   : > { %7535 = vmatpush1.bf16.msra.mxu0 %v17777_v54  ;;  %13819 = vmatprep.mubr.msk.bf16.mxu0 %vm5746_vm0, %v15462_v6  ;;  %v15554_v5 = vld [vmem:[%s17800_s8 + $0x224] ss:$8 sps:$4 sm:$0xff]   ;;  %v15556_v6 = vld [vmem:[%s17800_s8 + $0x100] ss:$8 sps:$4 sm:$0xff]  }
 0x184   : > { %13837 = vmatprep.mubr.msk.bf16.mxu1 %vm5746_vm0, %v15464_v7  ;;  %6661 = vmatpush1.bf16.msra.mxu1 %v17777_v54  ;;  %v15534_v54 = vld [vmem:[%s17800_s8 + $0xd4] ss:$8 sps:$4 sm:$0xff]   ;;  %v15557_v7 = vld [vmem:[%s17800_s8 + $0x220] ss:$8 sps:$4 sm:$0xff]  }
 0x185   : > { %7536 = vmatprep.subr.bf16.mxu0 %v20080_v55  ;;  %6662 = vmatprep.subr.bf16.mxu1 %v20080_v55 }
 0x187   : > { %7537 = vmatpush1.bf16.msra.mxu0 %v17786_v56 }
 0x188   : > { %6663 = vmatpush1.bf16.msra.mxu1 %v17786_v56  ;;  %7538 = vmatprep.subr.bf16.mxu0 %v20080_v55  ;;  %v15536_v56 = vld [vmem:[%s17800_s8 + $0x1f4] ss:$8 sps:$4 sm:$0xff]  }
 0x189   : > { %6664 = vmatprep.subr.bf16.mxu1 %v20080_v55 }
 0x18a   : > { %5897 = vmatmul.mubr.bf16.gmra.mrb[4].mxu0 %v15466_v8  ;;  %6041 = vmatmul.mubr.bf16.gmra.mrb[4].mxu1 %v15467_v9  ;;  %v15558_v8 = vld [vmem:[%s17800_s8 + $0x114] ss:$8 sps:$4 sm:$0xff]  }
 0x18b   : > { %13820 = vmatprep.mubr.msk.bf16.mxu0 %vm5746_vm0, %v15468_v10  ;;  %13838 = vmatprep.mubr.msk.bf16.mxu1 %vm5746_vm0, %v15470_v11  ;;  %v15562_v9 = vld [vmem:[%s17800_s8 + $0x234] ss:$8 sps:$4 sm:$0xff]   ;;  %v15560_v10 = vld [vmem:[%s17800_s8 + $0x230] ss:$8 sps:$4 sm:$0xff]  }
 0x18c   : > { %7539 = vmatpush1.bf16.msra.mxu0 %v17796_v57  ;;  %6665 = vmatpush1.bf16.msra.mxu1 %v17796_v57  ;;  %v15538_v57 = vld [vmem:[%s17800_s8 + $0xd0] ss:$8 sps:$4 sm:$0xff]  }
 0x18d   : > { %7540 = vmatprep.subr.bf16.mxu0 %v20080_v55  ;;  %6666 = vmatprep.subr.bf16.mxu1 %v20080_v55  ;;  %v15563_v11 = vld [vmem:[%s17800_s8 + $0x110] ss:$8 sps:$4 sm:$0xff]  }
 0x190   : > { %7541 = vmatpush1.bf16.msra.mxu0 %v17807_v58  ;;  %6667 = vmatpush1.bf16.msra.mxu1 %v17807_v58  ;;  %v15539_v58 = vld [vmem:[%s17800_s8 + $0x1f0] ss:$8 sps:$4 sm:$0xff]  }
 0x191   : > { %7542 = vmatprep.subr.bf16.mxu0 %v20080_v55  ;;  %6668 = vmatprep.subr.bf16.mxu1 %v20080_v55 }
 0x192   : > { %5905 = vmatmul.mubr.bf16.gmra.mrb[8].mxu0 %v15472_v12  ;;  %6049 = vmatmul.mubr.bf16.gmra.mrb[8].mxu1 %v15473_v13  ;;  %v15564_v12 = vld [vmem:[%s17800_s8 + $0x244] ss:$8 sps:$4 sm:$0xff]  }
 0x193   : > { %13821 = vmatprep.mubr.msk.bf16.mxu0 %vm5746_vm0, %v15474_v14  ;;  %13839 = vmatprep.mubr.msk.bf16.mxu1 %vm5746_vm0, %v15476_v15  ;;  %v15568_v13 = vld [vmem:[%s17800_s8 + $0x464] ss:$8 sps:$4 sm:$0xff]   ;;  %v15566_v14 = vld [vmem:[%s17800_s8 + $0x460] ss:$8 sps:$4 sm:$0xff]  }
 0x194   : > { %7543 = vmatpush1.bf16.msra.mxu0 %v17819_v61  ;;  %6669 = vmatpush1.bf16.msra.mxu1 %v17819_v61  ;;  %v15544_v61 = vld [vmem:[%s17800_s8 + $0xe0] ss:$8 sps:$4 sm:$0xff]  }
 0x195   : > { %7544 = vmatprep.subr.bf16.mxu0 %v20080_v55  ;;  %6670 = vmatprep.subr.bf16.mxu1 %v20080_v55  ;;  %v16401_v15 = vld [vmem:[%s20077_s1] sm:$0xff]  }
 0x198   : > { %7545 = vmatpush1.bf16.msra.mxu0 %v17829_v62  ;;  %6671 = vmatpush1.bf16.msra.mxu1 %v17829_v62  ;;  %v15545_v62 = vld [vmem:[%s17800_s8 + $0x200] ss:$8 sps:$4 sm:$0xff]  }
 0x199   : > { %7546 = vmatprep.subr.bf16.mxu0 %v20080_v55  ;;  %6672 = vmatprep.subr.bf16.mxu1 %v20080_v55 }
 0x19a   : > { %5913 = vmatmul.mubr.bf16.gmra.mrb[12].mxu0 %v15478_v16  ;;  %6057 = vmatmul.mubr.bf16.gmra.mrb[12].mxu1 %v15479_v17  ;;  %v15569_v16 = vld [vmem:[%s17800_s8 + $0x240] ss:$8 sps:$4 sm:$0xff]   ;;  %v15570_v17 = vld [vmem:[%s17800_s8 + $0x254] ss:$8 sps:$4 sm:$0xff]  }
 0x19b   : > { %13822 = vmatprep.mubr.msk.bf16.mxu0 %vm5746_vm0, %v15480_v18  ;;  %13840 = vmatprep.mubr.msk.bf16.mxu1 %vm5746_vm0, %v15482_v19  ;;  %v15572_v18 = vld [vmem:[%s17800_s8 + $0x474] ss:$8 sps:$4 sm:$0xff]  }
 0x19c   : > { %7547 = vmatpush1.bf16.msra.mxu0 %v17838_v63  ;;  %6673 = vmatpush1.bf16.msra.mxu1 %v17838_v63  ;;  %v15546_v63 = vld [vmem:[%s17800_s8 + $0xf4] ss:$8 sps:$4 sm:$0xff]  }
 0x19d   : > { %7548 = vmatprep.subr.bf16.mxu0 %v20080_v55  ;;  %6674 = vmatprep.subr.bf16.mxu1 %v20080_v55  ;;  %v16402_v19 = vld [vmem:[%s20077_s1 + $0x8] sm:$0xff]  }
 0x1a0   : > { %7549 = vmatpush1.bf16.msra.mxu0 %v17847_v0  ;;  %6675 = vmatpush1.bf16.msra.mxu1 %v17847_v0  ;;  %v15548_v0 = vld [vmem:[%s17800_s8 + $0x214] ss:$8 sps:$4 sm:$0xff]  }
 0x1a1   : > { %6676 = vmatprep.subr.bf16.mxu1 %v20080_v55  ;;  %7550 = vmatprep.subr.bf16.mxu0 %v20080_v55 }
 0x1a2   : > { %5921 = vmatmul.mubr.bf16.gmra.mrb[16].mxu0 %v15484_v20  ;;  %6065 = vmatmul.mubr.bf16.gmra.mrb[16].mxu1 %v15485_v21  ;;  %v15574_v20 = vld [vmem:[%s17800_s8 + $0x250] ss:$8 sps:$4 sm:$0xff]  }
 0x1a3   : > { %13823 = vmatprep.mubr.msk.bf16.mxu0 %vm5746_vm0, %v15486_v22  ;;  %13841 = vmatprep.mubr.msk.bf16.mxu1 %vm5746_vm0, %v15488_v23  ;;  %v15575_v21 = vld [vmem:[%s17800_s8 + $0x470] ss:$8 sps:$4 sm:$0xff]   ;;  %v15576_v23 = vld [vmem:[%s17800_s8 + $0x264] ss:$8 sps:$4 sm:$0xff]  }
 0x1a4   : > { %6677 = vmatpush1.bf16.msra.mxu1 %v17856_v1  ;;  %7551 = vmatpush1.bf16.msra.mxu0 %v17856_v1  ;;  %v15550_v1 = vld [vmem:[%s17800_s8 + $0xf0] ss:$8 sps:$4 sm:$0xff]  }
 0x1a5   : > { %6678 = vmatprep.subr.bf16.mxu1 %v20080_v55  ;;  %7552 = vmatprep.subr.bf16.mxu0 %v20080_v55  ;;  %v16403_v22 = vld [vmem:[%s20077_s1 + $0x10] sm:$0xff]  }
 0x1a8   : > { %6679 = vmatpush1.bf16.msra.mxu1 %v17867_v3  ;;  %7553 = vmatpush1.bf16.msra.mxu0 %v17867_v3 }
 0x1a9   : > { %8408 = vmatprep.subr.bf16.mxu1 %v20080_v55  ;;  %9282 = vmatprep.subr.bf16.mxu0 %v20080_v55 }
 0x1aa   : > { %5929 = vmatmul.mubr.bf16.gmra.mrb[20].mxu0 %v15490_v24  ;;  %6073 = vmatmul.mubr.bf16.gmra.mrb[20].mxu1 %v15491_v25  ;;  %v15578_v24 = vld [vmem:[%s17800_s8 + $0x484] ss:$8 sps:$4 sm:$0xff]  }
 0x1ab   : > { %13824 = vmatprep.mubr.msk.bf16.mxu0 %vm5746_vm0, %v15492_v26  ;;  %13842 = vmatprep.mubr.msk.bf16.mxu1 %vm5746_vm0, %v15494_v27  ;;  %v16404_v25 = vld [vmem:[%s20077_s1 + $0x18] sm:$0xff]  }
 0x1ac   : > { %v15580_v26 = vld [vmem:[%s17800_s8 + $0x260] ss:$8 sps:$4 sm:$0xff]  }
 0x1ad   : > { %v15581_v27 = vld [vmem:[%s17800_s8 + $0x480] ss:$8 sps:$4 sm:$0xff]  }
 0x1b2   : > { %5937 = vmatmul.mubr.bf16.gmra.mrb[24].mxu0 %v15496_v28  ;;  %6081 = vmatmul.mubr.bf16.gmra.mrb[24].mxu1 %v15497_v29  ;;  %v16405_v28 = vld [vmem:[%s20077_s1 + $0x20] sm:$0xff]  }
 0x1b3   : > { %13825 = vmatprep.mubr.msk.bf16.mxu0 %vm5746_vm0, %v15498_v30  ;;  %13843 = vmatprep.mubr.msk.bf16.mxu1 %vm5746_vm0, %v15500_v31  ;;  %v15582_v29 = vld [vmem:[%s17800_s8 + $0x274] ss:$8 sps:$4 sm:$0xff]  }
 0x1b4   : > { %v15584_v30 = vld [vmem:[%s17800_s8 + $0x494] ss:$8 sps:$4 sm:$0xff]  }
 0x1b5   : > { %v16406_v31 = vld [vmem:[%s20077_s1 + $0x28] sm:$0xff]  }
 0x1ba   : > { %5945 = vmatmul.mubr.bf16.gmra.mrb[28].mxu0 %v15502_v32  ;;  %6089 = vmatmul.mubr.bf16.gmra.mrb[28].mxu1 %v15503_v33  ;;  %v15586_v32 = vld [vmem:[%s17800_s8 + $0x270] ss:$8 sps:$4 sm:$0xff]  }
 0x1bb   : > { %13826 = vmatprep.mubr.msk.bf16.mxu0 %vm5746_vm0, %v15504_v34  ;;  %13844 = vmatprep.mubr.msk.bf16.mxu1 %vm5746_vm0, %v15506_v35  ;;  %v15587_v33 = vld [vmem:[%s17800_s8 + $0x490] ss:$8 sps:$4 sm:$0xff]   ;;  %v15588_v35 = vld [vmem:[%s17800_s8 + $0x284] ss:$8 sps:$4 sm:$0xff]  }
 0x1bc   : > { %v16407_v34 = vld [vmem:[%s20077_s1 + $0x30] sm:$0xff]  }
 0x1c2   : > { %5953 = vmatmul.mubr.bf16.gmra.mrb[32].mxu0 %v15508_v36  ;;  %6097 = vmatmul.mubr.bf16.gmra.mrb[32].mxu1 %v15509_v37  ;;  %v15590_v36 = vld [vmem:[%s17800_s8 + $0x4a4] ss:$8 sps:$4 sm:$0xff]  }
 0x1c3   : > { %13827 = vmatprep.mubr.msk.bf16.mxu0 %vm5746_vm0, %v15510_v38  ;;  %13845 = vmatprep.mubr.msk.bf16.mxu1 %vm5746_vm0, %v15512_v39  ;;  %v16408_v37 = vld [vmem:[%s20077_s1 + $0x38] sm:$0xff]  }
 0x1c4   : > { %v15592_v38 = vld [vmem:[%s17800_s8 + $0x280] ss:$8 sps:$4 sm:$0xff]  }
 0x1c5   : > { %v15593_v39 = vld [vmem:[%s17800_s8 + $0x4a0] ss:$8 sps:$4 sm:$0xff]  }
 0x1ca   : > { %5961 = vmatmul.mubr.bf16.gmra.mrb[36].mxu0 %v15514_v40  ;;  %6105 = vmatmul.mubr.bf16.gmra.mrb[36].mxu1 %v15515_v41  ;;  %v16409_v40 = vld [vmem:[%s20077_s1 + $0x40] sm:$0xff]  }
 0x1cb   : > { %13828 = vmatprep.mubr.msk.bf16.mxu0 %vm5746_vm0, %v15516_v42  ;;  %13846 = vmatprep.mubr.msk.bf16.mxu1 %vm5746_vm0, %v15518_v43  ;;  %v15594_v41 = vld [vmem:[%s17800_s8 + $0x294] ss:$8 sps:$4 sm:$0xff]   ;;  %v15598_v43 = vld [vmem:[%s17800_s8 + $0x290] ss:$8 sps:$4 sm:$0xff]  }
 0x1cc   : > { %v15596_v42 = vld [vmem:[%s17800_s8 + $0x4b4] ss:$8 sps:$4 sm:$0xff]  }
 0x1d2   : > { %5969 = vmatmul.mubr.bf16.gmra.mrb[40].mxu0 %v15520_v44  ;;  %6113 = vmatmul.mubr.bf16.gmra.mrb[40].mxu1 %v15521_v45  ;;  %v15599_v44 = vld [vmem:[%s17800_s8 + $0x4b0] ss:$8 sps:$4 sm:$0xff]   ;;  %v15600_v45 = vld [vmem:[%s17800_s8 + $0x2a4] ss:$8 sps:$4 sm:$0xff]  }
 0x1d3   : > { %13829 = vmatprep.mubr.msk.bf16.mxu0 %vm5746_vm0, %v15522_v46  ;;  %13847 = vmatprep.mubr.msk.bf16.mxu1 %vm5746_vm0, %v15524_v47  ;;  %v15602_v46 = vld [vmem:[%s17800_s8 + $0x4c4] ss:$8 sps:$4 sm:$0xff]   ;;  %v15604_v47 = vld [vmem:[%s17800_s8 + $0x2a0] ss:$8 sps:$4 sm:$0xff]  }
 0x1da   : > { %5977 = vmatmul.mubr.bf16.gmra.mrb[44].mxu0 %v15526_v48  ;;  %6121 = vmatmul.mubr.bf16.gmra.mrb[44].mxu1 %v15527_v49  ;;  %v15605_v48 = vld [vmem:[%s17800_s8 + $0x4c0] ss:$8 sps:$4 sm:$0xff]   ;;  %v15606_v49 = vld [vmem:[%s17800_s8 + $0x2b4] ss:$8 sps:$4 sm:$0xff]  }
 0x1db   : > { %13830 = vmatprep.mubr.msk.bf16.mxu0 %vm5746_vm0, %v15528_v50  ;;  %13848 = vmatprep.mubr.msk.bf16.mxu1 %vm5746_vm0, %v15530_v51  ;;  %v15608_v50 = vld [vmem:[%s17800_s8 + $0x4d4] ss:$8 sps:$4 sm:$0xff]   ;;  %v15610_v51 = vld [vmem:[%s17800_s8 + $0x2b0] ss:$8 sps:$4 sm:$0xff]  }
 0x1e2   : > { %5985 = vmatmul.mubr.bf16.gmra.mrb[48].mxu0 %v15532_v52  ;;  %6129 = vmatmul.mubr.bf16.gmra.mrb[48].mxu1 %v15533_v53  ;;  %v15611_v52 = vld [vmem:[%s17800_s8 + $0x4d0] ss:$8 sps:$4 sm:$0xff]   ;;  %v15612_v53 = vld [vmem:[%s17800_s8 + $0x2c4] ss:$8 sps:$4 sm:$0xff]  }
 0x1e3   : > { %13831 = vmatprep.mubr.msk.bf16.mxu0 %vm5746_vm0, %v15534_v54  ;;  %13849 = vmatprep.mubr.msk.bf16.mxu1 %vm5746_vm0, %v15536_v56  ;;  %v15614_v54 = vld [vmem:[%s17800_s8 + $0x4e4] ss:$8 sps:$4 sm:$0xff]   ;;  %v15616_v56 = vld [vmem:[%s17800_s8 + $0x2c0] ss:$8 sps:$4 sm:$0xff]  }
 0x1ea   : > { %5993 = vmatmul.mubr.bf16.gmra.mrb[52].mxu0 %v15538_v57  ;;  %6137 = vmatmul.mubr.bf16.gmra.mrb[52].mxu1 %v15539_v58  ;;  %v15617_v57 = vld [vmem:[%s17800_s8 + $0x4e0] ss:$8 sps:$4 sm:$0xff]   ;;  %v15618_v58 = vld [vmem:[%s17800_s8 + $0x2d4] ss:$8 sps:$4 sm:$0xff]  }
 0x1eb   : > { %13832 = vmatprep.mubr.msk.bf16.mxu0 %vm5746_vm0, %v15540_v59  ;;  %13850 = vmatprep.mubr.msk.bf16.mxu1 %vm5746_vm0, %v15542_v60  ;;  %v15620_v59 = vld [vmem:[%s17800_s8 + $0x4f4] ss:$8 sps:$4 sm:$0xff]   ;;  %v15622_v60 = vld [vmem:[%s17800_s8 + $0x2d0] ss:$8 sps:$4 sm:$0xff]  }
 0x1f2   : > { %6001 = vmatmul.mubr.bf16.gmra.mrb[56].mxu0 %v15544_v61  ;;  %6145 = vmatmul.mubr.bf16.gmra.mrb[56].mxu1 %v15545_v62  ;;  %v15623_v61 = vld [vmem:[%s17800_s8 + $0x4f0] ss:$8 sps:$4 sm:$0xff]  }
 0x1f3   : > { %13833 = vmatprep.mubr.msk.bf16.mxu0 %vm5746_vm0, %v15546_v63  ;;  %13851 = vmatprep.mubr.msk.bf16.mxu1 %vm5746_vm0, %v15548_v0 }
 0x1fa   : > { %6009 = vmatmul.mubr.bf16.gmra.mrb[60].mxu0 %v15550_v1  ;;  %6153 = vmatmul.mubr.bf16.gmra.mrb[60].mxu1 %v15551_v2 }
 0x1fb   : > { %13834 = vmatprep.mubr.msk.bf16.mxu0 %vm5746_vm0, %v15552_v4  ;;  %13852 = vmatprep.mubr.msk.bf16.mxu1 %vm5746_vm0, %v15554_v5  ;;  %v15624_v5 = vld [vmem:[%s17800_s8 + $0x2e4] ss:$8 sps:$4 sm:$0xff]  }
 0x202   : > { %6017 = vmatmul.mubr.bf16.gmra.mrb[64].mxu0 %v15556_v6  ;;  %6161 = vmatmul.mubr.bf16.gmra.mrb[64].mxu1 %v15557_v7  ;;  %v15626_v6 = vld [vmem:[%s17800_s8 + $0x504] ss:$8 sps:$4 sm:$0xff]  }
 0x203   : > { %13835 = vmatprep.mubr.msk.bf16.mxu0 %vm5746_vm0, %v15558_v8  ;;  %13993 = vmatprep.mubr.msk.bf16.mxu1 %vm5746_vm0, %v15562_v9  ;;  %v15628_v9 = vld [vmem:[%s17800_s8 + $0x2e0] ss:$8 sps:$4 sm:$0xff]  }
 0x20a   : > { %6025 = vmatmul.mubr.bf16.gmra.mrb[68].mxu0 %v15563_v11  ;;  %6693 = vmatmul.mubr.bf16.vlgmr.msra.gmra.mrb[68].mxu1 %v15560_v10  ;;  %v15629_v10 = vld [vmem:[%s17800_s8 + $0x500] ss:$8 sps:$4 sm:$0xff]  }
 0x20b   : > { %13994 = vmatprep.mubr.msk.bf16.mxu1 %vm5746_vm0, %v15564_v12  ;;  %14168 = vmatprep.mubr.msk.bf16.mxu0 %vm5746_vm0, %v15568_v13 }
 0x20c   : > { %8409 = vmatpush1.bf16.msra.mxu1 %v16401_v15 }
 0x20d   : > { %8410 = vmatprep.subr.bf16.mxu1 %v20080_v55 }
 0x210   : > { %8411 = vmatpush1.bf16.msra.mxu1 %v16402_v19 }
 0x211   : > { %8412 = vmatprep.subr.bf16.mxu1 %v20080_v55 }
 0x212   : > { %6701 = vmatmul.mubr.bf16.gmra.mrb[72].mxu1 %v15569_v16  ;;  %7567 = vmatmul.mubr.bf16.vlgmr.msra.gmra.mrb[72].mxu0 %v15566_v14 }
 0x213   : > { %9283 = vmatpush1.bf16.msra.mxu0 %v16401_v15  ;;  %13995 = vmatprep.mubr.msk.bf16.mxu1 %vm5746_vm0, %v15570_v17  ;;  %v15630_v17 = vld [vmem:[%s17800_s8 + $0x2f4] ss:$8 sps:$4 sm:$0xff]  }
 0x214   : > { %14169 = vmatprep.mubr.msk.bf16.mxu0 %vm5746_vm0, %v15572_v18  ;;  %9284 = vmatprep.subr.bf16.mxu0 %v20080_v55  ;;  %v15632_v18 = vld [vmem:[%s17800_s8 + $0x514] ss:$8 sps:$4 sm:$0xff]  }
 0x215   : > { %8413 = vmatpush1.bf16.msra.mxu1 %v16403_v22 }
 0x216   : > { %8414 = vmatprep.subr.bf16.mxu1 %v20080_v55 }
 0x217   : > { %9285 = vmatpush1.bf16.msra.mxu0 %v16402_v19 }
 0x218   : > { %9286 = vmatprep.subr.bf16.mxu0 %v20080_v55 }
 0x219   : > { %8415 = vmatpush1.bf16.msra.mxu1 %v16404_v25 }
 0x21a   : > { %6709 = vmatmul.mubr.bf16.gmra.mrb[76].mxu1 %v15574_v20  ;;  %7575 = vmatmul.mubr.bf16.gmra.mrb[76].mxu0 %v15575_v21  ;;  %v15634_v21 = vld [vmem:[%s17800_s8 + $0x2f0] ss:$8 sps:$4 sm:$0xff]  }
 0x21b   : > { %13996 = vmatprep.mubr.msk.bf16.mxu1 %vm5746_vm0, %v15576_v23  ;;  %14170 = vmatprep.mubr.msk.bf16.mxu0 %vm5746_vm0, %v15578_v24 }
 0x21c   : > { %9287 = vmatpush1.bf16.msra.mxu0 %v16403_v22  ;;  %8416 = vmatprep.subr.bf16.mxu1 %v20080_v55  ;;  %v15635_v22 = vld [vmem:[%s17800_s8 + $0x510] ss:$8 sps:$4 sm:$0xff]  }
 0x21d   : > { %9288 = vmatprep.subr.bf16.mxu0 %v20080_v55  ;;  %8417 = vmatpush1.bf16.msra.mxu1 %v16405_v28 }
 0x21e   : > { %8418 = vmatprep.subr.bf16.mxu1 %v20080_v55 }
 0x220   : > { %9289 = vmatpush1.bf16.msra.mxu0 %v16404_v25 }
 0x221   : > { %9290 = vmatprep.subr.bf16.mxu0 %v20080_v55  ;;  %8419 = vmatpush1.bf16.msra.mxu1 %v16406_v31 }
 0x222   : > { %6717 = vmatmul.mubr.bf16.gmra.mrb[80].mxu1 %v15580_v26  ;;  %7583 = vmatmul.mubr.bf16.gmra.mrb[80].mxu0 %v15581_v27 }
 0x223   : > { %13997 = vmatprep.mubr.msk.bf16.mxu1 %vm5746_vm0, %v15582_v29  ;;  %14171 = vmatprep.mubr.msk.bf16.mxu0 %vm5746_vm0, %v15584_v30  ;;  %v15636_v29 = vld [vmem:[%s17800_s8 + $0x304] ss:$8 sps:$4 sm:$0xff]  }
 0x224   : > { %9291 = vmatpush1.bf16.msra.mxu0 %v16405_v28  ;;  %8420 = vmatprep.subr.bf16.mxu1 %v20080_v55  ;;  %v15638_v30 = vld [vmem:[%s17800_s8 + $0x524] ss:$8 sps:$4 sm:$0xff]  }
 0x225   : > { %9292 = vmatprep.subr.bf16.mxu0 %v20080_v55  ;;  %8421 = vmatpush1.bf16.msra.mxu1 %v16407_v34 }
 0x226   : > { %8422 = vmatprep.subr.bf16.mxu1 %v20080_v55 }
 0x228   : > { %9293 = vmatpush1.bf16.msra.mxu0 %v16406_v31 }
 0x229   : > { %9294 = vmatprep.subr.bf16.mxu0 %v20080_v55  ;;  %8423 = vmatpush1.bf16.msra.mxu1 %v16408_v37 }
 0x22a   : > { %6725 = vmatmul.mubr.bf16.gmra.mrb[84].mxu1 %v15586_v32  ;;  %7591 = vmatmul.mubr.bf16.gmra.mrb[84].mxu0 %v15587_v33  ;;  %v15640_v33 = vld [vmem:[%s17800_s8 + $0x300] ss:$8 sps:$4 sm:$0xff]  }
 0x22b   : > { %13998 = vmatprep.mubr.msk.bf16.mxu1 %vm5746_vm0, %v15588_v35  ;;  %14172 = vmatprep.mubr.msk.bf16.mxu0 %vm5746_vm0, %v15590_v36 }
 0x22c   : > { %9295 = vmatpush1.bf16.msra.mxu0 %v16407_v34  ;;  %8424 = vmatprep.subr.bf16.mxu1 %v20080_v55  ;;  %v15641_v34 = vld [vmem:[%s17800_s8 + $0x520] ss:$8 sps:$4 sm:$0xff]  }
 0x22d   : > { %9296 = vmatprep.subr.bf16.mxu0 %v20080_v55  ;;  %8425 = vmatpush1.bf16.msra.mxu1 %v16409_v40 }
 0x22e   : > { %8426 = vmatprep.subr.bf16.mxu1 %v20080_v55 }
 0x230   : > { %9297 = vmatpush1.bf16.msra.mxu0 %v16408_v37 }
 0x231   : > { %9298 = vmatprep.subr.bf16.mxu0 %v20080_v55  ;;  %8427 = vmatpush1.bf16.msra.mxu1 %v17867_v3 }
 0x232   : > { %6733 = vmatmul.mubr.bf16.gmra.mrb[88].mxu1 %v15592_v38  ;;  %7599 = vmatmul.mubr.bf16.gmra.mrb[88].mxu0 %v15593_v39 }
 0x233   : > { %13999 = vmatprep.mubr.msk.bf16.mxu1 %vm5746_vm0, %v15594_v41  ;;  %14173 = vmatprep.mubr.msk.bf16.mxu0 %vm5746_vm0, %v15596_v42  ;;  %v15642_v41 = vld [vmem:[%s17800_s8 + $0x314] ss:$8 sps:$4 sm:$0xff]  }
 0x234   : > { %9299 = vmatpush1.bf16.msra.mxu0 %v16409_v40  ;;  %10156 = vmatprep.subr.bf16.mxu1 %v20080_v55  ;;  %v15644_v42 = vld [vmem:[%s17800_s8 + $0x534] ss:$8 sps:$4 sm:$0xff]  }
 0x235   : > { %9300 = vmatprep.subr.bf16.mxu0 %v20080_v55 }
 0x238   : > { %9301 = vmatpush1.bf16.msra.mxu0 %v17867_v3 }
 0x239   : > { %11030 = vmatprep.subr.bf16.mxu0 %v20080_v55  ;;  %v15700_v55 = vld [vmem:[%s17800_s8 + $0x3a0] ss:$8 sps:$4 sm:$0xff]  }
 0x23a   : > { %6741 = vmatmul.mubr.bf16.gmra.mrb[92].mxu1 %v15598_v43  ;;  %7607 = vmatmul.mubr.bf16.gmra.mrb[92].mxu0 %v15599_v44 }
 0x23b   : > { %14000 = vmatprep.mubr.msk.bf16.mxu1 %vm5746_vm0, %v15600_v45  ;;  %14174 = vmatprep.mubr.msk.bf16.mxu0 %vm5746_vm0, %v15602_v46 }
 0x242   : > { %6749 = vmatmul.mubr.bf16.gmra.mrb[96].mxu1 %v15604_v47  ;;  %7615 = vmatmul.mubr.bf16.gmra.mrb[96].mxu0 %v15605_v48 }
 0x243   : > { %14001 = vmatprep.mubr.msk.bf16.mxu1 %vm5746_vm0, %v15606_v49  ;;  %14175 = vmatprep.mubr.msk.bf16.mxu0 %vm5746_vm0, %v15608_v50  ;;  %v15646_v49 = vld [vmem:[%s17800_s8 + $0x310] ss:$8 sps:$4 sm:$0xff]  }
 0x244   : > { %v15647_v50 = vld [vmem:[%s17800_s8 + $0x530] ss:$8 sps:$4 sm:$0xff]  }
 0x24a   : > { %6757 = vmatmul.mubr.bf16.gmra.mrb[100].mxu1 %v15610_v51  ;;  %7623 = vmatmul.mubr.bf16.gmra.mrb[100].mxu0 %v15611_v52 }
 0x24b   : > { %14002 = vmatprep.mubr.msk.bf16.mxu1 %vm5746_vm0, %v15612_v53  ;;  %14176 = vmatprep.mubr.msk.bf16.mxu0 %vm5746_vm0, %v15614_v54  ;;  %v15648_v53 = vld [vmem:[%s17800_s8 + $0x324] ss:$8 sps:$4 sm:$0xff]  }
 0x24c   : > { %v15650_v54 = vld [vmem:[%s17800_s8 + $0x544] ss:$8 sps:$4 sm:$0xff]  }
 0x252   : > { %6765 = vmatmul.mubr.bf16.gmra.mrb[104].mxu1 %v15616_v56  ;;  %7631 = vmatmul.mubr.bf16.gmra.mrb[104].mxu0 %v15617_v57 }
 0x253   : > { %14003 = vmatprep.mubr.msk.bf16.mxu1 %vm5746_vm0, %v15618_v58  ;;  %14177 = vmatprep.mubr.msk.bf16.mxu0 %vm5746_vm0, %v15620_v59 }
 0x255   : > { %v18126_v62 = vpop.f32.mrb[0].mxu0  ;;  %v18128_v63 = vpop.f32.mrb[0].mxu1 }
 0x256   : > { %v5892_v0 = vpop.f32.mrb[1].mxu0  ;;  %v6036_v1 = vpop.f32.mrb[1].mxu1 }
 0x257   : > { %v18130_v2 = vpop.f32.mrb[2].mxu0  ;;  %v18132_v4 = vpop.f32.mrb[2].mxu1  ;;  %v15652_v0 = vld [vmem:[%s17800_s8 + $0x320] ss:$8 sps:$4 sm:$0xff]  }
 0x258   : > { %v5895_v7 = vpop.f32.mrb[3].mxu0  ;;  %v6039_v8 = vpop.f32.mrb[3].mxu1  ;;  %v15653_v1 = vld [vmem:[%s17800_s8 + $0x540] ss:$8 sps:$4 sm:$0xff]  }
 0x259   : > { %v15654_v7 = vld [vmem:[%s17800_s8 + $0x334] ss:$8 sps:$4 sm:$0xff]  }
 0x25a   : > { %6773 = vmatmul.mubr.bf16.gmra.mrb[108].mxu1 %v15622_v60  ;;  %7639 = vmatmul.mubr.bf16.gmra.mrb[108].mxu0 %v15623_v61  ;;  %v15656_v8 = vld [vmem:[%s17800_s8 + $0x554] ss:$8 sps:$4 sm:$0xff]  }
 0x25b   : > { %14004 = vmatprep.mubr.msk.bf16.mxu1 %vm5746_vm0, %v15624_v5  ;;  %14178 = vmatprep.mubr.msk.bf16.mxu0 %vm5746_vm0, %v15626_v6 }
 0x25d   : > { %v18140_v11 = vpop.f32.mrb[4].mxu0  ;;  %v18142_v12 = vpop.f32.mrb[4].mxu1 }
 0x25e   : > { %v5900_v13 = vpop.f32.mrb[5].mxu0  ;;  %v6044_v14 = vpop.f32.mrb[5].mxu1 }
 0x25f   : > { %v18144_v15 = vpop.f32.mrb[6].mxu0  ;;  %v18146_v16 = vpop.f32.mrb[6].mxu1 }
 0x260   : > { %v5903_v19 = vpop.f32.mrb[7].mxu0  ;;  %v6047_v20 = vpop.f32.mrb[7].mxu1 }
 0x261   : > { %v15658_v19 = vld [vmem:[%s17800_s8 + $0x330] ss:$8 sps:$4 sm:$0xff]  }
 0x262   : > { %6781 = vmatmul.mubr.bf16.gmra.mrb[112].mxu1 %v15628_v9  ;;  %7647 = vmatmul.mubr.bf16.gmra.mrb[112].mxu0 %v15629_v10  ;;  %v15659_v20 = vld [vmem:[%s17800_s8 + $0x550] ss:$8 sps:$4 sm:$0xff]  }
 0x263   : > { %14005 = vmatprep.mubr.msk.bf16.mxu1 %vm5746_vm0, %v15630_v17  ;;  %14179 = vmatprep.mubr.msk.bf16.mxu0 %vm5746_vm0, %v15632_v18 }
 0x265   : > { %v18154_v23 = vpop.f32.mrb[8].mxu0  ;;  %v18156_v24 = vpop.f32.mrb[8].mxu1 }
 0x266   : > { %v5908_v25 = vpop.f32.mrb[9].mxu0  ;;  %v6052_v26 = vpop.f32.mrb[9].mxu1 }
 0x267   : > { %v18158_v27 = vpop.f32.mrb[10].mxu0  ;;  %v18160_v28 = vpop.f32.mrb[10].mxu1  ;;  %v15660_v25 = vld [vmem:[%s17800_s8 + $0x344] ss:$8 sps:$4 sm:$0xff]  }
 0x268   : > { %v5911_v31 = vpop.f32.mrb[11].mxu0  ;;  %v6055_v32 = vpop.f32.mrb[11].mxu1  ;;  %v15662_v26 = vld [vmem:[%s17800_s8 + $0x564] ss:$8 sps:$4 sm:$0xff]  }
 0x26a   : > { %6789 = vmatmul.mubr.bf16.gmra.mrb[116].mxu1 %v15634_v21  ;;  %7655 = vmatmul.mubr.bf16.gmra.mrb[116].mxu0 %v15635_v22 }
 0x26b   : > { %14006 = vmatprep.mubr.msk.bf16.mxu1 %vm5746_vm0, %v15636_v29  ;;  %14180 = vmatprep.mubr.msk.bf16.mxu0 %vm5746_vm0, %v15638_v30 }
 0x26d   : > { %v18168_v35 = vpop.f32.mrb[12].mxu0  ;;  %v18170_v36 = vpop.f32.mrb[12].mxu1 }
 0x26e   : > { %v5916_v37 = vpop.f32.mrb[13].mxu0  ;;  %v6060_v38 = vpop.f32.mrb[13].mxu1 }
 0x26f   : > { %v18172_v39 = vpop.f32.mrb[14].mxu0  ;;  %v18174_v40 = vpop.f32.mrb[14].mxu1  ;;  %v15664_v37 = vld [vmem:[%s17800_s8 + $0x340] ss:$8 sps:$4 sm:$0xff]  }
 0x270   : > { %v5919_v43 = vpop.f32.mrb[15].mxu0  ;;  %v6063_v44 = vpop.f32.mrb[15].mxu1  ;;  %v15665_v38 = vld [vmem:[%s17800_s8 + $0x560] ss:$8 sps:$4 sm:$0xff]  }
 0x271   : > { %v15666_v43 = vld [vmem:[%s17800_s8 + $0x354] ss:$8 sps:$4 sm:$0xff]  }
 0x272   : > { %6797 = vmatmul.mubr.bf16.gmra.mrb[120].mxu1 %v15640_v33  ;;  %7663 = vmatmul.mubr.bf16.gmra.mrb[120].mxu0 %v15641_v34  ;;  %v15668_v44 = vld [vmem:[%s17800_s8 + $0x574] ss:$8 sps:$4 sm:$0xff]  }
 0x273   : > { %14007 = vmatprep.mubr.msk.bf16.mxu1 %vm5746_vm0, %v15642_v41  ;;  %14181 = vmatprep.mubr.msk.bf16.mxu0 %vm5746_vm0, %v15644_v42 }
 0x275   : > { %v18180_v45 = vpop.f32.mrb[16].mxu0  ;;  %v18182_v46 = vpop.f32.mrb[16].mxu1 }
 0x276   : > { %v5924_v47 = vpop.f32.mrb[17].mxu0  ;;  %v6068_v48 = vpop.f32.mrb[17].mxu1 }
 0x277   : > { %v18186_v51 = vpop.f32.mrb[18].mxu0  ;;  %v18188_v52 = vpop.f32.mrb[18].mxu1 }
 0x278   : > { %v5927_v56 = vpop.f32.mrb[19].mxu0  ;;  %v6071_v57 = vpop.f32.mrb[19].mxu1 }
 0x279   : > { %v15670_v56 = vld [vmem:[%s17800_s8 + $0x350] ss:$8 sps:$4 sm:$0xff]  }
 0x27a   : > { %6805 = vmatmul.mubr.bf16.gmra.mrb[124].mxu1 %v15646_v49  ;;  %7671 = vmatmul.mubr.bf16.gmra.mrb[124].mxu0 %v15647_v50  ;;  %v15671_v57 = vld [vmem:[%s17800_s8 + $0x570] ss:$8 sps:$4 sm:$0xff]  }
 0x27b   : > { %14008 = vmatprep.mubr.msk.bf16.mxu1 %vm5746_vm0, %v15648_v53  ;;  %14182 = vmatprep.mubr.msk.bf16.mxu0 %vm5746_vm0, %v15650_v54 }
 0x27d   : > { %v18194_v58 = vpop.f32.mrb[20].mxu0  ;;  %v18196_v59 = vpop.f32.mrb[20].mxu1 }
 0x27e   : > { %v5932_v60 = vpop.f32.mrb[21].mxu0  ;;  %v6076_v61 = vpop.f32.mrb[21].mxu1 }
 0x27f   : > { %v18200_v5 = vpop.f32.mrb[22].mxu0  ;;  %v18202_v6 = vpop.f32.mrb[22].mxu1 }
 0x280   : > { %20082 = vst [vmem:[#allocation3_spill] sm:$0xff] %v18202_v6  ;;  %v5935_v9 = vpop.f32.mrb[23].mxu0  ;;  %v6079_v10 = vpop.f32.mrb[23].mxu1 }
 0x282   : > { %6813 = vmatmul.mubr.bf16.gmra.mrb[128].mxu1 %v15652_v0  ;;  %7679 = vmatmul.mubr.bf16.gmra.mrb[128].mxu0 %v15653_v1  ;;  %v15672_v0 = vld [vmem:[%s17800_s8 + $0x364] ss:$8 sps:$4 sm:$0xff]  }
 0x283   : > { %14009 = vmatprep.mubr.msk.bf16.mxu1 %vm5746_vm0, %v15654_v7  ;;  %14183 = vmatprep.mubr.msk.bf16.mxu0 %vm5746_vm0, %v15656_v8  ;;  %v15674_v1 = vld [vmem:[%s17800_s8 + $0x584] ss:$8 sps:$4 sm:$0xff]  }
 0x285   : > { %v18208_v13 = vpop.f32.mrb[24].mxu0  ;;  %v18210_v14 = vpop.f32.mrb[24].mxu1 }
 0x286   : > { %20083 = vst [vmem:[#allocation4_spill] sm:$0xff] %v18210_v14  ;;  %v5940_v17 = vpop.f32.mrb[25].mxu0  ;;  %v6084_v18 = vpop.f32.mrb[25].mxu1  ;;  %v15730_v14 = vld [vmem:[%s17800_s8 + $0x3f0] ss:$8 sps:$4 sm:$0xff]  }
 0x287   : > { %v18214_v21 = vpop.f32.mrb[26].mxu0  ;;  %v18216_v22 = vpop.f32.mrb[26].mxu1 }
 0x288   : > { %20084 = vst [vmem:[#allocation5_spill] sm:$0xff] %v18216_v22  ;;  %v5943_v29 = vpop.f32.mrb[27].mxu0  ;;  %v6087_v30 = vpop.f32.mrb[27].mxu1 }
 0x289   : > { %v15678_v29 = vld [vmem:[%s17800_s8 + $0x374] ss:$8 sps:$4 sm:$0xff]  }
 0x28a   : > { %6821 = vmatmul.mubr.bf16.gmra.mrb[132].mxu1 %v15658_v19  ;;  %7687 = vmatmul.mubr.bf16.gmra.mrb[132].mxu0 %v15659_v20  ;;  %v15676_v19 = vld [vmem:[%s17800_s8 + $0x360] ss:$8 sps:$4 sm:$0xff]   ;;  %v15680_v30 = vld [vmem:[%s17800_s8 + $0x594] ss:$8 sps:$4 sm:$0xff]  }
 0x28b   : > { %14010 = vmatprep.mubr.msk.bf16.mxu1 %vm5746_vm0, %v15660_v25  ;;  %14184 = vmatprep.mubr.msk.bf16.mxu0 %vm5746_vm0, %v15662_v26  ;;  %v15677_v20 = vld [vmem:[%s17800_s8 + $0x580] ss:$8 sps:$4 sm:$0xff]  }
 0x28d   : > { %v18222_v31 = vpop.f32.mrb[28].mxu0  ;;  %v18224_v32 = vpop.f32.mrb[28].mxu1 }
 0x28e   : > { %20085 = vst [vmem:[#allocation6_spill] sm:$0xff] %v18224_v32  ;;  %v5948_v33 = vpop.f32.mrb[29].mxu0  ;;  %v6092_v34 = vpop.f32.mrb[29].mxu1 }
 0x28f   : > { %v18228_v41 = vpop.f32.mrb[30].mxu0  ;;  %v18230_v42 = vpop.f32.mrb[30].mxu1 }
 0x290   : > { %20086 = vst [vmem:[#allocation7_spill] sm:$0xff] %v18230_v42  ;;  %v5951_v47 = vpop.f32.mrb[31].mxu0  ;;  %v6095_v48 = vpop.f32.mrb[31].mxu1 }
 0x291   : > { %v15682_v47 = vld [vmem:[%s17800_s8 + $0x370] ss:$8 sps:$4 sm:$0xff]  }
 0x292   : > { %6829 = vmatmul.mubr.bf16.gmra.mrb[136].mxu1 %v15664_v37  ;;  %7695 = vmatmul.mubr.bf16.gmra.mrb[136].mxu0 %v15665_v38  ;;  %v15683_v48 = vld [vmem:[%s17800_s8 + $0x590] ss:$8 sps:$4 sm:$0xff]  }
 0x293   : > { %14011 = vmatprep.mubr.msk.bf16.mxu1 %vm5746_vm0, %v15666_v43  ;;  %14185 = vmatprep.mubr.msk.bf16.mxu0 %vm5746_vm0, %v15668_v44 }
 0x295   : > { %v18236_v49 = vpop.f32.mrb[32].mxu0  ;;  %v18238_v50 = vpop.f32.mrb[32].mxu1 }
 0x296   : > { %20087 = vst [vmem:[#allocation8_spill] sm:$0xff] %v18238_v50  ;;  %v5956_v53 = vpop.f32.mrb[33].mxu0  ;;  %v6100_v54 = vpop.f32.mrb[33].mxu1  ;;  %v15725_v50 = vld [vmem:[%s17800_s8 + $0x600] ss:$8 sps:$4 sm:$0xff]  }
 0x297   : > { %v18242_v60 = vpop.f32.mrb[34].mxu0  ;;  %v18244_v61 = vpop.f32.mrb[34].mxu1 }
 0x298   : > { %20088 = vst [vmem:[#allocation9_spill] sm:$0xff] %v18244_v61  ;;  %v5959_v7 = vpop.f32.mrb[35].mxu0  ;;  %v6103_v8 = vpop.f32.mrb[35].mxu1 }
 0x29a   : > { %6837 = vmatmul.mubr.bf16.gmra.mrb[140].mxu1 %v15670_v56  ;;  %7703 = vmatmul.mubr.bf16.gmra.mrb[140].mxu0 %v15671_v57  ;;  %v15684_v56 = vld [vmem:[%s17800_s8 + $0x384] ss:$8 sps:$4 sm:$0xff]  }
 0x29b   : > { %14012 = vmatprep.mubr.msk.bf16.mxu1 %vm5746_vm0, %v15672_v0  ;;  %14186 = vmatprep.mubr.msk.bf16.mxu0 %vm5746_vm0, %v15674_v1  ;;  %v15686_v57 = vld [vmem:[%s17800_s8 + $0x5a4] ss:$8 sps:$4 sm:$0xff]  }
 0x29d   : > { %v18250_v9 = vpop.f32.mrb[36].mxu0  ;;  %v18252_v10 = vpop.f32.mrb[36].mxu1 }
 0x29e   : > { %20089 = vst [vmem:[#allocation10_spill] sm:$0xff] %v18252_v10  ;;  %v5964_v17 = vpop.f32.mrb[37].mxu0  ;;  %v6108_v18 = vpop.f32.mrb[37].mxu1 }
 0x29f   : > { %v18256_v25 = vpop.f32.mrb[38].mxu0  ;;  %v18258_v26 = vpop.f32.mrb[38].mxu1 }
 0x2a0   : > { %20090 = vst [vmem:[#allocation11_spill] sm:$0xff] %v18258_v26  ;;  %v5967_v33 = vpop.f32.mrb[39].mxu0  ;;  %v6111_v34 = vpop.f32.mrb[39].mxu1  ;;  %v15718_v26 = vld [vmem:[%s17800_s8 + $0x3d0] ss:$8 sps:$4 sm:$0xff]  }
 0x2a1   : > { %v15690_v33 = vld [vmem:[%s17800_s8 + $0x394] ss:$8 sps:$4 sm:$0xff]  }
 0x2a2   : > { %6845 = vmatmul.mubr.bf16.gmra.mrb[144].mxu1 %v15676_v19  ;;  %7711 = vmatmul.mubr.bf16.gmra.mrb[144].mxu0 %v15677_v20  ;;  %v15688_v19 = vld [vmem:[%s17800_s8 + $0x380] ss:$8 sps:$4 sm:$0xff]   ;;  %v15692_v34 = vld [vmem:[%s17800_s8 + $0x5b4] ss:$8 sps:$4 sm:$0xff]  }
 0x2a3   : > { %14013 = vmatprep.mubr.msk.bf16.mxu1 %vm5746_vm0, %v15678_v29  ;;  %14187 = vmatprep.mubr.msk.bf16.mxu0 %vm5746_vm0, %v15680_v30  ;;  %v15689_v20 = vld [vmem:[%s17800_s8 + $0x5a0] ss:$8 sps:$4 sm:$0xff]  }
 0x2a5   : > { %v18264_v37 = vpop.f32.mrb[40].mxu0  ;;  %v18266_v38 = vpop.f32.mrb[40].mxu1 }
 0x2a6   : > { %20091 = vst [vmem:[#allocation12_spill] sm:$0xff] %v18266_v38  ;;  %v5972_v43 = vpop.f32.mrb[41].mxu0  ;;  %v6116_v44 = vpop.f32.mrb[41].mxu1 }
 0x2a7   : > { %v18270_v53 = vpop.f32.mrb[42].mxu0  ;;  %v18272_v54 = vpop.f32.mrb[42].mxu1 }
 0x2a8   : > { %20092 = vst [vmem:[#allocation13_spill] sm:$0xff] %v18272_v54  ;;  %v5975_v0 = vpop.f32.mrb[43].mxu0  ;;  %v6119_v1 = vpop.f32.mrb[43].mxu1  ;;  %v15712_v54 = vld [vmem:[%s17800_s8 + $0x3c0] ss:$8 sps:$4 sm:$0xff]  }
 0x2a9   : > { %v15694_v0 = vld [vmem:[%s17800_s8 + $0x390] ss:$8 sps:$4 sm:$0xff]  }
 0x2aa   : > { %6853 = vmatmul.mubr.bf16.gmra.mrb[148].mxu1 %v15682_v47  ;;  %7719 = vmatmul.mubr.bf16.gmra.mrb[148].mxu0 %v15683_v48  ;;  %v15695_v1 = vld [vmem:[%s17800_s8 + $0x5b0] ss:$8 sps:$4 sm:$0xff]  }
 0x2ab   : > { %14014 = vmatprep.mubr.msk.bf16.mxu1 %vm5746_vm0, %v15684_v56  ;;  %14188 = vmatprep.mubr.msk.bf16.mxu0 %vm5746_vm0, %v15686_v57 }
 0x2ad   : > { %v18278_v7 = vpop.f32.mrb[44].mxu0  ;;  %v18280_v8 = vpop.f32.mrb[44].mxu1 }
 0x2ae   : > { %20093 = vst [vmem:[#allocation14_spill] sm:$0xff] %v18280_v8  ;;  %v5980_v17 = vpop.f32.mrb[45].mxu0  ;;  %v6124_v18 = vpop.f32.mrb[45].mxu1 }
 0x2af   : > { %v18284_v29 = vpop.f32.mrb[46].mxu0  ;;  %v18286_v30 = vpop.f32.mrb[46].mxu1 }
 0x2b0   : > { %20094 = vst [vmem:[#allocation15_spill] sm:$0xff] %v18286_v30  ;;  %v5983_v43 = vpop.f32.mrb[47].mxu0  ;;  %v6127_v44 = vpop.f32.mrb[47].mxu1  ;;  %v15706_v30 = vld [vmem:[%s17800_s8 + $0x3b0] ss:$8 sps:$4 sm:$0xff]  }
 0x2b2   : > { %6861 = vmatmul.mubr.bf16.gmra.mrb[152].mxu1 %v15688_v19  ;;  %7727 = vmatmul.mubr.bf16.gmra.mrb[152].mxu0 %v15689_v20  ;;  %v15696_v19 = vld [vmem:[%s17800_s8 + $0x3a4] ss:$8 sps:$4 sm:$0xff]  }
 0x2b3   : > { %14015 = vmatprep.mubr.msk.bf16.mxu1 %vm5746_vm0, %v15690_v33  ;;  %14189 = vmatprep.mubr.msk.bf16.mxu0 %vm5746_vm0, %v15692_v34  ;;  %v15698_v20 = vld [vmem:[%s17800_s8 + $0x5c4] ss:$8 sps:$4 sm:$0xff]  }
 0x2b5   : > { %v18292_v47 = vpop.f32.mrb[48].mxu0  ;;  %v18294_v48 = vpop.f32.mrb[48].mxu1 }
 0x2b6   : > { %20095 = vst [vmem:[#allocation16_spill] sm:$0xff] %v18294_v48  ;;  %v5988_v56 = vpop.f32.mrb[49].mxu0  ;;  %v6132_v57 = vpop.f32.mrb[49].mxu1 }
 0x2b7   : > { %v18298_v17 = vpop.f32.mrb[50].mxu0  ;;  %v18300_v18 = vpop.f32.mrb[50].mxu1 }
 0x2b8   : > { %20096 = vst [vmem:[#allocation17_spill] sm:$0xff] %v18300_v18  ;;  %v5991_v33 = vpop.f32.mrb[51].mxu0  ;;  %v6135_v34 = vpop.f32.mrb[51].mxu1  ;;  %v15701_v18 = vld [vmem:[%s17800_s8 + $0x5c0] ss:$8 sps:$4 sm:$0xff]  }
 0x2ba   : > { %6869 = vmatmul.mubr.bf16.gmra.mrb[156].mxu1 %v15694_v0  ;;  %7735 = vmatmul.mubr.bf16.gmra.mrb[156].mxu0 %v15695_v1  ;;  %v15702_v0 = vld [vmem:[%s17800_s8 + $0x3b4] ss:$8 sps:$4 sm:$0xff]  }
 0x2bb   : > { %14016 = vmatprep.mubr.msk.bf16.mxu1 %vm5746_vm0, %v15696_v19  ;;  %14190 = vmatprep.mubr.msk.bf16.mxu0 %vm5746_vm0, %v15698_v20  ;;  %v15704_v1 = vld [vmem:[%s17800_s8 + $0x5d4] ss:$8 sps:$4 sm:$0xff]  }
 0x2bd   : > { %v18306_v43 = vpop.f32.mrb[52].mxu0  ;;  %v18308_v44 = vpop.f32.mrb[52].mxu1 }
 0x2be   : > { %20097 = vst [vmem:[#allocation18_spill] sm:$0xff] %v18308_v44  ;;  %v5996_v56 = vpop.f32.mrb[53].mxu0  ;;  %v6140_v57 = vpop.f32.mrb[53].mxu1 }
 0x2bf   : > { %v18312_v48 = vpop.f32.mrb[54].mxu0  ;;  %v18314_v33 = vpop.f32.mrb[54].mxu1 }
 0x2c0   : > { %20098 = vst [vmem:[#allocation19_spill] sm:$0xff] %v18314_v33  ;;  %v5999_v19 = vpop.f32.mrb[55].mxu0  ;;  %v6143_v20 = vpop.f32.mrb[55].mxu1  ;;  %v15707_v33 = vld [vmem:[%s17800_s8 + $0x5d0] ss:$8 sps:$4 sm:$0xff]  }
 0x2c2   : > { %6877 = vmatmul.mubr.bf16.gmra.mrb[160].mxu1 %v15700_v55  ;;  %7743 = vmatmul.mubr.bf16.gmra.mrb[160].mxu0 %v15701_v18  ;;  %v15708_v55 = vld [vmem:[%s17800_s8 + $0x3c4] ss:$8 sps:$4 sm:$0xff]  }
 0x2c3   : > { %14017 = vmatprep.mubr.msk.bf16.mxu1 %vm5746_vm0, %v15702_v0  ;;  %14191 = vmatprep.mubr.msk.bf16.mxu0 %vm5746_vm0, %v15704_v1  ;;  %v15710_v18 = vld [vmem:[%s17800_s8 + $0x5e4] ss:$8 sps:$4 sm:$0xff]  }
 0x2c5   : > { %v18320_v34 = vpop.f32.mrb[56].mxu0  ;;  %v18322_v56 = vpop.f32.mrb[56].mxu1 }
 0x2c6   : > { %20099 = vst [vmem:[#allocation20_spill] sm:$0xff] %v18322_v56  ;;  %v6004_v57 = vpop.f32.mrb[57].mxu0  ;;  %v6148_v44 = vpop.f32.mrb[57].mxu1 }
 0x2c7   : > { %v18326_v8 = vpop.f32.mrb[58].mxu0  ;;  %v18328_v19 = vpop.f32.mrb[58].mxu1 }
 0x2c8   : > { %20100 = vst [vmem:[#allocation21_spill] sm:$0xff] %v18328_v19  ;;  %v6007_v0 = vpop.f32.mrb[59].mxu0  ;;  %v6151_v1 = vpop.f32.mrb[59].mxu1  ;;  %v15713_v19 = vld [vmem:[%s17800_s8 + $0x5e0] ss:$8 sps:$4 sm:$0xff]  }
 0x2ca   : > { %6885 = vmatmul.mubr.bf16.gmra.mrb[164].mxu1 %v15706_v30  ;;  %7751 = vmatmul.mubr.bf16.gmra.mrb[164].mxu0 %v15707_v33  ;;  %v15714_v30 = vld [vmem:[%s17800_s8 + $0x3d4] ss:$8 sps:$4 sm:$0xff]  }
 0x2cb   : > { %14018 = vmatprep.mubr.msk.bf16.mxu1 %vm5746_vm0, %v15708_v55  ;;  %14192 = vmatprep.mubr.msk.bf16.mxu0 %vm5746_vm0, %v15710_v18  ;;  %v15716_v33 = vld [vmem:[%s17800_s8 + $0x5f4] ss:$8 sps:$4 sm:$0xff]  }
 0x2cd   : > { %v18334_v44 = vpop.f32.mrb[60].mxu0  ;;  %v18336_v20 = vpop.f32.mrb[60].mxu1 }
 0x2ce   : > { %20101 = vst [vmem:[#allocation22_spill] sm:$0xff] %v18336_v20  ;;  %v6012_v57 = vpop.f32.mrb[61].mxu0  ;;  %v6156_v56 = vpop.f32.mrb[61].mxu1 }
 0x2cf   : > { %v18340_v38 = vpop.f32.mrb[62].mxu0  ;;  %v18342_v0 = vpop.f32.mrb[62].mxu1 }
 0x2d0   : > { %20102 = vst [vmem:[#allocation23_spill] sm:$0xff] %v18342_v0  ;;  %v6015_v55 = vpop.f32.mrb[63].mxu0  ;;  %v6159_v18 = vpop.f32.mrb[63].mxu1  ;;  %v15719_v0 = vld [vmem:[%s17800_s8 + $0x5f0] ss:$8 sps:$4 sm:$0xff]  }
 0x2d2   : > { %6893 = vmatmul.mubr.bf16.gmra.mrb[168].mxu1 %v15712_v54  ;;  %7759 = vmatmul.mubr.bf16.gmra.mrb[168].mxu0 %v15713_v19  ;;  %v15720_v54 = vld [vmem:[%s17800_s8 + $0x3e4] ss:$8 sps:$4 sm:$0xff]  }
 0x2d3   : > { %14019 = vmatprep.mubr.msk.bf16.mxu1 %vm5746_vm0, %v15714_v30  ;;  %14193 = vmatprep.mubr.msk.bf16.mxu0 %vm5746_vm0, %v15716_v33  ;;  %v15722_v19 = vld [vmem:[%s17800_s8 + $0x604] ss:$8 sps:$4 sm:$0xff]  }
 0x2d5   : > { %v18348_v56 = vpop.f32.mrb[64].mxu0  ;;  %v18350_v1 = vpop.f32.mrb[64].mxu1 }
 0x2d6   : > { %20103 = vst [vmem:[#allocation24_spill] sm:$0xff] %v18350_v1  ;;  %v6020_v57 = vpop.f32.mrb[65].mxu0  ;;  %v6164_v20 = vpop.f32.mrb[65].mxu1 }
 0x2d7   : > { %v18354_v10 = vpop.f32.mrb[66].mxu0  ;;  %v18356_v55 = vpop.f32.mrb[66].mxu1 }
 0x2d8   : > { %20104 = vst [vmem:[#allocation25_spill] sm:$0xff] %v18356_v55  ;;  %v6023_v30 = vpop.f32.mrb[67].mxu0  ;;  %v6167_v33 = vpop.f32.mrb[67].mxu1  ;;  %v15724_v55 = vld [vmem:[%s17800_s8 + $0x3e0] ss:$8 sps:$4 sm:$0xff]  }
 0x2d9   : > { %v15726_v33 = vld [vmem:[%s17800_s8 + $0x3f4] ss:$8 sps:$4 sm:$0xff]  }
 0x2da   : > { %6901 = vmatmul.mubr.bf16.gmra.mrb[172].mxu1 %v15718_v26  ;;  %7767 = vmatmul.mubr.bf16.gmra.mrb[172].mxu0 %v15719_v0  ;;  %v15728_v26 = vld [vmem:[%s17800_s8 + $0x614] ss:$8 sps:$4 sm:$0xff]  }
 0x2db   : > { %14020 = vmatprep.mubr.msk.bf16.mxu1 %vm5746_vm0, %v15720_v54  ;;  %14194 = vmatprep.mubr.msk.bf16.mxu0 %vm5746_vm0, %v15722_v19 }
 0x2dd   : > { %v18362_v20 = vpop.f32.mrb[68].mxu0  ;;  %v6694_v18 = vpop.f32.mrb[68].mxu1 }
 0x2de   : > { %v6973_v57 = vmax.f32 %v18126_v62, %v6694_v18  ;;  %v6028_v1 = vpop.f32.mrb[69].mxu0  ;;  %v6696_v61 = vpop.f32.mrb[69].mxu1 }
 0x2df   : > { %v18367_v42 = vpop.f32.mrb[70].mxu0  ;;  %v6697_v30 = vpop.f32.mrb[70].mxu1 }
 0x2e0   : > { %v6974_v0 = vmax.f32 %v18130_v2, %v6697_v30  ;;  %v6031_v54 = vpop.f32.mrb[71].mxu0  ;;  %v6699_v19 = vpop.f32.mrb[71].mxu1  ;;  %v15731_v2 = vld [vmem:[%s17800_s8 + $0x610] ss:$8 sps:$4 sm:$0xff]  }
 0x2e1   : > { %v15732_v19 = vld [vmem:[%s17800_s8 + $0x404] ss:$8 sps:$4 sm:$0xff]  }
 0x2e2   : > { %6909 = vmatmul.mubr.bf16.gmra.mrb[176].mxu1 %v15724_v55  ;;  %7775 = vmatmul.mubr.bf16.gmra.mrb[176].mxu0 %v15725_v50  ;;  %v15734_v55 = vld [vmem:[%s17800_s8 + $0x624] ss:$8 sps:$4 sm:$0xff]  }
 0x2e3   : > { %14021 = vmatprep.mubr.msk.bf16.mxu1 %vm5746_vm0, %v15726_v33  ;;  %14195 = vmatprep.mubr.msk.bf16.mxu0 %vm5746_vm0, %v15728_v26 }
 0x2e5   : > { %v6702_v62 = vpop.f32.mrb[72].mxu1  ;;  %v7568_v61 = vpop.f32.mrb[72].mxu0 }
 0x2e6   : > { %v6975_v1 = vmax.f32 %v18140_v11, %v6702_v62  ;;  %v18375_v18 = vmax.f32 %v6973_v57, %v7568_v61  ;;  %v6704_v32 = vpop.f32.mrb[73].mxu1  ;;  %v7570_v22 = vpop.f32.mrb[73].mxu0  ;;  %v15737_v61 = vld [vmem:[%s17800_s8 + $0x620] ss:$8 sps:$4 sm:$0xff]  }
 0x2e7   : > { %v6705_v30 = vpop.f32.mrb[74].mxu1  ;;  %v7571_v54 = vpop.f32.mrb[74].mxu0 }
 0x2e8   : > { %v6976_v50 = vmax.f32 %v18144_v15, %v6705_v30  ;;  %v18382_v33 = vmax.f32 %v6974_v0, %v7571_v54  ;;  %v7573_v26 = vpop.f32.mrb[75].mxu0  ;;  %v6707_v6 = vpop.f32.mrb[75].mxu1  ;;  %v15736_v0 = vld [vmem:[%s17800_s8 + $0x400] ss:$8 sps:$4 sm:$0xff]  }
 0x2e9   : > { %v15738_v6 = vld [vmem:[%s17800_s8 + $0x414] ss:$8 sps:$4 sm:$0xff]  }
 0x2ea   : > { %6917 = vmatmul.mubr.bf16.gmra.mrb[180].mxu1 %v15730_v14  ;;  %7783 = vmatmul.mubr.bf16.gmra.mrb[180].mxu0 %v15731_v2  ;;  %v15740_v14 = vld [vmem:[%s17800_s8 + $0x634] ss:$8 sps:$4 sm:$0xff]  }
 0x2eb   : > { %14022 = vmatprep.mubr.msk.bf16.mxu1 %vm5746_vm0, %v15732_v19  ;;  %14196 = vmatprep.mubr.msk.bf16.mxu0 %vm5746_vm0, %v15734_v55 }
 0x2ed   : > { %v6710_v11 = vpop.f32.mrb[76].mxu1  ;;  %v7576_v22 = vpop.f32.mrb[76].mxu0 }
 0x2ee   : > { %v6977_v32 = vmax.f32 %v18154_v23, %v6710_v11  ;;  %v18387_v57 = vmax.f32 %v6975_v1, %v7576_v22  ;;  %v6712_v62 = vpop.f32.mrb[77].mxu1  ;;  %v7578_v15 = vpop.f32.mrb[77].mxu0 }
 0x2ef   : > { %v6713_v30 = vpop.f32.mrb[78].mxu1  ;;  %v7579_v54 = vpop.f32.mrb[78].mxu0  ;;  %v15743_v15 = vld [vmem:[%s17800_s8 + $0x630] ss:$8 sps:$4 sm:$0xff]  }
 0x2f0   : > { %v6978_v2 = vmax.f32 %v18158_v27, %v6713_v30  ;;  %v18394_v19 = vmax.f32 %v6976_v50, %v7579_v54  ;;  %v7581_v55 = vpop.f32.mrb[79].mxu0  ;;  %v6715_v26 = vpop.f32.mrb[79].mxu1  ;;  %v15742_v50 = vld [vmem:[%s17800_s8 + $0x410] ss:$8 sps:$4 sm:$0xff]  }
 0x2f1   : > { %v15744_v55 = vld [vmem:[%s17800_s8 + $0x424] ss:$8 sps:$4 sm:$0xff]  }
 0x2f2   : > { %6925 = vmatmul.mubr.bf16.gmra.mrb[184].mxu1 %v15736_v0  ;;  %7791 = vmatmul.mubr.bf16.gmra.mrb[184].mxu0 %v15737_v61  ;;  %v15746_v0 = vld [vmem:[%s17800_s8 + $0x644] ss:$8 sps:$4 sm:$0xff]  }
 0x2f3   : > { %14023 = vmatprep.mubr.msk.bf16.mxu1 %vm5746_vm0, %v15738_v6  ;;  %14197 = vmatprep.mubr.msk.bf16.mxu0 %vm5746_vm0, %v15740_v14 }
 0x2f5   : > { %v6718_v23 = vpop.f32.mrb[80].mxu1  ;;  %v7584_v1 = vpop.f32.mrb[80].mxu0 }
 0x2f6   : > { %v6979_v11 = vmax.f32 %v18168_v35, %v6718_v23  ;;  %v18399_v22 = vmax.f32 %v6977_v32, %v7584_v1  ;;  %v6720_v62 = vpop.f32.mrb[81].mxu1  ;;  %v7586_v27 = vpop.f32.mrb[81].mxu0 }
 0x2f7   : > { %v6721_v30 = vpop.f32.mrb[82].mxu1  ;;  %v7587_v54 = vpop.f32.mrb[82].mxu0  ;;  %v15749_v27 = vld [vmem:[%s17800_s8 + $0x640] ss:$8 sps:$4 sm:$0xff]  }
 0x2f8   : > { %v6980_v61 = vmax.f32 %v18172_v39, %v6721_v30  ;;  %v18406_v6 = vmax.f32 %v6978_v2, %v7587_v54  ;;  %v7589_v14 = vpop.f32.mrb[83].mxu0  ;;  %v6723_v26 = vpop.f32.mrb[83].mxu1  ;;  %v15748_v2 = vld [vmem:[%s17800_s8 + $0x420] ss:$8 sps:$4 sm:$0xff]  }
 0x2f9   : > { %v15750_v14 = vld [vmem:[%s17800_s8 + $0x434] ss:$8 sps:$4 sm:$0xff]  }
 0x2fa   : > { %6933 = vmatmul.mubr.bf16.gmra.mrb[188].mxu1 %v15742_v50  ;;  %7799 = vmatmul.mubr.bf16.gmra.mrb[188].mxu0 %v15743_v15  ;;  %v15752_v50 = vld [vmem:[%s17800_s8 + $0x654] ss:$8 sps:$4 sm:$0xff]  }
 0x2fb   : > { %14024 = vmatprep.mubr.msk.bf16.mxu1 %vm5746_vm0, %v15744_v55  ;;  %14198 = vmatprep.mubr.msk.bf16.mxu0 %vm5746_vm0, %v15746_v0 }
 0x2fd   : > { %v6726_v35 = vpop.f32.mrb[84].mxu1  ;;  %v7592_v32 = vpop.f32.mrb[84].mxu0 }
 0x2fe   : > { %v6981_v23 = vmax.f32 %v18180_v45, %v6726_v35  ;;  %v18411_v1 = vmax.f32 %v6979_v11, %v7592_v32  ;;  %v6728_v62 = vpop.f32.mrb[85].mxu1  ;;  %v7594_v39 = vpop.f32.mrb[85].mxu0 }
 0x2ff   : > { %v6729_v30 = vpop.f32.mrb[86].mxu1  ;;  %v7595_v54 = vpop.f32.mrb[86].mxu0  ;;  %v15755_v39 = vld [vmem:[%s17800_s8 + $0x650] ss:$8 sps:$4 sm:$0xff]  }
 0x300   : > { %v6982_v15 = vmax.f32 %v18186_v51, %v6729_v30  ;;  %v18418_v55 = vmax.f32 %v6980_v61, %v7595_v54  ;;  %v7597_v0 = vpop.f32.mrb[87].mxu0  ;;  %v6731_v26 = vpop.f32.mrb[87].mxu1  ;;  %v15754_v61 = vld [vmem:[%s17800_s8 + $0x430] ss:$8 sps:$4 sm:$0xff]  }
 0x301   : > { %v15756_v0 = vld [vmem:[%s17800_s8 + $0x444] ss:$8 sps:$4 sm:$0xff]  }
 0x302   : > { %6941 = vmatmul.mubr.bf16.gmra.mrb[192].mxu1 %v15748_v2  ;;  %7807 = vmatmul.mubr.bf16.gmra.mrb[192].mxu0 %v15749_v27  ;;  %v15758_v2 = vld [vmem:[%s17800_s8 + $0x664] ss:$8 sps:$4 sm:$0xff]  }
 0x303   : > { %14025 = vmatprep.mubr.msk.bf16.mxu1 %vm5746_vm0, %v15750_v14  ;;  %14199 = vmatprep.mubr.msk.bf16.mxu0 %vm5746_vm0, %v15752_v50 }
 0x305   : > { %v6734_v45 = vpop.f32.mrb[88].mxu1  ;;  %v7600_v11 = vpop.f32.mrb[88].mxu0 }
 0x306   : > { %v6983_v35 = vmax.f32 %v18194_v58, %v6734_v45  ;;  %v18423_v32 = vmax.f32 %v6981_v23, %v7600_v11  ;;  %v6736_v62 = vpop.f32.mrb[89].mxu1  ;;  %v7602_v51 = vpop.f32.mrb[89].mxu0 }
 0x307   : > { %v6737_v30 = vpop.f32.mrb[90].mxu1  ;;  %v7603_v54 = vpop.f32.mrb[90].mxu0  ;;  %v15761_v51 = vld [vmem:[%s17800_s8 + $0x660] ss:$8 sps:$4 sm:$0xff]  }
 0x308   : > { %v6984_v27 = vmax.f32 %v18200_v5, %v6737_v30  ;;  %v18430_v14 = vmax.f32 %v6982_v15, %v7603_v54  ;;  %v7605_v50 = vpop.f32.mrb[91].mxu0  ;;  %v6739_v26 = vpop.f32.mrb[91].mxu1  ;;  %v15760_v15 = vld [vmem:[%s17800_s8 + $0x440] ss:$8 sps:$4 sm:$0xff]  }
 0x309   : > { %v15762_v50 = vld [vmem:[%s17800_s8 + $0x454] ss:$8 sps:$4 sm:$0xff]  }
 0x30a   : > { %6949 = vmatmul.mubr.bf16.gmra.mrb[196].mxu1 %v15754_v61  ;;  %7815 = vmatmul.mubr.bf16.gmra.mrb[196].mxu0 %v15755_v39  ;;  %v15764_v61 = vld [vmem:[%s17800_s8 + $0x674] ss:$8 sps:$4 sm:$0xff]  }
 0x30b   : > { %14026 = vmatprep.mubr.msk.bf16.mxu1 %vm5746_vm0, %v15756_v0  ;;  %14200 = vmatprep.mubr.msk.bf16.mxu0 %vm5746_vm0, %v15758_v2 }
 0x30d   : > { %v6742_v58 = vpop.f32.mrb[92].mxu1  ;;  %v7608_v23 = vpop.f32.mrb[92].mxu0 }
 0x30e   : > { %v6985_v45 = vmax.f32 %v18208_v13, %v6742_v58  ;;  %v18435_v11 = vmax.f32 %v6983_v35, %v7608_v23  ;;  %v6744_v62 = vpop.f32.mrb[93].mxu1  ;;  %v7610_v5 = vpop.f32.mrb[93].mxu0 }
 0x30f   : > { %v6745_v30 = vpop.f32.mrb[94].mxu1  ;;  %v7611_v54 = vpop.f32.mrb[94].mxu0  ;;  %v15767_v5 = vld [vmem:[%s17800_s8 + $0x670] ss:$8 sps:$4 sm:$0xff]  }
 0x310   : > { %v6986_v39 = vmax.f32 %v18214_v21, %v6745_v30  ;;  %v18442_v0 = vmax.f32 %v6984_v27, %v7611_v54  ;;  %v7613_v2 = vpop.f32.mrb[95].mxu0  ;;  %v6747_v26 = vpop.f32.mrb[95].mxu1  ;;  %v15766_v27 = vld [vmem:[%s17800_s8 + $0x450] ss:$8 sps:$4 sm:$0xff]  }
 0x311   : > { %v15768_v2 = vld [vmem:[%s17800_s8 + $0x684] ss:$8 sps:$4 sm:$0xff]  }
 0x312   : > { %6957 = vmatmul.mubr.bf16.gmra.mrb[200].mxu1 %v15760_v15  ;;  %7823 = vmatmul.mubr.bf16.gmra.mrb[200].mxu0 %v15761_v51  ;;  %v15772_v15 = vld [vmem:[%s17800_s8 + $0x694] ss:$8 sps:$4 sm:$0xff]  }
 0x313   : > { %14027 = vmatprep.mubr.msk.bf16.mxu1 %vm5746_vm0, %v15762_v50  ;;  %14201 = vmatprep.mubr.msk.bf16.mxu0 %vm5746_vm0, %v15764_v61 }
 0x315   : > { %v6750_v13 = vpop.f32.mrb[96].mxu1  ;;  %v7616_v35 = vpop.f32.mrb[96].mxu0 }
 0x316   : > { %v6987_v58 = vmax.f32 %v18222_v31, %v6750_v13  ;;  %v18447_v23 = vmax.f32 %v6985_v45, %v7616_v35  ;;  %v6752_v62 = vpop.f32.mrb[97].mxu1  ;;  %v7618_v21 = vpop.f32.mrb[97].mxu0 }
 0x317   : > { %v6753_v30 = vpop.f32.mrb[98].mxu1  ;;  %v7619_v54 = vpop.f32.mrb[98].mxu0  ;;  %v15773_v21 = vld [vmem:[%s17800_s8 + $0x680] ss:$8 sps:$4 sm:$0xff]  }
 0x318   : > { %v6988_v51 = vmax.f32 %v18228_v41, %v6753_v30  ;;  %v18454_v50 = vmax.f32 %v6986_v39, %v7619_v54  ;;  %v7621_v61 = vpop.f32.mrb[99].mxu0  ;;  %v6755_v26 = vpop.f32.mrb[99].mxu1  ;;  %v15770_v39 = vld [vmem:[%s17800_s8 + $0x690] ss:$8 sps:$4 sm:$0xff]  }
 0x319   : > { %v15774_v61 = vld [vmem:[%s17800_s8 + $0x6a4] ss:$8 sps:$4 sm:$0xff]  }
 0x31a   : > { %6965 = vmatmul.mubr.bf16.gmra.mrb[204].mxu1 %v15766_v27  ;;  %7831 = vmatmul.mubr.bf16.gmra.mrb[204].mxu0 %v15767_v5  ;;  %v15778_v26 = vld [vmem:[%s17800_s8 + $0x8c4] ss:$8 sps:$4 sm:$0xff]  }
 0x31b   : > { %14202 = vmatprep.mubr.msk.bf16.mxu0 %vm5746_vm0, %v15768_v2  ;;  %14343 = vmatprep.mubr.msk.bf16.mxu1 %vm5746_vm0, %v15772_v15 }
 0x31d   : > { %v6758_v31 = vpop.f32.mrb[100].mxu1  ;;  %v7624_v45 = vpop.f32.mrb[100].mxu0 }
 0x31e   : > { %v6989_v13 = vmax.f32 %v18236_v49, %v6758_v31  ;;  %v18459_v35 = vmax.f32 %v6987_v58, %v7624_v45  ;;  %v6760_v62 = vpop.f32.mrb[101].mxu1  ;;  %v7626_v41 = vpop.f32.mrb[101].mxu0  ;;  %v16410_v49 = vld [vmem:[%s20077_s1] sm:$0xff]  }
 0x31f   : > { %v6761_v30 = vpop.f32.mrb[102].mxu1  ;;  %v7627_v54 = vpop.f32.mrb[102].mxu0 }
 0x320   : > { %20105 = vst [vmem:[#allocation26_spill] sm:$0xff] %v18459_v35  ;;  %v6990_v27 = vmax.f32 %v18242_v60, %v6761_v30  ;;  %v18466_v5 = vmax.f32 %v6988_v51, %v7627_v54  ;;  %v7629_v2 = vpop.f32.mrb[103].mxu0  ;;  %v6763_v15 = vpop.f32.mrb[103].mxu1  ;;  %v20107_v51 = vmov 0   ;;  %v15782_v35 = vld [vmem:[%s17800_s8 + $0x8d4] ss:$8 sps:$4 sm:$0xff]  }
 0x322   : > { %20106 = vst [vmem:[#allocation27_spill] sm:$0xff] %v18466_v5  ;;  %7839 = vmatmul.mubr.bf16.gmra.mrb[208].mxu0 %v15773_v21  ;;  %8441 = vmatmul.mubr.bf16.vlgmr.msra.gmra.mrb[208].mxu1 %v15770_v39  ;;  %v15776_v39 = vld [vmem:[%s17800_s8 + $0x8c0] ss:$8 sps:$4 sm:$0xff]  }
 0x323   : > { %14344 = vmatprep.mubr.msk.bf16.mxu1 %vm5746_vm0, %v15774_v61  ;;  %14518 = vmatprep.mubr.msk.bf16.mxu0 %vm5746_vm0, %v15778_v26  ;;  %v15779_v21 = vld [vmem:[%s17800_s8 + $0x6a0] ss:$8 sps:$4 sm:$0xff]   ;;  %v15780_v61 = vld [vmem:[%s17800_s8 + $0x6b4] ss:$8 sps:$4 sm:$0xff]  }
 0x324   : > { %10157 = vmatpush1.bf16.msra.mxu1 %v16410_v49 }
 0x325   : > { %v6766_v58 = vpop.f32.mrb[104].mxu1  ;;  %v7632_v60 = vpop.f32.mrb[104].mxu0  ;;  %10158 = vmatprep.subr.bf16.mxu1 %v20107_v51 }
 0x326   : > { %v6991_v31 = vmax.f32 %v18250_v9, %v6766_v58  ;;  %v18475_v45 = vmax.f32 %v6989_v13, %v7632_v60  ;;  %v6768_v62 = vpop.f32.mrb[105].mxu1  ;;  %v7634_v41 = vpop.f32.mrb[105].mxu0  ;;  %v16411_v9 = vld [vmem:[%s20077_s1 + $0x8] sm:$0xff]  }
 0x327   : > { %v6769_v30 = vpop.f32.mrb[106].mxu1  ;;  %v7635_v54 = vpop.f32.mrb[106].mxu0  ;;  %v15784_v62 = vld [vmem:[%s17800_s8 + $0x6b0] ss:$8 sps:$4 sm:$0xff]  }
 0x328   : > { %v6992_v26 = vmax.f32 %v18256_v25, %v6769_v30  ;;  %v18481_v2 = vmax.f32 %v6990_v27, %v7635_v54  ;;  %v7637_v15 = vpop.f32.mrb[107].mxu0  ;;  %v6771_v5 = vpop.f32.mrb[107].mxu1  ;;  %10159 = vmatpush1.bf16.msra.mxu1 %v16411_v9  ;;  %v16412_v27 = vld [vmem:[%s20077_s1 + $0x10] sm:$0xff]  }
 0x329   : > { %10160 = vmatprep.subr.bf16.mxu1 %v20107_v51  ;;  %v15785_v41 = vld [vmem:[%s17800_s8 + $0x8d0] ss:$8 sps:$4 sm:$0xff]   ;;  %v15788_v30 = vld [vmem:[%s17800_s8 + $0x8e4] ss:$8 sps:$4 sm:$0xff]  }
 0x32a   : > { %20108 = vst [vmem:[#allocation28_spill] sm:$0xff] %v18481_v2  ;;  %8449 = vmatmul.mubr.bf16.gmra.mrb[212].mxu1 %v15779_v21  ;;  %9315 = vmatmul.mubr.bf16.vlgmr.msra.gmra.mrb[212].mxu0 %v15776_v39  ;;  %v15786_v21 = vld [vmem:[%s17800_s8 + $0x6c4] ss:$8 sps:$4 sm:$0xff]  }
 0x32b   : > { %11031 = vmatpush1.bf16.msra.mxu0 %v16410_v49  ;;  %14345 = vmatprep.mubr.msk.bf16.mxu1 %vm5746_vm0, %v15780_v61 }
 0x32c   : > { %14519 = vmatprep.mubr.msk.bf16.mxu0 %vm5746_vm0, %v15782_v35  ;;  %11032 = vmatprep.subr.bf16.mxu0 %v20107_v51 }
 0x32d   : > { %v6774_v25 = vpop.f32.mrb[108].mxu1  ;;  %v7640_v13 = vpop.f32.mrb[108].mxu0  ;;  %10161 = vmatpush1.bf16.msra.mxu1 %v16412_v27 }
 0x32e   : > { %v6993_v5 = vmax.f32 %v18264_v37, %v6774_v25  ;;  %v18495_v58 = vmax.f32 %v6991_v31, %v7640_v13  ;;  %v6776_v49 = vpop.f32.mrb[109].mxu1  ;;  %v7642_v60 = vpop.f32.mrb[109].mxu0  ;;  %10162 = vmatprep.subr.bf16.mxu1 %v20107_v51  ;;  %v16413_v37 = vld [vmem:[%s20077_s1 + $0x18] sm:$0xff]  }
 0x32f   : > { %v6777_v35 = vpop.f32.mrb[110].mxu1  ;;  %v7643_v39 = vpop.f32.mrb[110].mxu0  ;;  %11033 = vmatpush1.bf16.msra.mxu0 %v16411_v9  ;;  %v15791_v49 = vld [vmem:[%s17800_s8 + $0x8e0] ss:$8 sps:$4 sm:$0xff]  }
 0x330   : > { %v6994_v54 = vmax.f32 %v18270_v53, %v6777_v35  ;;  %v18503_v61 = vmax.f32 %v6992_v26, %v7643_v39  ;;  %v7645_v15 = vpop.f32.mrb[111].mxu0  ;;  %v6779_v2 = vpop.f32.mrb[111].mxu1  ;;  %11034 = vmatprep.subr.bf16.mxu0 %v20107_v51  ;;  %v16414_v26 = vld [vmem:[%s20077_s1 + $0x20] sm:$0xff]  }
 0x331   : > { %10163 = vmatpush1.bf16.msra.mxu1 %v16413_v37  ;;  %v15794_v35 = vld [vmem:[%s17800_s8 + $0x8f4] ss:$8 sps:$4 sm:$0xff]  }
 0x332   : > { %8457 = vmatmul.mubr.bf16.gmra.mrb[216].mxu1 %v15784_v62  ;;  %9323 = vmatmul.mubr.bf16.gmra.mrb[216].mxu0 %v15785_v41  ;;  %v15792_v41 = vld [vmem:[%s17800_s8 + $0x6d4] ss:$8 sps:$4 sm:$0xff]  }
 0x333   : > { %14346 = vmatprep.mubr.msk.bf16.mxu1 %vm5746_vm0, %v15786_v21  ;;  %14520 = vmatprep.mubr.msk.bf16.mxu0 %vm5746_vm0, %v15788_v30 }
 0x334   : > { %11035 = vmatpush1.bf16.msra.mxu0 %v16412_v27  ;;  %10164 = vmatprep.subr.bf16.mxu1 %v20107_v51  ;;  %v15790_v27 = vld [vmem:[%s17800_s8 + $0x6c0] ss:$8 sps:$4 sm:$0xff]  }
 0x335   : > { %v6782_v53 = vpop.f32.mrb[112].mxu1  ;;  %v7648_v31 = vpop.f32.mrb[112].mxu0  ;;  %11036 = vmatprep.subr.bf16.mxu0 %v20107_v51  ;;  %10165 = vmatpush1.bf16.msra.mxu1 %v16414_v26 }
 0x336   : > { %v6995_v2 = vmax.f32 %v18278_v7, %v6782_v53  ;;  %v18517_v9 = vmax.f32 %v6993_v5, %v7648_v31  ;;  %v6784_v25 = vpop.f32.mrb[113].mxu1  ;;  %v7650_v13 = vpop.f32.mrb[113].mxu0  ;;  %10166 = vmatprep.subr.bf16.mxu1 %v20107_v51  ;;  %v16415_v7 = vld [vmem:[%s20077_s1 + $0x28] sm:$0xff]  }
 0x337   : > { %v6785_v60 = vpop.f32.mrb[114].mxu1  ;;  %v7651_v62 = vpop.f32.mrb[114].mxu0  ;;  %v15797_v13 = vld [vmem:[%s17800_s8 + $0x8f0] ss:$8 sps:$4 sm:$0xff]  }
 0x338   : > { %v6996_v39 = vmax.f32 %v18284_v29, %v6785_v60  ;;  %v18525_v21 = vmax.f32 %v6994_v54, %v7651_v62  ;;  %v7653_v30 = vpop.f32.mrb[115].mxu0  ;;  %v6787_v15 = vpop.f32.mrb[115].mxu1  ;;  %11037 = vmatpush1.bf16.msra.mxu0 %v16413_v37  ;;  %v16416_v54 = vld [vmem:[%s20077_s1 + $0x30] sm:$0xff]  }
 0x339   : > { %11038 = vmatprep.subr.bf16.mxu0 %v20107_v51  ;;  %10167 = vmatpush1.bf16.msra.mxu1 %v16415_v7  ;;  %v15798_v60 = vld [vmem:[%s17800_s8 + $0x6e4] ss:$8 sps:$4 sm:$0xff]  }
 0x33a   : > { %8465 = vmatmul.mubr.bf16.gmra.mrb[220].mxu1 %v15790_v27  ;;  %9331 = vmatmul.mubr.bf16.gmra.mrb[220].mxu0 %v15791_v49  ;;  %v15800_v62 = vld [vmem:[%s17800_s8 + $0x904] ss:$8 sps:$4 sm:$0xff]  }
 0x33b   : > { %14347 = vmatprep.mubr.msk.bf16.mxu1 %vm5746_vm0, %v15792_v41  ;;  %14521 = vmatprep.mubr.msk.bf16.mxu0 %vm5746_vm0, %v15794_v35 }
 0x33c   : > { %11039 = vmatpush1.bf16.msra.mxu0 %v16414_v26  ;;  %10168 = vmatprep.subr.bf16.mxu1 %v20107_v51  ;;  %v15796_v26 = vld [vmem:[%s17800_s8 + $0x6d0] ss:$8 sps:$4 sm:$0xff]  }
 0x33d   : > { %v6790_v29 = vpop.f32.mrb[116].mxu1  ;;  %v7656_v5 = vpop.f32.mrb[116].mxu0  ;;  %11040 = vmatprep.subr.bf16.mxu0 %v20107_v51  ;;  %10169 = vmatpush1.bf16.msra.mxu1 %v16416_v54 }
 0x33e   : > { %v6997_v37 = vmax.f32 %v18292_v47, %v6790_v29  ;;  %v18539_v53 = vmax.f32 %v6995_v2, %v7656_v5  ;;  %v6792_v31 = vpop.f32.mrb[117].mxu1  ;;  %v7658_v25 = vpop.f32.mrb[117].mxu0  ;;  %10170 = vmatprep.subr.bf16.mxu1 %v20107_v51  ;;  %v16417_v47 = vld [vmem:[%s20077_s1 + $0x38] sm:$0xff]  }
 0x33f   : > { %v6793_v27 = vpop.f32.mrb[118].mxu1  ;;  %v7659_v49 = vpop.f32.mrb[118].mxu0  ;;  %v15803_v25 = vld [vmem:[%s17800_s8 + $0x900] ss:$8 sps:$4 sm:$0xff]  }
 0x340   : > { %v6998_v41 = vmax.f32 %v18298_v17, %v6793_v27  ;;  %v18547_v35 = vmax.f32 %v6996_v39, %v7659_v49  ;;  %v7661_v30 = vpop.f32.mrb[119].mxu0  ;;  %v6795_v15 = vpop.f32.mrb[119].mxu1  ;;  %11041 = vmatpush1.bf16.msra.mxu0 %v16415_v7  ;;  %v16418_v39 = vld [vmem:[%s20077_s1 + $0x40] sm:$0xff]  }
 0x341   : > { %11042 = vmatprep.subr.bf16.mxu0 %v20107_v51  ;;  %10171 = vmatpush1.bf16.msra.mxu1 %v16417_v47  ;;  %v15804_v27 = vld [vmem:[%s17800_s8 + $0x6f4] ss:$8 sps:$4 sm:$0xff]  }
 0x342   : > { %8473 = vmatmul.mubr.bf16.gmra.mrb[224].mxu1 %v15796_v26  ;;  %9339 = vmatmul.mubr.bf16.gmra.mrb[224].mxu0 %v15797_v13  ;;  %v15806_v49 = vld [vmem:[%s17800_s8 + $0x914] ss:$8 sps:$4 sm:$0xff]  }
 0x343   : > { %14348 = vmatprep.mubr.msk.bf16.mxu1 %vm5746_vm0, %v15798_v60  ;;  %14522 = vmatprep.mubr.msk.bf16.mxu0 %vm5746_vm0, %v15800_v62 }
 0x344   : > { %11043 = vmatpush1.bf16.msra.mxu0 %v16416_v54  ;;  %10172 = vmatprep.subr.bf16.mxu1 %v20107_v51  ;;  %v15802_v54 = vld [vmem:[%s17800_s8 + $0x6e0] ss:$8 sps:$4 sm:$0xff]  }
 0x345   : > { %v6798_v17 = vpop.f32.mrb[120].mxu1  ;;  %v7664_v2 = vpop.f32.mrb[120].mxu0  ;;  %11044 = vmatprep.subr.bf16.mxu0 %v20107_v51  ;;  %10173 = vmatpush1.bf16.msra.mxu1 %v16418_v39 }
 0x346   : > { %v6999_v7 = vmax.f32 %v18306_v43, %v6798_v17  ;;  %v18561_v29 = vmax.f32 %v6997_v37, %v7664_v2  ;;  %v6800_v5 = vpop.f32.mrb[121].mxu1  ;;  %v7666_v31 = vpop.f32.mrb[121].mxu0  ;;  %10174 = vmatprep.subr.bf16.mxu1 %v20107_v51  ;;  %v15808_v2 = vld [vmem:[%s17800_s8 + $0x6f0] ss:$8 sps:$4 sm:$0xff]  }
 0x347   : > { %v6801_v26 = vpop.f32.mrb[122].mxu1  ;;  %v7667_v13 = vpop.f32.mrb[122].mxu0  ;;  %v15809_v5 = vld [vmem:[%s17800_s8 + $0x910] ss:$8 sps:$4 sm:$0xff]  }
 0x348   : > { %v7000_v60 = vmax.f32 %v18312_v48, %v6801_v26  ;;  %v18569_v62 = vmax.f32 %v6998_v41, %v7667_v13  ;;  %v7669_v30 = vpop.f32.mrb[123].mxu0  ;;  %v6803_v15 = vpop.f32.mrb[123].mxu1  ;;  %11045 = vmatpush1.bf16.msra.mxu0 %v16417_v47  ;;  %v15812_v26 = vld [vmem:[%s17800_s8 + $0x924] ss:$8 sps:$4 sm:$0xff]  }
 0x349   : > { %11046 = vmatprep.subr.bf16.mxu0 %v20107_v51  ;;  %10175 = vmatpush1.bf16.msra.mxu1 %v17867_v3 }
 0x34a   : > { %8481 = vmatmul.mubr.bf16.gmra.mrb[228].mxu1 %v15802_v54  ;;  %9347 = vmatmul.mubr.bf16.gmra.mrb[228].mxu0 %v15803_v25  ;;  %v15810_v25 = vld [vmem:[%s17800_s8 + $0x704] ss:$8 sps:$4 sm:$0xff]  }
 0x34b   : > { %14349 = vmatprep.mubr.msk.bf16.mxu1 %vm5746_vm0, %v15804_v27  ;;  %14523 = vmatprep.mubr.msk.bf16.mxu0 %vm5746_vm0, %v15806_v49 }
 0x34c   : > { %11047 = vmatpush1.bf16.msra.mxu0 %v16418_v39  ;;  %11904 = vmatprep.subr.bf16.mxu1 %v20107_v51 }
 0x34d   : > { %v6806_v48 = vpop.f32.mrb[124].mxu1  ;;  %v7672_v43 = vpop.f32.mrb[124].mxu0  ;;  %11048 = vmatprep.subr.bf16.mxu0 %v20107_v51 }
 0x34e   : > { %v7001_v37 = vmax.f32 %v18320_v34, %v6806_v48  ;;  %v18578_v41 = vmax.f32 %v6999_v7, %v7672_v43  ;;  %v6808_v47 = vpop.f32.mrb[125].mxu1  ;;  %v7674_v17 = vpop.f32.mrb[125].mxu0  ;;  %v15814_v48 = vld [vmem:[%s17800_s8 + $0x700] ss:$8 sps:$4 sm:$0xff]  }
 0x34f   : > { %v6809_v31 = vpop.f32.mrb[126].mxu1  ;;  %v7675_v54 = vpop.f32.mrb[126].mxu0  ;;  %v15815_v43 = vld [vmem:[%s17800_s8 + $0x920] ss:$8 sps:$4 sm:$0xff]  }
 0x350   : > { %v7002_v39 = vmax.f32 %v18326_v8, %v6809_v31  ;;  %v18585_v13 = vmax.f32 %v7000_v60, %v7675_v54  ;;  %v7677_v27 = vpop.f32.mrb[127].mxu0  ;;  %v6811_v49 = vpop.f32.mrb[127].mxu1  ;;  %11049 = vmatpush1.bf16.msra.mxu0 %v17867_v3  ;;  %v15816_v31 = vld [vmem:[%s17800_s8 + $0x714] ss:$8 sps:$4 sm:$0xff]  }
 0x351   : > { %12778 = vmatprep.subr.bf16.mxu0 %v20107_v51 }
 0x352   : > { %8489 = vmatmul.mubr.bf16.gmra.mrb[232].mxu1 %v15808_v2  ;;  %9355 = vmatmul.mubr.bf16.gmra.mrb[232].mxu0 %v15809_v5  ;;  %v15818_v2 = vld [vmem:[%s17800_s8 + $0x934] ss:$8 sps:$4 sm:$0xff]  }
 0x353   : > { %14350 = vmatprep.mubr.msk.bf16.mxu1 %vm5746_vm0, %v15810_v25  ;;  %14524 = vmatprep.mubr.msk.bf16.mxu0 %vm5746_vm0, %v15812_v26 }
 0x355   : > { %v6814_v34 = vpop.f32.mrb[128].mxu1  ;;  %v7680_v8 = vpop.f32.mrb[128].mxu0 }
 0x356   : > { %v7003_v7 = vmax.f32 %v18334_v44, %v6814_v34  ;;  %v18592_v60 = vmax.f32 %v7001_v37, %v7680_v8  ;;  %v6816_v30 = vpop.f32.mrb[129].mxu1  ;;  %v7682_v15 = vpop.f32.mrb[129].mxu0  ;;  %v15821_v8 = vld [vmem:[%s17800_s8 + $0x930] ss:$8 sps:$4 sm:$0xff]  }
 0x357   : > { %v6817_v47 = vpop.f32.mrb[130].mxu1  ;;  %v7683_v17 = vpop.f32.mrb[130].mxu0 }
 0x358   : > { %v7004_v5 = vmax.f32 %v18340_v38, %v6817_v47  ;;  %v18599_v54 = vmax.f32 %v7002_v39, %v7683_v17  ;;  %v7685_v25 = vpop.f32.mrb[131].mxu0  ;;  %v6819_v26 = vpop.f32.mrb[131].mxu1  ;;  %v15820_v39 = vld [vmem:[%s17800_s8 + $0x710] ss:$8 sps:$4 sm:$0xff]   ;;  %v15822_v47 = vld [vmem:[%s17800_s8 + $0x724] ss:$8 sps:$4 sm:$0xff]  }
 0x35a   : > { %8497 = vmatmul.mubr.bf16.gmra.mrb[236].mxu1 %v15814_v48  ;;  %9363 = vmatmul.mubr.bf16.gmra.mrb[236].mxu0 %v15815_v43  ;;  %v15824_v48 = vld [vmem:[%s17800_s8 + $0x944] ss:$8 sps:$4 sm:$0xff]  }
 0x35b   : > { %14351 = vmatprep.mubr.msk.bf16.mxu1 %vm5746_vm0, %v15816_v31  ;;  %14525 = vmatprep.mubr.msk.bf16.mxu0 %vm5746_vm0, %v15818_v2 }
 0x35d   : > { %v6822_v44 = vpop.f32.mrb[132].mxu1  ;;  %v7688_v37 = vpop.f32.mrb[132].mxu0 }
 0x35e   : > { %v7005_v27 = vmax.f32 %v18348_v56, %v6822_v44  ;;  %v18604_v49 = vmax.f32 %v7003_v7, %v7688_v37  ;;  %v6824_v34 = vpop.f32.mrb[133].mxu1  ;;  %v7690_v38 = vpop.f32.mrb[133].mxu0  ;;  %v15827_v37 = vld [vmem:[%s17800_s8 + $0x940] ss:$8 sps:$4 sm:$0xff]  }
 0x35f   : > { %v6825_v30 = vpop.f32.mrb[134].mxu1  ;;  %v7691_v15 = vpop.f32.mrb[134].mxu0 }
 0x360   : > { %v7006_v43 = vmax.f32 %v18354_v10, %v6825_v30  ;;  %v18611_v17 = vmax.f32 %v7004_v5, %v7691_v15  ;;  %v7693_v31 = vpop.f32.mrb[135].mxu0  ;;  %v6827_v2 = vpop.f32.mrb[135].mxu1  ;;  %v15826_v5 = vld [vmem:[%s17800_s8 + $0x720] ss:$8 sps:$4 sm:$0xff]   ;;  %v15828_v30 = vld [vmem:[%s17800_s8 + $0x734] ss:$8 sps:$4 sm:$0xff]  }
 0x362   : > { %8505 = vmatmul.mubr.bf16.gmra.mrb[240].mxu1 %v15820_v39  ;;  %9371 = vmatmul.mubr.bf16.gmra.mrb[240].mxu0 %v15821_v8  ;;  %v15830_v39 = vld [vmem:[%s17800_s8 + $0x954] ss:$8 sps:$4 sm:$0xff]  }
 0x363   : > { %14352 = vmatprep.mubr.msk.bf16.mxu1 %vm5746_vm0, %v15822_v47  ;;  %14526 = vmatprep.mubr.msk.bf16.mxu0 %vm5746_vm0, %v15824_v48 }
 0x365   : > { %v6830_v56 = vpop.f32.mrb[136].mxu1  ;;  %v7696_v7 = vpop.f32.mrb[136].mxu0 }
 0x366   : > { %v7007_v25 = vmax.f32 %v18362_v20, %v6830_v56  ;;  %v18616_v26 = vmax.f32 %v7005_v27, %v7696_v7  ;;  %v6832_v44 = vpop.f32.mrb[137].mxu1  ;;  %v7698_v10 = vpop.f32.mrb[137].mxu0  ;;  %v15833_v7 = vld [vmem:[%s17800_s8 + $0x950] ss:$8 sps:$4 sm:$0xff]  }
 0x367   : > { %v6833_v34 = vpop.f32.mrb[138].mxu1  ;;  %v7699_v38 = vpop.f32.mrb[138].mxu0 }
 0x368   : > { %v7008_v8 = vmax.f32 %v18367_v42, %v6833_v34  ;;  %v18623_v15 = vmax.f32 %v7006_v43, %v7699_v38  ;;  %v7701_v47 = vpop.f32.mrb[139].mxu0  ;;  %v6835_v48 = vpop.f32.mrb[139].mxu1  ;;  %v15832_v43 = vld [vmem:[%s17800_s8 + $0x730] ss:$8 sps:$4 sm:$0xff]   ;;  %v15834_v34 = vld [vmem:[%s17800_s8 + $0x744] ss:$8 sps:$4 sm:$0xff]  }
 0x36a   : > { %8513 = vmatmul.mubr.bf16.gmra.mrb[244].mxu1 %v15826_v5  ;;  %9379 = vmatmul.mubr.bf16.gmra.mrb[244].mxu0 %v15827_v37  ;;  %v15836_v5 = vld [vmem:[%s17800_s8 + $0x964] ss:$8 sps:$4 sm:$0xff]  }
 0x36b   : > { %14353 = vmatprep.mubr.msk.bf16.mxu1 %vm5746_vm0, %v15828_v30  ;;  %14527 = vmatprep.mubr.msk.bf16.mxu0 %vm5746_vm0, %v15830_v39 }
 0x36d   : > { %v6838_v20 = vpop.f32.mrb[140].mxu1  ;;  %v7704_v27 = vpop.f32.mrb[140].mxu0 }
 0x36e   : > { %v7009_v31 = vmax.f32 %v18128_v63, %v6838_v20  ;;  %v18628_v2 = vmax.f32 %v7007_v25, %v7704_v27  ;;  %v6840_v56 = vpop.f32.mrb[141].mxu1  ;;  %v7706_v42 = vpop.f32.mrb[141].mxu0  ;;  %v15839_v27 = vld [vmem:[%s17800_s8 + $0x960] ss:$8 sps:$4 sm:$0xff]  }
 0x36f   : > { %v6841_v44 = vpop.f32.mrb[142].mxu1  ;;  %v7707_v10 = vpop.f32.mrb[142].mxu0 }
 0x370   : > { %v7010_v37 = vmax.f32 %v18132_v4, %v6841_v44  ;;  %v18635_v38 = vmax.f32 %v7008_v8, %v7707_v10  ;;  %v7709_v30 = vpop.f32.mrb[143].mxu0  ;;  %v6843_v39 = vpop.f32.mrb[143].mxu1  ;;  %v15838_v8 = vld [vmem:[%s17800_s8 + $0x740] ss:$8 sps:$4 sm:$0xff]   ;;  %v15842_v44 = vld [vmem:[%s17800_s8 + $0x754] ss:$8 sps:$4 sm:$0xff]  }
 0x372   : > { %8521 = vmatmul.mubr.bf16.gmra.mrb[248].mxu1 %v15832_v43  ;;  %9387 = vmatmul.mubr.bf16.gmra.mrb[248].mxu0 %v15833_v7  ;;  %v15845_v43 = vld [vmem:[%s17800_s8 + $0x974] ss:$8 sps:$4 sm:$0xff]  }
 0x373   : > { %14354 = vmatprep.mubr.msk.bf16.mxu1 %vm5746_vm0, %v15834_v34  ;;  %14528 = vmatprep.mubr.msk.bf16.mxu0 %vm5746_vm0, %v15836_v5 }
 0x375   : > { %v6846_v63 = vpop.f32.mrb[144].mxu1  ;;  %v7712_v25 = vpop.f32.mrb[144].mxu0 }
 0x376   : > { %v7011_v47 = vmax.f32 %v18142_v12, %v6846_v63  ;;  %v18640_v48 = vmax.f32 %v7009_v31, %v7712_v25  ;;  %v6848_v20 = vpop.f32.mrb[145].mxu1  ;;  %v7714_v4 = vpop.f32.mrb[145].mxu0  ;;  %v15843_v25 = vld [vmem:[%s17800_s8 + $0x970] ss:$8 sps:$4 sm:$0xff]  }
 0x377   : > { %v6849_v56 = vpop.f32.mrb[146].mxu1  ;;  %v7715_v42 = vpop.f32.mrb[146].mxu0 }
 0x378   : > { %v7012_v7 = vmax.f32 %v18146_v16, %v6849_v56  ;;  %v18647_v10 = vmax.f32 %v7010_v37, %v7715_v42  ;;  %v7717_v34 = vpop.f32.mrb[147].mxu0  ;;  %v6851_v5 = vpop.f32.mrb[147].mxu1  ;;  %v15840_v37 = vld [vmem:[%s17800_s8 + $0x750] ss:$8 sps:$4 sm:$0xff]   ;;  %v15848_v56 = vld [vmem:[%s17800_s8 + $0x764] ss:$8 sps:$4 sm:$0xff]  }
 0x37a   : > { %8529 = vmatmul.mubr.bf16.gmra.mrb[252].mxu1 %v15838_v8  ;;  %9395 = vmatmul.mubr.bf16.gmra.mrb[252].mxu0 %v15839_v27  ;;  %v15851_v8 = vld [vmem:[%s17800_s8 + $0x984] ss:$8 sps:$4 sm:$0xff]  }
 0x37b   : > { %14355 = vmatprep.mubr.msk.bf16.mxu1 %vm5746_vm0, %v15842_v44  ;;  %14529 = vmatprep.mubr.msk.bf16.mxu0 %vm5746_vm0, %v15845_v43 }
 0x37d   : > { %v6854_v12 = vpop.f32.mrb[148].mxu1  ;;  %v7720_v31 = vpop.f32.mrb[148].mxu0 }
 0x37e   : > { %v7013_v30 = vmax.f32 %v18156_v24, %v6854_v12  ;;  %v18652_v39 = vmax.f32 %v7011_v47, %v7720_v31  ;;  %v6856_v63 = vpop.f32.mrb[149].mxu1  ;;  %v7722_v16 = vpop.f32.mrb[149].mxu0  ;;  %v15849_v31 = vld [vmem:[%s17800_s8 + $0x980] ss:$8 sps:$4 sm:$0xff]  }
 0x37f   : > { %v6857_v20 = vpop.f32.mrb[150].mxu1  ;;  %v7723_v4 = vpop.f32.mrb[150].mxu0 }
 0x380   : > { %v7014_v27 = vmax.f32 %v18160_v28, %v6857_v20  ;;  %v18659_v42 = vmax.f32 %v7012_v7, %v7723_v4  ;;  %v7725_v44 = vpop.f32.mrb[151].mxu0  ;;  %v6859_v43 = vpop.f32.mrb[151].mxu1  ;;  %v15846_v7 = vld [vmem:[%s17800_s8 + $0x760] ss:$8 sps:$4 sm:$0xff]   ;;  %v15854_v20 = vld [vmem:[%s17800_s8 + $0x774] ss:$8 sps:$4 sm:$0xff]  }
 0x382   : > { %8537 = vmatmul.mubr.bf16.gmra.mrb[0].mxu1 %v15840_v37  ;;  %9403 = vmatmul.mubr.bf16.gmra.mrb[0].mxu0 %v15843_v25  ;;  %v15857_v37 = vld [vmem:[%s17800_s8 + $0x994] ss:$8 sps:$4 sm:$0xff]  }
 0x383   : > { %14356 = vmatprep.mubr.msk.bf16.mxu1 %vm5746_vm0, %v15848_v56  ;;  %14530 = vmatprep.mubr.msk.bf16.mxu0 %vm5746_vm0, %v15851_v8 }
 0x385   : > { %v6862_v24 = vpop.f32.mrb[152].mxu1  ;;  %v7728_v47 = vpop.f32.mrb[152].mxu0 }
 0x386   : > { %v7015_v34 = vmax.f32 %v18170_v36, %v6862_v24  ;;  %v18664_v5 = vmax.f32 %v7013_v30, %v7728_v47  ;;  %v6864_v12 = vpop.f32.mrb[153].mxu1  ;;  %v7730_v28 = vpop.f32.mrb[153].mxu0  ;;  %v15855_v47 = vld [vmem:[%s17800_s8 + $0x990] ss:$8 sps:$4 sm:$0xff]  }
 0x387   : > { %v6865_v63 = vpop.f32.mrb[154].mxu1  ;;  %v7731_v16 = vpop.f32.mrb[154].mxu0 }
 0x388   : > { %v7016_v25 = vmax.f32 %v18174_v40, %v6865_v63  ;;  %v18671_v4 = vmax.f32 %v7014_v27, %v7731_v16  ;;  %v7733_v56 = vpop.f32.mrb[155].mxu0  ;;  %v6867_v8 = vpop.f32.mrb[155].mxu1  ;;  %v15852_v27 = vld [vmem:[%s17800_s8 + $0x770] ss:$8 sps:$4 sm:$0xff]   ;;  %v15860_v63 = vld [vmem:[%s17800_s8 + $0x784] ss:$8 sps:$4 sm:$0xff]  }
 0x38a   : > { %8545 = vmatmul.mubr.bf16.gmra.mrb[4].mxu1 %v15846_v7  ;;  %9411 = vmatmul.mubr.bf16.gmra.mrb[4].mxu0 %v15849_v31  ;;  %v15863_v7 = vld [vmem:[%s17800_s8 + $0x9a4] ss:$8 sps:$4 sm:$0xff]  }
 0x38b   : > { %14357 = vmatprep.mubr.msk.bf16.mxu1 %vm5746_vm0, %v15854_v20  ;;  %14531 = vmatprep.mubr.msk.bf16.mxu0 %vm5746_vm0, %v15857_v37 }
 0x38d   : > { %v6870_v36 = vpop.f32.mrb[156].mxu1  ;;  %v7736_v30 = vpop.f32.mrb[156].mxu0 }
 0x38e   : > { %v7017_v44 = vmax.f32 %v18182_v46, %v6870_v36  ;;  %v18676_v43 = vmax.f32 %v7015_v34, %v7736_v30  ;;  %v6872_v24 = vpop.f32.mrb[157].mxu1  ;;  %v7738_v40 = vpop.f32.mrb[157].mxu0  ;;  %v15861_v30 = vld [vmem:[%s17800_s8 + $0x9a0] ss:$8 sps:$4 sm:$0xff]  }
 0x38f   : > { %v6873_v12 = vpop.f32.mrb[158].mxu1  ;;  %v7739_v28 = vpop.f32.mrb[158].mxu0 }
 0x390   : > { %v7018_v31 = vmax.f32 %v18188_v52, %v6873_v12  ;;  %v18683_v16 = vmax.f32 %v7016_v25, %v7739_v28  ;;  %v7741_v20 = vpop.f32.mrb[159].mxu0  ;;  %v6875_v37 = vpop.f32.mrb[159].mxu1  ;;  %v15858_v25 = vld [vmem:[%s17800_s8 + $0x780] ss:$8 sps:$4 sm:$0xff]   ;;  %v15866_v12 = vld [vmem:[%s17800_s8 + $0x794] ss:$8 sps:$4 sm:$0xff]  }
 0x391   : > { %v20111_v37 = vld [vmem:[#allocation4_spill] sm:$0xff] }
 0x392   : > { %8553 = vmatmul.mubr.bf16.gmra.mrb[8].mxu1 %v15852_v27  ;;  %9419 = vmatmul.mubr.bf16.gmra.mrb[8].mxu0 %v15855_v47  ;;  %v15869_v27 = vld [vmem:[%s17800_s8 + $0x9b4] ss:$8 sps:$4 sm:$0xff]  }
 0x393   : > { %14358 = vmatprep.mubr.msk.bf16.mxu1 %vm5746_vm0, %v15860_v63  ;;  %14532 = vmatprep.mubr.msk.bf16.mxu0 %vm5746_vm0, %v15863_v7  ;;  %v20109_v47 = vld [vmem:[#allocation3_spill] sm:$0xff] }
 0x395   : > { %v6878_v46 = vpop.f32.mrb[160].mxu1  ;;  %v7744_v34 = vpop.f32.mrb[160].mxu0 }
 0x396   : > { %v7019_v56 = vmax.f32 %v18196_v59, %v6878_v46  ;;  %v18688_v8 = vmax.f32 %v7017_v44, %v7744_v34  ;;  %v6880_v36 = vpop.f32.mrb[161].mxu1  ;;  %v7746_v52 = vpop.f32.mrb[161].mxu0 }
 0x397   : > { %v6881_v24 = vpop.f32.mrb[162].mxu1  ;;  %v7747_v40 = vpop.f32.mrb[162].mxu0 }
 0x398   : > { %v7020_v28 = vmax.f32 %v20109_v47, %v6881_v24  ;;  %v18695_v63 = vmax.f32 %v7018_v31, %v7747_v40  ;;  %v7749_v7 = vpop.f32.mrb[163].mxu0  ;;  %v6883_v20 = vpop.f32.mrb[163].mxu1  ;;  %v15864_v31 = vld [vmem:[%s17800_s8 + $0x790] ss:$8 sps:$4 sm:$0xff]  }
 0x399   : > { %v15867_v24 = vld [vmem:[%s17800_s8 + $0x9b0] ss:$8 sps:$4 sm:$0xff]   ;;  %v15872_v7 = vld [vmem:[%s17800_s8 + $0x7a4] ss:$8 sps:$4 sm:$0xff]  }
 0x39a   : > { %20110 = vst [vmem:[#allocation3_spill] sm:$0xff] %v18695_v63  ;;  %8561 = vmatmul.mubr.bf16.gmra.mrb[12].mxu1 %v15858_v25  ;;  %9427 = vmatmul.mubr.bf16.gmra.mrb[12].mxu0 %v15861_v30  ;;  %v15875_v25 = vld [vmem:[%s17800_s8 + $0x9c4] ss:$8 sps:$4 sm:$0xff]  }
 0x39b   : > { %14359 = vmatprep.mubr.msk.bf16.mxu1 %vm5746_vm0, %v15866_v12  ;;  %14533 = vmatprep.mubr.msk.bf16.mxu0 %vm5746_vm0, %v15869_v27  ;;  %v20113_v30 = vld [vmem:[#allocation5_spill] sm:$0xff] }
 0x39d   : > { %v6886_v59 = vpop.f32.mrb[164].mxu1  ;;  %v7752_v44 = vpop.f32.mrb[164].mxu0 }
 0x39e   : > { %v7021_v46 = vmax.f32 %v20111_v37, %v6886_v59  ;;  %v18700_v34 = vmax.f32 %v7019_v56, %v7752_v44  ;;  %v6888_v36 = vpop.f32.mrb[165].mxu1  ;;  %v7754_v52 = vpop.f32.mrb[165].mxu0  ;;  %v20115_v44 = vld [vmem:[#allocation6_spill] sm:$0xff] }
 0x39f   : > { %v6889_v40 = vpop.f32.mrb[166].mxu1  ;;  %v7755_v47 = vpop.f32.mrb[166].mxu0 }
 0x3a0   : > { %20112 = vst [vmem:[#allocation4_spill] sm:$0xff] %v18700_v34  ;;  %v7022_v12 = vmax.f32 %v20113_v30, %v6889_v40  ;;  %v18707_v20 = vmax.f32 %v7020_v28, %v7755_v47  ;;  %v7757_v27 = vpop.f32.mrb[167].mxu0  ;;  %v6891_v63 = vpop.f32.mrb[167].mxu1  ;;  %v15870_v28 = vld [vmem:[%s17800_s8 + $0x7a0] ss:$8 sps:$4 sm:$0xff]  }
 0x3a1   : > { %v15873_v47 = vld [vmem:[%s17800_s8 + $0x9c0] ss:$8 sps:$4 sm:$0xff]   ;;  %v15878_v63 = vld [vmem:[%s17800_s8 + $0x7b4] ss:$8 sps:$4 sm:$0xff]  }
 0x3a2   : > { %20114 = vst [vmem:[#allocation5_spill] sm:$0xff] %v18707_v20  ;;  %8569 = vmatmul.mubr.bf16.gmra.mrb[16].mxu1 %v15864_v31  ;;  %9435 = vmatmul.mubr.bf16.gmra.mrb[16].mxu0 %v15867_v24  ;;  %v15881_v31 = vld [vmem:[%s17800_s8 + $0x9d4] ss:$8 sps:$4 sm:$0xff]  }
 0x3a3   : > { %14360 = vmatprep.mubr.msk.bf16.mxu1 %vm5746_vm0, %v15872_v7  ;;  %14534 = vmatprep.mubr.msk.bf16.mxu0 %vm5746_vm0, %v15875_v25  ;;  %v20117_v24 = vld [vmem:[#allocation7_spill] sm:$0xff] }
 0x3a5   : > { %v6894_v56 = vpop.f32.mrb[168].mxu1  ;;  %v7760_v59 = vpop.f32.mrb[168].mxu0 }
 0x3a6   : > { %v7023_v37 = vmax.f32 %v20115_v44, %v6894_v56  ;;  %v18712_v36 = vmax.f32 %v7021_v46, %v7760_v59  ;;  %v6896_v52 = vpop.f32.mrb[169].mxu1  ;;  %v7762_v40 = vpop.f32.mrb[169].mxu0  ;;  %v20119_v59 = vld [vmem:[#allocation8_spill] sm:$0xff] }
 0x3a7   : > { %v6897_v30 = vpop.f32.mrb[170].mxu1  ;;  %v7763_v27 = vpop.f32.mrb[170].mxu0 }
 0x3a8   : > { %20116 = vst [vmem:[#allocation6_spill] sm:$0xff] %v18712_v36  ;;  %v7024_v7 = vmax.f32 %v20117_v24, %v6897_v30  ;;  %v18719_v20 = vmax.f32 %v7022_v12, %v7763_v27  ;;  %v7765_v25 = vpop.f32.mrb[171].mxu0  ;;  %v6899_v34 = vpop.f32.mrb[171].mxu1  ;;  %v15876_v12 = vld [vmem:[%s17800_s8 + $0x7b0] ss:$8 sps:$4 sm:$0xff]  }
 0x3a9   : > { %v15879_v27 = vld [vmem:[%s17800_s8 + $0x9d0] ss:$8 sps:$4 sm:$0xff]   ;;  %v15884_v34 = vld [vmem:[%s17800_s8 + $0x7c4] ss:$8 sps:$4 sm:$0xff]  }
 0x3aa   : > { %20118 = vst [vmem:[#allocation7_spill] sm:$0xff] %v18719_v20  ;;  %8577 = vmatmul.mubr.bf16.gmra.mrb[20].mxu1 %v15870_v28  ;;  %9443 = vmatmul.mubr.bf16.gmra.mrb[20].mxu0 %v15873_v47  ;;  %v15887_v28 = vld [vmem:[%s17800_s8 + $0x9e4] ss:$8 sps:$4 sm:$0xff]  }
 0x3ab   : > { %14361 = vmatprep.mubr.msk.bf16.mxu1 %vm5746_vm0, %v15878_v63  ;;  %14535 = vmatprep.mubr.msk.bf16.mxu0 %vm5746_vm0, %v15881_v31  ;;  %v20121_v47 = vld [vmem:[#allocation9_spill] sm:$0xff] }
 0x3ad   : > { %v6902_v46 = vpop.f32.mrb[172].mxu1  ;;  %v7768_v56 = vpop.f32.mrb[172].mxu0 }
 0x3ae   : > { %v7025_v44 = vmax.f32 %v20119_v59, %v6902_v46  ;;  %v18724_v52 = vmax.f32 %v7023_v37, %v7768_v56  ;;  %v6904_v40 = vpop.f32.mrb[173].mxu1  ;;  %v7770_v30 = vpop.f32.mrb[173].mxu0  ;;  %v20123_v56 = vld [vmem:[#allocation10_spill] sm:$0xff] }
 0x3af   : > { %v6905_v24 = vpop.f32.mrb[174].mxu1  ;;  %v7771_v25 = vpop.f32.mrb[174].mxu0 }
 0x3b0   : > { %20120 = vst [vmem:[#allocation8_spill] sm:$0xff] %v18724_v52  ;;  %v7026_v63 = vmax.f32 %v20121_v47, %v6905_v24  ;;  %v18731_v20 = vmax.f32 %v7024_v7, %v7771_v25  ;;  %v7773_v31 = vpop.f32.mrb[175].mxu0  ;;  %v6907_v36 = vpop.f32.mrb[175].mxu1  ;;  %v15882_v7 = vld [vmem:[%s17800_s8 + $0x7c0] ss:$8 sps:$4 sm:$0xff]  }
 0x3b1   : > { %v15885_v25 = vld [vmem:[%s17800_s8 + $0x9e0] ss:$8 sps:$4 sm:$0xff]   ;;  %v15890_v36 = vld [vmem:[%s17800_s8 + $0x7d4] ss:$8 sps:$4 sm:$0xff]  }
 0x3b2   : > { %20122 = vst [vmem:[#allocation9_spill] sm:$0xff] %v18731_v20  ;;  %8585 = vmatmul.mubr.bf16.gmra.mrb[24].mxu1 %v15876_v12  ;;  %9451 = vmatmul.mubr.bf16.gmra.mrb[24].mxu0 %v15879_v27  ;;  %v15893_v12 = vld [vmem:[%s17800_s8 + $0x9f4] ss:$8 sps:$4 sm:$0xff]  }
 0x3b3   : > { %14362 = vmatprep.mubr.msk.bf16.mxu1 %vm5746_vm0, %v15884_v34  ;;  %14536 = vmatprep.mubr.msk.bf16.mxu0 %vm5746_vm0, %v15887_v28  ;;  %v20125_v27 = vld [vmem:[#allocation11_spill] sm:$0xff] }
 0x3b5   : > { %v6910_v37 = vpop.f32.mrb[176].mxu1  ;;  %v7776_v46 = vpop.f32.mrb[176].mxu0 }
 0x3b6   : > { %v7027_v59 = vmax.f32 %v20123_v56, %v6910_v37  ;;  %v18736_v40 = vmax.f32 %v7025_v44, %v7776_v46  ;;  %v6912_v30 = vpop.f32.mrb[177].mxu1  ;;  %v7778_v24 = vpop.f32.mrb[177].mxu0  ;;  %v20127_v46 = vld [vmem:[#allocation12_spill] sm:$0xff] }
 0x3b7   : > { %v6913_v47 = vpop.f32.mrb[178].mxu1  ;;  %v7779_v31 = vpop.f32.mrb[178].mxu0 }
 0x3b8   : > { %20124 = vst [vmem:[#allocation10_spill] sm:$0xff] %v18736_v40  ;;  %v7028_v34 = vmax.f32 %v20125_v27, %v6913_v47  ;;  %v18743_v20 = vmax.f32 %v7026_v63, %v7779_v31  ;;  %v7781_v28 = vpop.f32.mrb[179].mxu0  ;;  %v6915_v52 = vpop.f32.mrb[179].mxu1  ;;  %v15888_v63 = vld [vmem:[%s17800_s8 + $0x7d0] ss:$8 sps:$4 sm:$0xff]  }
 0x3b9   : > { %v15891_v31 = vld [vmem:[%s17800_s8 + $0x9f0] ss:$8 sps:$4 sm:$0xff]   ;;  %v15896_v52 = vld [vmem:[%s17800_s8 + $0x7e4] ss:$8 sps:$4 sm:$0xff]  }
 0x3ba   : > { %20126 = vst [vmem:[#allocation11_spill] sm:$0xff] %v18743_v20  ;;  %8593 = vmatmul.mubr.bf16.gmra.mrb[28].mxu1 %v15882_v7  ;;  %9459 = vmatmul.mubr.bf16.gmra.mrb[28].mxu0 %v15885_v25  ;;  %v15899_v7 = vld [vmem:[%s17800_s8 + $0xa04] ss:$8 sps:$4 sm:$0xff]  }
 0x3bb   : > { %14363 = vmatprep.mubr.msk.bf16.mxu1 %vm5746_vm0, %v15890_v36  ;;  %14537 = vmatprep.mubr.msk.bf16.mxu0 %vm5746_vm0, %v15893_v12  ;;  %v20129_v25 = vld [vmem:[#allocation13_spill] sm:$0xff] }
 0x3bd   : > { %v6918_v44 = vpop.f32.mrb[180].mxu1  ;;  %v7784_v37 = vpop.f32.mrb[180].mxu0 }
 0x3be   : > { %v7029_v56 = vmax.f32 %v20127_v46, %v6918_v44  ;;  %v18748_v30 = vmax.f32 %v7027_v59, %v7784_v37  ;;  %v6920_v24 = vpop.f32.mrb[181].mxu1  ;;  %v7786_v47 = vpop.f32.mrb[181].mxu0  ;;  %v20131_v37 = vld [vmem:[#allocation14_spill] sm:$0xff] }
 0x3bf   : > { %v6921_v27 = vpop.f32.mrb[182].mxu1  ;;  %v7787_v28 = vpop.f32.mrb[182].mxu0 }
 0x3c0   : > { %20128 = vst [vmem:[#allocation12_spill] sm:$0xff] %v18748_v30  ;;  %v7030_v36 = vmax.f32 %v20129_v25, %v6921_v27  ;;  %v18755_v20 = vmax.f32 %v7028_v34, %v7787_v28  ;;  %v7789_v12 = vpop.f32.mrb[183].mxu0  ;;  %v6923_v40 = vpop.f32.mrb[183].mxu1  ;;  %v15894_v34 = vld [vmem:[%s17800_s8 + $0x7e0] ss:$8 sps:$4 sm:$0xff]  }
 0x3c1   : > { %v15897_v28 = vld [vmem:[%s17800_s8 + $0xa00] ss:$8 sps:$4 sm:$0xff]   ;;  %v15902_v40 = vld [vmem:[%s17800_s8 + $0x7f4] ss:$8 sps:$4 sm:$0xff]  }
 0x3c2   : > { %20130 = vst [vmem:[#allocation13_spill] sm:$0xff] %v18755_v20  ;;  %8601 = vmatmul.mubr.bf16.gmra.mrb[32].mxu1 %v15888_v63  ;;  %9467 = vmatmul.mubr.bf16.gmra.mrb[32].mxu0 %v15891_v31  ;;  %v15905_v63 = vld [vmem:[%s17800_s8 + $0xa14] ss:$8 sps:$4 sm:$0xff]  }
 0x3c3   : > { %14364 = vmatprep.mubr.msk.bf16.mxu1 %vm5746_vm0, %v15896_v52  ;;  %14538 = vmatprep.mubr.msk.bf16.mxu0 %vm5746_vm0, %v15899_v7  ;;  %v20133_v31 = vld [vmem:[#allocation15_spill] sm:$0xff] }
 0x3c5   : > { %v6926_v59 = vpop.f32.mrb[184].mxu1  ;;  %v7792_v44 = vpop.f32.mrb[184].mxu0 }
 0x3c6   : > { %v7031_v46 = vmax.f32 %v20131_v37, %v6926_v59  ;;  %v18760_v24 = vmax.f32 %v7029_v56, %v7792_v44  ;;  %v6928_v47 = vpop.f32.mrb[185].mxu1  ;;  %v7794_v27 = vpop.f32.mrb[185].mxu0  ;;  %v20135_v44 = vld [vmem:[#allocation16_spill] sm:$0xff] }
 0x3c7   : > { %v6929_v25 = vpop.f32.mrb[186].mxu1  ;;  %v7795_v12 = vpop.f32.mrb[186].mxu0 }
 0x3c8   : > { %20132 = vst [vmem:[#allocation14_spill] sm:$0xff] %v18760_v24  ;;  %v7032_v52 = vmax.f32 %v20133_v31, %v6929_v25  ;;  %v18767_v20 = vmax.f32 %v7030_v36, %v7795_v12  ;;  %v7797_v7 = vpop.f32.mrb[187].mxu0  ;;  %v6931_v30 = vpop.f32.mrb[187].mxu1  ;;  %v15900_v36 = vld [vmem:[%s17800_s8 + $0x7f0] ss:$8 sps:$4 sm:$0xff]  }
 0x3c9   : > { %v15903_v12 = vld [vmem:[%s17800_s8 + $0xa10] ss:$8 sps:$4 sm:$0xff]   ;;  %v15908_v30 = vld [vmem:[%s17800_s8 + $0x804] ss:$8 sps:$4 sm:$0xff]  }
 0x3ca   : > { %20134 = vst [vmem:[#allocation15_spill] sm:$0xff] %v18767_v20  ;;  %8609 = vmatmul.mubr.bf16.gmra.mrb[36].mxu1 %v15894_v34  ;;  %9475 = vmatmul.mubr.bf16.gmra.mrb[36].mxu0 %v15897_v28  ;;  %v15911_v34 = vld [vmem:[%s17800_s8 + $0xa24] ss:$8 sps:$4 sm:$0xff]  }
 0x3cb   : > { %14365 = vmatprep.mubr.msk.bf16.mxu1 %vm5746_vm0, %v15902_v40  ;;  %14539 = vmatprep.mubr.msk.bf16.mxu0 %vm5746_vm0, %v15905_v63  ;;  %v20137_v28 = vld [vmem:[#allocation17_spill] sm:$0xff] }
 0x3cd   : > { %v6934_v56 = vpop.f32.mrb[188].mxu1  ;;  %v7800_v59 = vpop.f32.mrb[188].mxu0 }
 0x3ce   : > { %v7033_v37 = vmax.f32 %v20135_v44, %v6934_v56  ;;  %v18772_v47 = vmax.f32 %v7031_v46, %v7800_v59  ;;  %v6936_v27 = vpop.f32.mrb[189].mxu1  ;;  %v7802_v25 = vpop.f32.mrb[189].mxu0  ;;  %v20139_v59 = vld [vmem:[#allocation18_spill] sm:$0xff] }
 0x3cf   : > { %v6937_v31 = vpop.f32.mrb[190].mxu1  ;;  %v7803_v7 = vpop.f32.mrb[190].mxu0 }
 0x3d0   : > { %20136 = vst [vmem:[#allocation16_spill] sm:$0xff] %v18772_v47  ;;  %v7034_v40 = vmax.f32 %v20137_v28, %v6937_v31  ;;  %v18779_v20 = vmax.f32 %v7032_v52, %v7803_v7  ;;  %v7805_v63 = vpop.f32.mrb[191].mxu0  ;;  %v6939_v24 = vpop.f32.mrb[191].mxu1  ;;  %v15906_v52 = vld [vmem:[%s17800_s8 + $0x800] ss:$8 sps:$4 sm:$0xff]  }
 0x3d1   : > { %v15909_v7 = vld [vmem:[%s17800_s8 + $0xa20] ss:$8 sps:$4 sm:$0xff]   ;;  %v15914_v24 = vld [vmem:[%s17800_s8 + $0x814] ss:$8 sps:$4 sm:$0xff]  }
 0x3d2   : > { %20138 = vst [vmem:[#allocation17_spill] sm:$0xff] %v18779_v20  ;;  %8617 = vmatmul.mubr.bf16.gmra.mrb[40].mxu1 %v15900_v36  ;;  %9483 = vmatmul.mubr.bf16.gmra.mrb[40].mxu0 %v15903_v12  ;;  %v15917_v36 = vld [vmem:[%s17800_s8 + $0xa34] ss:$8 sps:$4 sm:$0xff]  }
 0x3d3   : > { %14366 = vmatprep.mubr.msk.bf16.mxu1 %vm5746_vm0, %v15908_v30  ;;  %14540 = vmatprep.mubr.msk.bf16.mxu0 %vm5746_vm0, %v15911_v34  ;;  %v20141_v12 = vld [vmem:[#allocation19_spill] sm:$0xff] }
 0x3d5   : > { %v6942_v46 = vpop.f32.mrb[192].mxu1  ;;  %v7808_v56 = vpop.f32.mrb[192].mxu0 }
 0x3d6   : > { %v7035_v44 = vmax.f32 %v20139_v59, %v6942_v46  ;;  %v18784_v27 = vmax.f32 %v7033_v37, %v7808_v56  ;;  %v6944_v25 = vpop.f32.mrb[193].mxu1  ;;  %v7810_v31 = vpop.f32.mrb[193].mxu0  ;;  %v20143_v56 = vld [vmem:[#allocation20_spill] sm:$0xff] }
 0x3d7   : > { %v6945_v28 = vpop.f32.mrb[194].mxu1  ;;  %v7811_v63 = vpop.f32.mrb[194].mxu0 }
 0x3d8   : > { %20140 = vst [vmem:[#allocation18_spill] sm:$0xff] %v18784_v27  ;;  %v7036_v30 = vmax.f32 %v20141_v12, %v6945_v28  ;;  %v18791_v20 = vmax.f32 %v7034_v40, %v7811_v63  ;;  %v7813_v34 = vpop.f32.mrb[195].mxu0  ;;  %v6947_v47 = vpop.f32.mrb[195].mxu1  ;;  %v15912_v40 = vld [vmem:[%s17800_s8 + $0x810] ss:$8 sps:$4 sm:$0xff]  }
 0x3d9   : > { %v15915_v63 = vld [vmem:[%s17800_s8 + $0xa30] ss:$8 sps:$4 sm:$0xff]   ;;  %v15920_v47 = vld [vmem:[%s17800_s8 + $0x824] ss:$8 sps:$4 sm:$0xff]  }
 0x3da   : > { %20142 = vst [vmem:[#allocation19_spill] sm:$0xff] %v18791_v20  ;;  %8625 = vmatmul.mubr.bf16.gmra.mrb[44].mxu1 %v15906_v52  ;;  %9491 = vmatmul.mubr.bf16.gmra.mrb[44].mxu0 %v15909_v7  ;;  %v15923_v52 = vld [vmem:[%s17800_s8 + $0xa44] ss:$8 sps:$4 sm:$0xff]  }
 0x3db   : > { %14367 = vmatprep.mubr.msk.bf16.mxu1 %vm5746_vm0, %v15914_v24  ;;  %14541 = vmatprep.mubr.msk.bf16.mxu0 %vm5746_vm0, %v15917_v36  ;;  %v20145_v7 = vld [vmem:[#allocation21_spill] sm:$0xff] }
 0x3dd   : > { %v6950_v37 = vpop.f32.mrb[196].mxu1  ;;  %v7816_v46 = vpop.f32.mrb[196].mxu0 }
 0x3de   : > { %v7037_v59 = vmax.f32 %v20143_v56, %v6950_v37  ;;  %v18796_v25 = vmax.f32 %v7035_v44, %v7816_v46  ;;  %v6952_v31 = vpop.f32.mrb[197].mxu1  ;;  %v7818_v28 = vpop.f32.mrb[197].mxu0  ;;  %v20147_v46 = vld [vmem:[#allocation22_spill] sm:$0xff] }
 0x3df   : > { %v6953_v12 = vpop.f32.mrb[198].mxu1  ;;  %v7819_v34 = vpop.f32.mrb[198].mxu0 }
 0x3e0   : > { %20144 = vst [vmem:[#allocation20_spill] sm:$0xff] %v18796_v25  ;;  %v7038_v24 = vmax.f32 %v20145_v7, %v6953_v12  ;;  %v18803_v20 = vmax.f32 %v7036_v30, %v7819_v34  ;;  %v7821_v36 = vpop.f32.mrb[199].mxu0  ;;  %v6955_v27 = vpop.f32.mrb[199].mxu1  ;;  %v15918_v30 = vld [vmem:[%s17800_s8 + $0x820] ss:$8 sps:$4 sm:$0xff]  }
 0x3e1   : > { %v15921_v34 = vld [vmem:[%s17800_s8 + $0xa40] ss:$8 sps:$4 sm:$0xff]   ;;  %v15926_v27 = vld [vmem:[%s17800_s8 + $0x834] ss:$8 sps:$4 sm:$0xff]  }
 0x3e2   : > { %20146 = vst [vmem:[#allocation21_spill] sm:$0xff] %v18803_v20  ;;  %8633 = vmatmul.mubr.bf16.gmra.mrb[48].mxu1 %v15912_v40  ;;  %9499 = vmatmul.mubr.bf16.gmra.mrb[48].mxu0 %v15915_v63  ;;  %v15929_v40 = vld [vmem:[%s17800_s8 + $0xa54] ss:$8 sps:$4 sm:$0xff]  }
 0x3e3   : > { %14368 = vmatprep.mubr.msk.bf16.mxu1 %vm5746_vm0, %v15920_v47  ;;  %14542 = vmatprep.mubr.msk.bf16.mxu0 %vm5746_vm0, %v15923_v52  ;;  %v20149_v63 = vld [vmem:[#allocation23_spill] sm:$0xff] }
 0x3e5   : > { %v6958_v44 = vpop.f32.mrb[200].mxu1  ;;  %v7824_v37 = vpop.f32.mrb[200].mxu0 }
 0x3e6   : > { %v7039_v56 = vmax.f32 %v20147_v46, %v6958_v44  ;;  %v18808_v31 = vmax.f32 %v7037_v59, %v7824_v37  ;;  %v6960_v28 = vpop.f32.mrb[201].mxu1  ;;  %v7826_v12 = vpop.f32.mrb[201].mxu0  ;;  %v20151_v37 = vld [vmem:[#allocation24_spill] sm:$0xff] }
 0x3e7   : > { %v6961_v7 = vpop.f32.mrb[202].mxu1  ;;  %v7827_v36 = vpop.f32.mrb[202].mxu0 }
 0x3e8   : > { %20148 = vst [vmem:[#allocation22_spill] sm:$0xff] %v18808_v31  ;;  %v7040_v47 = vmax.f32 %v20149_v63, %v6961_v7  ;;  %v18815_v20 = vmax.f32 %v7038_v24, %v7827_v36  ;;  %v7829_v52 = vpop.f32.mrb[203].mxu0  ;;  %v6963_v25 = vpop.f32.mrb[203].mxu1  ;;  %v15924_v24 = vld [vmem:[%s17800_s8 + $0x830] ss:$8 sps:$4 sm:$0xff]  }
 0x3e9   : > { %v15927_v36 = vld [vmem:[%s17800_s8 + $0xa50] ss:$8 sps:$4 sm:$0xff]   ;;  %v15932_v25 = vld [vmem:[%s17800_s8 + $0x844] ss:$8 sps:$4 sm:$0xff]  }
 0x3ea   : > { %20150 = vst [vmem:[#allocation23_spill] sm:$0xff] %v18815_v20  ;;  %8641 = vmatmul.mubr.bf16.gmra.mrb[52].mxu1 %v15918_v30  ;;  %9507 = vmatmul.mubr.bf16.gmra.mrb[52].mxu0 %v15921_v34  ;;  %v15935_v30 = vld [vmem:[%s17800_s8 + $0xa64] ss:$8 sps:$4 sm:$0xff]  }
 0x3eb   : > { %14369 = vmatprep.mubr.msk.bf16.mxu1 %vm5746_vm0, %v15926_v27  ;;  %14543 = vmatprep.mubr.msk.bf16.mxu0 %vm5746_vm0, %v15929_v40  ;;  %v20152_v34 = vld [vmem:[#allocation25_spill] sm:$0xff] }
 0x3ed   : > { %v6966_v59 = vpop.f32.mrb[204].mxu1  ;;  %v7832_v44 = vpop.f32.mrb[204].mxu0 }
 0x3ee   : > { %v7041_v46 = vmax.f32 %v20151_v37, %v6966_v59  ;;  %v18820_v28 = vmax.f32 %v7039_v56, %v7832_v44  ;;  %v6968_v12 = vpop.f32.mrb[205].mxu1  ;;  %v7834_v7 = vpop.f32.mrb[205].mxu0 }
 0x3ef   : > { %v6969_v63 = vpop.f32.mrb[206].mxu1  ;;  %v7835_v52 = vpop.f32.mrb[206].mxu0 }
 0x3f0   : > { %v7042_v27 = vmax.f32 %v20152_v34, %v6969_v63  ;;  %v18827_v20 = vmax.f32 %v7040_v47, %v7835_v52  ;;  %v7837_v40 = vpop.f32.mrb[207].mxu0  ;;  %v6971_v31 = vpop.f32.mrb[207].mxu1  ;;  %v15930_v47 = vld [vmem:[%s17800_s8 + $0x840] ss:$8 sps:$4 sm:$0xff]  }
 0x3f1   : > { %v15933_v63 = vld [vmem:[%s17800_s8 + $0xa60] ss:$8 sps:$4 sm:$0xff]   ;;  %v15938_v31 = vld [vmem:[%s17800_s8 + $0x854] ss:$8 sps:$4 sm:$0xff]  }
 0x3f2   : > { %8649 = vmatmul.mubr.bf16.gmra.mrb[56].mxu1 %v15924_v24  ;;  %9515 = vmatmul.mubr.bf16.gmra.mrb[56].mxu0 %v15927_v36  ;;  %v15941_v24 = vld [vmem:[%s17800_s8 + $0xa74] ss:$8 sps:$4 sm:$0xff]  }
 0x3f3   : > { %14370 = vmatprep.mubr.msk.bf16.mxu1 %vm5746_vm0, %v15932_v25  ;;  %14544 = vmatprep.mubr.msk.bf16.mxu0 %vm5746_vm0, %v15935_v30 }
 0x3f5   : > { %v7840_v56 = vpop.f32.mrb[208].mxu0  ;;  %v8442_v59 = vpop.f32.mrb[208].mxu1 }
 0x3f6   : > { %v18831_v44 = vmax.f32 %v7041_v46, %v7840_v56  ;;  %v8721_v37 = vmax.f32 %v18375_v18, %v8442_v59  ;;  %v7842_v12 = vpop.f32.mrb[209].mxu0  ;;  %v8444_v7 = vpop.f32.mrb[209].mxu1 }
 0x3f7   : > { %v7843_v52 = vpop.f32.mrb[210].mxu0  ;;  %v8445_v34 = vpop.f32.mrb[210].mxu1  ;;  %v15936_v7 = vld [vmem:[%s17800_s8 + $0x850] ss:$8 sps:$4 sm:$0xff]  }
 0x3f8   : > { %v18838_v36 = vmax.f32 %v7042_v27, %v7843_v52  ;;  %v8722_v25 = vmax.f32 %v18382_v33, %v8445_v34  ;;  %v7845_v30 = vpop.f32.mrb[211].mxu0  ;;  %v8447_v46 = vpop.f32.mrb[211].mxu1  ;;  %v15939_v33 = vld [vmem:[%s17800_s8 + $0xa70] ss:$8 sps:$4 sm:$0xff]  }
 0x3f9   : > { %v15944_v30 = vld [vmem:[%s17800_s8 + $0x864] ss:$8 sps:$4 sm:$0xff]  }
 0x3fa   : > { %8657 = vmatmul.mubr.bf16.gmra.mrb[60].mxu1 %v15930_v47  ;;  %9523 = vmatmul.mubr.bf16.gmra.mrb[60].mxu0 %v15933_v63  ;;  %v15947_v47 = vld [vmem:[%s17800_s8 + $0xa84] ss:$8 sps:$4 sm:$0xff]  }
 0x3fb   : > { %14371 = vmatprep.mubr.msk.bf16.mxu1 %vm5746_vm0, %v15938_v31  ;;  %14545 = vmatprep.mubr.msk.bf16.mxu0 %vm5746_vm0, %v15941_v24 }
 0x3fd   : > { %v8450_v18 = vpop.f32.mrb[212].mxu1  ;;  %v9316_v40 = vpop.f32.mrb[212].mxu0 }
 0x3fe   : > { %v8723_v56 = vmax.f32 %v18387_v57, %v8450_v18  ;;  %v18844_v59 = vmax.f32 %v8721_v37, %v9316_v40  ;;  %v8452_v27 = vpop.f32.mrb[213].mxu1  ;;  %v9318_v12 = vpop.f32.mrb[213].mxu0 }
 0x3ff   : > { %v8453_v52 = vpop.f32.mrb[214].mxu1  ;;  %v9319_v34 = vpop.f32.mrb[214].mxu0  ;;  %v15945_v12 = vld [vmem:[%s17800_s8 + $0xa80] ss:$8 sps:$4 sm:$0xff]  }
 0x400   : > { %v8724_v63 = vmax.f32 %v18394_v19, %v8453_v52  ;;  %v18851_v31 = vmax.f32 %v8722_v25, %v9319_v34  ;;  %v9321_v24 = vpop.f32.mrb[215].mxu0  ;;  %v8455_v46 = vpop.f32.mrb[215].mxu1  ;;  %v15942_v25 = vld [vmem:[%s17800_s8 + $0x860] ss:$8 sps:$4 sm:$0xff]  }
 0x401   : > { %v15950_v24 = vld [vmem:[%s17800_s8 + $0x874] ss:$8 sps:$4 sm:$0xff]  }
 0x402   : > { %8665 = vmatmul.mubr.bf16.gmra.mrb[64].mxu1 %v15936_v7  ;;  %9531 = vmatmul.mubr.bf16.gmra.mrb[64].mxu0 %v15939_v33  ;;  %v15953_v7 = vld [vmem:[%s17800_s8 + $0xa94] ss:$8 sps:$4 sm:$0xff]  }
 0x403   : > { %14372 = vmatprep.mubr.msk.bf16.mxu1 %vm5746_vm0, %v15944_v30  ;;  %14546 = vmatprep.mubr.msk.bf16.mxu0 %vm5746_vm0, %v15947_v47 }
 0x405   : > { %v8458_v57 = vpop.f32.mrb[216].mxu1  ;;  %v9324_v37 = vpop.f32.mrb[216].mxu0 }
 0x406   : > { %v8725_v18 = vmax.f32 %v18399_v22, %v8458_v57  ;;  %v18856_v40 = vmax.f32 %v8723_v56, %v9324_v37  ;;  %v8460_v27 = vpop.f32.mrb[217].mxu1  ;;  %v9326_v19 = vpop.f32.mrb[217].mxu0 }
 0x407   : > { %v8461_v52 = vpop.f32.mrb[218].mxu1  ;;  %v9327_v34 = vpop.f32.mrb[218].mxu0  ;;  %v15951_v19 = vld [vmem:[%s17800_s8 + $0xa90] ss:$8 sps:$4 sm:$0xff]  }
 0x408   : > { %v8726_v33 = vmax.f32 %v18406_v6, %v8461_v52  ;;  %v18863_v30 = vmax.f32 %v8724_v63, %v9327_v34  ;;  %v9329_v47 = vpop.f32.mrb[219].mxu0  ;;  %v8463_v46 = vpop.f32.mrb[219].mxu1  ;;  %v15948_v63 = vld [vmem:[%s17800_s8 + $0x870] ss:$8 sps:$4 sm:$0xff]  }
 0x409   : > { %v15956_v47 = vld [vmem:[%s17800_s8 + $0x884] ss:$8 sps:$4 sm:$0xff]  }
 0x40a   : > { %8673 = vmatmul.mubr.bf16.gmra.mrb[68].mxu1 %v15942_v25  ;;  %9539 = vmatmul.mubr.bf16.gmra.mrb[68].mxu0 %v15945_v12  ;;  %v15959_v25 = vld [vmem:[%s17800_s8 + $0xaa4] ss:$8 sps:$4 sm:$0xff]  }
 0x40b   : > { %14373 = vmatprep.mubr.msk.bf16.mxu1 %vm5746_vm0, %v15950_v24  ;;  %14547 = vmatprep.mubr.msk.bf16.mxu0 %vm5746_vm0, %v15953_v7 }
 0x40d   : > { %v8466_v22 = vpop.f32.mrb[220].mxu1  ;;  %v9332_v56 = vpop.f32.mrb[220].mxu0 }
 0x40e   : > { %v8727_v57 = vmax.f32 %v18411_v1, %v8466_v22  ;;  %v18868_v37 = vmax.f32 %v8725_v18, %v9332_v56  ;;  %v8468_v27 = vpop.f32.mrb[221].mxu1  ;;  %v9334_v6 = vpop.f32.mrb[221].mxu0 }
 0x40f   : > { %v8469_v52 = vpop.f32.mrb[222].mxu1  ;;  %v9335_v34 = vpop.f32.mrb[222].mxu0  ;;  %v15957_v6 = vld [vmem:[%s17800_s8 + $0xaa0] ss:$8 sps:$4 sm:$0xff]  }
 0x410   : > { %v8728_v12 = vmax.f32 %v18418_v55, %v8469_v52  ;;  %v18875_v24 = vmax.f32 %v8726_v33, %v9335_v34  ;;  %v9337_v7 = vpop.f32.mrb[223].mxu0  ;;  %v8471_v46 = vpop.f32.mrb[223].mxu1  ;;  %v15954_v33 = vld [vmem:[%s17800_s8 + $0x880] ss:$8 sps:$4 sm:$0xff]  }
 0x411   : > { %v15962_v7 = vld [vmem:[%s17800_s8 + $0x894] ss:$8 sps:$4 sm:$0xff]  }
 0x412   : > { %8681 = vmatmul.mubr.bf16.gmra.mrb[72].mxu1 %v15948_v63  ;;  %9547 = vmatmul.mubr.bf16.gmra.mrb[72].mxu0 %v15951_v19  ;;  %v15965_v63 = vld [vmem:[%s17800_s8 + $0xab4] ss:$8 sps:$4 sm:$0xff]  }
 0x413   : > { %14374 = vmatprep.mubr.msk.bf16.mxu1 %vm5746_vm0, %v15956_v47  ;;  %14548 = vmatprep.mubr.msk.bf16.mxu0 %vm5746_vm0, %v15959_v25 }
 0x415   : > { %v8474_v1 = vpop.f32.mrb[224].mxu1  ;;  %v9340_v18 = vpop.f32.mrb[224].mxu0 }
 0x416   : > { %v8729_v22 = vmax.f32 %v18423_v32, %v8474_v1  ;;  %v18880_v56 = vmax.f32 %v8727_v57, %v9340_v18  ;;  %v8476_v27 = vpop.f32.mrb[225].mxu1  ;;  %v9342_v55 = vpop.f32.mrb[225].mxu0 }
 0x417   : > { %v8477_v52 = vpop.f32.mrb[226].mxu1  ;;  %v9343_v34 = vpop.f32.mrb[226].mxu0  ;;  %v15963_v55 = vld [vmem:[%s17800_s8 + $0xab0] ss:$8 sps:$4 sm:$0xff]  }
 0x418   : > { %v8730_v19 = vmax.f32 %v18430_v14, %v8477_v52  ;;  %v18887_v47 = vmax.f32 %v8728_v12, %v9343_v34  ;;  %v9345_v25 = vpop.f32.mrb[227].mxu0  ;;  %v8479_v46 = vpop.f32.mrb[227].mxu1  ;;  %v15960_v12 = vld [vmem:[%s17800_s8 + $0x890] ss:$8 sps:$4 sm:$0xff]  }
 0x419   : > { %v15968_v25 = vld [vmem:[%s17800_s8 + $0x8a4] ss:$8 sps:$4 sm:$0xff]  }
 0x41a   : > { %8689 = vmatmul.mubr.bf16.gmra.mrb[76].mxu1 %v15954_v33  ;;  %9555 = vmatmul.mubr.bf16.gmra.mrb[76].mxu0 %v15957_v6  ;;  %v15971_v33 = vld [vmem:[%s17800_s8 + $0xac4] ss:$8 sps:$4 sm:$0xff]  }
 0x41b   : > { %14375 = vmatprep.mubr.msk.bf16.mxu1 %vm5746_vm0, %v15962_v7  ;;  %14549 = vmatprep.mubr.msk.bf16.mxu0 %vm5746_vm0, %v15965_v63 }
 0x41d   : > { %v8482_v32 = vpop.f32.mrb[228].mxu1  ;;  %v9348_v57 = vpop.f32.mrb[228].mxu0 }
 0x41e   : > { %v8731_v1 = vmax.f32 %v18435_v11, %v8482_v32  ;;  %v18892_v18 = vmax.f32 %v8729_v22, %v9348_v57  ;;  %v8484_v27 = vpop.f32.mrb[229].mxu1  ;;  %v9350_v14 = vpop.f32.mrb[229].mxu0 }
 0x41f   : > { %v8485_v52 = vpop.f32.mrb[230].mxu1  ;;  %v9351_v34 = vpop.f32.mrb[230].mxu0  ;;  %v15969_v14 = vld [vmem:[%s17800_s8 + $0xac0] ss:$8 sps:$4 sm:$0xff]  }
 0x420   : > { %v8732_v6 = vmax.f32 %v18442_v0, %v8485_v52  ;;  %v18899_v7 = vmax.f32 %v8730_v19, %v9351_v34  ;;  %v9353_v63 = vpop.f32.mrb[231].mxu0  ;;  %v8487_v46 = vpop.f32.mrb[231].mxu1  ;;  %v15966_v19 = vld [vmem:[%s17800_s8 + $0x8a0] ss:$8 sps:$4 sm:$0xff]  }
 0x421   : > { %v15974_v63 = vld [vmem:[%s17800_s8 + $0x8b4] ss:$8 sps:$4 sm:$0xff]  }
 0x422   : > { %8697 = vmatmul.mubr.bf16.gmra.mrb[80].mxu1 %v15960_v12  ;;  %9563 = vmatmul.mubr.bf16.gmra.mrb[80].mxu0 %v15963_v55  ;;  %v15977_v12 = vld [vmem:[%s17800_s8 + $0xad4] ss:$8 sps:$4 sm:$0xff]  }
 0x423   : > { %14376 = vmatprep.mubr.msk.bf16.mxu1 %vm5746_vm0, %v15968_v25  ;;  %14550 = vmatprep.mubr.msk.bf16.mxu0 %vm5746_vm0, %v15971_v33 }
 0x425   : > { %v8490_v11 = vpop.f32.mrb[232].mxu1  ;;  %v9356_v22 = vpop.f32.mrb[232].mxu0 }
 0x426   : > { %v8733_v32 = vmax.f32 %v18447_v23, %v8490_v11  ;;  %v18904_v57 = vmax.f32 %v8731_v1, %v9356_v22  ;;  %v8492_v27 = vpop.f32.mrb[233].mxu1  ;;  %v9358_v0 = vpop.f32.mrb[233].mxu0  ;;  %v20155_v11 = vld [vmem:[#allocation26_spill] sm:$0xff] }
 0x427   : > { %v8493_v52 = vpop.f32.mrb[234].mxu1  ;;  %v9359_v34 = vpop.f32.mrb[234].mxu0 }
 0x428   : > { %20153 = vst [vmem:[#allocation24_spill] sm:$0xff] %v18904_v57  ;;  %v8734_v55 = vmax.f32 %v18454_v50, %v8493_v52  ;;  %v18911_v25 = vmax.f32 %v8732_v6, %v9359_v34  ;;  %v9361_v33 = vpop.f32.mrb[235].mxu0  ;;  %v8495_v46 = vpop.f32.mrb[235].mxu1  ;;  %v15972_v57 = vld [vmem:[%s17800_s8 + $0x8b0] ss:$8 sps:$4 sm:$0xff]  }
 0x429   : > { %v15975_v50 = vld [vmem:[%s17800_s8 + $0xad0] ss:$8 sps:$4 sm:$0xff]   ;;  %v15980_v33 = vld [vmem:[%s17800_s8 + $0xae4] ss:$8 sps:$4 sm:$0xff]  }
 0x42a   : > { %20154 = vst [vmem:[#allocation25_spill] sm:$0xff] %v18911_v25  ;;  %8705 = vmatmul.mubr.bf16.gmra.mrb[84].mxu1 %v15966_v19  ;;  %9571 = vmatmul.mubr.bf16.gmra.mrb[84].mxu0 %v15969_v14  ;;  %v15983_v19 = vld [vmem:[%s17800_s8 + $0xaf4] ss:$8 sps:$4 sm:$0xff]  }
 0x42b   : > { %14377 = vmatprep.mubr.msk.bf16.mxu1 %vm5746_vm0, %v15974_v63  ;;  %14551 = vmatprep.mubr.msk.bf16.mxu0 %vm5746_vm0, %v15977_v12  ;;  %v20156_v14 = vld [vmem:[#allocation27_spill] sm:$0xff] }
 0x42d   : > { %v8498_v23 = vpop.f32.mrb[236].mxu1  ;;  %v9364_v1 = vpop.f32.mrb[236].mxu0 }
 0x42e   : > { %v8735_v22 = vmax.f32 %v20155_v11, %v8498_v23  ;;  %v8500_v27 = vpop.f32.mrb[237].mxu1  ;;  %v9366_v0 = vpop.f32.mrb[237].mxu0  ;;  %v18918_v6 = vmax.f32 %v8733_v32, %v9364_v1 }
 0x42f   : > { %v8501_v52 = vpop.f32.mrb[238].mxu1  ;;  %v9367_v34 = vpop.f32.mrb[238].mxu0  ;;  %v15978_v0 = vld [vmem:[%s17800_s8 + $0xae0] ss:$8 sps:$4 sm:$0xff]  }
 0x430   : > { %v8736_v63 = vmax.f32 %v20156_v14, %v8501_v52  ;;  %v9369_v46 = vpop.f32.mrb[239].mxu0  ;;  %v8503_v12 = vpop.f32.mrb[239].mxu1  ;;  %v18923_v25 = vmax.f32 %v8734_v55, %v9367_v34  ;;  %v15981_v52 = vld [vmem:[%s17800_s8 + $0xaf0] ss:$8 sps:$4 sm:$0xff]   ;;  %v15986_v34 = vld [vmem:[%s17800_s8 + $0xb04] ss:$8 sps:$4 sm:$0xff]  }
 0x431   : > { %v15989_v12 = vld [vmem:[%s17800_s8 + $0xd24] ss:$8 sps:$4 sm:$0xff]  }
 0x432   : > { %20157 = vst [vmem:[#allocation26_spill] sm:$0xff] %v18923_v25  ;;  %8713 = vmatmul.mubr.bf16.gmra.mrb[88].mxu1 %v15972_v57  ;;  %9579 = vmatmul.mubr.bf16.gmra.mrb[88].mxu0 %v15975_v50  ;;  %v20158_v57 = vld [vmem:[#allocation28_spill] sm:$0xff] }
 0x433   : > { %14552 = vmatprep.mubr.msk.bf16.mxu0 %vm5746_vm0, %v15980_v33  ;;  %14693 = vmatprep.mubr.msk.bf16.mxu1 %vm5746_vm0, %v15983_v19 }
 0x435   : > { %v8506_v32 = vpop.f32.mrb[240].mxu1  ;;  %v9372_v23 = vpop.f32.mrb[240].mxu0 }
 0x436   : > { %v8737_v1 = vmax.f32 %v18475_v45, %v8506_v32  ;;  %v8508_v11 = vpop.f32.mrb[241].mxu1  ;;  %v9374_v27 = vpop.f32.mrb[241].mxu0  ;;  %v18930_v14 = vmax.f32 %v8735_v22, %v9372_v23  ;;  %v16419_v45 = vld [vmem:[%s20077_s1] sm:$0xff]  }
 0x437   : > { %v8509_v46 = vpop.f32.mrb[242].mxu1  ;;  %v9375_v55 = vpop.f32.mrb[242].mxu0  ;;  %v15984_v27 = vld [vmem:[%s17800_s8 + $0xb00] ss:$8 sps:$4 sm:$0xff]  }
 0x438   : > { %v8738_v50 = vmax.f32 %v20158_v57, %v8509_v46  ;;  %v9377_v33 = vpop.f32.mrb[243].mxu0  ;;  %v8511_v19 = vpop.f32.mrb[243].mxu1  ;;  %v18935_v25 = vmax.f32 %v8736_v63, %v9375_v55 }
 0x439   : > { %v15995_v19 = vld [vmem:[%s17800_s8 + $0xd34] ss:$8 sps:$4 sm:$0xff]  }
 0x43a   : > { %20159 = vst [vmem:[#allocation27_spill] sm:$0xff] %v18935_v25  ;;  %9587 = vmatmul.mubr.bf16.gmra.mrb[92].mxu0 %v15978_v0  ;;  %10189 = vmatmul.mubr.bf16.vlgmr.msra.gmra.mrb[92].mxu1 %v15981_v52  ;;  %v15987_v0 = vld [vmem:[%s17800_s8 + $0xd20] ss:$8 sps:$4 sm:$0xff]  }
 0x43b   : > { %14694 = vmatprep.mubr.msk.bf16.mxu1 %vm5746_vm0, %v15986_v34  ;;  %14868 = vmatprep.mubr.msk.bf16.mxu0 %vm5746_vm0, %v15989_v12  ;;  %v15992_v34 = vld [vmem:[%s17800_s8 + $0xb14] ss:$8 sps:$4 sm:$0xff]  }
 0x43c   : > { %11905 = vmatpush1.bf16.msra.mxu1 %v16419_v45  ;;  %v16420_v25 = vld [vmem:[%s20077_s1 + $0x8] sm:$0xff]  }
 0x43d   : > { %v8514_v22 = vpop.f32.mrb[244].mxu1  ;;  %v9380_v32 = vpop.f32.mrb[244].mxu0  ;;  %11906 = vmatprep.subr.bf16.mxu1 %v20107_v51 }
 0x43e   : > { %v8739_v63 = vmax.f32 %v18495_v58, %v8514_v22  ;;  %v8516_v23 = vpop.f32.mrb[245].mxu1  ;;  %v9382_v11 = vpop.f32.mrb[245].mxu0  ;;  %v18946_v52 = vmax.f32 %v8737_v1, %v9380_v32 }
 0x43f   : > { %v8517_v46 = vpop.f32.mrb[246].mxu1  ;;  %v9383_v55 = vpop.f32.mrb[246].mxu0  ;;  %v15993_v11 = vld [vmem:[%s17800_s8 + $0xd30] ss:$8 sps:$4 sm:$0xff]  }
 0x440   : > { %v8740_v12 = vmax.f32 %v18503_v61, %v8517_v46  ;;  %v9385_v57 = vpop.f32.mrb[247].mxu0  ;;  %v8519_v33 = vpop.f32.mrb[247].mxu1  ;;  %11907 = vmatpush1.bf16.msra.mxu1 %v16420_v25  ;;  %v18954_v58 = vmax.f32 %v8738_v50, %v9383_v55  ;;  %v16421_v50 = vld [vmem:[%s20077_s1 + $0x10] sm:$0xff]  }
 0x441   : > { %11908 = vmatprep.subr.bf16.mxu1 %v20107_v51  ;;  %v15998_v55 = vld [vmem:[%s17800_s8 + $0xb24] ss:$8 sps:$4 sm:$0xff]  }
 0x442   : > { %10197 = vmatmul.mubr.bf16.gmra.mrb[96].mxu1 %v15984_v27  ;;  %11063 = vmatmul.mubr.bf16.vlgmr.msra.gmra.mrb[96].mxu0 %v15987_v0 }
 0x443   : > { %12779 = vmatpush1.bf16.msra.mxu0 %v16419_v45  ;;  %14695 = vmatprep.mubr.msk.bf16.mxu1 %vm5746_vm0, %v15992_v34  ;;  %v15990_v45 = vld [vmem:[%s17800_s8 + $0xb10] ss:$8 sps:$4 sm:$0xff]   ;;  %v16001_v34 = vld [vmem:[%s17800_s8 + $0xd44] ss:$8 sps:$4 sm:$0xff]  }
 0x444   : > { %14869 = vmatprep.mubr.msk.bf16.mxu0 %vm5746_vm0, %v15995_v19  ;;  %12780 = vmatprep.subr.bf16.mxu0 %v20107_v51 }
 0x445   : > { %v8522_v61 = vpop.f32.mrb[248].mxu1  ;;  %v9388_v1 = vpop.f32.mrb[248].mxu0  ;;  %11909 = vmatpush1.bf16.msra.mxu1 %v16421_v50 }
 0x446   : > { %v8741_v22 = vmax.f32 %v18517_v9, %v8522_v61  ;;  %v8524_v32 = vpop.f32.mrb[249].mxu1  ;;  %v9390_v23 = vpop.f32.mrb[249].mxu0  ;;  %11910 = vmatprep.subr.bf16.mxu1 %v20107_v51  ;;  %v18967_v27 = vmax.f32 %v8739_v63, %v9388_v1  ;;  %v16422_v61 = vld [vmem:[%s20077_s1 + $0x18] sm:$0xff]   ;;  %v16423_v63 = vld [vmem:[%s20077_s1 + $0x20] sm:$0xff]  }
 0x447   : > { %v8525_v0 = vpop.f32.mrb[250].mxu1  ;;  %v9391_v46 = vpop.f32.mrb[250].mxu0  ;;  %12781 = vmatpush1.bf16.msra.mxu0 %v16420_v25  ;;  %v15996_v23 = vld [vmem:[%s17800_s8 + $0xb20] ss:$8 sps:$4 sm:$0xff]  }
 0x448   : > { %v8742_v57 = vmax.f32 %v18525_v21, %v8525_v0  ;;  %v9393_v33 = vpop.f32.mrb[251].mxu0  ;;  %v8527_v19 = vpop.f32.mrb[251].mxu1  ;;  %12782 = vmatprep.subr.bf16.mxu0 %v20107_v51  ;;  %v18973_v9 = vmax.f32 %v8740_v12, %v9391_v46  ;;  %v16004_v46 = vld [vmem:[%s17800_s8 + $0xb34] ss:$8 sps:$4 sm:$0xff]  }
 0x449   : > { %11911 = vmatpush1.bf16.msra.mxu1 %v16422_v61 }
 0x44a   : > { %20160 = vst [vmem:[#allocation28_spill] sm:$0xff] %v18973_v9  ;;  %10205 = vmatmul.mubr.bf16.gmra.mrb[100].mxu1 %v15990_v45  ;;  %11071 = vmatmul.mubr.bf16.gmra.mrb[100].mxu0 %v15993_v11  ;;  %v15999_v45 = vld [vmem:[%s17800_s8 + $0xd40] ss:$8 sps:$4 sm:$0xff]  }
 0x44b   : > { %14696 = vmatprep.mubr.msk.bf16.mxu1 %vm5746_vm0, %v15998_v55  ;;  %14870 = vmatprep.mubr.msk.bf16.mxu0 %vm5746_vm0, %v16001_v34  ;;  %v16007_v55 = vld [vmem:[%s17800_s8 + $0xd54] ss:$8 sps:$4 sm:$0xff]  }
 0x44c   : > { %12783 = vmatpush1.bf16.msra.mxu0 %v16421_v50  ;;  %11912 = vmatprep.subr.bf16.mxu1 %v20107_v51 }
 0x44d   : > { %v8530_v21 = vpop.f32.mrb[252].mxu1  ;;  %v9396_v25 = vpop.f32.mrb[252].mxu0  ;;  %12784 = vmatprep.subr.bf16.mxu0 %v20107_v51  ;;  %11913 = vmatpush1.bf16.msra.mxu1 %v16423_v63 }
 0x44e   : > { %v8743_v12 = vmax.f32 %v18539_v53, %v8530_v21  ;;  %v8532_v1 = vpop.f32.mrb[253].mxu1  ;;  %v9398_v32 = vpop.f32.mrb[253].mxu0  ;;  %11914 = vmatprep.subr.bf16.mxu1 %v20107_v51  ;;  %v18989_v50 = vmax.f32 %v8741_v22, %v9396_v25  ;;  %v16424_v53 = vld [vmem:[%s20077_s1 + $0x28] sm:$0xff]  }
 0x44f   : > { %v8533_v11 = vpop.f32.mrb[254].mxu1  ;;  %v9399_v0 = vpop.f32.mrb[254].mxu0  ;;  %v16002_v1 = vld [vmem:[%s17800_s8 + $0xb30] ss:$8 sps:$4 sm:$0xff]  }
 0x450   : > { %v8744_v34 = vmax.f32 %v18547_v35, %v8533_v11  ;;  %v9401_v33 = vpop.f32.mrb[255].mxu0  ;;  %v8535_v19 = vpop.f32.mrb[255].mxu1  ;;  %12785 = vmatpush1.bf16.msra.mxu0 %v16422_v61  ;;  %v18994_v9 = vmax.f32 %v8742_v57, %v9399_v0  ;;  %v16425_v57 = vld [vmem:[%s20077_s1 + $0x30] sm:$0xff]  }
 0x451   : > { %12786 = vmatprep.subr.bf16.mxu0 %v20107_v51  ;;  %11915 = vmatpush1.bf16.msra.mxu1 %v16424_v53  ;;  %v16005_v32 = vld [vmem:[%s17800_s8 + $0xd50] ss:$8 sps:$4 sm:$0xff]   ;;  %v16010_v11 = vld [vmem:[%s17800_s8 + $0xb44] ss:$8 sps:$4 sm:$0xff]  }
 0x452   : > { %10213 = vmatmul.mubr.bf16.gmra.mrb[104].mxu1 %v15996_v23  ;;  %11079 = vmatmul.mubr.bf16.gmra.mrb[104].mxu0 %v15999_v45  ;;  %v16013_v0 = vld [vmem:[%s17800_s8 + $0xd64] ss:$8 sps:$4 sm:$0xff]  }
 0x453   : > { %14697 = vmatprep.mubr.msk.bf16.mxu1 %vm5746_vm0, %v16004_v46  ;;  %14871 = vmatprep.mubr.msk.bf16.mxu0 %vm5746_vm0, %v16007_v55 }
 0x454   : > { %12787 = vmatpush1.bf16.msra.mxu0 %v16423_v63  ;;  %11916 = vmatprep.subr.bf16.mxu1 %v20107_v51 }
 0x455   : > { %v8538_v35 = vpop.f32.mrb[0].mxu1  ;;  %v9404_v22 = vpop.f32.mrb[0].mxu0  ;;  %12788 = vmatprep.subr.bf16.mxu0 %v20107_v51  ;;  %11917 = vmatpush1.bf16.msra.mxu1 %v16425_v57 }
 0x456   : > { %v8745_v61 = vmax.f32 %v18561_v29, %v8538_v35  ;;  %v8540_v21 = vpop.f32.mrb[1].mxu1  ;;  %v9406_v25 = vpop.f32.mrb[1].mxu0  ;;  %11918 = vmatprep.subr.bf16.mxu1 %v20107_v51  ;;  %v19011_v63 = vmax.f32 %v8743_v12, %v9404_v22  ;;  %v16426_v29 = vld [vmem:[%s20077_s1 + $0x38] sm:$0xff]  }
 0x457   : > { %v8541_v23 = vpop.f32.mrb[2].mxu1  ;;  %v9407_v45 = vpop.f32.mrb[2].mxu0  ;;  %v16008_v21 = vld [vmem:[%s17800_s8 + $0xb40] ss:$8 sps:$4 sm:$0xff]  }
 0x458   : > { %v8746_v46 = vmax.f32 %v18569_v62, %v8541_v23  ;;  %v9409_v55 = vpop.f32.mrb[3].mxu0  ;;  %v8543_v33 = vpop.f32.mrb[3].mxu1  ;;  %12789 = vmatpush1.bf16.msra.mxu0 %v16424_v53  ;;  %v19016_v19 = vmax.f32 %v8744_v34, %v9407_v45  ;;  %v16427_v34 = vld [vmem:[%s20077_s1 + $0x40] sm:$0xff]  }
 0x459   : > { %12790 = vmatprep.subr.bf16.mxu0 %v20107_v51  ;;  %11919 = vmatpush1.bf16.msra.mxu1 %v16426_v29  ;;  %v16011_v25 = vld [vmem:[%s17800_s8 + $0xd60] ss:$8 sps:$4 sm:$0xff]   ;;  %v16016_v23 = vld [vmem:[%s17800_s8 + $0xb54] ss:$8 sps:$4 sm:$0xff]  }
 0x45a   : > { %10221 = vmatmul.mubr.bf16.gmra.mrb[108].mxu1 %v16002_v1  ;;  %11087 = vmatmul.mubr.bf16.gmra.mrb[108].mxu0 %v16005_v32  ;;  %v16019_v45 = vld [vmem:[%s17800_s8 + $0xd74] ss:$8 sps:$4 sm:$0xff]  }
 0x45b   : > { %14698 = vmatprep.mubr.msk.bf16.mxu1 %vm5746_vm0, %v16010_v11  ;;  %14872 = vmatprep.mubr.msk.bf16.mxu0 %vm5746_vm0, %v16013_v0 }
 0x45c   : > { %12791 = vmatpush1.bf16.msra.mxu0 %v16425_v57  ;;  %11920 = vmatprep.subr.bf16.mxu1 %v20107_v51 }
 0x45d   : > { %v8546_v62 = vpop.f32.mrb[4].mxu1  ;;  %v9412_v12 = vpop.f32.mrb[4].mxu0  ;;  %12792 = vmatprep.subr.bf16.mxu0 %v20107_v51  ;;  %11921 = vmatpush1.bf16.msra.mxu1 %v16427_v34 }
 0x45e   : > { %v8747_v53 = vmax.f32 %v18578_v41, %v8546_v62  ;;  %v8548_v35 = vpop.f32.mrb[5].mxu1  ;;  %v9414_v22 = vpop.f32.mrb[5].mxu0  ;;  %11922 = vmatprep.subr.bf16.mxu1 %v20107_v51  ;;  %v19033_v57 = vmax.f32 %v8745_v61, %v9412_v12  ;;  %v16014_v62 = vld [vmem:[%s17800_s8 + $0xb50] ss:$8 sps:$4 sm:$0xff]  }
 0x45f   : > { %v8549_v1 = vpop.f32.mrb[6].mxu1  ;;  %v9415_v32 = vpop.f32.mrb[6].mxu0  ;;  %v16017_v12 = vld [vmem:[%s17800_s8 + $0xd70] ss:$8 sps:$4 sm:$0xff]  }
 0x460   : > { %v8748_v11 = vmax.f32 %v18585_v13, %v8549_v1  ;;  %v9417_v0 = vpop.f32.mrb[7].mxu0  ;;  %v8551_v55 = vpop.f32.mrb[7].mxu1  ;;  %12793 = vmatpush1.bf16.msra.mxu0 %v16426_v29  ;;  %v19038_v41 = vmax.f32 %v8746_v46, %v9415_v32  ;;  %v16025_v1 = vld [vmem:[%s17800_s8 + $0xd84] ss:$8 sps:$4 sm:$0xff]  }
 0x461   : > { %12794 = vmatprep.subr.bf16.mxu0 %v20107_v51  ;;  %11923 = vmatpush1.bf16.msra.mxu1 %v17867_v3  ;;  %v16020_v55 = vld [vmem:[%s17800_s8 + $0xb60] ss:$8 sps:$4 sm:$0xff]  }
 0x462   : > { %10229 = vmatmul.mubr.bf16.gmra.mrb[112].mxu1 %v16008_v21  ;;  %11095 = vmatmul.mubr.bf16.gmra.mrb[112].mxu0 %v16011_v25  ;;  %v16022_v25 = vld [vmem:[%s17800_s8 + $0xb64] ss:$8 sps:$4 sm:$0xff]  }
 0x463   : > { %14699 = vmatprep.mubr.msk.bf16.mxu1 %vm5746_vm0, %v16016_v23  ;;  %14873 = vmatprep.mubr.msk.bf16.mxu0 %vm5746_vm0, %v16019_v45 }
 0x464   : > { %12795 = vmatpush1.bf16.msra.mxu0 %v16427_v34 }
 0x465   : > { %v8554_v13 = vpop.f32.mrb[8].mxu1  ;;  %v9420_v61 = vpop.f32.mrb[8].mxu0  ;;  %12796 = vmatprep.subr.bf16.mxu0 %v20107_v51 }
 0x466   : > { %v8749_v46 = vmax.f32 %v18592_v60, %v8554_v13  ;;  %v8556_v33 = vpop.f32.mrb[9].mxu1  ;;  %v9422_v29 = vpop.f32.mrb[9].mxu0  ;;  %v19048_v35 = vmax.f32 %v8747_v53, %v9420_v61  ;;  %v16023_v13 = vld [vmem:[%s17800_s8 + $0xd80] ss:$8 sps:$4 sm:$0xff]  }
 0x467   : > { %v8557_v22 = vpop.f32.mrb[10].mxu1  ;;  %v9423_v21 = vpop.f32.mrb[10].mxu0  ;;  %v16028_v33 = vld [vmem:[%s17800_s8 + $0xb74] ss:$8 sps:$4 sm:$0xff]  }
 0x468   : > { %v8750_v34 = vmax.f32 %v18599_v54, %v8557_v22  ;;  %v9425_v32 = vpop.f32.mrb[11].mxu0  ;;  %v8559_v23 = vpop.f32.mrb[11].mxu1  ;;  %12797 = vmatpush1.bf16.msra.mxu0 %v17867_v3  ;;  %v19054_v51 = vmax.f32 %v8748_v11, %v9423_v21  ;;  %v16031_v29 = vld [vmem:[%s17800_s8 + $0xd94] ss:$8 sps:$4 sm:$0xff]  }
 0x469   : > { %v16026_v23 = vld [vmem:[%s17800_s8 + $0xb70] ss:$8 sps:$4 sm:$0xff]  }
 0x46a   : > { %10237 = vmatmul.mubr.bf16.gmra.mrb[116].mxu1 %v16014_v62  ;;  %11103 = vmatmul.mubr.bf16.gmra.mrb[116].mxu0 %v16017_v12 }
 0x46b   : > { %14700 = vmatprep.mubr.msk.bf16.mxu1 %vm5746_vm0, %v16022_v25  ;;  %14874 = vmatprep.mubr.msk.bf16.mxu0 %vm5746_vm0, %v16025_v1 }
 0x46d   : > { %v8562_v60 = vpop.f32.mrb[12].mxu1  ;;  %v9428_v53 = vpop.f32.mrb[12].mxu0 }
 0x46e   : > { %v8751_v45 = vmax.f32 %v18604_v49, %v8562_v60  ;;  %v8564_v0 = vpop.f32.mrb[13].mxu1  ;;  %v9430_v54 = vpop.f32.mrb[13].mxu0  ;;  %v19061_v61 = vmax.f32 %v8749_v46, %v9428_v53 }
 0x46f   : > { %v8565_v3 = vpop.f32.mrb[14].mxu1  ;;  %v9431_v11 = vpop.f32.mrb[14].mxu0  ;;  %v16034_v0 = vld [vmem:[%s17800_s8 + $0xb84] ss:$8 sps:$4 sm:$0xff]  }
 0x470   : > { %v8752_v62 = vmax.f32 %v18611_v17, %v8565_v3  ;;  %v9433_v12 = vpop.f32.mrb[15].mxu0  ;;  %v8567_v22 = vpop.f32.mrb[15].mxu1  ;;  %v19066_v21 = vmax.f32 %v8750_v34, %v9431_v11  ;;  %v16029_v17 = vld [vmem:[%s17800_s8 + $0xd90] ss:$8 sps:$4 sm:$0xff]   ;;  %v16037_v54 = vld [vmem:[%s17800_s8 + $0xda4] ss:$8 sps:$4 sm:$0xff]  }
 0x471   : > { %v16032_v22 = vld [vmem:[%s17800_s8 + $0xb80] ss:$8 sps:$4 sm:$0xff]  }
 0x472   : > { %10245 = vmatmul.mubr.bf16.gmra.mrb[120].mxu1 %v16020_v55  ;;  %11111 = vmatmul.mubr.bf16.gmra.mrb[120].mxu0 %v16023_v13 }
 0x473   : > { %14701 = vmatprep.mubr.msk.bf16.mxu1 %vm5746_vm0, %v16028_v33  ;;  %14875 = vmatprep.mubr.msk.bf16.mxu0 %vm5746_vm0, %v16031_v29 }
 0x475   : > { %v8570_v49 = vpop.f32.mrb[16].mxu1  ;;  %v9436_v46 = vpop.f32.mrb[16].mxu0 }
 0x476   : > { %v8753_v25 = vmax.f32 %v18616_v26, %v8570_v49  ;;  %v8572_v1 = vpop.f32.mrb[17].mxu1  ;;  %v9438_v32 = vpop.f32.mrb[17].mxu0  ;;  %v19073_v60 = vmax.f32 %v8751_v45, %v9436_v46 }
 0x477   : > { %v8573_v53 = vpop.f32.mrb[18].mxu1  ;;  %v9439_v34 = vpop.f32.mrb[18].mxu0  ;;  %v16040_v1 = vld [vmem:[%s17800_s8 + $0xb94] ss:$8 sps:$4 sm:$0xff]  }
 0x478   : > { %v8754_v55 = vmax.f32 %v18623_v15, %v8573_v53  ;;  %v9441_v13 = vpop.f32.mrb[19].mxu0  ;;  %v8575_v3 = vpop.f32.mrb[19].mxu1  ;;  %v19078_v11 = vmax.f32 %v8752_v62, %v9439_v34  ;;  %v16035_v15 = vld [vmem:[%s17800_s8 + $0xda0] ss:$8 sps:$4 sm:$0xff]   ;;  %v16043_v32 = vld [vmem:[%s17800_s8 + $0xdb4] ss:$8 sps:$4 sm:$0xff]  }
 0x479   : > { %v16038_v3 = vld [vmem:[%s17800_s8 + $0xb90] ss:$8 sps:$4 sm:$0xff]  }
 0x47a   : > { %10253 = vmatmul.mubr.bf16.gmra.mrb[124].mxu1 %v16026_v23  ;;  %11119 = vmatmul.mubr.bf16.gmra.mrb[124].mxu0 %v16029_v17 }
 0x47b   : > { %14702 = vmatprep.mubr.msk.bf16.mxu1 %vm5746_vm0, %v16034_v0  ;;  %14876 = vmatprep.mubr.msk.bf16.mxu0 %vm5746_vm0, %v16037_v54 }
 0x47d   : > { %v8578_v26 = vpop.f32.mrb[20].mxu1  ;;  %v9444_v45 = vpop.f32.mrb[20].mxu0 }
 0x47e   : > { %v8755_v33 = vmax.f32 %v18628_v2, %v8578_v26  ;;  %v8580_v29 = vpop.f32.mrb[21].mxu1  ;;  %v9446_v12 = vpop.f32.mrb[21].mxu0  ;;  %v19085_v49 = vmax.f32 %v8753_v25, %v9444_v45 }
 0x47f   : > { %v8581_v46 = vpop.f32.mrb[22].mxu1  ;;  %v9447_v62 = vpop.f32.mrb[22].mxu0  ;;  %v16046_v29 = vld [vmem:[%s17800_s8 + $0xba4] ss:$8 sps:$4 sm:$0xff]  }
 0x480   : > { %v8756_v23 = vmax.f32 %v18635_v38, %v8581_v46  ;;  %v9449_v17 = vpop.f32.mrb[23].mxu0  ;;  %v8583_v53 = vpop.f32.mrb[23].mxu1  ;;  %v19090_v34 = vmax.f32 %v8754_v55, %v9447_v62  ;;  %v16041_v38 = vld [vmem:[%s17800_s8 + $0xdb0] ss:$8 sps:$4 sm:$0xff]   ;;  %v16049_v12 = vld [vmem:[%s17800_s8 + $0xdc4] ss:$8 sps:$4 sm:$0xff]  }
 0x481   : > { %v16044_v53 = vld [vmem:[%s17800_s8 + $0xba0] ss:$8 sps:$4 sm:$0xff]  }
 0x482   : > { %10261 = vmatmul.mubr.bf16.gmra.mrb[128].mxu1 %v16032_v22  ;;  %11127 = vmatmul.mubr.bf16.gmra.mrb[128].mxu0 %v16035_v15 }
 0x483   : > { %14703 = vmatprep.mubr.msk.bf16.mxu1 %vm5746_vm0, %v16040_v1  ;;  %14877 = vmatprep.mubr.msk.bf16.mxu0 %vm5746_vm0, %v16043_v32 }
 0x485   : > { %v8586_v2 = vpop.f32.mrb[24].mxu1  ;;  %v9452_v25 = vpop.f32.mrb[24].mxu0 }
 0x486   : > { %v8757_v0 = vmax.f32 %v18640_v48, %v8586_v2  ;;  %v8588_v54 = vpop.f32.mrb[25].mxu1  ;;  %v9454_v13 = vpop.f32.mrb[25].mxu0  ;;  %v19097_v26 = vmax.f32 %v8755_v33, %v9452_v25 }
 0x487   : > { %v8589_v45 = vpop.f32.mrb[26].mxu1  ;;  %v9455_v55 = vpop.f32.mrb[26].mxu0  ;;  %v16052_v54 = vld [vmem:[%s17800_s8 + $0xbb4] ss:$8 sps:$4 sm:$0xff]  }
 0x488   : > { %v8758_v22 = vmax.f32 %v18647_v10, %v8589_v45  ;;  %v9457_v15 = vpop.f32.mrb[27].mxu0  ;;  %v8591_v46 = vpop.f32.mrb[27].mxu1  ;;  %v19102_v62 = vmax.f32 %v8756_v23, %v9455_v55  ;;  %v16047_v10 = vld [vmem:[%s17800_s8 + $0xdc0] ss:$8 sps:$4 sm:$0xff]   ;;  %v16055_v13 = vld [vmem:[%s17800_s8 + $0xdd4] ss:$8 sps:$4 sm:$0xff]  }
 0x489   : > { %v16050_v46 = vld [vmem:[%s17800_s8 + $0xbb0] ss:$8 sps:$4 sm:$0xff]  }
 0x48a   : > { %10269 = vmatmul.mubr.bf16.gmra.mrb[132].mxu1 %v16038_v3  ;;  %11135 = vmatmul.mubr.bf16.gmra.mrb[132].mxu0 %v16041_v38 }
 0x48b   : > { %14704 = vmatprep.mubr.msk.bf16.mxu1 %vm5746_vm0, %v16046_v29  ;;  %14878 = vmatprep.mubr.msk.bf16.mxu0 %vm5746_vm0, %v16049_v12 }
 0x48d   : > { %v8594_v48 = vpop.f32.mrb[28].mxu1  ;;  %v9460_v33 = vpop.f32.mrb[28].mxu0 }
 0x48e   : > { %v8759_v1 = vmax.f32 %v18652_v39, %v8594_v48  ;;  %v8596_v32 = vpop.f32.mrb[29].mxu1  ;;  %v9462_v17 = vpop.f32.mrb[29].mxu0  ;;  %v19109_v2 = vmax.f32 %v8757_v0, %v9460_v33 }
 0x48f   : > { %v8597_v25 = vpop.f32.mrb[30].mxu1  ;;  %v9463_v23 = vpop.f32.mrb[30].mxu0  ;;  %v16058_v32 = vld [vmem:[%s17800_s8 + $0xbc4] ss:$8 sps:$4 sm:$0xff]  }
 0x490   : > { %v8760_v3 = vmax.f32 %v18659_v42, %v8597_v25  ;;  %v9465_v38 = vpop.f32.mrb[31].mxu0  ;;  %v8599_v45 = vpop.f32.mrb[31].mxu1  ;;  %v19114_v55 = vmax.f32 %v8758_v22, %v9463_v23  ;;  %v16053_v42 = vld [vmem:[%s17800_s8 + $0xdd0] ss:$8 sps:$4 sm:$0xff]   ;;  %v16061_v17 = vld [vmem:[%s17800_s8 + $0xde4] ss:$8 sps:$4 sm:$0xff]  }
 0x491   : > { %v16056_v45 = vld [vmem:[%s17800_s8 + $0xbc0] ss:$8 sps:$4 sm:$0xff]  }
 0x492   : > { %10277 = vmatmul.mubr.bf16.gmra.mrb[136].mxu1 %v16044_v53  ;;  %11143 = vmatmul.mubr.bf16.gmra.mrb[136].mxu0 %v16047_v10 }
 0x493   : > { %14705 = vmatprep.mubr.msk.bf16.mxu1 %vm5746_vm0, %v16052_v54  ;;  %14879 = vmatprep.mubr.msk.bf16.mxu0 %vm5746_vm0, %v16055_v13 }
 0x495   : > { %v8602_v39 = vpop.f32.mrb[32].mxu1  ;;  %v9468_v0 = vpop.f32.mrb[32].mxu0 }
 0x496   : > { %v8761_v29 = vmax.f32 %v18664_v5, %v8602_v39  ;;  %v8604_v12 = vpop.f32.mrb[33].mxu1  ;;  %v9470_v15 = vpop.f32.mrb[33].mxu0  ;;  %v19121_v48 = vmax.f32 %v8759_v1, %v9468_v0 }
 0x497   : > { %v8605_v33 = vpop.f32.mrb[34].mxu1  ;;  %v9471_v22 = vpop.f32.mrb[34].mxu0  ;;  %v16064_v12 = vld [vmem:[%s17800_s8 + $0xbd4] ss:$8 sps:$4 sm:$0xff]  }
 0x498   : > { %v8762_v53 = vmax.f32 %v18671_v4, %v8605_v33  ;;  %v9473_v10 = vpop.f32.mrb[35].mxu0  ;;  %v8607_v25 = vpop.f32.mrb[35].mxu1  ;;  %v19126_v23 = vmax.f32 %v8760_v3, %v9471_v22  ;;  %v16059_v4 = vld [vmem:[%s17800_s8 + $0xde0] ss:$8 sps:$4 sm:$0xff]   ;;  %v16067_v15 = vld [vmem:[%s17800_s8 + $0xdf4] ss:$8 sps:$4 sm:$0xff]  }
 0x499   : > { %v16062_v25 = vld [vmem:[%s17800_s8 + $0xbd0] ss:$8 sps:$4 sm:$0xff]  }
 0x49a   : > { %10285 = vmatmul.mubr.bf16.gmra.mrb[140].mxu1 %v16050_v46  ;;  %11151 = vmatmul.mubr.bf16.gmra.mrb[140].mxu0 %v16053_v42 }
 0x49b   : > { %14706 = vmatprep.mubr.msk.bf16.mxu1 %vm5746_vm0, %v16058_v32  ;;  %14880 = vmatprep.mubr.msk.bf16.mxu0 %vm5746_vm0, %v16061_v17 }
 0x49d   : > { %v8610_v5 = vpop.f32.mrb[36].mxu1  ;;  %v9476_v1 = vpop.f32.mrb[36].mxu0 }
 0x49e   : > { %v8763_v54 = vmax.f32 %v18676_v43, %v8610_v5  ;;  %v8612_v13 = vpop.f32.mrb[37].mxu1  ;;  %v9478_v38 = vpop.f32.mrb[37].mxu0  ;;  %v19133_v39 = vmax.f32 %v8761_v29, %v9476_v1 }
 0x49f   : > { %v8613_v0 = vpop.f32.mrb[38].mxu1  ;;  %v9479_v3 = vpop.f32.mrb[38].mxu0  ;;  %v16070_v13 = vld [vmem:[%s17800_s8 + $0xbe4] ss:$8 sps:$4 sm:$0xff]  }
 0x4a0   : > { %v8764_v46 = vmax.f32 %v18683_v16, %v8613_v0  ;;  %v9481_v42 = vpop.f32.mrb[39].mxu0  ;;  %v8615_v33 = vpop.f32.mrb[39].mxu1  ;;  %v19138_v22 = vmax.f32 %v8762_v53, %v9479_v3  ;;  %v16065_v16 = vld [vmem:[%s17800_s8 + $0xdf0] ss:$8 sps:$4 sm:$0xff]   ;;  %v16073_v38 = vld [vmem:[%s17800_s8 + $0xe04] ss:$8 sps:$4 sm:$0xff]  }
 0x4a2   : > { %10293 = vmatmul.mubr.bf16.gmra.mrb[144].mxu1 %v16056_v45  ;;  %11159 = vmatmul.mubr.bf16.gmra.mrb[144].mxu0 %v16059_v4  ;;  %v20161_v45 = vld [vmem:[#allocation3_spill] sm:$0xff] }
 0x4a3   : > { %14707 = vmatprep.mubr.msk.bf16.mxu1 %vm5746_vm0, %v16064_v12  ;;  %14881 = vmatprep.mubr.msk.bf16.mxu0 %vm5746_vm0, %v16067_v15  ;;  %v20162_v15 = vld [vmem:[#allocation4_spill] sm:$0xff] }
 0x4a5   : > { %v8618_v43 = vpop.f32.mrb[40].mxu1  ;;  %v9484_v29 = vpop.f32.mrb[40].mxu0 }
 0x4a6   : > { %v8765_v32 = vmax.f32 %v18688_v8, %v8618_v43  ;;  %v8620_v17 = vpop.f32.mrb[41].mxu1  ;;  %v9486_v10 = vpop.f32.mrb[41].mxu0  ;;  %v19145_v5 = vmax.f32 %v8763_v54, %v9484_v29  ;;  %v16068_v29 = vld [vmem:[%s17800_s8 + $0xbe0] ss:$8 sps:$4 sm:$0xff]  }
 0x4a7   : > { %v8621_v1 = vpop.f32.mrb[42].mxu1  ;;  %v9487_v53 = vpop.f32.mrb[42].mxu0  ;;  %v16071_v17 = vld [vmem:[%s17800_s8 + $0xe00] ss:$8 sps:$4 sm:$0xff]  }
 0x4a8   : > { %v8766_v4 = vmax.f32 %v20161_v45, %v8621_v1  ;;  %v9489_v0 = vpop.f32.mrb[43].mxu0  ;;  %v8623_v3 = vpop.f32.mrb[43].mxu1  ;;  %v19150_v12 = vmax.f32 %v8764_v46, %v9487_v53  ;;  %v16076_v53 = vld [vmem:[%s17800_s8 + $0xbf4] ss:$8 sps:$4 sm:$0xff]  }
 0x4aa   : > { %10301 = vmatmul.mubr.bf16.gmra.mrb[148].mxu1 %v16062_v25  ;;  %11167 = vmatmul.mubr.bf16.gmra.mrb[148].mxu0 %v16065_v16  ;;  %v16079_v25 = vld [vmem:[%s17800_s8 + $0xe14] ss:$8 sps:$4 sm:$0xff]  }
 0x4ab   : > { %14708 = vmatprep.mubr.msk.bf16.mxu1 %vm5746_vm0, %v16070_v13  ;;  %14882 = vmatprep.mubr.msk.bf16.mxu0 %vm5746_vm0, %v16073_v38  ;;  %v20163_v16 = vld [vmem:[#allocation5_spill] sm:$0xff] }
 0x4ad   : > { %v8626_v8 = vpop.f32.mrb[44].mxu1  ;;  %v9492_v54 = vpop.f32.mrb[44].mxu0 }
 0x4ae   : > { %v8767_v42 = vmax.f32 %v20162_v15, %v8626_v8  ;;  %v8628_v33 = vpop.f32.mrb[45].mxu1  ;;  %v9494_v43 = vpop.f32.mrb[45].mxu0  ;;  %v19157_v10 = vmax.f32 %v8765_v32, %v9492_v54  ;;  %v20165_v8 = vld [vmem:[#allocation6_spill] sm:$0xff] }
 0x4af   : > { %v8629_v1 = vpop.f32.mrb[46].mxu1  ;;  %v9495_v46 = vpop.f32.mrb[46].mxu0  ;;  %v16074_v43 = vld [vmem:[%s17800_s8 + $0xbf0] ss:$8 sps:$4 sm:$0xff]  }
 0x4b0   : > { %v8768_v13 = vmax.f32 %v20163_v16, %v8629_v1  ;;  %v9497_v45 = vpop.f32.mrb[47].mxu0  ;;  %v8631_v38 = vpop.f32.mrb[47].mxu1  ;;  %v19162_v0 = vmax.f32 %v8766_v4, %v9495_v46  ;;  %v16077_v1 = vld [vmem:[%s17800_s8 + $0xe10] ss:$8 sps:$4 sm:$0xff]   ;;  %v16082_v46 = vld [vmem:[%s17800_s8 + $0xc04] ss:$8 sps:$4 sm:$0xff]  }
 0x4b2   : > { %20164 = vst [vmem:[#allocation3_spill] sm:$0xff] %v19162_v0  ;;  %10309 = vmatmul.mubr.bf16.gmra.mrb[152].mxu1 %v16068_v29  ;;  %11175 = vmatmul.mubr.bf16.gmra.mrb[152].mxu0 %v16071_v17  ;;  %v16085_v29 = vld [vmem:[%s17800_s8 + $0xe24] ss:$8 sps:$4 sm:$0xff]  }
 0x4b3   : > { %14709 = vmatprep.mubr.msk.bf16.mxu1 %vm5746_vm0, %v16076_v53  ;;  %14883 = vmatprep.mubr.msk.bf16.mxu0 %vm5746_vm0, %v16079_v25  ;;  %v20167_v17 = vld [vmem:[#allocation7_spill] sm:$0xff] }
 0x4b5   : > { %v8634_v32 = vpop.f32.mrb[48].mxu1  ;;  %v9500_v3 = vpop.f32.mrb[48].mxu0 }
 0x4b6   : > { %v8769_v54 = vmax.f32 %v20165_v8, %v8634_v32  ;;  %v8636_v15 = vpop.f32.mrb[49].mxu1  ;;  %v9502_v33 = vpop.f32.mrb[49].mxu0  ;;  %v19169_v16 = vmax.f32 %v8767_v42, %v9500_v3  ;;  %v20169_v3 = vld [vmem:[#allocation8_spill] sm:$0xff] }
 0x4b7   : > { %v8637_v45 = vpop.f32.mrb[50].mxu1  ;;  %v9503_v4 = vpop.f32.mrb[50].mxu0 }
 0x4b8   : > { %20166 = vst [vmem:[#allocation4_spill] sm:$0xff] %v19169_v16  ;;  %v8770_v53 = vmax.f32 %v20167_v17, %v8637_v45  ;;  %v9505_v38 = vpop.f32.mrb[51].mxu0  ;;  %v8639_v25 = vpop.f32.mrb[51].mxu1  ;;  %v19174_v0 = vmax.f32 %v8768_v13, %v9503_v4  ;;  %v16080_v16 = vld [vmem:[%s17800_s8 + $0xc00] ss:$8 sps:$4 sm:$0xff]  }
 0x4b9   : > { %v16083_v45 = vld [vmem:[%s17800_s8 + $0xe20] ss:$8 sps:$4 sm:$0xff]   ;;  %v16088_v4 = vld [vmem:[%s17800_s8 + $0xc14] ss:$8 sps:$4 sm:$0xff]  }
 0x4ba   : > { %20168 = vst [vmem:[#allocation5_spill] sm:$0xff] %v19174_v0  ;;  %10317 = vmatmul.mubr.bf16.gmra.mrb[156].mxu1 %v16074_v43  ;;  %11183 = vmatmul.mubr.bf16.gmra.mrb[156].mxu0 %v16077_v1  ;;  %v16091_v43 = vld [vmem:[%s17800_s8 + $0xe34] ss:$8 sps:$4 sm:$0xff]  }
 0x4bb   : > { %14710 = vmatprep.mubr.msk.bf16.mxu1 %vm5746_vm0, %v16082_v46  ;;  %14884 = vmatprep.mubr.msk.bf16.mxu0 %vm5746_vm0, %v16085_v29  ;;  %v20171_v1 = vld [vmem:[#allocation9_spill] sm:$0xff] }
 0x4bd   : > { %v8642_v42 = vpop.f32.mrb[52].mxu1  ;;  %v9508_v32 = vpop.f32.mrb[52].mxu0 }
 0x4be   : > { %v8771_v8 = vmax.f32 %v20169_v3, %v8642_v42  ;;  %v8644_v15 = vpop.f32.mrb[53].mxu1  ;;  %v9510_v33 = vpop.f32.mrb[53].mxu0  ;;  %v19181_v17 = vmax.f32 %v8769_v54, %v9508_v32  ;;  %v20173_v32 = vld [vmem:[#allocation10_spill] sm:$0xff] }
 0x4bf   : > { %v8645_v38 = vpop.f32.mrb[54].mxu1  ;;  %v9511_v13 = vpop.f32.mrb[54].mxu0 }
 0x4c0   : > { %20170 = vst [vmem:[#allocation6_spill] sm:$0xff] %v19181_v17  ;;  %v8772_v46 = vmax.f32 %v20171_v1, %v8645_v38  ;;  %v9513_v25 = vpop.f32.mrb[55].mxu0  ;;  %v8647_v29 = vpop.f32.mrb[55].mxu1  ;;  %v19186_v0 = vmax.f32 %v8770_v53, %v9511_v13  ;;  %v16086_v17 = vld [vmem:[%s17800_s8 + $0xc10] ss:$8 sps:$4 sm:$0xff]  }
 0x4c1   : > { %v16089_v38 = vld [vmem:[%s17800_s8 + $0xe30] ss:$8 sps:$4 sm:$0xff]   ;;  %v16094_v13 = vld [vmem:[%s17800_s8 + $0xc24] ss:$8 sps:$4 sm:$0xff]  }
 0x4c2   : > { %20172 = vst [vmem:[#allocation7_spill] sm:$0xff] %v19186_v0  ;;  %10325 = vmatmul.mubr.bf16.gmra.mrb[160].mxu1 %v16080_v16  ;;  %11191 = vmatmul.mubr.bf16.gmra.mrb[160].mxu0 %v16083_v45  ;;  %v16097_v16 = vld [vmem:[%s17800_s8 + $0xe44] ss:$8 sps:$4 sm:$0xff]  }
 0x4c3   : > { %14711 = vmatprep.mubr.msk.bf16.mxu1 %vm5746_vm0, %v16088_v4  ;;  %14885 = vmatprep.mubr.msk.bf16.mxu0 %vm5746_vm0, %v16091_v43  ;;  %v20175_v45 = vld [vmem:[#allocation11_spill] sm:$0xff] }
 0x4c5   : > { %v8650_v54 = vpop.f32.mrb[56].mxu1  ;;  %v9516_v42 = vpop.f32.mrb[56].mxu0 }
 0x4c6   : > { %v8773_v3 = vmax.f32 %v20173_v32, %v8650_v54  ;;  %v8652_v15 = vpop.f32.mrb[57].mxu1  ;;  %v9518_v33 = vpop.f32.mrb[57].mxu0  ;;  %v19193_v1 = vmax.f32 %v8771_v8, %v9516_v42  ;;  %v20177_v42 = vld [vmem:[#allocation12_spill] sm:$0xff] }
 0x4c7   : > { %v8653_v25 = vpop.f32.mrb[58].mxu1  ;;  %v9519_v53 = vpop.f32.mrb[58].mxu0 }
 0x4c8   : > { %20174 = vst [vmem:[#allocation8_spill] sm:$0xff] %v19193_v1  ;;  %v8774_v4 = vmax.f32 %v20175_v45, %v8653_v25  ;;  %v9521_v29 = vpop.f32.mrb[59].mxu0  ;;  %v8655_v43 = vpop.f32.mrb[59].mxu1  ;;  %v19198_v0 = vmax.f32 %v8772_v46, %v9519_v53  ;;  %v16092_v1 = vld [vmem:[%s17800_s8 + $0xc20] ss:$8 sps:$4 sm:$0xff]  }
 0x4c9   : > { %v16095_v25 = vld [vmem:[%s17800_s8 + $0xe40] ss:$8 sps:$4 sm:$0xff]   ;;  %v16100_v53 = vld [vmem:[%s17800_s8 + $0xc34] ss:$8 sps:$4 sm:$0xff]  }
 0x4ca   : > { %20176 = vst [vmem:[#allocation9_spill] sm:$0xff] %v19198_v0  ;;  %10333 = vmatmul.mubr.bf16.gmra.mrb[164].mxu1 %v16086_v17  ;;  %11199 = vmatmul.mubr.bf16.gmra.mrb[164].mxu0 %v16089_v38  ;;  %v16103_v17 = vld [vmem:[%s17800_s8 + $0xe54] ss:$8 sps:$4 sm:$0xff]  }
 0x4cb   : > { %14712 = vmatprep.mubr.msk.bf16.mxu1 %vm5746_vm0, %v16094_v13  ;;  %14886 = vmatprep.mubr.msk.bf16.mxu0 %vm5746_vm0, %v16097_v16  ;;  %v20179_v38 = vld [vmem:[#allocation13_spill] sm:$0xff] }
 0x4cd   : > { %v8658_v8 = vpop.f32.mrb[60].mxu1  ;;  %v9524_v54 = vpop.f32.mrb[60].mxu0 }
 0x4ce   : > { %v8775_v32 = vmax.f32 %v20177_v42, %v8658_v8  ;;  %v8660_v15 = vpop.f32.mrb[61].mxu1  ;;  %v9526_v33 = vpop.f32.mrb[61].mxu0  ;;  %v19205_v45 = vmax.f32 %v8773_v3, %v9524_v54  ;;  %v20181_v54 = vld [vmem:[#allocation14_spill] sm:$0xff] }
 0x4cf   : > { %v8661_v29 = vpop.f32.mrb[62].mxu1  ;;  %v9527_v46 = vpop.f32.mrb[62].mxu0 }
 0x4d0   : > { %20178 = vst [vmem:[#allocation10_spill] sm:$0xff] %v19205_v45  ;;  %v8776_v13 = vmax.f32 %v20179_v38, %v8661_v29  ;;  %v9529_v43 = vpop.f32.mrb[63].mxu0  ;;  %v8663_v16 = vpop.f32.mrb[63].mxu1  ;;  %v19210_v0 = vmax.f32 %v8774_v4, %v9527_v46  ;;  %v16098_v45 = vld [vmem:[%s17800_s8 + $0xc30] ss:$8 sps:$4 sm:$0xff]  }
 0x4d1   : > { %v16101_v29 = vld [vmem:[%s17800_s8 + $0xe50] ss:$8 sps:$4 sm:$0xff]   ;;  %v16106_v46 = vld [vmem:[%s17800_s8 + $0xc44] ss:$8 sps:$4 sm:$0xff]  }
 0x4d2   : > { %20180 = vst [vmem:[#allocation11_spill] sm:$0xff] %v19210_v0  ;;  %10341 = vmatmul.mubr.bf16.gmra.mrb[168].mxu1 %v16092_v1  ;;  %11207 = vmatmul.mubr.bf16.gmra.mrb[168].mxu0 %v16095_v25  ;;  %v16109_v1 = vld [vmem:[%s17800_s8 + $0xe64] ss:$8 sps:$4 sm:$0xff]  }
 0x4d3   : > { %14713 = vmatprep.mubr.msk.bf16.mxu1 %vm5746_vm0, %v16100_v53  ;;  %14887 = vmatprep.mubr.msk.bf16.mxu0 %vm5746_vm0, %v16103_v17  ;;  %v20183_v25 = vld [vmem:[#allocation15_spill] sm:$0xff] }
 0x4d5   : > { %v8666_v3 = vpop.f32.mrb[64].mxu1  ;;  %v9532_v8 = vpop.f32.mrb[64].mxu0 }
 0x4d6   : > { %v8777_v42 = vmax.f32 %v20181_v54, %v8666_v3  ;;  %v8668_v15 = vpop.f32.mrb[65].mxu1  ;;  %v9534_v33 = vpop.f32.mrb[65].mxu0  ;;  %v19217_v38 = vmax.f32 %v8775_v32, %v9532_v8  ;;  %v20185_v8 = vld [vmem:[#allocation16_spill] sm:$0xff] }
 0x4d7   : > { %v8669_v43 = vpop.f32.mrb[66].mxu1  ;;  %v9535_v4 = vpop.f32.mrb[66].mxu0 }
 0x4d8   : > { %20182 = vst [vmem:[#allocation12_spill] sm:$0xff] %v19217_v38  ;;  %v8778_v53 = vmax.f32 %v20183_v25, %v8669_v43  ;;  %v9537_v16 = vpop.f32.mrb[67].mxu0  ;;  %v8671_v17 = vpop.f32.mrb[67].mxu1  ;;  %v19222_v0 = vmax.f32 %v8776_v13, %v9535_v4  ;;  %v16104_v38 = vld [vmem:[%s17800_s8 + $0xc40] ss:$8 sps:$4 sm:$0xff]  }
 0x4d9   : > { %v16107_v43 = vld [vmem:[%s17800_s8 + $0xe60] ss:$8 sps:$4 sm:$0xff]   ;;  %v16112_v4 = vld [vmem:[%s17800_s8 + $0xc54] ss:$8 sps:$4 sm:$0xff]  }
 0x4da   : > { %20184 = vst [vmem:[#allocation13_spill] sm:$0xff] %v19222_v0  ;;  %10349 = vmatmul.mubr.bf16.gmra.mrb[172].mxu1 %v16098_v45  ;;  %11215 = vmatmul.mubr.bf16.gmra.mrb[172].mxu0 %v16101_v29  ;;  %v16115_v45 = vld [vmem:[%s17800_s8 + $0xe74] ss:$8 sps:$4 sm:$0xff]  }
 0x4db   : > { %14714 = vmatprep.mubr.msk.bf16.mxu1 %vm5746_vm0, %v16106_v46  ;;  %14888 = vmatprep.mubr.msk.bf16.mxu0 %vm5746_vm0, %v16109_v1  ;;  %v20187_v29 = vld [vmem:[#allocation17_spill] sm:$0xff] }
 0x4dd   : > { %v8674_v32 = vpop.f32.mrb[68].mxu1  ;;  %v9540_v3 = vpop.f32.mrb[68].mxu0 }
 0x4de   : > { %v8779_v54 = vmax.f32 %v20185_v8, %v8674_v32  ;;  %v8676_v15 = vpop.f32.mrb[69].mxu1  ;;  %v9542_v33 = vpop.f32.mrb[69].mxu0  ;;  %v19229_v25 = vmax.f32 %v8777_v42, %v9540_v3  ;;  %v20189_v3 = vld [vmem:[#allocation18_spill] sm:$0xff] }
 0x4df   : > { %v8677_v16 = vpop.f32.mrb[70].mxu1  ;;  %v9543_v13 = vpop.f32.mrb[70].mxu0 }
 0x4e0   : > { %20186 = vst [vmem:[#allocation14_spill] sm:$0xff] %v19229_v25  ;;  %v8780_v46 = vmax.f32 %v20187_v29, %v8677_v16  ;;  %v9545_v17 = vpop.f32.mrb[71].mxu0  ;;  %v8679_v1 = vpop.f32.mrb[71].mxu1  ;;  %v19234_v0 = vmax.f32 %v8778_v53, %v9543_v13  ;;  %v16110_v25 = vld [vmem:[%s17800_s8 + $0xc50] ss:$8 sps:$4 sm:$0xff]  }
 0x4e1   : > { %v16113_v16 = vld [vmem:[%s17800_s8 + $0xe70] ss:$8 sps:$4 sm:$0xff]   ;;  %v16118_v13 = vld [vmem:[%s17800_s8 + $0xc64] ss:$8 sps:$4 sm:$0xff]  }
 0x4e2   : > { %20188 = vst [vmem:[#allocation15_spill] sm:$0xff] %v19234_v0  ;;  %10357 = vmatmul.mubr.bf16.gmra.mrb[176].mxu1 %v16104_v38  ;;  %11223 = vmatmul.mubr.bf16.gmra.mrb[176].mxu0 %v16107_v43  ;;  %v16121_v38 = vld [vmem:[%s17800_s8 + $0xe84] ss:$8 sps:$4 sm:$0xff]  }
 0x4e3   : > { %14715 = vmatprep.mubr.msk.bf16.mxu1 %vm5746_vm0, %v16112_v4  ;;  %14889 = vmatprep.mubr.msk.bf16.mxu0 %vm5746_vm0, %v16115_v45  ;;  %v20191_v43 = vld [vmem:[#allocation19_spill] sm:$0xff] }
 0x4e5   : > { %v8682_v42 = vpop.f32.mrb[72].mxu1  ;;  %v9548_v32 = vpop.f32.mrb[72].mxu0 }
 0x4e6   : > { %v8781_v8 = vmax.f32 %v20189_v3, %v8682_v42  ;;  %v8684_v15 = vpop.f32.mrb[73].mxu1  ;;  %v9550_v33 = vpop.f32.mrb[73].mxu0  ;;  %v19241_v29 = vmax.f32 %v8779_v54, %v9548_v32  ;;  %v20193_v32 = vld [vmem:[#allocation20_spill] sm:$0xff] }
 0x4e7   : > { %v8685_v17 = vpop.f32.mrb[74].mxu1  ;;  %v9551_v53 = vpop.f32.mrb[74].mxu0 }
 0x4e8   : > { %20190 = vst [vmem:[#allocation16_spill] sm:$0xff] %v19241_v29  ;;  %v8782_v4 = vmax.f32 %v20191_v43, %v8685_v17  ;;  %v9553_v1 = vpop.f32.mrb[75].mxu0  ;;  %v8687_v45 = vpop.f32.mrb[75].mxu1  ;;  %v19246_v0 = vmax.f32 %v8780_v46, %v9551_v53  ;;  %v16116_v29 = vld [vmem:[%s17800_s8 + $0xc60] ss:$8 sps:$4 sm:$0xff]  }
 0x4e9   : > { %v16119_v17 = vld [vmem:[%s17800_s8 + $0xe80] ss:$8 sps:$4 sm:$0xff]   ;;  %v16124_v53 = vld [vmem:[%s17800_s8 + $0xc74] ss:$8 sps:$4 sm:$0xff]  }
 0x4ea   : > { %20192 = vst [vmem:[#allocation17_spill] sm:$0xff] %v19246_v0  ;;  %10365 = vmatmul.mubr.bf16.gmra.mrb[180].mxu1 %v16110_v25  ;;  %11231 = vmatmul.mubr.bf16.gmra.mrb[180].mxu0 %v16113_v16  ;;  %v16127_v25 = vld [vmem:[%s17800_s8 + $0xe94] ss:$8 sps:$4 sm:$0xff]  }
 0x4eb   : > { %14716 = vmatprep.mubr.msk.bf16.mxu1 %vm5746_vm0, %v16118_v13  ;;  %14890 = vmatprep.mubr.msk.bf16.mxu0 %vm5746_vm0, %v16121_v38  ;;  %v20195_v16 = vld [vmem:[#allocation21_spill] sm:$0xff] }
 0x4ed   : > { %v8690_v54 = vpop.f32.mrb[76].mxu1  ;;  %v9556_v42 = vpop.f32.mrb[76].mxu0 }
 0x4ee   : > { %v8783_v3 = vmax.f32 %v20193_v32, %v8690_v54  ;;  %v8692_v15 = vpop.f32.mrb[77].mxu1  ;;  %v9558_v33 = vpop.f32.mrb[77].mxu0  ;;  %v19253_v43 = vmax.f32 %v8781_v8, %v9556_v42  ;;  %v20197_v42 = vld [vmem:[#allocation22_spill] sm:$0xff] }
 0x4ef   : > { %v8693_v1 = vpop.f32.mrb[78].mxu1  ;;  %v9559_v46 = vpop.f32.mrb[78].mxu0 }
 0x4f0   : > { %20194 = vst [vmem:[#allocation18_spill] sm:$0xff] %v19253_v43  ;;  %v8784_v13 = vmax.f32 %v20195_v16, %v8693_v1  ;;  %v9561_v45 = vpop.f32.mrb[79].mxu0  ;;  %v8695_v38 = vpop.f32.mrb[79].mxu1  ;;  %v19258_v0 = vmax.f32 %v8782_v4, %v9559_v46  ;;  %v16122_v43 = vld [vmem:[%s17800_s8 + $0xc70] ss:$8 sps:$4 sm:$0xff]  }
 0x4f1   : > { %v16125_v1 = vld [vmem:[%s17800_s8 + $0xe90] ss:$8 sps:$4 sm:$0xff]   ;;  %v16130_v46 = vld [vmem:[%s17800_s8 + $0xc84] ss:$8 sps:$4 sm:$0xff]  }
 0x4f2   : > { %20196 = vst [vmem:[#allocation19_spill] sm:$0xff] %v19258_v0  ;;  %10373 = vmatmul.mubr.bf16.gmra.mrb[184].mxu1 %v16116_v29  ;;  %11239 = vmatmul.mubr.bf16.gmra.mrb[184].mxu0 %v16119_v17  ;;  %v16133_v29 = vld [vmem:[%s17800_s8 + $0xea4] ss:$8 sps:$4 sm:$0xff]  }
 0x4f3   : > { %14717 = vmatprep.mubr.msk.bf16.mxu1 %vm5746_vm0, %v16124_v53  ;;  %14891 = vmatprep.mubr.msk.bf16.mxu0 %vm5746_vm0, %v16127_v25  ;;  %v20198_v17 = vld [vmem:[#allocation23_spill] sm:$0xff] }
 0x4f5   : > { %v8698_v8 = vpop.f32.mrb[80].mxu1  ;;  %v9564_v54 = vpop.f32.mrb[80].mxu0 }
 0x4f6   : > { %v8785_v32 = vmax.f32 %v20197_v42, %v8698_v8  ;;  %v8700_v15 = vpop.f32.mrb[81].mxu1  ;;  %v9566_v33 = vpop.f32.mrb[81].mxu0  ;;  %v19265_v16 = vmax.f32 %v8783_v3, %v9564_v54 }
 0x4f7   : > { %v8701_v45 = vpop.f32.mrb[82].mxu1  ;;  %v9567_v4 = vpop.f32.mrb[82].mxu0  ;;  %v16128_v33 = vld [vmem:[%s17800_s8 + $0xc80] ss:$8 sps:$4 sm:$0xff]  }
 0x4f8   : > { %v8786_v53 = vmax.f32 %v20198_v17, %v8701_v45  ;;  %v9569_v38 = vpop.f32.mrb[83].mxu0  ;;  %v8703_v25 = vpop.f32.mrb[83].mxu1  ;;  %v19270_v0 = vmax.f32 %v8784_v13, %v9567_v4  ;;  %v16131_v45 = vld [vmem:[%s17800_s8 + $0xea0] ss:$8 sps:$4 sm:$0xff]   ;;  %v16136_v4 = vld [vmem:[%s17800_s8 + $0xc94] ss:$8 sps:$4 sm:$0xff]  }
 0x4fa   : > { %10381 = vmatmul.mubr.bf16.gmra.mrb[188].mxu1 %v16122_v43  ;;  %11247 = vmatmul.mubr.bf16.gmra.mrb[188].mxu0 %v16125_v1  ;;  %v16139_v43 = vld [vmem:[%s17800_s8 + $0xeb4] ss:$8 sps:$4 sm:$0xff]  }
 0x4fb   : > { %14718 = vmatprep.mubr.msk.bf16.mxu1 %vm5746_vm0, %v16130_v46  ;;  %14892 = vmatprep.mubr.msk.bf16.mxu0 %vm5746_vm0, %v16133_v29 }
 0x4fd   : > { %v8706_v3 = vpop.f32.mrb[84].mxu1  ;;  %v9572_v8 = vpop.f32.mrb[84].mxu0 }
 0x4fe   : > { %v8787_v54 = vmax.f32 %v18820_v28, %v8706_v3  ;;  %v8708_v42 = vpop.f32.mrb[85].mxu1  ;;  %v9574_v15 = vpop.f32.mrb[85].mxu0  ;;  %v19277_v17 = vmax.f32 %v8785_v32, %v9572_v8 }
 0x4ff   : > { %v8709_v38 = vpop.f32.mrb[86].mxu1  ;;  %v9575_v13 = vpop.f32.mrb[86].mxu0  ;;  %v16134_v15 = vld [vmem:[%s17800_s8 + $0xc90] ss:$8 sps:$4 sm:$0xff]  }
 0x500   : > { %v8788_v1 = vmax.f32 %v18827_v20, %v8709_v38  ;;  %v9577_v46 = vpop.f32.mrb[87].mxu0  ;;  %v8711_v29 = vpop.f32.mrb[87].mxu1  ;;  %v19282_v25 = vmax.f32 %v8786_v53, %v9575_v13  ;;  %v16137_v20 = vld [vmem:[%s17800_s8 + $0xeb0] ss:$8 sps:$4 sm:$0xff]   ;;  %v16142_v13 = vld [vmem:[%s17800_s8 + $0xca4] ss:$8 sps:$4 sm:$0xff]  }
 0x502   : > { %10389 = vmatmul.mubr.bf16.gmra.mrb[192].mxu1 %v16128_v33  ;;  %11255 = vmatmul.mubr.bf16.gmra.mrb[192].mxu0 %v16131_v45  ;;  %v16145_v33 = vld [vmem:[%s17800_s8 + $0xec4] ss:$8 sps:$4 sm:$0xff]  }
 0x503   : > { %14719 = vmatprep.mubr.msk.bf16.mxu1 %vm5746_vm0, %v16136_v4  ;;  %14893 = vmatprep.mubr.msk.bf16.mxu0 %vm5746_vm0, %v16139_v43 }
 0x505   : > { %v8714_v28 = vpop.f32.mrb[88].mxu1  ;;  %v9580_v32 = vpop.f32.mrb[88].mxu0 }
 0x506   : > { %v8789_v3 = vmax.f32 %v18831_v44, %v8714_v28  ;;  %v8716_v8 = vpop.f32.mrb[89].mxu1  ;;  %v9582_v42 = vpop.f32.mrb[89].mxu0  ;;  %v19289_v38 = vmax.f32 %v8787_v54, %v9580_v32 }
 0x507   : > { %v8717_v46 = vpop.f32.mrb[90].mxu1  ;;  %v9583_v53 = vpop.f32.mrb[90].mxu0  ;;  %v16140_v42 = vld [vmem:[%s17800_s8 + $0xca0] ss:$8 sps:$4 sm:$0xff]  }
 0x508   : > { %v8790_v45 = vmax.f32 %v18838_v36, %v8717_v46  ;;  %v9585_v4 = vpop.f32.mrb[91].mxu0  ;;  %v8719_v43 = vpop.f32.mrb[91].mxu1  ;;  %v19294_v29 = vmax.f32 %v8788_v1, %v9583_v53  ;;  %v16143_v36 = vld [vmem:[%s17800_s8 + $0xec0] ss:$8 sps:$4 sm:$0xff]   ;;  %v16148_v53 = vld [vmem:[%s17800_s8 + $0xcb4] ss:$8 sps:$4 sm:$0xff]  }
 0x50a   : > { %10397 = vmatmul.mubr.bf16.gmra.mrb[196].mxu1 %v16134_v15  ;;  %11263 = vmatmul.mubr.bf16.gmra.mrb[196].mxu0 %v16137_v20  ;;  %v16151_v15 = vld [vmem:[%s17800_s8 + $0xed4] ss:$8 sps:$4 sm:$0xff]  }
 0x50b   : > { %14720 = vmatprep.mubr.msk.bf16.mxu1 %vm5746_vm0, %v16142_v13  ;;  %14894 = vmatprep.mubr.msk.bf16.mxu0 %vm5746_vm0, %v16145_v33 }
 0x50d   : > { %v9588_v44 = vpop.f32.mrb[92].mxu0  ;;  %v10190_v54 = vpop.f32.mrb[92].mxu1 }
 0x50e   : > { %v10469_v28 = vmax.f32 %v18844_v59, %v10190_v54  ;;  %v9590_v32 = vpop.f32.mrb[93].mxu0  ;;  %v10192_v8 = vpop.f32.mrb[93].mxu1  ;;  %v19301_v46 = vmax.f32 %v8789_v3, %v9588_v44 }
 0x50f   : > { %v9591_v4 = vpop.f32.mrb[94].mxu0  ;;  %v10193_v1 = vpop.f32.mrb[94].mxu1  ;;  %v16146_v8 = vld [vmem:[%s17800_s8 + $0xcb0] ss:$8 sps:$4 sm:$0xff]  }
 0x510   : > { %v10470_v20 = vmax.f32 %v18851_v31, %v10193_v1  ;;  %v9593_v13 = vpop.f32.mrb[95].mxu0  ;;  %v10195_v33 = vpop.f32.mrb[95].mxu1  ;;  %v19306_v43 = vmax.f32 %v8790_v45, %v9591_v4  ;;  %v16149_v31 = vld [vmem:[%s17800_s8 + $0xed0] ss:$8 sps:$4 sm:$0xff]   ;;  %v16154_v4 = vld [vmem:[%s17800_s8 + $0xcc4] ss:$8 sps:$4 sm:$0xff]  }
 0x512   : > { %10405 = vmatmul.mubr.bf16.gmra.mrb[200].mxu1 %v16140_v42  ;;  %11271 = vmatmul.mubr.bf16.gmra.mrb[200].mxu0 %v16143_v36  ;;  %v16157_v42 = vld [vmem:[%s17800_s8 + $0xee4] ss:$8 sps:$4 sm:$0xff]  }
 0x513   : > { %14721 = vmatprep.mubr.msk.bf16.mxu1 %vm5746_vm0, %v16148_v53  ;;  %14895 = vmatprep.mubr.msk.bf16.mxu0 %vm5746_vm0, %v16151_v15 }
 0x515   : > { %v10198_v59 = vpop.f32.mrb[96].mxu1  ;;  %v11064_v3 = vpop.f32.mrb[96].mxu0 }
 0x516   : > { %v10471_v44 = vmax.f32 %v18856_v40, %v10198_v59  ;;  %v10200_v54 = vpop.f32.mrb[97].mxu1  ;;  %v11066_v32 = vpop.f32.mrb[97].mxu0  ;;  %v19313_v1 = vmax.f32 %v10469_v28, %v11064_v3 }
 0x517   : > { %v10201_v13 = vpop.f32.mrb[98].mxu1  ;;  %v11067_v45 = vpop.f32.mrb[98].mxu0  ;;  %v16152_v32 = vld [vmem:[%s17800_s8 + $0xcc0] ss:$8 sps:$4 sm:$0xff]  }
 0x518   : > { %v10472_v36 = vmax.f32 %v18863_v30, %v10201_v13  ;;  %v11069_v53 = vpop.f32.mrb[99].mxu0  ;;  %v10203_v15 = vpop.f32.mrb[99].mxu1  ;;  %v19318_v33 = vmax.f32 %v10470_v20, %v11067_v45  ;;  %v16155_v30 = vld [vmem:[%s17800_s8 + $0xee0] ss:$8 sps:$4 sm:$0xff]   ;;  %v16160_v45 = vld [vmem:[%s17800_s8 + $0xcd4] ss:$8 sps:$4 sm:$0xff]  }
 0x51a   : > { %10413 = vmatmul.mubr.bf16.gmra.mrb[204].mxu1 %v16146_v8  ;;  %11279 = vmatmul.mubr.bf16.gmra.mrb[204].mxu0 %v16149_v31  ;;  %v16163_v8 = vld [vmem:[%s17800_s8 + $0xef4] ss:$8 sps:$4 sm:$0xff]  }
 0x51b   : > { %14722 = vmatprep.mubr.msk.bf16.mxu1 %vm5746_vm0, %v16154_v4  ;;  %14896 = vmatprep.mubr.msk.bf16.mxu0 %vm5746_vm0, %v16157_v42 }
 0x51d   : > { %v10206_v40 = vpop.f32.mrb[100].mxu1  ;;  %v11072_v28 = vpop.f32.mrb[100].mxu0 }
 0x51e   : > { %v10473_v59 = vmax.f32 %v18868_v37, %v10206_v40  ;;  %v10208_v3 = vpop.f32.mrb[101].mxu1  ;;  %v11074_v54 = vpop.f32.mrb[101].mxu0  ;;  %v19325_v13 = vmax.f32 %v10471_v44, %v11072_v28 }
 0x51f   : > { %v10209_v53 = vpop.f32.mrb[102].mxu1  ;;  %v11075_v20 = vpop.f32.mrb[102].mxu0  ;;  %v16158_v54 = vld [vmem:[%s17800_s8 + $0xcd0] ss:$8 sps:$4 sm:$0xff]  }
 0x520   : > { %v10474_v31 = vmax.f32 %v18875_v24, %v10209_v53  ;;  %v11077_v4 = vpop.f32.mrb[103].mxu0  ;;  %v10211_v42 = vpop.f32.mrb[103].mxu1  ;;  %v19330_v15 = vmax.f32 %v10472_v36, %v11075_v20  ;;  %v16161_v24 = vld [vmem:[%s17800_s8 + $0xef0] ss:$8 sps:$4 sm:$0xff]   ;;  %v16166_v20 = vld [vmem:[%s17800_s8 + $0xce4] ss:$8 sps:$4 sm:$0xff]  }
 0x522   : > { %10421 = vmatmul.mubr.bf16.gmra.mrb[208].mxu1 %v16152_v32  ;;  %11287 = vmatmul.mubr.bf16.gmra.mrb[208].mxu0 %v16155_v30  ;;  %v16169_v32 = vld [vmem:[%s17800_s8 + $0xf04] ss:$8 sps:$4 sm:$0xff]  }
 0x523   : > { %14723 = vmatprep.mubr.msk.bf16.mxu1 %vm5746_vm0, %v16160_v45  ;;  %14897 = vmatprep.mubr.msk.bf16.mxu0 %vm5746_vm0, %v16163_v8 }
 0x525   : > { %v10214_v37 = vpop.f32.mrb[104].mxu1  ;;  %v11080_v44 = vpop.f32.mrb[104].mxu0 }
 0x526   : > { %v10475_v40 = vmax.f32 %v18880_v56, %v10214_v37  ;;  %v10216_v28 = vpop.f32.mrb[105].mxu1  ;;  %v11082_v3 = vpop.f32.mrb[105].mxu0  ;;  %v19337_v53 = vmax.f32 %v10473_v59, %v11080_v44 }
 0x527   : > { %v10217_v4 = vpop.f32.mrb[106].mxu1  ;;  %v11083_v36 = vpop.f32.mrb[106].mxu0  ;;  %v16164_v3 = vld [vmem:[%s17800_s8 + $0xce0] ss:$8 sps:$4 sm:$0xff]  }
 0x528   : > { %v10476_v30 = vmax.f32 %v18887_v47, %v10217_v4  ;;  %v11085_v45 = vpop.f32.mrb[107].mxu0  ;;  %v10219_v8 = vpop.f32.mrb[107].mxu1  ;;  %v19342_v42 = vmax.f32 %v10474_v31, %v11083_v36  ;;  %v16167_v47 = vld [vmem:[%s17800_s8 + $0xf00] ss:$8 sps:$4 sm:$0xff]   ;;  %v16172_v36 = vld [vmem:[%s17800_s8 + $0xcf4] ss:$8 sps:$4 sm:$0xff]  }
 0x52a   : > { %10429 = vmatmul.mubr.bf16.gmra.mrb[212].mxu1 %v16158_v54  ;;  %11295 = vmatmul.mubr.bf16.gmra.mrb[212].mxu0 %v16161_v24  ;;  %v16175_v54 = vld [vmem:[%s17800_s8 + $0xf14] ss:$8 sps:$4 sm:$0xff]  }
 0x52b   : > { %14724 = vmatprep.mubr.msk.bf16.mxu1 %vm5746_vm0, %v16166_v20  ;;  %14898 = vmatprep.mubr.msk.bf16.mxu0 %vm5746_vm0, %v16169_v32 }
 0x52d   : > { %v10222_v56 = vpop.f32.mrb[108].mxu1  ;;  %v11088_v59 = vpop.f32.mrb[108].mxu0 }
 0x52e   : > { %v10477_v37 = vmax.f32 %v18892_v18, %v10222_v56  ;;  %v10224_v44 = vpop.f32.mrb[109].mxu1  ;;  %v11090_v28 = vpop.f32.mrb[109].mxu0  ;;  %v19349_v4 = vmax.f32 %v10475_v40, %v11088_v59  ;;  %v20201_v56 = vld [vmem:[#allocation24_spill] sm:$0xff] }
 0x52f   : > { %v10225_v45 = vpop.f32.mrb[110].mxu1  ;;  %v11091_v31 = vpop.f32.mrb[110].mxu0 }
 0x530   : > { %20199 = vst [vmem:[#allocation20_spill] sm:$0xff] %v19349_v4  ;;  %v10478_v24 = vmax.f32 %v18899_v7, %v10225_v45  ;;  %v11093_v20 = vpop.f32.mrb[111].mxu0  ;;  %v10227_v32 = vpop.f32.mrb[111].mxu1  ;;  %v19354_v8 = vmax.f32 %v10476_v30, %v11091_v31  ;;  %v16170_v4 = vld [vmem:[%s17800_s8 + $0xcf0] ss:$8 sps:$4 sm:$0xff]  }
 0x531   : > { %v16173_v7 = vld [vmem:[%s17800_s8 + $0xf10] ss:$8 sps:$4 sm:$0xff]   ;;  %v16178_v31 = vld [vmem:[%s17800_s8 + $0xd04] ss:$8 sps:$4 sm:$0xff]  }
 0x532   : > { %20200 = vst [vmem:[#allocation21_spill] sm:$0xff] %v19354_v8  ;;  %10437 = vmatmul.mubr.bf16.gmra.mrb[216].mxu1 %v16164_v3  ;;  %11303 = vmatmul.mubr.bf16.gmra.mrb[216].mxu0 %v16167_v47  ;;  %v16181_v3 = vld [vmem:[%s17800_s8 + $0xf24] ss:$8 sps:$4 sm:$0xff]  }
 0x533   : > { %14725 = vmatprep.mubr.msk.bf16.mxu1 %vm5746_vm0, %v16172_v36  ;;  %14899 = vmatprep.mubr.msk.bf16.mxu0 %vm5746_vm0, %v16175_v54  ;;  %v20202_v47 = vld [vmem:[#allocation25_spill] sm:$0xff] }
 0x535   : > { %v10230_v18 = vpop.f32.mrb[112].mxu1  ;;  %v11096_v40 = vpop.f32.mrb[112].mxu0 }
 0x536   : > { %v10479_v59 = vmax.f32 %v20201_v56, %v10230_v18  ;;  %v10232_v44 = vpop.f32.mrb[113].mxu1  ;;  %v11098_v28 = vpop.f32.mrb[113].mxu0  ;;  %v19361_v45 = vmax.f32 %v10477_v37, %v11096_v40 }
 0x537   : > { %v10233_v20 = vpop.f32.mrb[114].mxu1  ;;  %v11099_v30 = vpop.f32.mrb[114].mxu0  ;;  %v16176_v28 = vld [vmem:[%s17800_s8 + $0xd00] ss:$8 sps:$4 sm:$0xff]  }
 0x538   : > { %v10480_v36 = vmax.f32 %v20202_v47, %v10233_v20  ;;  %v11101_v32 = vpop.f32.mrb[115].mxu0  ;;  %v10235_v54 = vpop.f32.mrb[115].mxu1  ;;  %v19366_v8 = vmax.f32 %v10478_v24, %v11099_v30  ;;  %v16179_v20 = vld [vmem:[%s17800_s8 + $0xf20] ss:$8 sps:$4 sm:$0xff]   ;;  %v16184_v30 = vld [vmem:[%s17800_s8 + $0xd14] ss:$8 sps:$4 sm:$0xff]  }
 0x53a   : > { %20203 = vst [vmem:[#allocation22_spill] sm:$0xff] %v19366_v8  ;;  %10445 = vmatmul.mubr.bf16.gmra.mrb[220].mxu1 %v16170_v4  ;;  %11311 = vmatmul.mubr.bf16.gmra.mrb[220].mxu0 %v16173_v7  ;;  %v16187_v4 = vld [vmem:[%s17800_s8 + $0xf34] ss:$8 sps:$4 sm:$0xff]  }
 0x53b   : > { %14726 = vmatprep.mubr.msk.bf16.mxu1 %vm5746_vm0, %v16178_v31  ;;  %14900 = vmatprep.mubr.msk.bf16.mxu0 %vm5746_vm0, %v16181_v3  ;;  %v20204_v7 = vld [vmem:[#allocation26_spill] sm:$0xff] }
 0x53d   : > { %v10238_v37 = vpop.f32.mrb[116].mxu1  ;;  %v11104_v18 = vpop.f32.mrb[116].mxu0 }
 0x53e   : > { %v10481_v40 = vmax.f32 %v18918_v6, %v10238_v37  ;;  %v10240_v56 = vpop.f32.mrb[117].mxu1  ;;  %v11106_v44 = vpop.f32.mrb[117].mxu0  ;;  %v19373_v47 = vmax.f32 %v10479_v59, %v11104_v18 }
 0x53f   : > { %v10241_v32 = vpop.f32.mrb[118].mxu1  ;;  %v11107_v24 = vpop.f32.mrb[118].mxu0 }
 0x540   : > { %v10482_v31 = vmax.f32 %v20204_v7, %v10241_v32  ;;  %v11109_v54 = vpop.f32.mrb[119].mxu0  ;;  %v10243_v3 = vpop.f32.mrb[119].mxu1  ;;  %v19378_v8 = vmax.f32 %v10480_v36, %v11107_v24  ;;  %v16182_v32 = vld [vmem:[%s17800_s8 + $0xd10] ss:$8 sps:$4 sm:$0xff]   ;;  %v16190_v24 = vld [vmem:[%s17800_s8 + $0xf44] ss:$8 sps:$4 sm:$0xff]  }
 0x541   : > { %v16185_v7 = vld [vmem:[%s17800_s8 + $0xf30] ss:$8 sps:$4 sm:$0xff]  }
 0x542   : > { %20205 = vst [vmem:[#allocation23_spill] sm:$0xff] %v19378_v8  ;;  %10453 = vmatmul.mubr.bf16.gmra.mrb[224].mxu1 %v16176_v28  ;;  %11319 = vmatmul.mubr.bf16.gmra.mrb[224].mxu0 %v16179_v20  ;;  %v16193_v28 = vld [vmem:[%s17800_s8 + $0xf54] ss:$8 sps:$4 sm:$0xff]  }
 0x543   : > { %14727 = vmatprep.mubr.msk.bf16.mxu1 %vm5746_vm0, %v16184_v30  ;;  %14901 = vmatprep.mubr.msk.bf16.mxu0 %vm5746_vm0, %v16187_v4  ;;  %v20206_v20 = vld [vmem:[#allocation27_spill] sm:$0xff] }
 0x545   : > { %v10246_v6 = vpop.f32.mrb[120].mxu1  ;;  %v11112_v59 = vpop.f32.mrb[120].mxu0 }
 0x546   : > { %v10483_v37 = vmax.f32 %v18930_v14, %v10246_v6  ;;  %v19383_v18 = vmax.f32 %v10481_v40, %v11112_v59  ;;  %v10248_v56 = vpop.f32.mrb[121].mxu1  ;;  %v11114_v44 = vpop.f32.mrb[121].mxu0 }
 0x547   : > { %v10249_v54 = vpop.f32.mrb[122].mxu1  ;;  %v11115_v36 = vpop.f32.mrb[122].mxu0 }
 0x548   : > { %v10484_v30 = vmax.f32 %v20206_v20, %v10249_v54  ;;  %v19390_v3 = vmax.f32 %v10482_v31, %v11115_v36  ;;  %v11117_v4 = vpop.f32.mrb[123].mxu0  ;;  %v10251_v8 = vpop.f32.mrb[123].mxu1  ;;  %v16188_v31 = vld [vmem:[%s17800_s8 + $0xf40] ss:$8 sps:$4 sm:$0xff]   ;;  %v16191_v54 = vld [vmem:[%s17800_s8 + $0xf50] ss:$8 sps:$4 sm:$0xff]  }
 0x549   : > { %v16196_v8 = vld [vmem:[%s17800_s8 + $0xf64] ss:$8 sps:$4 sm:$0xff]  }
 0x54a   : > { %10461 = vmatmul.mubr.bf16.gmra.mrb[228].mxu1 %v16182_v32  ;;  %11327 = vmatmul.mubr.bf16.gmra.mrb[228].mxu0 %v16185_v7  ;;  %v16199_v32 = vld [vmem:[%s17800_s8 + $0x1184] ss:$8 sps:$4 sm:$0xff]  }
 0x54b   : > { %14902 = vmatprep.mubr.msk.bf16.mxu0 %vm5746_vm0, %v16190_v24  ;;  %15043 = vmatprep.mubr.msk.bf16.mxu1 %vm5746_vm0, %v16193_v28 }
 0x54d   : > { %v10254_v14 = vpop.f32.mrb[124].mxu1  ;;  %v11120_v40 = vpop.f32.mrb[124].mxu0 }
 0x54e   : > { %v10485_v6 = vmax.f32 %v18946_v52, %v10254_v14  ;;  %v19395_v59 = vmax.f32 %v10483_v37, %v11120_v40  ;;  %v10256_v56 = vpop.f32.mrb[125].mxu1  ;;  %v11122_v44 = vpop.f32.mrb[125].mxu0 }
 0x54f   : > { %v10257_v36 = vpop.f32.mrb[126].mxu1  ;;  %v11123_v20 = vpop.f32.mrb[126].mxu0  ;;  %v16197_v44 = vld [vmem:[%s17800_s8 + $0x1180] ss:$8 sps:$4 sm:$0xff]  }
 0x550   : > { %v10486_v7 = vmax.f32 %v18954_v58, %v10257_v36  ;;  %v19402_v24 = vmax.f32 %v10484_v30, %v11123_v20  ;;  %v11125_v28 = vpop.f32.mrb[127].mxu0  ;;  %v10259_v4 = vpop.f32.mrb[127].mxu1  ;;  %v16194_v30 = vld [vmem:[%s17800_s8 + $0xf60] ss:$8 sps:$4 sm:$0xff]  }
 0x551   : > { %v16202_v28 = vld [vmem:[%s17800_s8 + $0xf74] ss:$8 sps:$4 sm:$0xff]  }
 0x552   : > { %20207 = vst [vmem:[#allocation24_spill] sm:$0xff] %v19402_v24  ;;  %11335 = vmatmul.mubr.bf16.gmra.mrb[232].mxu0 %v16188_v31  ;;  %11937 = vmatmul.mubr.bf16.vlgmr.msra.gmra.mrb[232].mxu1 %v16191_v54  ;;  %v16205_v31 = vld [vmem:[%s17800_s8 + $0x1194] ss:$8 sps:$4 sm:$0xff]  }
 0x553   : > { %15044 = vmatprep.mubr.msk.bf16.mxu1 %vm5746_vm0, %v16196_v8  ;;  %15218 = vmatprep.mubr.msk.bf16.mxu0 %vm5746_vm0, %v16199_v32  ;;  %v20208_v54 = vld [vmem:[#allocation28_spill] sm:$0xff] }
 0x555   : > { %v10262_v52 = vpop.f32.mrb[128].mxu1  ;;  %v11128_v37 = vpop.f32.mrb[128].mxu0 }
 0x556   : > { %v10487_v14 = vmax.f32 %v18967_v27, %v10262_v52  ;;  %v19407_v40 = vmax.f32 %v10485_v6, %v11128_v37  ;;  %v10264_v56 = vpop.f32.mrb[129].mxu1  ;;  %v11130_v58 = vpop.f32.mrb[129].mxu0 }
 0x557   : > { %v10265_v36 = vpop.f32.mrb[130].mxu1  ;;  %v11131_v20 = vpop.f32.mrb[130].mxu0 }
 0x558   : > { %v10488_v8 = vmax.f32 %v20208_v54, %v10265_v36  ;;  %v19414_v4 = vmax.f32 %v10486_v7, %v11131_v20  ;;  %v11133_v32 = vpop.f32.mrb[131].mxu0  ;;  %v10267_v24 = vpop.f32.mrb[131].mxu1  ;;  %v16200_v7 = vld [vmem:[%s17800_s8 + $0xf70] ss:$8 sps:$4 sm:$0xff]  }
 0x559   : > { %v16203_v36 = vld [vmem:[%s17800_s8 + $0x1190] ss:$8 sps:$4 sm:$0xff]   ;;  %v16208_v24 = vld [vmem:[%s17800_s8 + $0xf84] ss:$8 sps:$4 sm:$0xff]  }
 0x55a   : > { %11945 = vmatmul.mubr.bf16.gmra.mrb[236].mxu1 %v16194_v30  ;;  %12811 = vmatmul.mubr.bf16.vlgmr.msra.gmra.mrb[236].mxu0 %v16197_v44  ;;  %v16211_v30 = vld [vmem:[%s17800_s8 + $0x11a4] ss:$8 sps:$4 sm:$0xff]  }
 0x55b   : > { %15045 = vmatprep.mubr.msk.bf16.mxu1 %vm5746_vm0, %v16202_v28  ;;  %15219 = vmatprep.mubr.msk.bf16.mxu0 %vm5746_vm0, %v16205_v31 }
 0x55d   : > { %v10270_v27 = vpop.f32.mrb[132].mxu1  ;;  %v11136_v6 = vpop.f32.mrb[132].mxu0 }
 0x55e   : > { %v10489_v52 = vmax.f32 %v18989_v50, %v10270_v27  ;;  %v19419_v37 = vmax.f32 %v10487_v14, %v11136_v6  ;;  %v10272_v56 = vpop.f32.mrb[133].mxu1  ;;  %v11138_v58 = vpop.f32.mrb[133].mxu0 }
 0x55f   : > { %v10273_v20 = vpop.f32.mrb[134].mxu1  ;;  %v11139_v54 = vpop.f32.mrb[134].mxu0  ;;  %v16209_v58 = vld [vmem:[%s17800_s8 + $0x11a0] ss:$8 sps:$4 sm:$0xff]  }
 0x560   : > { %v10490_v44 = vmax.f32 %v18994_v9, %v10273_v20  ;;  %v19426_v28 = vmax.f32 %v10488_v8, %v11139_v54  ;;  %v11141_v31 = vpop.f32.mrb[135].mxu0  ;;  %v10275_v32 = vpop.f32.mrb[135].mxu1  ;;  %v16206_v8 = vld [vmem:[%s17800_s8 + $0xf80] ss:$8 sps:$4 sm:$0xff]  }
 0x561   : > { %v16214_v31 = vld [vmem:[%s17800_s8 + $0xf94] ss:$8 sps:$4 sm:$0xff]  }
 0x562   : > { %11953 = vmatmul.mubr.bf16.gmra.mrb[240].mxu1 %v16200_v7  ;;  %12819 = vmatmul.mubr.bf16.gmra.mrb[240].mxu0 %v16203_v36  ;;  %v16217_v7 = vld [vmem:[%s17800_s8 + $0x11b4] ss:$8 sps:$4 sm:$0xff]  }
 0x563   : > { %15046 = vmatprep.mubr.msk.bf16.mxu1 %vm5746_vm0, %v16208_v24  ;;  %15220 = vmatprep.mubr.msk.bf16.mxu0 %vm5746_vm0, %v16211_v30 }
 0x565   : > { %v10278_v50 = vpop.f32.mrb[136].mxu1  ;;  %v11144_v14 = vpop.f32.mrb[136].mxu0 }
 0x566   : > { %v10491_v27 = vmax.f32 %v19011_v63, %v10278_v50  ;;  %v19431_v6 = vmax.f32 %v10489_v52, %v11144_v14  ;;  %v10280_v56 = vpop.f32.mrb[137].mxu1  ;;  %v11146_v9 = vpop.f32.mrb[137].mxu0 }
 0x567   : > { %v10281_v20 = vpop.f32.mrb[138].mxu1  ;;  %v11147_v54 = vpop.f32.mrb[138].mxu0  ;;  %v16215_v9 = vld [vmem:[%s17800_s8 + $0x11b0] ss:$8 sps:$4 sm:$0xff]  }
 0x568   : > { %v10492_v36 = vmax.f32 %v19016_v19, %v10281_v20  ;;  %v19438_v24 = vmax.f32 %v10490_v44, %v11147_v54  ;;  %v11149_v30 = vpop.f32.mrb[139].mxu0  ;;  %v10283_v32 = vpop.f32.mrb[139].mxu1  ;;  %v16212_v44 = vld [vmem:[%s17800_s8 + $0xf90] ss:$8 sps:$4 sm:$0xff]  }
 0x569   : > { %v16220_v30 = vld [vmem:[%s17800_s8 + $0xfa4] ss:$8 sps:$4 sm:$0xff]  }
 0x56a   : > { %11961 = vmatmul.mubr.bf16.gmra.mrb[244].mxu1 %v16206_v8  ;;  %12827 = vmatmul.mubr.bf16.gmra.mrb[244].mxu0 %v16209_v58  ;;  %v16223_v8 = vld [vmem:[%s17800_s8 + $0x11c4] ss:$8 sps:$4 sm:$0xff]  }
 0x56b   : > { %15047 = vmatprep.mubr.msk.bf16.mxu1 %vm5746_vm0, %v16214_v31  ;;  %15221 = vmatprep.mubr.msk.bf16.mxu0 %vm5746_vm0, %v16217_v7 }
 0x56d   : > { %v10286_v63 = vpop.f32.mrb[140].mxu1  ;;  %v11152_v52 = vpop.f32.mrb[140].mxu0 }
 0x56e   : > { %v10493_v50 = vmax.f32 %v19033_v57, %v10286_v63  ;;  %v19443_v14 = vmax.f32 %v10491_v27, %v11152_v52  ;;  %v10288_v56 = vpop.f32.mrb[141].mxu1  ;;  %v11154_v19 = vpop.f32.mrb[141].mxu0 }
 0x56f   : > { %v10289_v20 = vpop.f32.mrb[142].mxu1  ;;  %v11155_v54 = vpop.f32.mrb[142].mxu0  ;;  %v16221_v19 = vld [vmem:[%s17800_s8 + $0x11c0] ss:$8 sps:$4 sm:$0xff]  }
 0x570   : > { %v10494_v58 = vmax.f32 %v19038_v41, %v10289_v20  ;;  %v19450_v31 = vmax.f32 %v10492_v36, %v11155_v54  ;;  %v11157_v7 = vpop.f32.mrb[143].mxu0  ;;  %v10291_v32 = vpop.f32.mrb[143].mxu1  ;;  %v16218_v36 = vld [vmem:[%s17800_s8 + $0xfa0] ss:$8 sps:$4 sm:$0xff]  }
 0x571   : > { %v16226_v7 = vld [vmem:[%s17800_s8 + $0xfb4] ss:$8 sps:$4 sm:$0xff]  }
 0x572   : > { %11969 = vmatmul.mubr.bf16.gmra.mrb[248].mxu1 %v16212_v44  ;;  %12835 = vmatmul.mubr.bf16.gmra.mrb[248].mxu0 %v16215_v9  ;;  %v16229_v44 = vld [vmem:[%s17800_s8 + $0x11d4] ss:$8 sps:$4 sm:$0xff]  }
 0x573   : > { %15048 = vmatprep.mubr.msk.bf16.mxu1 %vm5746_vm0, %v16220_v30  ;;  %15222 = vmatprep.mubr.msk.bf16.mxu0 %vm5746_vm0, %v16223_v8 }
 0x575   : > { %v10294_v57 = vpop.f32.mrb[144].mxu1  ;;  %v11160_v27 = vpop.f32.mrb[144].mxu0 }
 0x576   : > { %v10495_v63 = vmax.f32 %v19048_v35, %v10294_v57  ;;  %v19455_v52 = vmax.f32 %v10493_v50, %v11160_v27  ;;  %v10296_v56 = vpop.f32.mrb[145].mxu1  ;;  %v11162_v41 = vpop.f32.mrb[145].mxu0 }
 0x577   : > { %v10297_v20 = vpop.f32.mrb[146].mxu1  ;;  %v11163_v54 = vpop.f32.mrb[146].mxu0  ;;  %v16227_v41 = vld [vmem:[%s17800_s8 + $0x11d0] ss:$8 sps:$4 sm:$0xff]  }
 0x578   : > { %v10496_v9 = vmax.f32 %v19054_v51, %v10297_v20  ;;  %v19462_v30 = vmax.f32 %v10494_v58, %v11163_v54  ;;  %v11165_v8 = vpop.f32.mrb[147].mxu0  ;;  %v10299_v32 = vpop.f32.mrb[147].mxu1  ;;  %v16224_v58 = vld [vmem:[%s17800_s8 + $0xfb0] ss:$8 sps:$4 sm:$0xff]  }
 0x579   : > { %v16232_v8 = vld [vmem:[%s17800_s8 + $0xfc4] ss:$8 sps:$4 sm:$0xff]  }
 0x57a   : > { %11977 = vmatmul.mubr.bf16.gmra.mrb[252].mxu1 %v16218_v36  ;;  %12843 = vmatmul.mubr.bf16.gmra.mrb[252].mxu0 %v16221_v19  ;;  %v16235_v36 = vld [vmem:[%s17800_s8 + $0x11e4] ss:$8 sps:$4 sm:$0xff]  }
 0x57b   : > { %15049 = vmatprep.mubr.msk.bf16.mxu1 %vm5746_vm0, %v16226_v7  ;;  %15223 = vmatprep.mubr.msk.bf16.mxu0 %vm5746_vm0, %v16229_v44 }
 0x57d   : > { %v10302_v35 = vpop.f32.mrb[148].mxu1  ;;  %v11168_v50 = vpop.f32.mrb[148].mxu0 }
 0x57e   : > { %v10497_v57 = vmax.f32 %v19061_v61, %v10302_v35  ;;  %v19467_v27 = vmax.f32 %v10495_v63, %v11168_v50  ;;  %v10304_v56 = vpop.f32.mrb[149].mxu1  ;;  %v11170_v51 = vpop.f32.mrb[149].mxu0 }
 0x57f   : > { %v10305_v20 = vpop.f32.mrb[150].mxu1  ;;  %v11171_v54 = vpop.f32.mrb[150].mxu0  ;;  %v16233_v51 = vld [vmem:[%s17800_s8 + $0x11e0] ss:$8 sps:$4 sm:$0xff]  }
 0x580   : > { %v10498_v19 = vmax.f32 %v19066_v21, %v10305_v20  ;;  %v19474_v7 = vmax.f32 %v10496_v9, %v11171_v54  ;;  %v11173_v44 = vpop.f32.mrb[151].mxu0  ;;  %v10307_v32 = vpop.f32.mrb[151].mxu1  ;;  %v16230_v9 = vld [vmem:[%s17800_s8 + $0xfc0] ss:$8 sps:$4 sm:$0xff]  }
 0x581   : > { %v16238_v44 = vld [vmem:[%s17800_s8 + $0xfd4] ss:$8 sps:$4 sm:$0xff]  }
 0x582   : > { %11985 = vmatmul.mubr.bf16.gmra.mrb[0].mxu1 %v16224_v58  ;;  %12851 = vmatmul.mubr.bf16.gmra.mrb[0].mxu0 %v16227_v41  ;;  %v16241_v58 = vld [vmem:[%s17800_s8 + $0x11f4] ss:$8 sps:$4 sm:$0xff]  }
 0x583   : > { %15050 = vmatprep.mubr.msk.bf16.mxu1 %vm5746_vm0, %v16232_v8  ;;  %15224 = vmatprep.mubr.msk.bf16.mxu0 %vm5746_vm0, %v16235_v36 }
 0x585   : > { %v10310_v61 = vpop.f32.mrb[152].mxu1  ;;  %v11176_v63 = vpop.f32.mrb[152].mxu0 }
 0x586   : > { %v10499_v35 = vmax.f32 %v19073_v60, %v10310_v61  ;;  %v19479_v50 = vmax.f32 %v10497_v57, %v11176_v63  ;;  %v10312_v56 = vpop.f32.mrb[153].mxu1  ;;  %v11178_v21 = vpop.f32.mrb[153].mxu0 }
 0x587   : > { %v10313_v20 = vpop.f32.mrb[154].mxu1  ;;  %v11179_v54 = vpop.f32.mrb[154].mxu0  ;;  %v16239_v21 = vld [vmem:[%s17800_s8 + $0x11f0] ss:$8 sps:$4 sm:$0xff]  }
 0x588   : > { %v10500_v41 = vmax.f32 %v19078_v11, %v10313_v20  ;;  %v19486_v8 = vmax.f32 %v10498_v19, %v11179_v54  ;;  %v11181_v36 = vpop.f32.mrb[155].mxu0  ;;  %v10315_v32 = vpop.f32.mrb[155].mxu1  ;;  %v16236_v19 = vld [vmem:[%s17800_s8 + $0xfd0] ss:$8 sps:$4 sm:$0xff]  }
 0x589   : > { %v16244_v36 = vld [vmem:[%s17800_s8 + $0xfe4] ss:$8 sps:$4 sm:$0xff]  }
 0x58a   : > { %11993 = vmatmul.mubr.bf16.gmra.mrb[4].mxu1 %v16230_v9  ;;  %12859 = vmatmul.mubr.bf16.gmra.mrb[4].mxu0 %v16233_v51  ;;  %v16247_v9 = vld [vmem:[%s17800_s8 + $0x1204] ss:$8 sps:$4 sm:$0xff]  }
 0x58b   : > { %15051 = vmatprep.mubr.msk.bf16.mxu1 %vm5746_vm0, %v16238_v44  ;;  %15225 = vmatprep.mubr.msk.bf16.mxu0 %vm5746_vm0, %v16241_v58 }
 0x58d   : > { %v10318_v60 = vpop.f32.mrb[156].mxu1  ;;  %v11184_v57 = vpop.f32.mrb[156].mxu0 }
 0x58e   : > { %v10501_v61 = vmax.f32 %v19085_v49, %v10318_v60  ;;  %v19491_v63 = vmax.f32 %v10499_v35, %v11184_v57  ;;  %v10320_v56 = vpop.f32.mrb[157].mxu1  ;;  %v11186_v11 = vpop.f32.mrb[157].mxu0 }
 0x58f   : > { %v10321_v20 = vpop.f32.mrb[158].mxu1  ;;  %v11187_v54 = vpop.f32.mrb[158].mxu0  ;;  %v16245_v11 = vld [vmem:[%s17800_s8 + $0x1200] ss:$8 sps:$4 sm:$0xff]  }
 0x590   : > { %v10502_v51 = vmax.f32 %v19090_v34, %v10321_v20  ;;  %v19498_v44 = vmax.f32 %v10500_v41, %v11187_v54  ;;  %v11189_v58 = vpop.f32.mrb[159].mxu0  ;;  %v10323_v32 = vpop.f32.mrb[159].mxu1  ;;  %v16242_v41 = vld [vmem:[%s17800_s8 + $0xfe0] ss:$8 sps:$4 sm:$0xff]  }
 0x591   : > { %v16250_v58 = vld [vmem:[%s17800_s8 + $0xff4] ss:$8 sps:$4 sm:$0xff]  }
 0x592   : > { %12001 = vmatmul.mubr.bf16.gmra.mrb[8].mxu1 %v16236_v19  ;;  %12867 = vmatmul.mubr.bf16.gmra.mrb[8].mxu0 %v16239_v21  ;;  %v16253_v19 = vld [vmem:[%s17800_s8 + $0x1214] ss:$8 sps:$4 sm:$0xff]  }
 0x593   : > { %15052 = vmatprep.mubr.msk.bf16.mxu1 %vm5746_vm0, %v16244_v36  ;;  %15226 = vmatprep.mubr.msk.bf16.mxu0 %vm5746_vm0, %v16247_v9 }
 0x595   : > { %v10326_v49 = vpop.f32.mrb[160].mxu1  ;;  %v11192_v35 = vpop.f32.mrb[160].mxu0 }
 0x596   : > { %v10503_v60 = vmax.f32 %v19097_v26, %v10326_v49  ;;  %v19503_v57 = vmax.f32 %v10501_v61, %v11192_v35  ;;  %v10328_v56 = vpop.f32.mrb[161].mxu1  ;;  %v11194_v34 = vpop.f32.mrb[161].mxu0 }
 0x597   : > { %v10329_v20 = vpop.f32.mrb[162].mxu1  ;;  %v11195_v54 = vpop.f32.mrb[162].mxu0  ;;  %v16251_v34 = vld [vmem:[%s17800_s8 + $0x1210] ss:$8 sps:$4 sm:$0xff]  }
 0x598   : > { %v10504_v21 = vmax.f32 %v19102_v62, %v10329_v20  ;;  %v19510_v36 = vmax.f32 %v10502_v51, %v11195_v54  ;;  %v11197_v9 = vpop.f32.mrb[163].mxu0  ;;  %v10331_v32 = vpop.f32.mrb[163].mxu1  ;;  %v16248_v51 = vld [vmem:[%s17800_s8 + $0xff0] ss:$8 sps:$4 sm:$0xff]  }
 0x599   : > { %v16256_v9 = vld [vmem:[%s17800_s8 + $0x1004] ss:$8 sps:$4 sm:$0xff]  }
 0x59a   : > { %12009 = vmatmul.mubr.bf16.gmra.mrb[12].mxu1 %v16242_v41  ;;  %12875 = vmatmul.mubr.bf16.gmra.mrb[12].mxu0 %v16245_v11  ;;  %v16259_v41 = vld [vmem:[%s17800_s8 + $0x1224] ss:$8 sps:$4 sm:$0xff]  }
 0x59b   : > { %15053 = vmatprep.mubr.msk.bf16.mxu1 %vm5746_vm0, %v16250_v58  ;;  %15227 = vmatprep.mubr.msk.bf16.mxu0 %vm5746_vm0, %v16253_v19 }
 0x59d   : > { %v10334_v26 = vpop.f32.mrb[164].mxu1  ;;  %v11200_v61 = vpop.f32.mrb[164].mxu0 }
 0x59e   : > { %v10505_v49 = vmax.f32 %v19109_v2, %v10334_v26  ;;  %v19515_v35 = vmax.f32 %v10503_v60, %v11200_v61  ;;  %v10336_v56 = vpop.f32.mrb[165].mxu1  ;;  %v11202_v62 = vpop.f32.mrb[165].mxu0 }
 0x59f   : > { %v10337_v20 = vpop.f32.mrb[166].mxu1  ;;  %v11203_v54 = vpop.f32.mrb[166].mxu0  ;;  %v16257_v62 = vld [vmem:[%s17800_s8 + $0x1220] ss:$8 sps:$4 sm:$0xff]  }
 0x5a0   : > { %v10506_v11 = vmax.f32 %v19114_v55, %v10337_v20  ;;  %v19522_v58 = vmax.f32 %v10504_v21, %v11203_v54  ;;  %v11205_v19 = vpop.f32.mrb[167].mxu0  ;;  %v10339_v32 = vpop.f32.mrb[167].mxu1  ;;  %v16254_v21 = vld [vmem:[%s17800_s8 + $0x1000] ss:$8 sps:$4 sm:$0xff]  }
 0x5a1   : > { %v16262_v19 = vld [vmem:[%s17800_s8 + $0x1014] ss:$8 sps:$4 sm:$0xff]  }
 0x5a2   : > { %12017 = vmatmul.mubr.bf16.gmra.mrb[16].mxu1 %v16248_v51  ;;  %12883 = vmatmul.mubr.bf16.gmra.mrb[16].mxu0 %v16251_v34  ;;  %v16265_v51 = vld [vmem:[%s17800_s8 + $0x1234] ss:$8 sps:$4 sm:$0xff]  }
 0x5a3   : > { %15054 = vmatprep.mubr.msk.bf16.mxu1 %vm5746_vm0, %v16256_v9  ;;  %15228 = vmatprep.mubr.msk.bf16.mxu0 %vm5746_vm0, %v16259_v41 }
 0x5a5   : > { %v10342_v2 = vpop.f32.mrb[168].mxu1  ;;  %v11208_v60 = vpop.f32.mrb[168].mxu0 }
 0x5a6   : > { %v10507_v26 = vmax.f32 %v19121_v48, %v10342_v2  ;;  %v19527_v61 = vmax.f32 %v10505_v49, %v11208_v60  ;;  %v10344_v56 = vpop.f32.mrb[169].mxu1  ;;  %v11210_v55 = vpop.f32.mrb[169].mxu0 }
 0x5a7   : > { %v10345_v20 = vpop.f32.mrb[170].mxu1  ;;  %v11211_v54 = vpop.f32.mrb[170].mxu0  ;;  %v16263_v55 = vld [vmem:[%s17800_s8 + $0x1230] ss:$8 sps:$4 sm:$0xff]  }
 0x5a8   : > { %v10508_v34 = vmax.f32 %v19126_v23, %v10345_v20  ;;  %v19534_v9 = vmax.f32 %v10506_v11, %v11211_v54  ;;  %v11213_v41 = vpop.f32.mrb[171].mxu0  ;;  %v10347_v32 = vpop.f32.mrb[171].mxu1  ;;  %v16260_v11 = vld [vmem:[%s17800_s8 + $0x1010] ss:$8 sps:$4 sm:$0xff]  }
 0x5a9   : > { %v16268_v41 = vld [vmem:[%s17800_s8 + $0x1024] ss:$8 sps:$4 sm:$0xff]  }
 0x5aa   : > { %12025 = vmatmul.mubr.bf16.gmra.mrb[20].mxu1 %v16254_v21  ;;  %12891 = vmatmul.mubr.bf16.gmra.mrb[20].mxu0 %v16257_v62  ;;  %v16271_v21 = vld [vmem:[%s17800_s8 + $0x1244] ss:$8 sps:$4 sm:$0xff]  }
 0x5ab   : > { %15055 = vmatprep.mubr.msk.bf16.mxu1 %vm5746_vm0, %v16262_v19  ;;  %15229 = vmatprep.mubr.msk.bf16.mxu0 %vm5746_vm0, %v16265_v51 }
 0x5ad   : > { %v10350_v48 = vpop.f32.mrb[172].mxu1  ;;  %v11216_v49 = vpop.f32.mrb[172].mxu0 }
 0x5ae   : > { %v10509_v2 = vmax.f32 %v19133_v39, %v10350_v48  ;;  %v19539_v60 = vmax.f32 %v10507_v26, %v11216_v49  ;;  %v10352_v56 = vpop.f32.mrb[173].mxu1  ;;  %v11218_v23 = vpop.f32.mrb[173].mxu0 }
 0x5af   : > { %v10353_v20 = vpop.f32.mrb[174].mxu1  ;;  %v11219_v54 = vpop.f32.mrb[174].mxu0  ;;  %v16269_v23 = vld [vmem:[%s17800_s8 + $0x1240] ss:$8 sps:$4 sm:$0xff]  }
 0x5b0   : > { %v10510_v62 = vmax.f32 %v19138_v22, %v10353_v20  ;;  %v19546_v19 = vmax.f32 %v10508_v34, %v11219_v54  ;;  %v11221_v51 = vpop.f32.mrb[175].mxu0  ;;  %v10355_v32 = vpop.f32.mrb[175].mxu1  ;;  %v16266_v34 = vld [vmem:[%s17800_s8 + $0x1020] ss:$8 sps:$4 sm:$0xff]  }
 0x5b1   : > { %v16274_v51 = vld [vmem:[%s17800_s8 + $0x1034] ss:$8 sps:$4 sm:$0xff]  }
 0x5b2   : > { %12033 = vmatmul.mubr.bf16.gmra.mrb[24].mxu1 %v16260_v11  ;;  %12899 = vmatmul.mubr.bf16.gmra.mrb[24].mxu0 %v16263_v55  ;;  %v16277_v11 = vld [vmem:[%s17800_s8 + $0x1254] ss:$8 sps:$4 sm:$0xff]  }
 0x5b3   : > { %15056 = vmatprep.mubr.msk.bf16.mxu1 %vm5746_vm0, %v16268_v41  ;;  %15230 = vmatprep.mubr.msk.bf16.mxu0 %vm5746_vm0, %v16271_v21 }
 0x5b5   : > { %v10358_v39 = vpop.f32.mrb[176].mxu1  ;;  %v11224_v26 = vpop.f32.mrb[176].mxu0 }
 0x5b6   : > { %v10511_v48 = vmax.f32 %v19145_v5, %v10358_v39  ;;  %v19551_v49 = vmax.f32 %v10509_v2, %v11224_v26  ;;  %v10360_v56 = vpop.f32.mrb[177].mxu1  ;;  %v11226_v22 = vpop.f32.mrb[177].mxu0 }
 0x5b7   : > { %v10361_v20 = vpop.f32.mrb[178].mxu1  ;;  %v11227_v54 = vpop.f32.mrb[178].mxu0  ;;  %v16275_v22 = vld [vmem:[%s17800_s8 + $0x1250] ss:$8 sps:$4 sm:$0xff]  }
 0x5b8   : > { %v10512_v55 = vmax.f32 %v19150_v12, %v10361_v20  ;;  %v19558_v41 = vmax.f32 %v10510_v62, %v11227_v54  ;;  %v11229_v21 = vpop.f32.mrb[179].mxu0  ;;  %v10363_v32 = vpop.f32.mrb[179].mxu1  ;;  %v16272_v62 = vld [vmem:[%s17800_s8 + $0x1030] ss:$8 sps:$4 sm:$0xff]  }
 0x5b9   : > { %v16280_v21 = vld [vmem:[%s17800_s8 + $0x1044] ss:$8 sps:$4 sm:$0xff]  }
 0x5ba   : > { %20209 = vst [vmem:[#allocation25_spill] sm:$0xff] %v19558_v41  ;;  %12041 = vmatmul.mubr.bf16.gmra.mrb[28].mxu1 %v16266_v34  ;;  %12907 = vmatmul.mubr.bf16.gmra.mrb[28].mxu0 %v16269_v23  ;;  %v16283_v34 = vld [vmem:[%s17800_s8 + $0x1264] ss:$8 sps:$4 sm:$0xff]  }
 0x5bb   : > { %15057 = vmatprep.mubr.msk.bf16.mxu1 %vm5746_vm0, %v16274_v51  ;;  %15231 = vmatprep.mubr.msk.bf16.mxu0 %vm5746_vm0, %v16277_v11  ;;  %v20211_v23 = vld [vmem:[#allocation3_spill] sm:$0xff] }
 0x5bd   : > { %v10366_v5 = vpop.f32.mrb[180].mxu1  ;;  %v11232_v2 = vpop.f32.mrb[180].mxu0 }
 0x5be   : > { %v10513_v39 = vmax.f32 %v19157_v10, %v10366_v5  ;;  %v19563_v26 = vmax.f32 %v10511_v48, %v11232_v2  ;;  %v10368_v56 = vpop.f32.mrb[181].mxu1  ;;  %v11234_v12 = vpop.f32.mrb[181].mxu0  ;;  %v20213_v5 = vld [vmem:[#allocation4_spill] sm:$0xff] }
 0x5bf   : > { %v10369_v20 = vpop.f32.mrb[182].mxu1  ;;  %v11235_v54 = vpop.f32.mrb[182].mxu0 }
 0x5c0   : > { %20210 = vst [vmem:[#allocation26_spill] sm:$0xff] %v19563_v26  ;;  %v10514_v51 = vmax.f32 %v20211_v23, %v10369_v20  ;;  %v19570_v32 = vmax.f32 %v10512_v55, %v11235_v54  ;;  %v11237_v11 = vpop.f32.mrb[183].mxu0  ;;  %v10371_v41 = vpop.f32.mrb[183].mxu1  ;;  %v16278_v55 = vld [vmem:[%s17800_s8 + $0x1040] ss:$8 sps:$4 sm:$0xff]  }
 0x5c1   : > { %v16281_v54 = vld [vmem:[%s17800_s8 + $0x1260] ss:$8 sps:$4 sm:$0xff]   ;;  %v16286_v41 = vld [vmem:[%s17800_s8 + $0x1054] ss:$8 sps:$4 sm:$0xff]  }
 0x5c2   : > { %20212 = vst [vmem:[#allocation27_spill] sm:$0xff] %v19570_v32  ;;  %12049 = vmatmul.mubr.bf16.gmra.mrb[32].mxu1 %v16272_v62  ;;  %12915 = vmatmul.mubr.bf16.gmra.mrb[32].mxu0 %v16275_v22  ;;  %v16289_v62 = vld [vmem:[%s17800_s8 + $0x1274] ss:$8 sps:$4 sm:$0xff]  }
 0x5c3   : > { %15058 = vmatprep.mubr.msk.bf16.mxu1 %vm5746_vm0, %v16280_v21  ;;  %15232 = vmatprep.mubr.msk.bf16.mxu0 %vm5746_vm0, %v16283_v34  ;;  %v20215_v22 = vld [vmem:[#allocation5_spill] sm:$0xff] }
 0x5c5   : > { %v10374_v10 = vpop.f32.mrb[184].mxu1  ;;  %v11240_v48 = vpop.f32.mrb[184].mxu0 }
 0x5c6   : > { %v10515_v2 = vmax.f32 %v20213_v5, %v10374_v10  ;;  %v19575_v56 = vmax.f32 %v10513_v39, %v11240_v48  ;;  %v10376_v12 = vpop.f32.mrb[185].mxu1  ;;  %v11242_v20 = vpop.f32.mrb[185].mxu0  ;;  %v20217_v48 = vld [vmem:[#allocation6_spill] sm:$0xff] }
 0x5c7   : > { %v10377_v23 = vpop.f32.mrb[186].mxu1  ;;  %v11243_v11 = vpop.f32.mrb[186].mxu0 }
 0x5c8   : > { %20214 = vst [vmem:[#allocation28_spill] sm:$0xff] %v19575_v56  ;;  %v10516_v21 = vmax.f32 %v20215_v22, %v10377_v23  ;;  %v19582_v32 = vmax.f32 %v10514_v51, %v11243_v11  ;;  %v11245_v34 = vpop.f32.mrb[187].mxu0  ;;  %v10379_v26 = vpop.f32.mrb[187].mxu1  ;;  %v16284_v51 = vld [vmem:[%s17800_s8 + $0x1050] ss:$8 sps:$4 sm:$0xff]  }
 0x5c9   : > { %v16287_v11 = vld [vmem:[%s17800_s8 + $0x1270] ss:$8 sps:$4 sm:$0xff]   ;;  %v16292_v26 = vld [vmem:[%s17800_s8 + $0x1064] ss:$8 sps:$4 sm:$0xff]  }
 0x5ca   : > { %20216 = vst [vmem:[#allocation3_spill] sm:$0xff] %v19582_v32  ;;  %12057 = vmatmul.mubr.bf16.gmra.mrb[36].mxu1 %v16278_v55  ;;  %12923 = vmatmul.mubr.bf16.gmra.mrb[36].mxu0 %v16281_v54  ;;  %v16295_v55 = vld [vmem:[%s17800_s8 + $0x1284] ss:$8 sps:$4 sm:$0xff]  }
 0x5cb   : > { %15059 = vmatprep.mubr.msk.bf16.mxu1 %vm5746_vm0, %v16286_v41  ;;  %15233 = vmatprep.mubr.msk.bf16.mxu0 %vm5746_vm0, %v16289_v62  ;;  %v20219_v54 = vld [vmem:[#allocation7_spill] sm:$0xff] }
 0x5cd   : > { %v10382_v39 = vpop.f32.mrb[188].mxu1  ;;  %v11248_v10 = vpop.f32.mrb[188].mxu0 }
 0x5ce   : > { %v10517_v5 = vmax.f32 %v20217_v48, %v10382_v39  ;;  %v19587_v12 = vmax.f32 %v10515_v2, %v11248_v10  ;;  %v10384_v20 = vpop.f32.mrb[189].mxu1  ;;  %v11250_v23 = vpop.f32.mrb[189].mxu0  ;;  %v20221_v10 = vld [vmem:[#allocation8_spill] sm:$0xff] }
 0x5cf   : > { %v10385_v22 = vpop.f32.mrb[190].mxu1  ;;  %v11251_v34 = vpop.f32.mrb[190].mxu0 }
 0x5d0   : > { %20218 = vst [vmem:[#allocation4_spill] sm:$0xff] %v19587_v12  ;;  %v10518_v41 = vmax.f32 %v20219_v54, %v10385_v22  ;;  %v19594_v32 = vmax.f32 %v10516_v21, %v11251_v34  ;;  %v11253_v62 = vpop.f32.mrb[191].mxu0  ;;  %v10387_v56 = vpop.f32.mrb[191].mxu1  ;;  %v16290_v21 = vld [vmem:[%s17800_s8 + $0x1060] ss:$8 sps:$4 sm:$0xff]  }
 0x5d1   : > { %v16293_v34 = vld [vmem:[%s17800_s8 + $0x1280] ss:$8 sps:$4 sm:$0xff]   ;;  %v16298_v56 = vld [vmem:[%s17800_s8 + $0x1074] ss:$8 sps:$4 sm:$0xff]  }
 0x5d2   : > { %20220 = vst [vmem:[#allocation5_spill] sm:$0xff] %v19594_v32  ;;  %12065 = vmatmul.mubr.bf16.gmra.mrb[40].mxu1 %v16284_v51  ;;  %12931 = vmatmul.mubr.bf16.gmra.mrb[40].mxu0 %v16287_v11  ;;  %v16301_v51 = vld [vmem:[%s17800_s8 + $0x1294] ss:$8 sps:$4 sm:$0xff]  }
 0x5d3   : > { %15060 = vmatprep.mubr.msk.bf16.mxu1 %vm5746_vm0, %v16292_v26  ;;  %15234 = vmatprep.mubr.msk.bf16.mxu0 %vm5746_vm0, %v16295_v55  ;;  %v20223_v11 = vld [vmem:[#allocation9_spill] sm:$0xff] }
 0x5d5   : > { %v10390_v2 = vpop.f32.mrb[192].mxu1  ;;  %v11256_v39 = vpop.f32.mrb[192].mxu0 }
 0x5d6   : > { %v10519_v48 = vmax.f32 %v20221_v10, %v10390_v2  ;;  %v19599_v20 = vmax.f32 %v10517_v5, %v11256_v39  ;;  %v10392_v23 = vpop.f32.mrb[193].mxu1  ;;  %v11258_v22 = vpop.f32.mrb[193].mxu0  ;;  %v20225_v39 = vld [vmem:[#allocation10_spill] sm:$0xff] }
 0x5d7   : > { %v10393_v54 = vpop.f32.mrb[194].mxu1  ;;  %v11259_v62 = vpop.f32.mrb[194].mxu0 }
 0x5d8   : > { %20222 = vst [vmem:[#allocation6_spill] sm:$0xff] %v19599_v20  ;;  %v10520_v26 = vmax.f32 %v20223_v11, %v10393_v54  ;;  %v19606_v32 = vmax.f32 %v10518_v41, %v11259_v62  ;;  %v11261_v55 = vpop.f32.mrb[195].mxu0  ;;  %v10395_v12 = vpop.f32.mrb[195].mxu1  ;;  %v16296_v41 = vld [vmem:[%s17800_s8 + $0x1070] ss:$8 sps:$4 sm:$0xff]  }
 0x5d9   : > { %v16299_v62 = vld [vmem:[%s17800_s8 + $0x1290] ss:$8 sps:$4 sm:$0xff]   ;;  %v16304_v12 = vld [vmem:[%s17800_s8 + $0x1084] ss:$8 sps:$4 sm:$0xff]  }
 0x5da   : > { %20224 = vst [vmem:[#allocation7_spill] sm:$0xff] %v19606_v32  ;;  %12073 = vmatmul.mubr.bf16.gmra.mrb[44].mxu1 %v16290_v21  ;;  %12939 = vmatmul.mubr.bf16.gmra.mrb[44].mxu0 %v16293_v34  ;;  %v16307_v21 = vld [vmem:[%s17800_s8 + $0x12a4] ss:$8 sps:$4 sm:$0xff]  }
 0x5db   : > { %15061 = vmatprep.mubr.msk.bf16.mxu1 %vm5746_vm0, %v16298_v56  ;;  %15235 = vmatprep.mubr.msk.bf16.mxu0 %vm5746_vm0, %v16301_v51  ;;  %v20227_v34 = vld [vmem:[#allocation11_spill] sm:$0xff] }
 0x5dd   : > { %v10398_v5 = vpop.f32.mrb[196].mxu1  ;;  %v11264_v2 = vpop.f32.mrb[196].mxu0 }
 0x5de   : > { %v10521_v10 = vmax.f32 %v20225_v39, %v10398_v5  ;;  %v19611_v23 = vmax.f32 %v10519_v48, %v11264_v2  ;;  %v10400_v22 = vpop.f32.mrb[197].mxu1  ;;  %v11266_v54 = vpop.f32.mrb[197].mxu0  ;;  %v20229_v2 = vld [vmem:[#allocation12_spill] sm:$0xff] }
 0x5df   : > { %v10401_v11 = vpop.f32.mrb[198].mxu1  ;;  %v11267_v55 = vpop.f32.mrb[198].mxu0 }
 0x5e0   : > { %20226 = vst [vmem:[#allocation8_spill] sm:$0xff] %v19611_v23  ;;  %v10522_v56 = vmax.f32 %v20227_v34, %v10401_v11  ;;  %v19618_v32 = vmax.f32 %v10520_v26, %v11267_v55  ;;  %v11269_v51 = vpop.f32.mrb[199].mxu0  ;;  %v10403_v20 = vpop.f32.mrb[199].mxu1  ;;  %v16302_v26 = vld [vmem:[%s17800_s8 + $0x1080] ss:$8 sps:$4 sm:$0xff]  }
 0x5e1   : > { %v16305_v55 = vld [vmem:[%s17800_s8 + $0x12a0] ss:$8 sps:$4 sm:$0xff]   ;;  %v16310_v20 = vld [vmem:[%s17800_s8 + $0x1094] ss:$8 sps:$4 sm:$0xff]  }
 0x5e2   : > { %20228 = vst [vmem:[#allocation9_spill] sm:$0xff] %v19618_v32  ;;  %12081 = vmatmul.mubr.bf16.gmra.mrb[48].mxu1 %v16296_v41  ;;  %12947 = vmatmul.mubr.bf16.gmra.mrb[48].mxu0 %v16299_v62  ;;  %v16313_v41 = vld [vmem:[%s17800_s8 + $0x12b4] ss:$8 sps:$4 sm:$0xff]  }
 0x5e3   : > { %15062 = vmatprep.mubr.msk.bf16.mxu1 %vm5746_vm0, %v16304_v12  ;;  %15236 = vmatprep.mubr.msk.bf16.mxu0 %vm5746_vm0, %v16307_v21  ;;  %v20231_v62 = vld [vmem:[#allocation13_spill] sm:$0xff] }
 0x5e5   : > { %v10406_v48 = vpop.f32.mrb[200].mxu1  ;;  %v11272_v5 = vpop.f32.mrb[200].mxu0 }
 0x5e6   : > { %v10523_v39 = vmax.f32 %v20229_v2, %v10406_v48  ;;  %v19623_v22 = vmax.f32 %v10521_v10, %v11272_v5  ;;  %v10408_v54 = vpop.f32.mrb[201].mxu1  ;;  %v11274_v11 = vpop.f32.mrb[201].mxu0  ;;  %v20233_v5 = vld [vmem:[#allocation14_spill] sm:$0xff] }
 0x5e7   : > { %v10409_v34 = vpop.f32.mrb[202].mxu1  ;;  %v11275_v51 = vpop.f32.mrb[202].mxu0 }
 0x5e8   : > { %20230 = vst [vmem:[#allocation10_spill] sm:$0xff] %v19623_v22  ;;  %v10524_v12 = vmax.f32 %v20231_v62, %v10409_v34  ;;  %v19630_v32 = vmax.f32 %v10522_v56, %v11275_v51  ;;  %v11277_v21 = vpop.f32.mrb[203].mxu0  ;;  %v10411_v23 = vpop.f32.mrb[203].mxu1  ;;  %v16308_v56 = vld [vmem:[%s17800_s8 + $0x1090] ss:$8 sps:$4 sm:$0xff]  }
 0x5e9   : > { %v16311_v51 = vld [vmem:[%s17800_s8 + $0x12b0] ss:$8 sps:$4 sm:$0xff]   ;;  %v16316_v23 = vld [vmem:[%s17800_s8 + $0x10a4] ss:$8 sps:$4 sm:$0xff]  }
 0x5ea   : > { %20232 = vst [vmem:[#allocation11_spill] sm:$0xff] %v19630_v32  ;;  %12089 = vmatmul.mubr.bf16.gmra.mrb[52].mxu1 %v16302_v26  ;;  %12955 = vmatmul.mubr.bf16.gmra.mrb[52].mxu0 %v16305_v55  ;;  %v16319_v26 = vld [vmem:[%s17800_s8 + $0x12c4] ss:$8 sps:$4 sm:$0xff]  }
 0x5eb   : > { %15063 = vmatprep.mubr.msk.bf16.mxu1 %vm5746_vm0, %v16310_v20  ;;  %15237 = vmatprep.mubr.msk.bf16.mxu0 %vm5746_vm0, %v16313_v41  ;;  %v20235_v55 = vld [vmem:[#allocation15_spill] sm:$0xff] }
 0x5ed   : > { %v10414_v10 = vpop.f32.mrb[204].mxu1  ;;  %v11280_v48 = vpop.f32.mrb[204].mxu0 }
 0x5ee   : > { %v10525_v2 = vmax.f32 %v20233_v5, %v10414_v10  ;;  %v19635_v54 = vmax.f32 %v10523_v39, %v11280_v48  ;;  %v10416_v11 = vpop.f32.mrb[205].mxu1  ;;  %v11282_v34 = vpop.f32.mrb[205].mxu0  ;;  %v20237_v48 = vld [vmem:[#allocation16_spill] sm:$0xff] }
 0x5ef   : > { %v10417_v62 = vpop.f32.mrb[206].mxu1  ;;  %v11283_v21 = vpop.f32.mrb[206].mxu0 }
 0x5f0   : > { %20234 = vst [vmem:[#allocation12_spill] sm:$0xff] %v19635_v54  ;;  %v10526_v20 = vmax.f32 %v20235_v55, %v10417_v62  ;;  %v19642_v32 = vmax.f32 %v10524_v12, %v11283_v21  ;;  %v11285_v41 = vpop.f32.mrb[207].mxu0  ;;  %v10419_v22 = vpop.f32.mrb[207].mxu1  ;;  %v16314_v12 = vld [vmem:[%s17800_s8 + $0x10a0] ss:$8 sps:$4 sm:$0xff]  }
 0x5f1   : > { %v16317_v21 = vld [vmem:[%s17800_s8 + $0x12c0] ss:$8 sps:$4 sm:$0xff]   ;;  %v16322_v22 = vld [vmem:[%s17800_s8 + $0x10b4] ss:$8 sps:$4 sm:$0xff]  }
 0x5f2   : > { %20236 = vst [vmem:[#allocation13_spill] sm:$0xff] %v19642_v32  ;;  %12097 = vmatmul.mubr.bf16.gmra.mrb[56].mxu1 %v16308_v56  ;;  %12963 = vmatmul.mubr.bf16.gmra.mrb[56].mxu0 %v16311_v51  ;;  %v16325_v56 = vld [vmem:[%s17800_s8 + $0x12d4] ss:$8 sps:$4 sm:$0xff]  }
 0x5f3   : > { %15064 = vmatprep.mubr.msk.bf16.mxu1 %vm5746_vm0, %v16316_v23  ;;  %15238 = vmatprep.mubr.msk.bf16.mxu0 %vm5746_vm0, %v16319_v26  ;;  %v20239_v51 = vld [vmem:[#allocation17_spill] sm:$0xff] }
 0x5f5   : > { %v10422_v39 = vpop.f32.mrb[208].mxu1  ;;  %v11288_v10 = vpop.f32.mrb[208].mxu0 }
 0x5f6   : > { %v10527_v5 = vmax.f32 %v20237_v48, %v10422_v39  ;;  %v19647_v11 = vmax.f32 %v10525_v2, %v11288_v10  ;;  %v10424_v34 = vpop.f32.mrb[209].mxu1  ;;  %v11290_v62 = vpop.f32.mrb[209].mxu0  ;;  %v20241_v10 = vld [vmem:[#allocation18_spill] sm:$0xff] }
 0x5f7   : > { %v10425_v55 = vpop.f32.mrb[210].mxu1  ;;  %v11291_v41 = vpop.f32.mrb[210].mxu0 }
 0x5f8   : > { %20238 = vst [vmem:[#allocation14_spill] sm:$0xff] %v19647_v11  ;;  %v10528_v23 = vmax.f32 %v20239_v51, %v10425_v55  ;;  %v19654_v32 = vmax.f32 %v10526_v20, %v11291_v41  ;;  %v11293_v26 = vpop.f32.mrb[211].mxu0  ;;  %v10427_v54 = vpop.f32.mrb[211].mxu1  ;;  %v16320_v20 = vld [vmem:[%s17800_s8 + $0x10b0] ss:$8 sps:$4 sm:$0xff]  }
 0x5f9   : > { %v16323_v41 = vld [vmem:[%s17800_s8 + $0x12d0] ss:$8 sps:$4 sm:$0xff]   ;;  %v16328_v54 = vld [vmem:[%s17800_s8 + $0x10c4] ss:$8 sps:$4 sm:$0xff]  }
 0x5fa   : > { %20240 = vst [vmem:[#allocation15_spill] sm:$0xff] %v19654_v32  ;;  %12105 = vmatmul.mubr.bf16.gmra.mrb[60].mxu1 %v16314_v12  ;;  %12971 = vmatmul.mubr.bf16.gmra.mrb[60].mxu0 %v16317_v21  ;;  %v16331_v12 = vld [vmem:[%s17800_s8 + $0x12e4] ss:$8 sps:$4 sm:$0xff]  }
 0x5fb   : > { %15065 = vmatprep.mubr.msk.bf16.mxu1 %vm5746_vm0, %v16322_v22  ;;  %15239 = vmatprep.mubr.msk.bf16.mxu0 %vm5746_vm0, %v16325_v56  ;;  %v20242_v21 = vld [vmem:[#allocation19_spill] sm:$0xff] }
 0x5fd   : > { %v10430_v2 = vpop.f32.mrb[212].mxu1  ;;  %v11296_v39 = vpop.f32.mrb[212].mxu0 }
 0x5fe   : > { %v10529_v48 = vmax.f32 %v20241_v10, %v10430_v2  ;;  %v19659_v34 = vmax.f32 %v10527_v5, %v11296_v39  ;;  %v10432_v62 = vpop.f32.mrb[213].mxu1  ;;  %v11298_v55 = vpop.f32.mrb[213].mxu0 }
 0x5ff   : > { %v10433_v51 = vpop.f32.mrb[214].mxu1  ;;  %v11299_v26 = vpop.f32.mrb[214].mxu0 }
 0x600   : > { %v10530_v22 = vmax.f32 %v20242_v21, %v10433_v51  ;;  %v19666_v32 = vmax.f32 %v10528_v23, %v11299_v26  ;;  %v11301_v56 = vpop.f32.mrb[215].mxu0  ;;  %v10435_v11 = vpop.f32.mrb[215].mxu1  ;;  %v16326_v23 = vld [vmem:[%s17800_s8 + $0x10c0] ss:$8 sps:$4 sm:$0xff]  }
 0x601   : > { %v16329_v51 = vld [vmem:[%s17800_s8 + $0x12e0] ss:$8 sps:$4 sm:$0xff]   ;;  %v16334_v11 = vld [vmem:[%s17800_s8 + $0x10d4] ss:$8 sps:$4 sm:$0xff]  }
 0x602   : > { %12113 = vmatmul.mubr.bf16.gmra.mrb[64].mxu1 %v16320_v20  ;;  %12979 = vmatmul.mubr.bf16.gmra.mrb[64].mxu0 %v16323_v41  ;;  %v16337_v20 = vld [vmem:[%s17800_s8 + $0x12f4] ss:$8 sps:$4 sm:$0xff]  }
 0x603   : > { %15066 = vmatprep.mubr.msk.bf16.mxu1 %vm5746_vm0, %v16328_v54  ;;  %15240 = vmatprep.mubr.msk.bf16.mxu0 %vm5746_vm0, %v16331_v12 }
 0x605   : > { %v10438_v5 = vpop.f32.mrb[216].mxu1  ;;  %v11304_v2 = vpop.f32.mrb[216].mxu0 }
 0x606   : > { %v10531_v39 = vmax.f32 %v19265_v16, %v10438_v5  ;;  %v19671_v10 = vmax.f32 %v10529_v48, %v11304_v2  ;;  %v10440_v62 = vpop.f32.mrb[217].mxu1  ;;  %v11306_v55 = vpop.f32.mrb[217].mxu0 }
 0x607   : > { %v10441_v26 = vpop.f32.mrb[218].mxu1  ;;  %v11307_v21 = vpop.f32.mrb[218].mxu0  ;;  %v16335_v55 = vld [vmem:[%s17800_s8 + $0x12f0] ss:$8 sps:$4 sm:$0xff]  }
 0x608   : > { %v10532_v41 = vmax.f32 %v19270_v0, %v10441_v26  ;;  %v19678_v54 = vmax.f32 %v10530_v22, %v11307_v21  ;;  %v11309_v12 = vpop.f32.mrb[219].mxu0  ;;  %v10443_v56 = vpop.f32.mrb[219].mxu1  ;;  %v16332_v22 = vld [vmem:[%s17800_s8 + $0x10d0] ss:$8 sps:$4 sm:$0xff]  }
 0x609   : > { %v16340_v12 = vld [vmem:[%s17800_s8 + $0x10e4] ss:$8 sps:$4 sm:$0xff]  }
 0x60a   : > { %12121 = vmatmul.mubr.bf16.gmra.mrb[68].mxu1 %v16326_v23  ;;  %12987 = vmatmul.mubr.bf16.gmra.mrb[68].mxu0 %v16329_v51  ;;  %v16343_v23 = vld [vmem:[%s17800_s8 + $0x1304] ss:$8 sps:$4 sm:$0xff]  }
 0x60b   : > { %15067 = vmatprep.mubr.msk.bf16.mxu1 %vm5746_vm0, %v16334_v11  ;;  %15241 = vmatprep.mubr.msk.bf16.mxu0 %vm5746_vm0, %v16337_v20 }
 0x60d   : > { %v10446_v16 = vpop.f32.mrb[220].mxu1  ;;  %v11312_v48 = vpop.f32.mrb[220].mxu0 }
 0x60e   : > { %v10533_v5 = vmax.f32 %v19277_v17, %v10446_v16  ;;  %v19683_v2 = vmax.f32 %v10531_v39, %v11312_v48  ;;  %v10448_v62 = vpop.f32.mrb[221].mxu1  ;;  %v11314_v0 = vpop.f32.mrb[221].mxu0 }
 0x60f   : > { %v10449_v26 = vpop.f32.mrb[222].mxu1  ;;  %v11315_v21 = vpop.f32.mrb[222].mxu0  ;;  %v16341_v0 = vld [vmem:[%s17800_s8 + $0x1300] ss:$8 sps:$4 sm:$0xff]  }
 0x610   : > { %v10534_v51 = vmax.f32 %v19282_v25, %v10449_v26  ;;  %v19690_v11 = vmax.f32 %v10532_v41, %v11315_v21  ;;  %v11317_v20 = vpop.f32.mrb[223].mxu0  ;;  %v10451_v56 = vpop.f32.mrb[223].mxu1  ;;  %v16338_v41 = vld [vmem:[%s17800_s8 + $0x10e0] ss:$8 sps:$4 sm:$0xff]  }
 0x611   : > { %v16346_v20 = vld [vmem:[%s17800_s8 + $0x10f4] ss:$8 sps:$4 sm:$0xff]  }
 0x612   : > { %12129 = vmatmul.mubr.bf16.gmra.mrb[72].mxu1 %v16332_v22  ;;  %12995 = vmatmul.mubr.bf16.gmra.mrb[72].mxu0 %v16335_v55  ;;  %v16349_v22 = vld [vmem:[%s17800_s8 + $0x1314] ss:$8 sps:$4 sm:$0xff]  }
 0x613   : > { %15068 = vmatprep.mubr.msk.bf16.mxu1 %vm5746_vm0, %v16340_v12  ;;  %15242 = vmatprep.mubr.msk.bf16.mxu0 %vm5746_vm0, %v16343_v23 }
 0x615   : > { %v10454_v17 = vpop.f32.mrb[224].mxu1  ;;  %v11320_v39 = vpop.f32.mrb[224].mxu0 }
 0x616   : > { %v10535_v16 = vmax.f32 %v19289_v38, %v10454_v17  ;;  %v19695_v48 = vmax.f32 %v10533_v5, %v11320_v39  ;;  %v10456_v62 = vpop.f32.mrb[225].mxu1  ;;  %v11322_v25 = vpop.f32.mrb[225].mxu0 }
 0x617   : > { %v10457_v26 = vpop.f32.mrb[226].mxu1  ;;  %v11323_v21 = vpop.f32.mrb[226].mxu0  ;;  %v16347_v25 = vld [vmem:[%s17800_s8 + $0x1310] ss:$8 sps:$4 sm:$0xff]  }
 0x618   : > { %v10536_v55 = vmax.f32 %v19294_v29, %v10457_v26  ;;  %v19702_v12 = vmax.f32 %v10534_v51, %v11323_v21  ;;  %v11325_v23 = vpop.f32.mrb[227].mxu0  ;;  %v10459_v56 = vpop.f32.mrb[227].mxu1  ;;  %v16344_v51 = vld [vmem:[%s17800_s8 + $0x10f0] ss:$8 sps:$4 sm:$0xff]  }
 0x619   : > { %v16352_v23 = vld [vmem:[%s17800_s8 + $0x1104] ss:$8 sps:$4 sm:$0xff]  }
 0x61a   : > { %12137 = vmatmul.mubr.bf16.gmra.mrb[76].mxu1 %v16338_v41  ;;  %13003 = vmatmul.mubr.bf16.gmra.mrb[76].mxu0 %v16341_v0  ;;  %v16355_v41 = vld [vmem:[%s17800_s8 + $0x1324] ss:$8 sps:$4 sm:$0xff]  }
 0x61b   : > { %15069 = vmatprep.mubr.msk.bf16.mxu1 %vm5746_vm0, %v16346_v20  ;;  %15243 = vmatprep.mubr.msk.bf16.mxu0 %vm5746_vm0, %v16349_v22 }
 0x61d   : > { %v10462_v38 = vpop.f32.mrb[228].mxu1  ;;  %v11328_v5 = vpop.f32.mrb[228].mxu0 }
 0x61e   : > { %v10537_v17 = vmax.f32 %v19301_v46, %v10462_v38  ;;  %v19707_v39 = vmax.f32 %v10535_v16, %v11328_v5  ;;  %v10464_v62 = vpop.f32.mrb[229].mxu1  ;;  %v11330_v29 = vpop.f32.mrb[229].mxu0 }
 0x61f   : > { %v10465_v26 = vpop.f32.mrb[230].mxu1  ;;  %v11331_v21 = vpop.f32.mrb[230].mxu0  ;;  %v16350_v62 = vld [vmem:[%s17800_s8 + $0x1100] ss:$8 sps:$4 sm:$0xff]  }
 0x620   : > { %v10538_v0 = vmax.f32 %v19306_v43, %v10465_v26  ;;  %v19714_v20 = vmax.f32 %v10536_v55, %v11331_v21  ;;  %v11333_v22 = vpop.f32.mrb[231].mxu0  ;;  %v10467_v56 = vpop.f32.mrb[231].mxu1  ;;  %v16353_v29 = vld [vmem:[%s17800_s8 + $0x1320] ss:$8 sps:$4 sm:$0xff]   ;;  %v16358_v21 = vld [vmem:[%s17800_s8 + $0x1114] ss:$8 sps:$4 sm:$0xff]  }
 0x622   : > { %20243 = vst [vmem:[#allocation16_spill] sm:$0xff] %v19714_v20  ;;  %12145 = vmatmul.mubr.bf16.gmra.mrb[80].mxu1 %v16344_v51  ;;  %13011 = vmatmul.mubr.bf16.gmra.mrb[80].mxu0 %v16347_v25  ;;  %v16361_v25 = vld [vmem:[%s17800_s8 + $0x1334] ss:$8 sps:$4 sm:$0xff]  }
 0x623   : > { %15070 = vmatprep.mubr.msk.bf16.mxu1 %vm5746_vm0, %v16352_v23  ;;  %15244 = vmatprep.mubr.msk.bf16.mxu0 %vm5746_vm0, %v16355_v41 }
 0x625   : > { %v11336_v46 = vpop.f32.mrb[232].mxu0  ;;  %v11938_v16 = vpop.f32.mrb[232].mxu1 }
 0x626   : > { %v19720_v38 = vmax.f32 %v10537_v17, %v11336_v46  ;;  %v12217_v43 = vmax.f32 %v19313_v1, %v11938_v16  ;;  %v11338_v55 = vpop.f32.mrb[233].mxu0  ;;  %v11940_v5 = vpop.f32.mrb[233].mxu1 }
 0x627   : > { %v11339_v26 = vpop.f32.mrb[234].mxu0  ;;  %v11941_v51 = vpop.f32.mrb[234].mxu1  ;;  %v16356_v5 = vld [vmem:[%s17800_s8 + $0x1110] ss:$8 sps:$4 sm:$0xff]  }
 0x628   : > { %20244 = vst [vmem:[#allocation17_spill] sm:$0xff] %v19720_v38  ;;  %v19727_v22 = vmax.f32 %v10538_v0, %v11339_v26  ;;  %v12218_v23 = vmax.f32 %v19318_v33, %v11941_v51  ;;  %v11341_v41 = vpop.f32.mrb[235].mxu0  ;;  %v11943_v56 = vpop.f32.mrb[235].mxu1  ;;  %v19735_v33 = vld [vmem:[%s20078_s2] ss:$0 sm:$0xff] }
 0x629   : > { %v16364_v51 = vld [vmem:[%s17800_s8 + $0x1124] ss:$8 sps:$4 sm:$0xff]  }
 0x62a   : > { %20245 = vst [vmem:[#allocation18_spill] sm:$0xff] %v19727_v22  ;;  %12153 = vmatmul.mubr.bf16.gmra.mrb[84].mxu1 %v16350_v62  ;;  %13019 = vmatmul.mubr.bf16.gmra.mrb[84].mxu0 %v16353_v29  ;;  %v16359_v62 = vld [vmem:[%s17800_s8 + $0x1330] ss:$8 sps:$4 sm:$0xff]  }
 0x62b   : > { %15071 = vmatprep.mubr.msk.bf16.mxu1 %vm5746_vm0, %v16358_v21  ;;  %15245 = vmatprep.mubr.msk.bf16.mxu0 %vm5746_vm0, %v16361_v25  ;;  %v16367_v21 = vld [vmem:[%s17800_s8 + $0x1344] ss:$8 sps:$4 sm:$0xff]  }
 0x62d   : > { %v11946_v1 = vpop.f32.mrb[236].mxu1  ;;  %v12812_v17 = vpop.f32.mrb[236].mxu0 }
 0x62e   : > { %v12219_v0 = vmax.f32 %v19325_v13, %v11946_v1  ;;  %v13091_v46 = vmax.f32 %v12217_v43, %v12812_v17  ;;  %v11948_v16 = vpop.f32.mrb[237].mxu1  ;;  %v12814_v55 = vpop.f32.mrb[237].mxu0 }
 0x62f   : > { %v11949_v29 = vpop.f32.mrb[238].mxu1  ;;  %v12815_v26 = vpop.f32.mrb[238].mxu0  ;;  %v16362_v55 = vld [vmem:[%s17800_s8 + $0x1120] ss:$8 sps:$4 sm:$0xff]  }
 0x630   : > { %v13168_v25 = vadd.f32 %v19735_v33, %v13091_v46  ;;  %v12220_v41 = vmax.f32 %v19330_v15, %v11949_v29  ;;  %v13092_v56 = vmax.f32 %v12218_v23, %v12815_v26  ;;  %v12817_v22 = vpop.f32.mrb[239].mxu0  ;;  %v11951_v38 = vpop.f32.mrb[239].mxu1  ;;  %v16370_v26 = vld [vmem:[%s17800_s8 + $0x1134] ss:$8 sps:$4 sm:$0xff]  }
 0x632   : > { %v13238_v20 = vmax.f32 %v13168_v25, 0.0  ;;  %v13169_v13 = vadd.f32 %v19735_v33, %v13092_v56  ;;  %12161 = vmatmul.mubr.bf16.gmra.mrb[88].mxu1 %v16356_v5  ;;  %13027 = vmatmul.mubr.bf16.gmra.mrb[88].mxu0 %v16359_v62  ;;  %v16365_v5 = vld [vmem:[%s17800_s8 + $0x1340] ss:$8 sps:$4 sm:$0xff]  }
 0x633   : > { %15072 = vmatprep.mubr.msk.bf16.mxu1 %vm5746_vm0, %v16364_v51  ;;  %15246 = vmatprep.mubr.msk.bf16.mxu0 %vm5746_vm0, %v16367_v21  ;;  %v16373_v51 = vld [vmem:[%s17800_s8 + $0x1354] ss:$8 sps:$4 sm:$0xff]  }
 0x634   : > { %v15328_v15 = vpack.c.bf16 %v13238_v20, %v13238_v20  ;;  %v13239_v38 = vmax.f32 %v13169_v13, 0.0 }
 0x635   : > { %v11954_v43 = vpop.f32.mrb[240].mxu1  ;;  %v12820_v22 = vpop.f32.mrb[240].mxu0 }
 0x636   : > { %13589 = vst.msk [vmem:[%s19748_s23] sm:$0xf] %vm13588_vm2, %v15328_v15  ;;  %v15329_v23 = vpack.c.bf16 %v13239_v38, %v13239_v38  ;;  %v12221_v1 = vmax.f32 %v19337_v53, %v11954_v43  ;;  %v13093_v17 = vmax.f32 %v12219_v0, %v12820_v22  ;;  %v11956_v46 = vpop.f32.mrb[241].mxu1  ;;  %v12822_v16 = vpop.f32.mrb[241].mxu0  ;;  %v20246_v22 = vld [vmem:[#allocation20_spill] sm:$0xff] }
 0x637   : > { %v11957_v62 = vpop.f32.mrb[242].mxu1  ;;  %v12823_v29 = vpop.f32.mrb[242].mxu0 }
 0x638   : > { %13590 = vst.msk [vmem:[%s19748_s23 + $0x4] sm:$0xf] %vm13588_vm2, %v15329_v23  ;;  %v13170_v20 = vadd.f32 %v19735_v33, %v13093_v17  ;;  %v12222_v21 = vmax.f32 %v19342_v42, %v11957_v62  ;;  %v13094_v25 = vmax.f32 %v12220_v41, %v12823_v29  ;;  %v12825_v56 = vpop.f32.mrb[243].mxu0  ;;  %v11959_v13 = vpop.f32.mrb[243].mxu1 }
 0x63a   : > { %v13240_v53 = vmax.f32 %v13170_v20, 0.0  ;;  %v13171_v0 = vadd.f32 %v19735_v33, %v13094_v25  ;;  %12169 = vmatmul.mubr.bf16.gmra.mrb[92].mxu1 %v16362_v55  ;;  %13035 = vmatmul.mubr.bf16.gmra.mrb[92].mxu0 %v16365_v5  ;;  %v16368_v55 = vld [vmem:[%s17800_s8 + $0x1130] ss:$8 sps:$4 sm:$0xff]  }
 0x63b   : > { %15073 = vmatprep.mubr.msk.bf16.mxu1 %vm5746_vm0, %v16370_v26  ;;  %15247 = vmatprep.mubr.msk.bf16.mxu0 %vm5746_vm0, %v16373_v51  ;;  %v16371_v5 = vld [vmem:[%s17800_s8 + $0x1350] ss:$8 sps:$4 sm:$0xff]   ;;  %v16376_v26 = vld [vmem:[%s17800_s8 + $0x1144] ss:$8 sps:$4 sm:$0xff]  }
 0x63c   : > { %v15330_v15 = vpack.c.bf16 %v13240_v53, %v13240_v53  ;;  %v13241_v38 = vmax.f32 %v13171_v0, 0.0  ;;  %v16379_v51 = vld [vmem:[%s17800_s8 + $0x1364] ss:$8 sps:$4 sm:$0xff]  }
 0x63d   : > { %v11962_v42 = vpop.f32.mrb[244].mxu1  ;;  %v12828_v41 = vpop.f32.mrb[244].mxu0  ;;  %v20247_v25 = vld [vmem:[#allocation21_spill] sm:$0xff] }
 0x63e   : > { %13591 = vst.msk [vmem:[%s19748_s23 + $0x8] sm:$0xf] %vm13588_vm2, %v15330_v15  ;;  %v15331_v43 = vpack.c.bf16 %v13241_v38, %v13241_v38  ;;  %v12223_v23 = vmax.f32 %v20246_v22, %v11962_v42  ;;  %v13095_v17 = vmax.f32 %v12221_v1, %v12828_v41  ;;  %v11964_v46 = vpop.f32.mrb[245].mxu1  ;;  %v12830_v16 = vpop.f32.mrb[245].mxu0 }
 0x63f   : > { %v11965_v62 = vpop.f32.mrb[246].mxu1  ;;  %v12831_v29 = vpop.f32.mrb[246].mxu0 }
 0x640   : > { %13592 = vst.msk [vmem:[%s19748_s23 + $0xc] sm:$0xf] %vm13588_vm2, %v15331_v43  ;;  %v13172_v20 = vadd.f32 %v19735_v33, %v13095_v17  ;;  %v12224_v56 = vmax.f32 %v20247_v25, %v11965_v62  ;;  %v13096_v13 = vmax.f32 %v12222_v21, %v12831_v29  ;;  %v12833_v53 = vpop.f32.mrb[247].mxu0  ;;  %v11967_v0 = vpop.f32.mrb[247].mxu1  ;;  %v20248_v25 = vld [vmem:[#allocation22_spill] sm:$0xff] }
 0x642   : > { %v13242_v15 = vmax.f32 %v13172_v20, 0.0  ;;  %v13173_v1 = vadd.f32 %v19735_v33, %v13096_v13  ;;  %12177 = vmatmul.mubr.bf16.gmra.mrb[96].mxu1 %v16368_v55  ;;  %13043 = vmatmul.mubr.bf16.gmra.mrb[96].mxu0 %v16371_v5  ;;  %v16374_v55 = vld [vmem:[%s17800_s8 + $0x1140] ss:$8 sps:$4 sm:$0xff]  }
 0x643   : > { %15074 = vmatprep.mubr.msk.bf16.mxu1 %vm5746_vm0, %v16376_v26  ;;  %15248 = vmatprep.mubr.msk.bf16.mxu0 %vm5746_vm0, %v16379_v51  ;;  %v16377_v5 = vld [vmem:[%s17800_s8 + $0x1360] ss:$8 sps:$4 sm:$0xff]   ;;  %v16382_v26 = vld [vmem:[%s17800_s8 + $0x1154] ss:$8 sps:$4 sm:$0xff]  }
 0x644   : > { %v15332_v38 = vpack.c.bf16 %v13242_v15, %v13242_v15  ;;  %v13243_v42 = vmax.f32 %v13173_v1, 0.0  ;;  %v16385_v51 = vld [vmem:[%s17800_s8 + $0x1374] ss:$8 sps:$4 sm:$0xff]  }
 0x645   : > { %v11970_v41 = vpop.f32.mrb[248].mxu1  ;;  %v12836_v21 = vpop.f32.mrb[248].mxu0 }
 0x646   : > { %13593 = vst.msk [vmem:[%s19748_s23 + $0x10] sm:$0xf] %vm13588_vm2, %v15332_v38  ;;  %v15333_v43 = vpack.c.bf16 %v13243_v42, %v13243_v42  ;;  %v12225_v22 = vmax.f32 %v19361_v45, %v11970_v41  ;;  %v13097_v17 = vmax.f32 %v12223_v23, %v12836_v21  ;;  %v11972_v46 = vpop.f32.mrb[249].mxu1  ;;  %v12838_v16 = vpop.f32.mrb[249].mxu0 }
 0x647   : > { %v11973_v62 = vpop.f32.mrb[250].mxu1  ;;  %v12839_v29 = vpop.f32.mrb[250].mxu0  ;;  %v16380_v16 = vld [vmem:[%s17800_s8 + $0x1150] ss:$8 sps:$4 sm:$0xff]  }
 0x648   : > { %13594 = vst.msk [vmem:[%s19748_s23 + $0x14] sm:$0xf] %vm13588_vm2, %v15333_v43  ;;  %v13174_v20 = vadd.f32 %v19735_v33, %v13097_v17  ;;  %v12226_v13 = vmax.f32 %v20248_v25, %v11973_v62  ;;  %v13098_v53 = vmax.f32 %v12224_v56, %v12839_v29  ;;  %v12841_v0 = vpop.f32.mrb[251].mxu0  ;;  %v11975_v15 = vpop.f32.mrb[251].mxu1  ;;  %v16388_v29 = vld [vmem:[%s17800_s8 + $0x1164] ss:$8 sps:$4 sm:$0xff]  }
 0x64a   : > { %v13244_v45 = vmax.f32 %v13174_v20, 0.0  ;;  %v13175_v23 = vadd.f32 %v19735_v33, %v13098_v53  ;;  %12185 = vmatmul.mubr.bf16.gmra.mrb[100].mxu1 %v16374_v55  ;;  %13051 = vmatmul.mubr.bf16.gmra.mrb[100].mxu0 %v16377_v5  ;;  %v16383_v55 = vld [vmem:[%s17800_s8 + $0x1370] ss:$8 sps:$4 sm:$0xff]  }
 0x64b   : > { %15075 = vmatprep.mubr.msk.bf16.mxu1 %vm5746_vm0, %v16382_v26  ;;  %15249 = vmatprep.mubr.msk.bf16.mxu0 %vm5746_vm0, %v16385_v51  ;;  %v16391_v26 = vld [vmem:[%s17800_s8 + $0x1384] ss:$8 sps:$4 sm:$0xff]  }
 0x64c   : > { %v15334_v1 = vpack.c.bf16 %v13244_v45, %v13244_v45  ;;  %v13245_v38 = vmax.f32 %v13175_v23, 0.0  ;;  %v20249_v20 = vld [vmem:[#allocation23_spill] sm:$0xff] }
 0x64d   : > { %v11978_v42 = vpop.f32.mrb[252].mxu1  ;;  %v12844_v56 = vpop.f32.mrb[252].mxu0 }
 0x64e   : > { %13595 = vst.msk [vmem:[%s19748_s23 + $0x18] sm:$0xf] %vm13588_vm2, %v15334_v1  ;;  %v15335_v41 = vpack.c.bf16 %v13245_v38, %v13245_v38  ;;  %v12227_v21 = vmax.f32 %v19373_v47, %v11978_v42  ;;  %v13099_v43 = vmax.f32 %v12225_v22, %v12844_v56  ;;  %v11980_v17 = vpop.f32.mrb[253].mxu1  ;;  %v12846_v46 = vpop.f32.mrb[253].mxu0 }
 0x64f   : > { %v11981_v5 = vpop.f32.mrb[254].mxu1  ;;  %v12847_v62 = vpop.f32.mrb[254].mxu0  ;;  %v16386_v17 = vld [vmem:[%s17800_s8 + $0x1160] ss:$8 sps:$4 sm:$0xff]  }
 0x650   : > { %13596 = vst.msk [vmem:[%s19748_s23 + $0x1c] sm:$0xf] %vm13588_vm2, %v15335_v41  ;;  %v13176_v51 = vadd.f32 %v19735_v33, %v13099_v43  ;;  %v12228_v25 = vmax.f32 %v20249_v20, %v11981_v5  ;;  %v13100_v53 = vmax.f32 %v12226_v13, %v12847_v62  ;;  %v12849_v0 = vpop.f32.mrb[255].mxu0  ;;  %v11983_v15 = vpop.f32.mrb[255].mxu1  ;;  %v16389_v46 = vld [vmem:[%s17800_s8 + $0x1380] ss:$8 sps:$4 sm:$0xff]  }
 0x651   : > { %v16394_v5 = vld [vmem:[%s17800_s8 + $0x1174] ss:$8 sps:$4 sm:$0xff]  }
 0x652   : > { %v13246_v47 = vmax.f32 %v13176_v51, 0.0  ;;  %v13177_v22 = vadd.f32 %v19735_v33, %v13100_v53  ;;  %12193 = vmatmul.mubr.bf16.gmra.mrb[104].mxu1 %v16380_v16  ;;  %13059 = vmatmul.mubr.bf16.gmra.mrb[104].mxu0 %v16383_v55  ;;  %v16397_v62 = vld [vmem:[%s17800_s8 + $0x1394] ss:$8 sps:$4 sm:$0xff]  }
 0x653   : > { %15076 = vmatprep.mubr.msk.bf16.mxu1 %vm5746_vm0, %v16388_v29  ;;  %15250 = vmatprep.mubr.msk.bf16.mxu0 %vm5746_vm0, %v16391_v26 }
 0x654   : > { %v15336_v45 = vpack.c.bf16 %v13246_v47, %v13246_v47  ;;  %v13247_v23 = vmax.f32 %v13177_v22, 0.0 }
 0x655   : > { %v11986_v1 = vpop.f32.mrb[0].mxu1  ;;  %v12852_v13 = vpop.f32.mrb[0].mxu0 }
 0x656   : > { %13597 = vst.msk [vmem:[%s19748_s23 + $0x20] sm:$0xf] %vm13588_vm2, %v15336_v45  ;;  %v15337_v38 = vpack.c.bf16 %v13247_v23, %v13247_v23  ;;  %v12229_v42 = vmax.f32 %v19383_v18, %v11986_v1  ;;  %v13101_v56 = vmax.f32 %v12227_v21, %v12852_v13  ;;  %v11988_v41 = vpop.f32.mrb[1].mxu1  ;;  %v12854_v43 = vpop.f32.mrb[1].mxu0  ;;  %v16392_v13 = vld [vmem:[%s17800_s8 + $0x1170] ss:$8 sps:$4 sm:$0xff]  }
 0x657   : > { %v11989_v16 = vpop.f32.mrb[2].mxu1  ;;  %v12855_v55 = vpop.f32.mrb[2].mxu0  ;;  %v16400_v43 = vld [vmem:[%s17800_s8 + $0x13a4] ss:$8 sps:$4 sm:$0xff]  }
 0x658   : > { %13598 = vst.msk [vmem:[%s19748_s23 + $0x24] sm:$0xf] %vm13588_vm2, %v15337_v38  ;;  %v13178_v29 = vadd.f32 %v19735_v33, %v13101_v56  ;;  %v12230_v26 = vmax.f32 %v19390_v3, %v11989_v16  ;;  %v13102_v51 = vmax.f32 %v12228_v25, %v12855_v55  ;;  %v12857_v20 = vpop.f32.mrb[3].mxu0  ;;  %v11991_v53 = vpop.f32.mrb[3].mxu1  ;;  %v16395_v38 = vld [vmem:[%s17800_s8 + $0x1390] ss:$8 sps:$4 sm:$0xff]  }
 0x65a   : > { %v13248_v18 = vmax.f32 %v13178_v29, 0.0  ;;  %v13179_v21 = vadd.f32 %v19735_v33, %v13102_v51  ;;  %12201 = vmatmul.mubr.bf16.gmra.mrb[108].mxu1 %v16386_v17  ;;  %13067 = vmatmul.mubr.bf16.gmra.mrb[108].mxu0 %v16389_v46  ;;  %v20250_v46 = vld [vmem:[#allocation24_spill] sm:$0xff] }
 0x65b   : > { %15077 = vmatprep.mubr.msk.bf16.mxu1 %vm5746_vm0, %v16394_v5  ;;  %15251 = vmatprep.mubr.msk.bf16.mxu0 %vm5746_vm0, %v16397_v62 }
 0x65c   : > { %v15338_v0 = vpack.c.bf16 %v13248_v18, %v13248_v18  ;;  %v13249_v15 = vmax.f32 %v13179_v21, 0.0 }
 0x65d   : > { %v11994_v47 = vpop.f32.mrb[4].mxu1  ;;  %v12860_v3 = vpop.f32.mrb[4].mxu0 }
 0x65e   : > { %13599 = vst.msk [vmem:[%s19748_s23 + $0x28] sm:$0xf] %vm13588_vm2, %v15338_v0  ;;  %v15339_v25 = vpack.c.bf16 %v13249_v15, %v13249_v15  ;;  %v12231_v22 = vmax.f32 %v19395_v59, %v11994_v47  ;;  %v13103_v45 = vmax.f32 %v12229_v42, %v12860_v3  ;;  %v11996_v23 = vpop.f32.mrb[5].mxu1  ;;  %v12862_v1 = vpop.f32.mrb[5].mxu0  ;;  %v16398_v47 = vld [vmem:[%s17800_s8 + $0x13a0] ss:$8 sps:$4 sm:$0xff]  }
 0x65f   : > { %v11997_v56 = vpop.f32.mrb[6].mxu1  ;;  %v12863_v41 = vpop.f32.mrb[6].mxu0 }
 0x660   : > { %13600 = vst.msk [vmem:[%s19748_s23 + $0x2c] sm:$0xf] %vm13588_vm2, %v15339_v25  ;;  %v13180_v17 = vadd.f32 %v19735_v33, %v13103_v45  ;;  %v12232_v16 = vmax.f32 %v20250_v46, %v11997_v56  ;;  %v13104_v55 = vmax.f32 %v12230_v26, %v12863_v41  ;;  %v12865_v5 = vpop.f32.mrb[7].mxu0  ;;  %v11999_v62 = vpop.f32.mrb[7].mxu1 }
 0x662   : > { %v13250_v59 = vmax.f32 %v13180_v17, 0.0  ;;  %v13181_v42 = vadd.f32 %v19735_v33, %v13104_v55  ;;  %12209 = vmatmul.mubr.bf16.gmra.mrb[112].mxu1 %v16392_v13  ;;  %13075 = vmatmul.mubr.bf16.gmra.mrb[112].mxu0 %v16395_v38 }
 0x663   : > { %15252 = vmatprep.mubr.msk.bf16.mxu0 %vm5746_vm0, %v16400_v43 }
 0x664   : > { %v15340_v29 = vpack.c.bf16 %v13250_v59, %v13250_v59  ;;  %v13251_v51 = vmax.f32 %v13181_v42, 0.0 }
 0x665   : > { %v12002_v20 = vpop.f32.mrb[8].mxu1  ;;  %v12868_v53 = vpop.f32.mrb[8].mxu0 }
 0x666   : > { %13601 = vst.msk [vmem:[%s19748_s23 + $0x30] sm:$0xf] %vm13588_vm2, %v15340_v29  ;;  %v15341_v18 = vpack.c.bf16 %v13251_v51, %v13251_v51  ;;  %v12233_v26 = vmax.f32 %v19407_v40, %v12002_v20  ;;  %v13105_v21 = vmax.f32 %v12231_v22, %v12868_v53  ;;  %v12004_v0 = vpop.f32.mrb[9].mxu1  ;;  %v12870_v15 = vpop.f32.mrb[9].mxu0 }
 0x667   : > { %v12005_v3 = vpop.f32.mrb[10].mxu1  ;;  %v12871_v25 = vpop.f32.mrb[10].mxu0 }
 0x668   : > { %13602 = vst.msk [vmem:[%s19748_s23 + $0x34] sm:$0xf] %vm13588_vm2, %v15341_v18  ;;  %v13182_v45 = vadd.f32 %v19735_v33, %v13105_v21  ;;  %v12234_v23 = vmax.f32 %v19414_v4, %v12005_v3  ;;  %v13106_v1 = vmax.f32 %v12232_v16, %v12871_v25  ;;  %v12873_v13 = vpop.f32.mrb[11].mxu0  ;;  %v12007_v38 = vpop.f32.mrb[11].mxu1 }
 0x66a   : > { %v13252_v56 = vmax.f32 %v13182_v45, 0.0  ;;  %v13183_v40 = vadd.f32 %v19735_v33, %v13106_v1  ;;  %13083 = vmatmul.mubr.bf16.gmra.mrb[116].mxu0 %v16398_v47 }
 0x66c   : > { %v15342_v22 = vpack.c.bf16 %v13252_v56, %v13252_v56  ;;  %v13253_v41 = vmax.f32 %v13183_v40, 0.0 }
 0x66d   : > { %v12010_v43 = vpop.f32.mrb[12].mxu1  ;;  %v12876_v17 = vpop.f32.mrb[12].mxu0 }
 0x66e   : > { %13603 = vst.msk [vmem:[%s19748_s23 + $0x38] sm:$0xf] %vm13588_vm2, %v15342_v22  ;;  %v15343_v46 = vpack.c.bf16 %v13253_v41, %v13253_v41  ;;  %v12235_v55 = vmax.f32 %v19419_v37, %v12010_v43  ;;  %v13107_v5 = vmax.f32 %v12233_v26, %v12876_v17  ;;  %v12012_v62 = vpop.f32.mrb[13].mxu1  ;;  %v12878_v4 = vpop.f32.mrb[13].mxu0 }
 0x66f   : > { %v12013_v16 = vpop.f32.mrb[14].mxu1  ;;  %v12879_v59 = vpop.f32.mrb[14].mxu0 }
 0x670   : > { %13604 = vst.msk [vmem:[%s19748_s23 + $0x3c] sm:$0xf] %vm13588_vm2, %v15343_v46  ;;  %v13184_v42 = vadd.f32 %v19735_v33, %v13107_v5  ;;  %v12236_v29 = vmax.f32 %v19426_v28, %v12013_v16  ;;  %v13108_v51 = vmax.f32 %v12234_v23, %v12879_v59  ;;  %v12881_v20 = vpop.f32.mrb[15].mxu0  ;;  %v12015_v53 = vpop.f32.mrb[15].mxu1 }
 0x672   : > { %v13254_v18 = vmax.f32 %v13184_v42, 0.0  ;;  %v13185_v21 = vadd.f32 %v19735_v33, %v13108_v51 }
 0x674   : > { %v15344_v37 = vpack.c.bf16 %v13254_v18, %v13254_v18  ;;  %v13255_v26 = vmax.f32 %v13185_v21, 0.0 }
 0x675   : > { %v12018_v0 = vpop.f32.mrb[16].mxu1  ;;  %v12884_v15 = vpop.f32.mrb[16].mxu0 }
 0x676   : > { %13605 = vst.msk [vmem:[%s19748_s23 + $0x40] sm:$0xf] %vm13588_vm2, %v15344_v37  ;;  %v15345_v47 = vpack.c.bf16 %v13255_v26, %v13255_v26  ;;  %v12237_v3 = vmax.f32 %v19431_v6, %v12018_v0  ;;  %v13109_v25 = vmax.f32 %v12235_v55, %v12884_v15  ;;  %v12020_v45 = vpop.f32.mrb[17].mxu1  ;;  %v12886_v28 = vpop.f32.mrb[17].mxu0 }
 0x677   : > { %v12021_v23 = vpop.f32.mrb[18].mxu1  ;;  %v12887_v1 = vpop.f32.mrb[18].mxu0 }
 0x678   : > { %13606 = vst.msk [vmem:[%s19748_s23 + $0x44] sm:$0xf] %vm13588_vm2, %v15345_v47  ;;  %v13186_v13 = vadd.f32 %v19735_v33, %v13109_v25  ;;  %v12238_v38 = vmax.f32 %v19438_v24, %v12021_v23  ;;  %v13110_v56 = vmax.f32 %v12236_v29, %v12887_v1  ;;  %v12889_v40 = vpop.f32.mrb[19].mxu0  ;;  %v12023_v22 = vpop.f32.mrb[19].mxu1 }
 0x67a   : > { %v13256_v41 = vmax.f32 %v13186_v13, 0.0  ;;  %v13187_v43 = vadd.f32 %v19735_v33, %v13110_v56 }
 0x67c   : > { %v15346_v6 = vpack.c.bf16 %v13256_v41, %v13256_v41  ;;  %v13257_v17 = vmax.f32 %v13187_v43, 0.0 }
 0x67d   : > { %v12026_v46 = vpop.f32.mrb[20].mxu1  ;;  %v12892_v55 = vpop.f32.mrb[20].mxu0 }
 0x67e   : > { %13607 = vst.msk [vmem:[%s19748_s23 + $0x48] sm:$0xf] %vm13588_vm2, %v15346_v6  ;;  %v15347_v5 = vpack.c.bf16 %v13257_v17, %v13257_v17  ;;  %v12239_v62 = vmax.f32 %v19443_v14, %v12026_v46  ;;  %v13111_v4 = vmax.f32 %v12237_v3, %v12892_v55  ;;  %v12028_v16 = vpop.f32.mrb[21].mxu1  ;;  %v12894_v24 = vpop.f32.mrb[21].mxu0 }
 0x67f   : > { %v12029_v59 = vpop.f32.mrb[22].mxu1  ;;  %v12895_v42 = vpop.f32.mrb[22].mxu0 }
 0x680   : > { %13608 = vst.msk [vmem:[%s19748_s23 + $0x4c] sm:$0xf] %vm13588_vm2, %v15347_v5  ;;  %v13188_v29 = vadd.f32 %v19735_v33, %v13111_v4  ;;  %v12240_v51 = vmax.f32 %v19450_v31, %v12029_v59  ;;  %v13112_v20 = vmax.f32 %v12238_v38, %v12895_v42  ;;  %v12897_v53 = vpop.f32.mrb[23].mxu0  ;;  %v12031_v18 = vpop.f32.mrb[23].mxu1 }
 0x682   : > { %v13258_v21 = vmax.f32 %v13188_v29, 0.0  ;;  %v13189_v37 = vadd.f32 %v19735_v33, %v13112_v20 }
 0x684   : > { %v15348_v14 = vpack.c.bf16 %v13258_v21, %v13258_v21  ;;  %v13259_v26 = vmax.f32 %v13189_v37, 0.0 }
 0x685   : > { %v12034_v0 = vpop.f32.mrb[24].mxu1  ;;  %v12900_v15 = vpop.f32.mrb[24].mxu0 }
 0x686   : > { %13609 = vst.msk [vmem:[%s19748_s23 + $0x50] sm:$0xf] %vm13588_vm2, %v15348_v14  ;;  %v15349_v47 = vpack.c.bf16 %v13259_v26, %v13259_v26  ;;  %v12241_v3 = vmax.f32 %v19455_v52, %v12034_v0  ;;  %v13113_v25 = vmax.f32 %v12239_v62, %v12900_v15  ;;  %v12036_v45 = vpop.f32.mrb[25].mxu1  ;;  %v12902_v31 = vpop.f32.mrb[25].mxu0 }
 0x687   : > { %v12037_v28 = vpop.f32.mrb[26].mxu1  ;;  %v12903_v23 = vpop.f32.mrb[26].mxu0 }
 0x688   : > { %13610 = vst.msk [vmem:[%s19748_s23 + $0x54] sm:$0xf] %vm13588_vm2, %v15349_v47  ;;  %v13190_v1 = vadd.f32 %v19735_v33, %v13113_v25  ;;  %v12242_v13 = vmax.f32 %v19462_v30, %v12037_v28  ;;  %v13114_v38 = vmax.f32 %v12240_v51, %v12903_v23  ;;  %v12905_v56 = vpop.f32.mrb[27].mxu0  ;;  %v12039_v40 = vpop.f32.mrb[27].mxu1 }
 0x68a   : > { %v13260_v22 = vmax.f32 %v13190_v1, 0.0  ;;  %v13191_v41 = vadd.f32 %v19735_v33, %v13114_v38 }
 0x68c   : > { %v15350_v52 = vpack.c.bf16 %v13260_v22, %v13260_v22  ;;  %v13261_v43 = vmax.f32 %v13191_v41, 0.0 }
 0x68d   : > { %v12042_v6 = vpop.f32.mrb[28].mxu1  ;;  %v12908_v17 = vpop.f32.mrb[28].mxu0 }
 0x68e   : > { %13611 = vst.msk [vmem:[%s19748_s23 + $0x58] sm:$0xf] %vm13588_vm2, %v15350_v52  ;;  %v15351_v46 = vpack.c.bf16 %v13261_v43, %v13261_v43  ;;  %v12243_v55 = vmax.f32 %v19467_v27, %v12042_v6  ;;  %v13115_v5 = vmax.f32 %v12241_v3, %v12908_v17  ;;  %v12044_v62 = vpop.f32.mrb[29].mxu1  ;;  %v12910_v30 = vpop.f32.mrb[29].mxu0 }
 0x68f   : > { %v12045_v4 = vpop.f32.mrb[30].mxu1  ;;  %v12911_v16 = vpop.f32.mrb[30].mxu0 }
 0x690   : > { %13612 = vst.msk [vmem:[%s19748_s23 + $0x5c] sm:$0xf] %vm13588_vm2, %v15351_v46  ;;  %v13192_v24 = vadd.f32 %v19735_v33, %v13115_v5  ;;  %v12244_v59 = vmax.f32 %v19474_v7, %v12045_v4  ;;  %v13116_v42 = vmax.f32 %v12242_v13, %v12911_v16  ;;  %v12913_v29 = vpop.f32.mrb[31].mxu0  ;;  %v12047_v51 = vpop.f32.mrb[31].mxu1 }
 0x692   : > { %v13262_v20 = vmax.f32 %v13192_v24, 0.0  ;;  %v13193_v53 = vadd.f32 %v19735_v33, %v13116_v42 }
 0x694   : > { %v15352_v27 = vpack.c.bf16 %v13262_v20, %v13262_v20  ;;  %v13263_v18 = vmax.f32 %v13193_v53, 0.0 }
 0x695   : > { %v12050_v21 = vpop.f32.mrb[32].mxu1  ;;  %v12916_v37 = vpop.f32.mrb[32].mxu0 }
 0x696   : > { %13613 = vst.msk [vmem:[%s19748_s23 + $0x60] sm:$0xf] %vm13588_vm2, %v15352_v27  ;;  %v15353_v14 = vpack.c.bf16 %v13263_v18, %v13263_v18  ;;  %v12245_v26 = vmax.f32 %v19479_v50, %v12050_v21  ;;  %v13117_v0 = vmax.f32 %v12243_v55, %v12916_v37  ;;  %v12052_v15 = vpop.f32.mrb[33].mxu1  ;;  %v12918_v7 = vpop.f32.mrb[33].mxu0 }
 0x697   : > { %v12053_v47 = vpop.f32.mrb[34].mxu1  ;;  %v12919_v3 = vpop.f32.mrb[34].mxu0 }
 0x698   : > { %13614 = vst.msk [vmem:[%s19748_s23 + $0x64] sm:$0xf] %vm13588_vm2, %v15353_v14  ;;  %v13194_v25 = vadd.f32 %v19735_v33, %v13117_v0  ;;  %v12246_v45 = vmax.f32 %v19486_v8, %v12053_v47  ;;  %v13118_v31 = vmax.f32 %v12244_v59, %v12919_v3  ;;  %v12921_v28 = vpop.f32.mrb[35].mxu0  ;;  %v12055_v23 = vpop.f32.mrb[35].mxu1 }
 0x69a   : > { %v13264_v1 = vmax.f32 %v13194_v25, 0.0  ;;  %v13195_v13 = vadd.f32 %v19735_v33, %v13118_v31 }
 0x69c   : > { %v15354_v50 = vpack.c.bf16 %v13264_v1, %v13264_v1  ;;  %v13265_v38 = vmax.f32 %v13195_v13, 0.0 }
 0x69d   : > { %v12058_v56 = vpop.f32.mrb[36].mxu1  ;;  %v12924_v40 = vpop.f32.mrb[36].mxu0 }
 0x69e   : > { %13615 = vst.msk [vmem:[%s19748_s23 + $0x68] sm:$0xf] %vm13588_vm2, %v15354_v50  ;;  %v15355_v22 = vpack.c.bf16 %v13265_v38, %v13265_v38  ;;  %v12247_v41 = vmax.f32 %v19491_v63, %v12058_v56  ;;  %v13119_v52 = vmax.f32 %v12245_v26, %v12924_v40  ;;  %v12060_v43 = vpop.f32.mrb[37].mxu1  ;;  %v12926_v8 = vpop.f32.mrb[37].mxu0 }
 0x69f   : > { %v12061_v6 = vpop.f32.mrb[38].mxu1  ;;  %v12927_v17 = vpop.f32.mrb[38].mxu0 }
 0x6a0   : > { %13616 = vst.msk [vmem:[%s19748_s23 + $0x6c] sm:$0xf] %vm13588_vm2, %v15355_v22  ;;  %v13196_v46 = vadd.f32 %v19735_v33, %v13119_v52  ;;  %v12248_v55 = vmax.f32 %v19498_v44, %v12061_v6  ;;  %v13120_v5 = vmax.f32 %v12246_v45, %v12927_v17  ;;  %v12929_v62 = vpop.f32.mrb[39].mxu0  ;;  %v12063_v30 = vpop.f32.mrb[39].mxu1 }
 0x6a2   : > { %v13266_v4 = vmax.f32 %v13196_v46, 0.0  ;;  %v13197_v16 = vadd.f32 %v19735_v33, %v13120_v5 }
 0x6a4   : > { %v15356_v63 = vpack.c.bf16 %v13266_v4, %v13266_v4  ;;  %v13267_v24 = vmax.f32 %v13197_v16, 0.0 }
 0x6a5   : > { %v12066_v59 = vpop.f32.mrb[40].mxu1  ;;  %v12932_v42 = vpop.f32.mrb[40].mxu0 }
 0x6a6   : > { %13617 = vst.msk [vmem:[%s19748_s23 + $0x70] sm:$0xf] %vm13588_vm2, %v15356_v63  ;;  %v15357_v29 = vpack.c.bf16 %v13267_v24, %v13267_v24  ;;  %v12249_v51 = vmax.f32 %v19503_v57, %v12066_v59  ;;  %v13121_v20 = vmax.f32 %v12247_v41, %v12932_v42  ;;  %v12068_v53 = vpop.f32.mrb[41].mxu1  ;;  %v12934_v44 = vpop.f32.mrb[41].mxu0 }
 0x6a7   : > { %v12069_v27 = vpop.f32.mrb[42].mxu1  ;;  %v12935_v18 = vpop.f32.mrb[42].mxu0 }
 0x6a8   : > { %13618 = vst.msk [vmem:[%s19748_s23 + $0x74] sm:$0xf] %vm13588_vm2, %v15357_v29  ;;  %v13198_v21 = vadd.f32 %v19735_v33, %v13121_v20  ;;  %v12250_v37 = vmax.f32 %v19510_v36, %v12069_v27  ;;  %v13122_v14 = vmax.f32 %v12248_v55, %v12935_v18  ;;  %v12937_v26 = vpop.f32.mrb[43].mxu0  ;;  %v12071_v0 = vpop.f32.mrb[43].mxu1 }
 0x6aa   : > { %v13268_v15 = vmax.f32 %v13198_v21, 0.0  ;;  %v13199_v7 = vadd.f32 %v19735_v33, %v13122_v14 }
 0x6ac   : > { %v15358_v57 = vpack.c.bf16 %v13268_v15, %v13268_v15  ;;  %v13269_v47 = vmax.f32 %v13199_v7, 0.0 }
 0x6ad   : > { %v12074_v3 = vpop.f32.mrb[44].mxu1  ;;  %v12940_v25 = vpop.f32.mrb[44].mxu0 }
 0x6ae   : > { %13619 = vst.msk [vmem:[%s19748_s23 + $0x78] sm:$0xf] %vm13588_vm2, %v15358_v57  ;;  %v15359_v45 = vpack.c.bf16 %v13269_v47, %v13269_v47  ;;  %v12251_v31 = vmax.f32 %v19515_v35, %v12074_v3  ;;  %v13123_v28 = vmax.f32 %v12249_v51, %v12940_v25  ;;  %v12076_v23 = vpop.f32.mrb[45].mxu1  ;;  %v12942_v36 = vpop.f32.mrb[45].mxu0 }
 0x6af   : > { %v12077_v1 = vpop.f32.mrb[46].mxu1  ;;  %v12943_v13 = vpop.f32.mrb[46].mxu0 }
 0x6b0   : > { %13620 = vst.msk [vmem:[%s19748_s23 + $0x7c] sm:$0xf] %vm13588_vm2, %v15359_v45  ;;  %v13200_v50 = vadd.f32 %v19735_v33, %v13123_v28  ;;  %v12252_v38 = vmax.f32 %v19522_v58, %v12077_v1  ;;  %v13124_v56 = vmax.f32 %v12250_v37, %v12943_v13  ;;  %v12945_v40 = vpop.f32.mrb[47].mxu0  ;;  %v12079_v22 = vpop.f32.mrb[47].mxu1 }
 0x6b2   : > { %v13270_v41 = vmax.f32 %v13200_v50, 0.0  ;;  %v13201_v52 = vadd.f32 %v19735_v33, %v13124_v56  ;;  %v20251_v56 = vld [vmem:[#allocation25_spill] sm:$0xff] }
 0x6b4   : > { %v15360_v35 = vpack.c.bf16 %v13270_v41, %v13270_v41  ;;  %v13271_v43 = vmax.f32 %v13201_v52, 0.0 }
 0x6b5   : > { %v12082_v8 = vpop.f32.mrb[48].mxu1  ;;  %v12948_v6 = vpop.f32.mrb[48].mxu0 }
 0x6b6   : > { %13621 = vst.msk [vmem:[%s19748_s23 + $0x80] sm:$0xf] %vm13588_vm2, %v15360_v35  ;;  %v15361_v17 = vpack.c.bf16 %v13271_v43, %v13271_v43  ;;  %v12253_v46 = vmax.f32 %v19527_v61, %v12082_v8  ;;  %v13125_v55 = vmax.f32 %v12251_v31, %v12948_v6  ;;  %v12084_v5 = vpop.f32.mrb[49].mxu1  ;;  %v12950_v58 = vpop.f32.mrb[49].mxu0 }
 0x6b7   : > { %v12085_v62 = vpop.f32.mrb[50].mxu1  ;;  %v12951_v30 = vpop.f32.mrb[50].mxu0 }
 0x6b8   : > { %13622 = vst.msk [vmem:[%s19748_s23 + $0x84] sm:$0xf] %vm13588_vm2, %v15361_v17  ;;  %v13202_v4 = vadd.f32 %v19735_v33, %v13125_v55  ;;  %v12254_v16 = vmax.f32 %v19534_v9, %v12085_v62  ;;  %v13126_v63 = vmax.f32 %v12252_v38, %v12951_v30  ;;  %v12953_v24 = vpop.f32.mrb[51].mxu0  ;;  %v12087_v59 = vpop.f32.mrb[51].mxu1  ;;  %v20252_v55 = vld [vmem:[#allocation26_spill] sm:$0xff] }
 0x6b9   : > { %v20253_v24 = vld [vmem:[#allocation27_spill] sm:$0xff] }
 0x6ba   : > { %v13272_v42 = vmax.f32 %v13202_v4, 0.0  ;;  %v13203_v29 = vadd.f32 %v19735_v33, %v13126_v63 }
 0x6bc   : > { %v15362_v61 = vpack.c.bf16 %v13272_v42, %v13272_v42  ;;  %v13273_v51 = vmax.f32 %v13203_v29, 0.0 }
 0x6bd   : > { %v12090_v20 = vpop.f32.mrb[52].mxu1  ;;  %v12956_v53 = vpop.f32.mrb[52].mxu0 }
 0x6be   : > { %13623 = vst.msk [vmem:[%s19748_s23 + $0x88] sm:$0xf] %vm13588_vm2, %v15362_v61  ;;  %v15363_v44 = vpack.c.bf16 %v13273_v51, %v13273_v51  ;;  %v12255_v27 = vmax.f32 %v19539_v60, %v12090_v20  ;;  %v13127_v18 = vmax.f32 %v12253_v46, %v12956_v53  ;;  %v12092_v21 = vpop.f32.mrb[53].mxu1  ;;  %v12958_v9 = vpop.f32.mrb[53].mxu0 }
 0x6bf   : > { %v12093_v37 = vpop.f32.mrb[54].mxu1  ;;  %v12959_v14 = vpop.f32.mrb[54].mxu0  ;;  %v20254_v9 = vld [vmem:[#allocation28_spill] sm:$0xff] }
 0x6c0   : > { %13624 = vst.msk [vmem:[%s19748_s23 + $0x8c] sm:$0xf] %vm13588_vm2, %v15363_v44  ;;  %v13204_v26 = vadd.f32 %v19735_v33, %v13127_v18  ;;  %v12256_v0 = vmax.f32 %v19546_v19, %v12093_v37  ;;  %v13128_v15 = vmax.f32 %v12254_v16, %v12959_v14  ;;  %v12961_v7 = vpop.f32.mrb[55].mxu0  ;;  %v12095_v57 = vpop.f32.mrb[55].mxu1 }
 0x6c2   : > { %v13274_v47 = vmax.f32 %v13204_v26, 0.0  ;;  %v13205_v3 = vadd.f32 %v19735_v33, %v13128_v15 }
 0x6c4   : > { %v15364_v60 = vpack.c.bf16 %v13274_v47, %v13274_v47  ;;  %v13275_v25 = vmax.f32 %v13205_v3, 0.0  ;;  %v20255_v47 = vld [vmem:[#allocation3_spill] sm:$0xff] }
 0x6c5   : > { %v12098_v45 = vpop.f32.mrb[56].mxu1  ;;  %v12964_v31 = vpop.f32.mrb[56].mxu0 }
 0x6c6   : > { %13625 = vst.msk [vmem:[%s19748_s23 + $0x90] sm:$0xf] %vm13588_vm2, %v15364_v60  ;;  %v15365_v28 = vpack.c.bf16 %v13275_v25, %v13275_v25  ;;  %v12257_v23 = vmax.f32 %v19551_v49, %v12098_v45  ;;  %v13129_v36 = vmax.f32 %v12255_v27, %v12964_v31  ;;  %v12100_v1 = vpop.f32.mrb[57].mxu1  ;;  %v12966_v19 = vpop.f32.mrb[57].mxu0 }
 0x6c7   : > { %v12101_v13 = vpop.f32.mrb[58].mxu1  ;;  %v12967_v50 = vpop.f32.mrb[58].mxu0 }
 0x6c8   : > { %13626 = vst.msk [vmem:[%s19748_s23 + $0x94] sm:$0xf] %vm13588_vm2, %v15365_v28  ;;  %v13206_v38 = vadd.f32 %v19735_v33, %v13129_v36  ;;  %v12258_v40 = vmax.f32 %v20251_v56, %v12101_v13  ;;  %v13130_v22 = vmax.f32 %v12256_v0, %v12967_v50  ;;  %v12969_v41 = vpop.f32.mrb[59].mxu0  ;;  %v12103_v52 = vpop.f32.mrb[59].mxu1  ;;  %v20256_v50 = vld [vmem:[#allocation4_spill] sm:$0xff] }
 0x6ca   : > { %v13276_v35 = vmax.f32 %v13206_v38, 0.0  ;;  %v13207_v43 = vadd.f32 %v19735_v33, %v13130_v22 }
 0x6cc   : > { %v15366_v49 = vpack.c.bf16 %v13276_v35, %v13276_v35  ;;  %v13277_v8 = vmax.f32 %v13207_v43, 0.0  ;;  %v20257_v43 = vld [vmem:[#allocation5_spill] sm:$0xff] }
 0x6cd   : > { %v12106_v6 = vpop.f32.mrb[60].mxu1  ;;  %v12972_v17 = vpop.f32.mrb[60].mxu0 }
 0x6ce   : > { %13627 = vst.msk [vmem:[%s19748_s23 + $0x98] sm:$0xf] %vm13588_vm2, %v15366_v49  ;;  %v15367_v46 = vpack.c.bf16 %v13277_v8, %v13277_v8  ;;  %v12259_v5 = vmax.f32 %v20252_v55, %v12106_v6  ;;  %v13131_v58 = vmax.f32 %v12257_v23, %v12972_v17  ;;  %v12108_v62 = vpop.f32.mrb[61].mxu1  ;;  %v12974_v30 = vpop.f32.mrb[61].mxu0  ;;  %v19965_v55 = vld [vmem:[%s20078_s2] ss:$0 sm:$0xff] }
 0x6cf   : > { %v12109_v4 = vpop.f32.mrb[62].mxu1  ;;  %v12975_v16 = vpop.f32.mrb[62].mxu0 }
 0x6d0   : > { %13628 = vst.msk [vmem:[%s19748_s23 + $0x9c] sm:$0xf] %vm13588_vm2, %v15367_v46  ;;  %v13208_v63 = vadd.f32 %v19735_v33, %v13131_v58  ;;  %v12260_v59 = vmax.f32 %v20253_v24, %v12109_v4  ;;  %v13132_v42 = vmax.f32 %v12258_v40, %v12975_v16  ;;  %v12977_v29 = vpop.f32.mrb[63].mxu0  ;;  %v12111_v61 = vpop.f32.mrb[63].mxu1  ;;  %v20258_v16 = vld [vmem:[#allocation6_spill] sm:$0xff] }
 0x6d2   : > { %v13278_v51 = vmax.f32 %v13208_v63, 0.0  ;;  %v13209_v20 = vadd.f32 %v19735_v33, %v13132_v42 }
 0x6d4   : > { %v15368_v53 = vpack.c.bf16 %v13278_v51, %v13278_v51  ;;  %v13279_v44 = vmax.f32 %v13209_v20, 0.0  ;;  %v20259_v20 = vld [vmem:[#allocation7_spill] sm:$0xff] }
 0x6d5   : > { %v12114_v27 = vpop.f32.mrb[64].mxu1  ;;  %v12980_v18 = vpop.f32.mrb[64].mxu0 }
 0x6d6   : > { %13629 = vst.msk [vmem:[%s19748_s23 + $0xa0] sm:$0xf] %vm13588_vm2, %v15368_v53  ;;  %v15369_v21 = vpack.c.bf16 %v13279_v44, %v13279_v44  ;;  %v12261_v37 = vmax.f32 %v20254_v9, %v12114_v27  ;;  %v13133_v14 = vmax.f32 %v12259_v5, %v12980_v18  ;;  %v12116_v26 = vpop.f32.mrb[65].mxu1  ;;  %v12982_v0 = vpop.f32.mrb[65].mxu0 }
 0x6d7   : > { %v12117_v15 = vpop.f32.mrb[66].mxu1  ;;  %v12983_v7 = vpop.f32.mrb[66].mxu0 }
 0x6d8   : > { %13630 = vst.msk [vmem:[%s19748_s23 + $0xa4] sm:$0xf] %vm13588_vm2, %v15369_v21  ;;  %v13210_v57 = vadd.f32 %v19735_v33, %v13133_v14  ;;  %v12262_v3 = vmax.f32 %v20255_v47, %v12117_v15  ;;  %v13134_v60 = vmax.f32 %v12260_v59, %v12983_v7  ;;  %v12985_v25 = vpop.f32.mrb[67].mxu0  ;;  %v12119_v45 = vpop.f32.mrb[67].mxu1  ;;  %v20260_v7 = vld [vmem:[#allocation8_spill] sm:$0xff] }
 0x6da   : > { %v13280_v31 = vmax.f32 %v13210_v57, 0.0  ;;  %v13211_v28 = vadd.f32 %v19735_v33, %v13134_v60 }
 0x6dc   : > { %v15370_v23 = vpack.c.bf16 %v13280_v31, %v13280_v31  ;;  %v13281_v36 = vmax.f32 %v13211_v28, 0.0  ;;  %v20261_v28 = vld [vmem:[#allocation9_spill] sm:$0xff] }
 0x6dd   : > { %v12122_v1 = vpop.f32.mrb[68].mxu1  ;;  %v12988_v19 = vpop.f32.mrb[68].mxu0 }
 0x6de   : > { %13631 = vst.msk [vmem:[%s19748_s23 + $0xa8] sm:$0xf] %vm13588_vm2, %v15370_v23  ;;  %v15371_v13 = vpack.c.bf16 %v13281_v36, %v13281_v36  ;;  %v12263_v38 = vmax.f32 %v20256_v50, %v12122_v1  ;;  %v13135_v56 = vmax.f32 %v12261_v37, %v12988_v19  ;;  %v12124_v40 = vpop.f32.mrb[69].mxu1  ;;  %v12990_v22 = vpop.f32.mrb[69].mxu0 }
 0x6df   : > { %v12125_v41 = vpop.f32.mrb[70].mxu1  ;;  %v12991_v52 = vpop.f32.mrb[70].mxu0 }
 0x6e0   : > { %13632 = vst.msk [vmem:[%s19748_s23 + $0xac] sm:$0xf] %vm13588_vm2, %v15371_v13  ;;  %v13212_v35 = vadd.f32 %v19735_v33, %v13135_v56  ;;  %v12264_v49 = vmax.f32 %v20257_v43, %v12125_v41  ;;  %v13136_v8 = vmax.f32 %v12262_v3, %v12991_v52  ;;  %v12993_v6 = vpop.f32.mrb[71].mxu0  ;;  %v12127_v17 = vpop.f32.mrb[71].mxu1  ;;  %v20262_v52 = vld [vmem:[#allocation10_spill] sm:$0xff] }
 0x6e2   : > { %v13282_v46 = vmax.f32 %v13212_v35, 0.0  ;;  %v13213_v5 = vadd.f32 %v19965_v55, %v13136_v8 }
 0x6e4   : > { %v15372_v58 = vpack.c.bf16 %v13282_v46, %v13282_v46  ;;  %v13283_v62 = vmax.f32 %v13213_v5, 0.0  ;;  %v20263_v5 = vld [vmem:[#allocation11_spill] sm:$0xff] }
 0x6e5   : > { %v12130_v30 = vpop.f32.mrb[72].mxu1  ;;  %v12996_v4 = vpop.f32.mrb[72].mxu0 }
 0x6e6   : > { %13633 = vst.msk [vmem:[%s19748_s23 + $0xb0] sm:$0xf] %vm13588_vm2, %v15372_v58  ;;  %v15373_v33 = vpack.c.bf16 %v13283_v62, %v13283_v62  ;;  %v12265_v63 = vmax.f32 %v20258_v16, %v12130_v30  ;;  %v13137_v24 = vmax.f32 %v12263_v38, %v12996_v4  ;;  %v12132_v59 = vpop.f32.mrb[73].mxu1  ;;  %v12998_v42 = vpop.f32.mrb[73].mxu0 }
 0x6e7   : > { %v12133_v29 = vpop.f32.mrb[74].mxu1  ;;  %v12999_v61 = vpop.f32.mrb[74].mxu0 }
 0x6e8   : > { %13634 = vst.msk [vmem:[%s19748_s23 + $0xb4] sm:$0xf] %vm13588_vm2, %v15373_v33  ;;  %v13214_v51 = vadd.f32 %v19965_v55, %v13137_v24  ;;  %v12266_v53 = vmax.f32 %v20259_v20, %v12133_v29  ;;  %v13138_v44 = vmax.f32 %v12264_v49, %v12999_v61  ;;  %v13001_v27 = vpop.f32.mrb[75].mxu0  ;;  %v12135_v18 = vpop.f32.mrb[75].mxu1  ;;  %v20264_v61 = vld [vmem:[#allocation12_spill] sm:$0xff] }
 0x6ea   : > { %v13284_v21 = vmax.f32 %v13214_v51, 0.0  ;;  %v13215_v9 = vadd.f32 %v19965_v55, %v13138_v44 }
 0x6ec   : > { %v15374_v37 = vpack.c.bf16 %v13284_v21, %v13284_v21  ;;  %v13285_v14 = vmax.f32 %v13215_v9, 0.0  ;;  %v20265_v9 = vld [vmem:[#allocation13_spill] sm:$0xff] }
 0x6ed   : > { %v12138_v26 = vpop.f32.mrb[76].mxu1  ;;  %v13004_v0 = vpop.f32.mrb[76].mxu0 }
 0x6ee   : > { %13635 = vst.msk [vmem:[%s19748_s23 + $0xb8] sm:$0xf] %vm13588_vm2, %v15374_v37  ;;  %v15375_v15 = vpack.c.bf16 %v13285_v14, %v13285_v14  ;;  %v12267_v57 = vmax.f32 %v20260_v7, %v12138_v26  ;;  %v13139_v47 = vmax.f32 %v12265_v63, %v13004_v0  ;;  %v12140_v3 = vpop.f32.mrb[77].mxu1  ;;  %v13006_v60 = vpop.f32.mrb[77].mxu0 }
 0x6ef   : > { %v12141_v25 = vpop.f32.mrb[78].mxu1  ;;  %v13007_v45 = vpop.f32.mrb[78].mxu0 }
 0x6f0   : > { %13636 = vst.msk [vmem:[%s19748_s23 + $0xbc] sm:$0xf] %vm13588_vm2, %v15375_v15  ;;  %v13216_v31 = vadd.f32 %v19965_v55, %v13139_v47  ;;  %v12268_v23 = vmax.f32 %v20261_v28, %v12141_v25  ;;  %v13140_v36 = vmax.f32 %v12266_v53, %v13007_v45  ;;  %v13009_v1 = vpop.f32.mrb[79].mxu0  ;;  %v12143_v19 = vpop.f32.mrb[79].mxu1  ;;  %v20266_v45 = vld [vmem:[#allocation14_spill] sm:$0xff] }
 0x6f2   : > { %v13286_v13 = vmax.f32 %v13216_v31, 0.0  ;;  %v13217_v50 = vadd.f32 %v19965_v55, %v13140_v36 }
 0x6f4   : > { %v15376_v38 = vpack.c.bf16 %v13286_v13, %v13286_v13  ;;  %v13287_v56 = vmax.f32 %v13217_v50, 0.0  ;;  %v20267_v50 = vld [vmem:[#allocation15_spill] sm:$0xff] }
 0x6f5   : > { %v12146_v40 = vpop.f32.mrb[80].mxu1  ;;  %v13012_v22 = vpop.f32.mrb[80].mxu0 }
 0x6f6   : > { %13637 = vst.msk [vmem:[%s19748_s23 + $0xc0] sm:$0xf] %vm13588_vm2, %v15376_v38  ;;  %v15377_v41 = vpack.c.bf16 %v13287_v56, %v13287_v56  ;;  %v12269_v35 = vmax.f32 %v20262_v52, %v12146_v40  ;;  %v13141_v43 = vmax.f32 %v12267_v57, %v13012_v22  ;;  %v12148_v49 = vpop.f32.mrb[81].mxu1  ;;  %v13014_v8 = vpop.f32.mrb[81].mxu0 }
 0x6f7   : > { %v12149_v6 = vpop.f32.mrb[82].mxu1  ;;  %v13015_v17 = vpop.f32.mrb[82].mxu0 }
 0x6f8   : > { %13638 = vst.msk [vmem:[%s19748_s23 + $0xc4] sm:$0xf] %vm13588_vm2, %v15377_v41  ;;  %v13218_v46 = vadd.f32 %v19965_v55, %v13141_v43  ;;  %v12270_v58 = vmax.f32 %v20263_v5, %v12149_v6  ;;  %v13142_v62 = vmax.f32 %v12268_v23, %v13015_v17  ;;  %v13017_v30 = vpop.f32.mrb[83].mxu0  ;;  %v12151_v4 = vpop.f32.mrb[83].mxu1 }
 0x6fa   : > { %v13288_v33 = vmax.f32 %v13218_v46, 0.0  ;;  %v13219_v16 = vadd.f32 %v19965_v55, %v13142_v62 }
 0x6fc   : > { %v15378_v63 = vpack.c.bf16 %v13288_v33, %v13288_v33  ;;  %v13289_v24 = vmax.f32 %v13219_v16, 0.0 }
 0x6fd   : > { %v12154_v59 = vpop.f32.mrb[84].mxu1  ;;  %v13020_v42 = vpop.f32.mrb[84].mxu0 }
 0x6fe   : > { %13639 = vst.msk [vmem:[%s19748_s23 + $0xc8] sm:$0xf] %vm13588_vm2, %v15378_v63  ;;  %v15379_v29 = vpack.c.bf16 %v13289_v24, %v13289_v24  ;;  %v12271_v51 = vmax.f32 %v20264_v61, %v12154_v59  ;;  %v13143_v20 = vmax.f32 %v12269_v35, %v13020_v42  ;;  %v12156_v53 = vpop.f32.mrb[85].mxu1  ;;  %v13022_v44 = vpop.f32.mrb[85].mxu0 }
 0x6ff   : > { %v12157_v27 = vpop.f32.mrb[86].mxu1  ;;  %v13023_v18 = vpop.f32.mrb[86].mxu0 }
 0x700   : > { %13640 = vst.msk [vmem:[%s19748_s23 + $0xcc] sm:$0xf] %vm13588_vm2, %v15379_v29  ;;  %v13220_v21 = vadd.f32 %v19965_v55, %v13143_v20  ;;  %v12272_v37 = vmax.f32 %v20265_v9, %v12157_v27  ;;  %v13144_v14 = vmax.f32 %v12270_v58, %v13023_v18  ;;  %v13025_v26 = vpop.f32.mrb[87].mxu0  ;;  %v12159_v0 = vpop.f32.mrb[87].mxu1 }
 0x702   : > { %v13290_v15 = vmax.f32 %v13220_v21, 0.0  ;;  %v13221_v7 = vadd.f32 %v19965_v55, %v13144_v14 }
 0x704   : > { %v15380_v57 = vpack.c.bf16 %v13290_v15, %v13290_v15  ;;  %v13291_v47 = vmax.f32 %v13221_v7, 0.0 }
 0x705   : > { %v12162_v3 = vpop.f32.mrb[88].mxu1  ;;  %v13028_v60 = vpop.f32.mrb[88].mxu0 }
 0x706   : > { %13641 = vst.msk [vmem:[%s19748_s23 + $0xd0] sm:$0xf] %vm13588_vm2, %v15380_v57  ;;  %v15381_v25 = vpack.c.bf16 %v13291_v47, %v13291_v47  ;;  %v12273_v31 = vmax.f32 %v20266_v45, %v12162_v3  ;;  %v13145_v28 = vmax.f32 %v12271_v51, %v13028_v60  ;;  %v12164_v23 = vpop.f32.mrb[89].mxu1  ;;  %v13030_v36 = vpop.f32.mrb[89].mxu0 }
 0x707   : > { %v12165_v1 = vpop.f32.mrb[90].mxu1  ;;  %v13031_v19 = vpop.f32.mrb[90].mxu0 }
 0x708   : > { %13642 = vst.msk [vmem:[%s19748_s23 + $0xd4] sm:$0xf] %vm13588_vm2, %v15381_v25  ;;  %v13222_v13 = vadd.f32 %v19965_v55, %v13145_v28  ;;  %v12274_v38 = vmax.f32 %v20267_v50, %v12165_v1  ;;  %v13146_v56 = vmax.f32 %v12272_v37, %v13031_v19  ;;  %v13033_v40 = vpop.f32.mrb[91].mxu0  ;;  %v12167_v22 = vpop.f32.mrb[91].mxu1 }
 0x70a   : > { %v13292_v41 = vmax.f32 %v13222_v13, 0.0  ;;  %v13223_v52 = vadd.f32 %v19965_v55, %v13146_v56 }
 0x70c   : > { %v15382_v35 = vpack.c.bf16 %v13292_v41, %v13292_v41  ;;  %v13293_v43 = vmax.f32 %v13223_v52, 0.0 }
 0x70d   : > { %v12170_v49 = vpop.f32.mrb[92].mxu1  ;;  %v13036_v8 = vpop.f32.mrb[92].mxu0 }
 0x70e   : > { %13643 = vst.msk [vmem:[%s19748_s23 + $0xd8] sm:$0xf] %vm13588_vm2, %v15382_v35  ;;  %v15383_v6 = vpack.c.bf16 %v13293_v43, %v13293_v43  ;;  %v12275_v17 = vmax.f32 %v19659_v34, %v12170_v49  ;;  %v13147_v46 = vmax.f32 %v12273_v31, %v13036_v8  ;;  %v12172_v5 = vpop.f32.mrb[93].mxu1  ;;  %v13038_v58 = vpop.f32.mrb[93].mxu0 }
 0x70f   : > { %v12173_v62 = vpop.f32.mrb[94].mxu1  ;;  %v13039_v30 = vpop.f32.mrb[94].mxu0 }
 0x710   : > { %13644 = vst.msk [vmem:[%s19748_s23 + $0xdc] sm:$0xf] %vm13588_vm2, %v15383_v6  ;;  %v13224_v4 = vadd.f32 %v19965_v55, %v13147_v46  ;;  %v12276_v33 = vmax.f32 %v19666_v32, %v12173_v62  ;;  %v13148_v16 = vmax.f32 %v12274_v38, %v13039_v30  ;;  %v13041_v63 = vpop.f32.mrb[95].mxu0  ;;  %v12175_v24 = vpop.f32.mrb[95].mxu1 }
 0x712   : > { %v13294_v59 = vmax.f32 %v13224_v4, 0.0  ;;  %v13225_v42 = vadd.f32 %v19965_v55, %v13148_v16 }
 0x714   : > { %v15384_v34 = vpack.c.bf16 %v13294_v59, %v13294_v59  ;;  %v13295_v29 = vmax.f32 %v13225_v42, 0.0 }
 0x715   : > { %v12178_v61 = vpop.f32.mrb[96].mxu1  ;;  %v13044_v51 = vpop.f32.mrb[96].mxu0 }
 0x716   : > { %13645 = vst.msk [vmem:[%s19748_s23 + $0xe0] sm:$0xf] %vm13588_vm2, %v15384_v34  ;;  %v15385_v20 = vpack.c.bf16 %v13295_v29, %v13295_v29  ;;  %v12277_v53 = vmax.f32 %v19671_v10, %v12178_v61  ;;  %v13149_v44 = vmax.f32 %v12275_v17, %v13044_v51  ;;  %v12180_v27 = vpop.f32.mrb[97].mxu1  ;;  %v13046_v32 = vpop.f32.mrb[97].mxu0 }
 0x717   : > { %v12181_v18 = vpop.f32.mrb[98].mxu1  ;;  %v13047_v21 = vpop.f32.mrb[98].mxu0 }
 0x718   : > { %13646 = vst.msk [vmem:[%s19748_s23 + $0xe4] sm:$0xf] %vm13588_vm2, %v15385_v20  ;;  %v13226_v9 = vadd.f32 %v19965_v55, %v13149_v44  ;;  %v12278_v37 = vmax.f32 %v19678_v54, %v12181_v18  ;;  %v13150_v14 = vmax.f32 %v12276_v33, %v13047_v21  ;;  %v13049_v26 = vpop.f32.mrb[99].mxu0  ;;  %v12183_v0 = vpop.f32.mrb[99].mxu1  ;;  %v20268_v20 = vld [vmem:[#allocation16_spill] sm:$0xff] }
 0x719   : > { %v20269_v0 = vld [vmem:[#allocation17_spill] sm:$0xff] }
 0x71a   : > { %v13296_v15 = vmax.f32 %v13226_v9, 0.0  ;;  %v13227_v7 = vadd.f32 %v19965_v55, %v13150_v14 }
 0x71c   : > { %v15386_v10 = vpack.c.bf16 %v13296_v15, %v13296_v15  ;;  %v13297_v57 = vmax.f32 %v13227_v7, 0.0 }
 0x71d   : > { %v12186_v47 = vpop.f32.mrb[100].mxu1  ;;  %v13052_v3 = vpop.f32.mrb[100].mxu0 }
 0x71e   : > { %13647 = vst.msk [vmem:[%s19748_s23 + $0xe8] sm:$0xf] %vm13588_vm2, %v15386_v10  ;;  %v15387_v60 = vpack.c.bf16 %v13297_v57, %v13297_v57  ;;  %v12279_v25 = vmax.f32 %v19683_v2, %v12186_v47  ;;  %v13151_v45 = vmax.f32 %v12277_v53, %v13052_v3  ;;  %v12188_v31 = vpop.f32.mrb[101].mxu1  ;;  %v13054_v54 = vpop.f32.mrb[101].mxu0 }
 0x71f   : > { %v12189_v28 = vpop.f32.mrb[102].mxu1  ;;  %v13055_v23 = vpop.f32.mrb[102].mxu0 }
 0x720   : > { %13648 = vst.msk [vmem:[%s19748_s23 + $0xec] sm:$0xf] %vm13588_vm2, %v15387_v60  ;;  %v13228_v36 = vadd.f32 %v19965_v55, %v13151_v45  ;;  %v12280_v1 = vmax.f32 %v19690_v11, %v12189_v28  ;;  %v13152_v19 = vmax.f32 %v12278_v37, %v13055_v23  ;;  %v13057_v13 = vpop.f32.mrb[103].mxu0  ;;  %v12191_v50 = vpop.f32.mrb[103].mxu1 }
 0x722   : > { %v13298_v38 = vmax.f32 %v13228_v36, 0.0  ;;  %v13229_v56 = vadd.f32 %v19965_v55, %v13152_v19 }
 0x724   : > { %v15388_v2 = vpack.c.bf16 %v13298_v38, %v13298_v38  ;;  %v13299_v40 = vmax.f32 %v13229_v56, 0.0 }
 0x725   : > { %v12194_v22 = vpop.f32.mrb[104].mxu1  ;;  %v13060_v41 = vpop.f32.mrb[104].mxu0 }
 0x726   : > { %13649 = vst.msk [vmem:[%s19748_s23 + $0xf0] sm:$0xf] %vm13588_vm2, %v15388_v2  ;;  %v15389_v52 = vpack.c.bf16 %v13299_v40, %v13299_v40  ;;  %v12281_v35 = vmax.f32 %v19695_v48, %v12194_v22  ;;  %v13153_v43 = vmax.f32 %v12279_v25, %v13060_v41  ;;  %v12196_v49 = vpop.f32.mrb[105].mxu1  ;;  %v13062_v11 = vpop.f32.mrb[105].mxu0  ;;  %v20270_v25 = vld [vmem:[#allocation18_spill] sm:$0xff] }
 0x727   : > { %v12197_v8 = vpop.f32.mrb[106].mxu1  ;;  %v13063_v6 = vpop.f32.mrb[106].mxu0 }
 0x728   : > { %13650 = vst.msk [vmem:[%s19748_s23 + $0xf4] sm:$0xf] %vm13588_vm2, %v15389_v52  ;;  %v13230_v17 = vadd.f32 %v19965_v55, %v13153_v43  ;;  %v12282_v46 = vmax.f32 %v19702_v12, %v12197_v8  ;;  %v13154_v5 = vmax.f32 %v12280_v1, %v13063_v6  ;;  %v13065_v58 = vpop.f32.mrb[107].mxu0  ;;  %v12199_v62 = vpop.f32.mrb[107].mxu1 }
 0x72a   : > { %v13300_v30 = vmax.f32 %v13230_v17, 0.0  ;;  %v13231_v4 = vadd.f32 %v19965_v55, %v13154_v5 }
 0x72c   : > { %v15390_v48 = vpack.c.bf16 %v13300_v30, %v13300_v30  ;;  %v13301_v33 = vmax.f32 %v13231_v4, 0.0 }
 0x72d   : > { %v12202_v16 = vpop.f32.mrb[108].mxu1  ;;  %v13068_v63 = vpop.f32.mrb[108].mxu0 }
 0x72e   : > { %13651 = vst.msk [vmem:[%s19748_s23 + $0xf8] sm:$0xf] %vm13588_vm2, %v15390_v48  ;;  %v15391_v24 = vpack.c.bf16 %v13301_v33, %v13301_v33  ;;  %v12283_v59 = vmax.f32 %v19707_v39, %v12202_v16  ;;  %v13155_v42 = vmax.f32 %v12281_v35, %v13068_v63  ;;  %v12204_v34 = vpop.f32.mrb[109].mxu1  ;;  %v13070_v12 = vpop.f32.mrb[109].mxu0 }
 0x72f   : > { %v12205_v29 = vpop.f32.mrb[110].mxu1  ;;  %v13071_v61 = vpop.f32.mrb[110].mxu0 }
 0x730   : > { %13652 = vst.msk [vmem:[%s19748_s23 + $0xfc] sm:$0xf] %vm13588_vm2, %v15391_v24  ;;  %v13232_v51 = vadd.f32 %v19965_v55, %v13155_v42  ;;  %v12284_v53 = vmax.f32 %v20268_v20, %v12205_v29  ;;  %v13156_v44 = vmax.f32 %v12282_v46, %v13071_v61  ;;  %v13073_v27 = vpop.f32.mrb[111].mxu0  ;;  %v12207_v32 = vpop.f32.mrb[111].mxu1 }
 0x732   : > { %v13302_v18 = vmax.f32 %v13232_v51, 0.0  ;;  %v13233_v21 = vadd.f32 %v19965_v55, %v13156_v44 }
 0x734   : > { %v15392_v39 = vpack.c.bf16 %v13302_v18, %v13302_v18  ;;  %v13303_v9 = vmax.f32 %v13233_v21, 0.0 }
 0x735   : > { %v12210_v37 = vpop.f32.mrb[112].mxu1  ;;  %v13076_v14 = vpop.f32.mrb[112].mxu0 }
 0x736   : > { %13653 = vst.msk [vmem:[%s19748_s23 + $0x100] sm:$0xf] %vm13588_vm2, %v15392_v39  ;;  %v15393_v26 = vpack.c.bf16 %v13303_v9, %v13303_v9  ;;  %v12285_v15 = vmax.f32 %v20269_v0, %v12210_v37  ;;  %v13157_v7 = vmax.f32 %v12283_v59, %v13076_v14  ;;  %v12212_v10 = vpop.f32.mrb[113].mxu1  ;;  %v13078_v57 = vpop.f32.mrb[113].mxu0 }
 0x737   : > { %v12213_v47 = vpop.f32.mrb[114].mxu1  ;;  %v13079_v3 = vpop.f32.mrb[114].mxu0 }
 0x738   : > { %13654 = vst.msk [vmem:[%s19748_s23 + $0x104] sm:$0xf] %vm13588_vm2, %v15393_v26  ;;  %v13234_v60 = vadd.f32 %v19965_v55, %v13157_v7  ;;  %v12286_v45 = vmax.f32 %v20270_v25, %v12213_v47  ;;  %v13158_v31 = vmax.f32 %v12284_v53, %v13079_v3  ;;  %v13081_v54 = vpop.f32.mrb[115].mxu0  ;;  %v12215_v28 = vpop.f32.mrb[115].mxu1 }
 0x73a   : > { %v13304_v23 = vmax.f32 %v13234_v60, 0.0  ;;  %v13235_v36 = vadd.f32 %v19965_v55, %v13158_v31 }
 0x73c   : > { %v15394_v1 = vpack.c.bf16 %v13304_v23, %v13304_v23  ;;  %v13305_v19 = vmax.f32 %v13235_v36, 0.0 }
 0x73d   : > { %v13084_v13 = vpop.f32.mrb[116].mxu0 }
 0x73e   : > { %13655 = vst.msk [vmem:[%s19748_s23 + $0x108] sm:$0xf] %vm13588_vm2, %v15394_v1  ;;  %v15395_v50 = vpack.c.bf16 %v13305_v19, %v13305_v19  ;;  %v13159_v38 = vmax.f32 %v12285_v15, %v13084_v13  ;;  %v13086_v56 = vpop.f32.mrb[117].mxu0 }
 0x73f   : > { %v13087_v2 = vpop.f32.mrb[118].mxu0 }
 0x740   : > { %13656 = vst.msk [vmem:[%s19748_s23 + $0x10c] sm:$0xf] %vm13588_vm2, %v15395_v50  ;;  %v13236_v40 = vadd.f32 %v19965_v55, %v13159_v38  ;;  %v13160_v22 = vmax.f32 %v12286_v45, %v13087_v2  ;;  %v13089_v41 = vpop.f32.mrb[119].mxu0 }
 0x742   : > { %v13306_v52 = vmax.f32 %v13236_v40, 0.0  ;;  %v13237_v35 = vadd.f32 %v19965_v55, %v13160_v22 }
 0x744   : > { %v15396_v43 = vpack.c.bf16 %v13306_v52, %v13306_v52  ;;  %v13307_v49 = vmax.f32 %v13237_v35, 0.0 }
 0x746   : > { %13657 = vst.msk [vmem:[%s19748_s23 + $0x110] sm:$0xf] %vm13588_vm2, %v15396_v43  ;;  %v15397_v11 = vpack.c.bf16 %v13307_v49, %v13307_v49 }
 0x748   : > { %13658 = vst.msk [vmem:[%s19748_s23 + $0x114] sm:$0xf] %vm13588_vm2, %v15397_v11 }
 0x749 PF: > { %p10_p9 = scmp.ge.s32.totalorder %s16491_s16, 12   ;;  %s20271_s12 = smov %s16447_s13 }
 0x74a   : > { %s20272_s13 = smov %s16500_s19  ;;  %s20273_s14 = smov %s16491_s16 }
 0x74b   :  { %12 = sbr.rel (!%p10_p9) target bundleno = 2 (0x2), region = 133 }

// kernel: state_net_forward.3
= control target key start
LH: loop header
LB: loop body
LE: loop exit
PB: predicated region body
PF: predicated region fallthrough
CT: control target
= control target key end

     0   :  { %vm500_vm0 = vcmask 261120   ;;  %vm5978_vm1 = vmmov 0   ;;  %vm2994_vm2 = vcmask 523264   ;;  %vm3911_vm3 = vcmask 1043456   ;;  %s7914_s1 = inlined_call_operand.vmem [shape: bf16[800,64], index: 1, kind: input, shape index: {}]   ;;  %s7915_s0 = inlined_call_operand.vmem [shape: bf16[9,24,800], index: 0, kind: input, shape index: {}]   ;;  %s7916_s3 = inlined_call_operand.vmem [shape: f32[768,100], index: 3, kind: input, shape index: {}]   ;;  %s7917_s2 = inlined_call_operand.vmem [shape: f32[1,64], index: 2, kind: input, shape index: {}]   ;;  %s7918_s5 = inlined_call_operand.vmem [shape: f32[100,1], index: 5, kind: input, shape index: {}]   ;;  %s7919_s6 = inlined_call_operand.<no memory space> [shape: f32[1,1], index: 6, kind: input, shape index: {}]   ;;  %s7920_s4 = inlined_call_operand.vmem [shape: f32[1,100], index: 4, kind: input, shape index: {}]   ;;  %s7921_s7 = inlined_call_operand.vmem [shape: f32[2,1], index: 7, kind: output, shape index: {}]  }
   0x1   :  { %v6023_v0 = vld [vmem:[%s7914_s1 + $0x40] sm:$0xff]   ;;  %v6046_v4 = vld [vmem:[%s7914_s1 + $0x48] sm:$0xff]   ;;  %v6070_v8 = vld [vmem:[%s7914_s1 + $0x50] sm:$0xff]   ;;  %vm3907_vm4 = vcmask 818176   ;;  %vm3985_vm5 = vcmask 1024  }
   0x2   :  { %v6028_v1 = vld [vmem:[%s7914_s1 + $0xc0] sm:$0xff]   ;;  %4298 = vmatprep.subr.bf16.mxu0 %v6023_v0  ;;  %v6052_v5 = vld [vmem:[%s7914_s1 + $0xc8] sm:$0xff]   ;;  %v6076_v9 = vld [vmem:[%s7914_s1 + $0xd0] sm:$0xff]  }
   0x3   :  { %v6034_v2 = vld [vmem:[%s7914_s1] sm:$0xff]   ;;  %4326 = vmatprep.subr.bf16.mxu1 %v6028_v1  ;;  %v6058_v6 = vld [vmem:[%s7914_s1 + $0x8] sm:$0xff]   ;;  %v6082_v10 = vld [vmem:[%s7914_s1 + $0x10] sm:$0xff]  }
   0x4   :  { %v6040_v3 = vld [vmem:[%s7914_s1 + $0x80] sm:$0xff]   ;;  %4299 = vmatpush3.bf16.msra.mxu0 %v6034_v2  ;;  %v6064_v7 = vld [vmem:[%s7914_s1 + $0x88] sm:$0xff]   ;;  %v6088_v11 = vld [vmem:[%s7914_s1 + $0x90] sm:$0xff]  }
   0x5   :  { %4327 = vmatpush3.bf16.msra.mxu1 %v6040_v3  ;;  %4300 = vmatprep.subr.bf16.mxu0 %v6046_v4  ;;  %v6094_v12 = vld [vmem:[%s7914_s1 + $0x58] sm:$0xff]   ;;  %v6118_v16 = vld [vmem:[%s7914_s1 + $0x60] sm:$0xff]   ;;  %v6142_v20 = vld [vmem:[%s7914_s1 + $0x68] sm:$0xff]  }
   0x6   :  { %4328 = vmatprep.subr.bf16.mxu1 %v6052_v5  ;;  %v6100_v13 = vld [vmem:[%s7914_s1 + $0xd8] sm:$0xff]   ;;  %v6124_v17 = vld [vmem:[%s7914_s1 + $0xe0] sm:$0xff]   ;;  %v6148_v21 = vld [vmem:[%s7914_s1 + $0xe8] sm:$0xff]  }
   0x7   :  { %v6106_v14 = vld [vmem:[%s7914_s1 + $0x18] sm:$0xff]   ;;  %v6130_v18 = vld [vmem:[%s7914_s1 + $0x20] sm:$0xff]   ;;  %v6154_v22 = vld [vmem:[%s7914_s1 + $0x28] sm:$0xff]  }
   0x8   :  { %4301 = vmatpush3.bf16.msra.mxu0 %v6058_v6  ;;  %v6112_v15 = vld [vmem:[%s7914_s1 + $0x98] sm:$0xff]   ;;  %v6136_v19 = vld [vmem:[%s7914_s1 + $0xa0] sm:$0xff]   ;;  %v6160_v23 = vld [vmem:[%s7914_s1 + $0xa8] sm:$0xff]  }
   0x9   :  { %4329 = vmatpush3.bf16.msra.mxu1 %v6064_v7  ;;  %4302 = vmatprep.subr.bf16.mxu0 %v6070_v8  ;;  %v6166_v24 = vld [vmem:[%s7914_s1 + $0x70] sm:$0xff]   ;;  %v6190_v28 = vld [vmem:[%s7914_s1 + $0x78] sm:$0xff]   ;;  %v5740_v33 = vld [vmem:[%s7915_s0 + $0x4] ss:$28 sps:$4 sm:$0xff]  }
   0xa   :  { %4330 = vmatprep.subr.bf16.mxu1 %v6076_v9  ;;  %v6172_v25 = vld [vmem:[%s7914_s1 + $0xf0] sm:$0xff]   ;;  %v6196_v29 = vld [vmem:[%s7914_s1 + $0xf8] sm:$0xff]   ;;  %v5741_v34 = vld [vmem:[%s7915_s0 + $0x8] ss:$28 sps:$4 sm:$0xff]   ;;  %539 = vmatprep.mubr.bf16.mxu0 %v5740_v33 }
   0xb   :  { %v6178_v26 = vld [vmem:[%s7914_s1 + $0x30] sm:$0xff]   ;;  %v6202_v30 = vld [vmem:[%s7914_s1 + $0x38] sm:$0xff]   ;;  %v5743_v35 = vld [vmem:[%s7915_s0 + $0xc] ss:$28 sps:$4 sm:$0xff]  }
   0xc   :  { %4303 = vmatpush3.bf16.msra.mxu0 %v6082_v10  ;;  %v6184_v27 = vld [vmem:[%s7914_s1 + $0xb0] sm:$0xff]   ;;  %v6208_v31 = vld [vmem:[%s7914_s1 + $0xb8] sm:$0xff]   ;;  %v6227_v36 = vld [vmem:[%s7914_s1 + $0x140] sm:$0xff]   ;;  %587 = vmatprep.mubr.bf16.mxu1 %v5743_v35 }
   0xd   :  { %4331 = vmatpush3.bf16.msra.mxu1 %v6088_v11  ;;  %4304 = vmatprep.subr.bf16.mxu0 %v6094_v12  ;;  %v5738_v32 = vld [vmem:[%s7915_s0] ss:$28 sps:$4 sm:$0xff]   ;;  %v6238_v38 = vld [vmem:[%s7914_s1 + $0x148] sm:$0xff]   ;;  %v6258_v43 = vld [vmem:[%s7914_s1 + $0x150] sm:$0xff]  }
   0xe   :  { %4332 = vmatprep.subr.bf16.mxu1 %v6100_v13  ;;  %v6232_v37 = vld [vmem:[%s7914_s1 + $0x100] sm:$0xff]   ;;  %v6244_v39 = vld [vmem:[%s7914_s1 + $0x108] sm:$0xff]   ;;  %v6264_v45 = vld [vmem:[%s7914_s1 + $0x110] sm:$0xff]  }
   0xf   :  { %v138_v40 = vld [vmem:[%s7915_s0 + $0x40] sm:$0xff]  ;;  %v6271_v46 = vld [vmem:[%s7914_s1 + $0x188] sm:$0xff]   ;;  %v6277_v47 = vld [vmem:[%s7914_s1 + $0x158] sm:$0xff]  }
  0x10   :  { %4305 = vmatpush3.bf16.msra.mxu0 %v6106_v14  ;;  %v4001_v41 = vcombine.high %v138_v40, %v138_v40  ;;  %v6253_v42 = vld [vmem:[%s7914_s1 + $0x180] sm:$0xff]   ;;  %v4000_v44 = vcombine.low %v138_v40, %v138_v40  ;;  %v5756_v48 = vld [vmem:[%s7915_s0 + $0x18] ss:$28 sps:$4 sm:$0xff]   ;;  %v5758_v51 = vld [vmem:[%s7915_s0 + $0x50] ss:$0 sps:$4 sm:$0xff]  }
  0x11   :  { %4333 = vmatpush3.bf16.msra.mxu1 %v6112_v15  ;;  %4306 = vmatprep.subr.bf16.mxu0 %v6118_v16  ;;  %v6288_v49 = vld [vmem:[%s7914_s1 + $0x118] sm:$0xff]   ;;  %v6295_v50 = vld [vmem:[%s7914_s1 + $0x160] sm:$0xff]   ;;  %v6314_v56 = vld [vmem:[%s7914_s1 + $0x168] sm:$0xff]  }
  0x12   :  { %4334 = vmatprep.subr.bf16.mxu1 %v6124_v17  ;;  %v137_v52 = vld [vmem:[%s7915_s0 + $0x38] sm:$0xff]  ;;  %v6308_v53 = vld [vmem:[%s7914_s1 + $0x120] sm:$0xff]   ;;  %v6322_v57 = vld [vmem:[%s7914_s1 + $0x128] sm:$0xff]  }
  0x13   :  { %v3999_v54 = vcombine.high %v137_v52, %v137_v52  ;;  %v3998_v55 = vcombine.low %v137_v52, %v137_v52  ;;  %v6329_v58 = vld [vmem:[%s7914_s1 + $0x170] sm:$0xff]   ;;  %v6349_v62 = vld [vmem:[%s7914_s1 + $0x178] sm:$0xff]   ;;  %v139_v33 = vld [vmem:[%s7915_s0 + $0x48] sm:$0xff] }
  0x14   :  { %4307 = vmatpush3.bf16.msra.mxu0 %v6130_v18  ;;  %v5770_v59 = vld [vmem:[%s7915_s0 + $0x14] ss:$28 sps:$4 sm:$0xff]   ;;  %v6356_v63 = vld [vmem:[%s7914_s1 + $0x138] sm:$0xff]   ;;  %v4002_v35 = vcombine.low %v139_v33, %v139_v33  ;;  %v5785_v52 = vld [vmem:[%s7915_s0 + $0x68] ss:$28 sps:$4 sm:$0xff]  }
  0x15   :  { %4335 = vmatpush3.bf16.msra.mxu1 %v6136_v19  ;;  %4308 = vmatprep.subr.bf16.mxu0 %v6142_v20  ;;  %v5775_v60 = vld [vmem:[%s7915_s0 + $0x58] ss:$28 sps:$4 sm:$0xff]   ;;  %v5778_v40 = vld [vmem:[%s7915_s0 + $0x60] ss:$28 sps:$4 sm:$0xff]  }
  0x16   :  { %4336 = vmatprep.subr.bf16.mxu1 %v6148_v21  ;;  %v6342_v61 = vld [vmem:[%s7914_s1 + $0x130] sm:$0xff]  }
  0x18   :  { %4309 = vmatpush3.bf16.msra.mxu0 %v6154_v22 }
  0x19   :  { %4337 = vmatpush3.bf16.msra.mxu1 %v6160_v23  ;;  %4310 = vmatprep.subr.bf16.mxu0 %v6166_v24 }
  0x1a   :  { %4338 = vmatprep.subr.bf16.mxu1 %v6172_v25 }
  0x1c   :  { %4311 = vmatpush3.bf16.msra.mxu0 %v6178_v26 }
  0x1d   :  { %4339 = vmatpush3.bf16.msra.mxu1 %v6184_v27  ;;  %4312 = vmatprep.subr.bf16.mxu0 %v6190_v28 }
  0x1e   :  { %4340 = vmatprep.subr.bf16.mxu1 %v6196_v29 }
  0x20   :  { %4313 = vmatpush3.bf16.msra.mxu0 %v6202_v30 }
  0x21   :  { %4341 = vmatpush3.bf16.msra.mxu1 %v6208_v31  ;;  %4354 = vmatprep.subr.bf16.mxu0 %v6227_v36 }
  0x22   :  { %5212 = vmatprep.subr.bf16.mxu1 %v6253_v42 }
  0x23   :  { %540 = vmatmul.mubr.bf16.vlgmr.msra.gmra.mrb[0].mxu0 %v5738_v32  ;;  %v5768_v32 = vld [vmem:[%s7915_s0 + $0x10] ss:$28 sps:$4 sm:$0xff]  }
  0x24   :  { %588 = vmatmul.mubr.bf16.vlgmr.msra.gmra.mrb[0].mxu1 %v5741_v34  ;;  %4355 = vmatpush3.bf16.msra.mxu0 %v6232_v37  ;;  %v4003_v34 = vcombine.high %v139_v33, %v139_v33  ;;  %v5783_v33 = vld [vmem:[%s7915_s0 + $0x64] ss:$28 sps:$4 sm:$0xff]  }
  0x25   :  { %4356 = vmatprep.subr.bf16.mxu0 %v6238_v38  ;;  %595 = vmatprep.mubr.bf16.mxu1 %v4001_v41  ;;  %v5773_v41 = vld [vmem:[%s7915_s0 + $0x54] ss:$28 sps:$4 sm:$0xff]  }
  0x26   :  { %5213 = vmatpush3.bf16.msra.mxu1 %v6253_v42  ;;  %547 = vmatprep.mubr.bf16.mxu0 %v3999_v54  ;;  %v4066_v54 = vld [vmem:[%s7915_s0 + $0x94] sm:$0xff] }
  0x27   :  { %5214 = vmatprep.subr.bf16.mxu1 %v6271_v46 }
  0x28   :  { %4357 = vmatpush3.bf16.msra.mxu0 %v6244_v39 }
  0x29   :  { %4358 = vmatprep.subr.bf16.mxu0 %v6258_v43 }
  0x2a   :  { %5215 = vmatpush3.bf16.msra.mxu1 %v6271_v46 }
  0x2b   :  { %4386 = vmatprep.subr.bf16.mxu1 %v6023_v0  ;;  %548 = vmatmul.mubr.bf16.gmra.mrb[4].mxu0 %v3998_v55  ;;  %v5776_v55 = vld [vmem:[%s7915_s0 + $0x5c] ss:$28 sps:$4 sm:$0xff]  }
  0x2c   :  { %596 = vmatmul.mubr.bf16.gmra.mrb[4].mxu1 %v4000_v44  ;;  %4359 = vmatpush3.bf16.msra.mxu0 %v6264_v45  ;;  %v4065_v44 = vld [vmem:[%s7915_s0 + $0x8c] sm:$0xff] }
  0x2d   :  { %4360 = vmatprep.subr.bf16.mxu0 %v6277_v47  ;;  %5216 = vmatprep.mubr.msk.bf16.mxu1 %vm500_vm0, %v5756_v48  ;;  %v4077_v48 = vcombine.high %v4065_v44, %v4065_v44 }
  0x2e   :  { %635 = vmatprep.mubr.bf16.mxu0 %v5770_v59  ;;  %v4079_v59 = vcombine.high %v4066_v54, %v4066_v54 }
  0x30   :  { %4361 = vmatpush3.bf16.msra.mxu0 %v6288_v49 }
  0x31   :  { %4362 = vmatprep.subr.bf16.mxu0 %v6295_v50 }
  0x34   :  { %5217 = vmatmul.mubr.msk.bf16.vlgmr.msra.gmra.mrb[8].mxu1 %vm500_vm0, %v5758_v51  ;;  %4363 = vmatpush3.bf16.msra.mxu0 %v6308_v53  ;;  %v4076_v51 = vcombine.low %v4065_v44, %v4065_v44 }
  0x35   :  { %4387 = vmatpush3.bf16.msra.mxu1 %v6034_v2  ;;  %4364 = vmatprep.subr.bf16.mxu0 %v6314_v56 }
  0x36   :  { %4388 = vmatprep.subr.bf16.mxu1 %v6046_v4  ;;  %809 = vmatprep.mubr.bf16.mxu1 %v5775_v60  ;;  %v4078_v60 = vcombine.low %v4066_v54, %v4066_v54  ;;  %v5793_v54 = vld [vmem:[%s7915_s0 + $0xb0] ss:$28 sps:$4 sm:$0xff]  }
  0x38   :  { %4365 = vmatpush3.bf16.msra.mxu0 %v6322_v57 }
  0x39   :  { %4389 = vmatpush3.bf16.msra.mxu1 %v6058_v6  ;;  %4366 = vmatprep.subr.bf16.mxu0 %v6329_v58 }
  0x3a   :  { %4390 = vmatprep.subr.bf16.mxu1 %v6070_v8 }
  0x3c   :  { %4367 = vmatpush3.bf16.msra.mxu0 %v6342_v61 }
  0x3d   :  { %4391 = vmatpush3.bf16.msra.mxu1 %v6082_v10  ;;  %4368 = vmatprep.subr.bf16.mxu0 %v6349_v62 }
  0x3e   :  { %4392 = vmatprep.subr.bf16.mxu1 %v6094_v12 }
  0x40   :  { %4369 = vmatpush3.bf16.msra.mxu0 %v6356_v63 }
  0x41   :  { %4393 = vmatpush3.bf16.msra.mxu1 %v6106_v14  ;;  %4414 = vmatprep.subr.bf16.mxu0 %v6028_v1 }
  0x42   :  { %4394 = vmatprep.subr.bf16.mxu1 %v6118_v16 }
  0x43   :  { %636 = vmatmul.mubr.bf16.vlgmr.msra.gmra.mrb[8].mxu0 %v5768_v32  ;;  %v5786_v32 = vld [vmem:[%s7915_s0 + $0x6c] ss:$28 sps:$4 sm:$0xff]  }
  0x44   :  { %4415 = vmatpush3.bf16.msra.mxu0 %v6040_v3  ;;  %643 = vmatprep.mubr.bf16.mxu0 %v4003_v34  ;;  %v5787_v34 = vld [vmem:[%s7915_s0 + $0xa4] ss:$0 sps:$4 sm:$0xff]  }
  0x45   :  { %4395 = vmatpush3.bf16.msra.mxu1 %v6130_v18  ;;  %4416 = vmatprep.subr.bf16.mxu0 %v6052_v5 }
  0x46   :  { %4396 = vmatprep.subr.bf16.mxu1 %v6142_v20 }
  0x48   :  { %4417 = vmatpush3.bf16.msra.mxu0 %v6064_v7 }
  0x49   :  { %4397 = vmatpush3.bf16.msra.mxu1 %v6154_v22  ;;  %4418 = vmatprep.subr.bf16.mxu0 %v6076_v9 }
  0x4a   :  { %4398 = vmatprep.subr.bf16.mxu1 %v6166_v24 }
  0x4b   :  { %644 = vmatmul.mubr.bf16.gmra.mrb[12].mxu0 %v4002_v35  ;;  %v4067_v35 = vld [vmem:[%s7915_s0 + $0x9c] sm:$0xff] }
  0x4c   :  { %4419 = vmatpush3.bf16.msra.mxu0 %v6088_v11  ;;  %857 = vmatprep.mubr.bf16.mxu0 %v5778_v40  ;;  %v4081_v40 = vcombine.high %v4067_v35, %v4067_v35  ;;  %v4080_v44 = vcombine.low %v4067_v35, %v4067_v35  ;;  %v5804_v35 = vld [vmem:[%s7915_s0 + $0xbc] ss:$28 sps:$4 sm:$0xff]  }
  0x4d   :  { %4399 = vmatpush3.bf16.msra.mxu1 %v6178_v26  ;;  %4420 = vmatprep.subr.bf16.mxu0 %v6100_v13 }
  0x4e   :  { %4400 = vmatprep.subr.bf16.mxu1 %v6190_v28 }
  0x50   :  { %4421 = vmatpush3.bf16.msra.mxu0 %v6112_v15 }
  0x51   :  { %4401 = vmatpush3.bf16.msra.mxu1 %v6202_v30  ;;  %4422 = vmatprep.subr.bf16.mxu0 %v6124_v17 }
  0x52   :  { %4442 = vmatprep.subr.bf16.mxu1 %v6227_v36 }
  0x54   :  { %810 = vmatmul.mubr.bf16.vlgmr.msra.gmra.mrb[12].mxu1 %v5773_v41  ;;  %4423 = vmatpush3.bf16.msra.mxu0 %v6136_v19  ;;  %v5792_v41 = vld [vmem:[%s7915_s0 + $0xac] ss:$28 sps:$4 sm:$0xff]  }
  0x55   :  { %4443 = vmatpush3.bf16.msra.mxu1 %v6232_v37  ;;  %4424 = vmatprep.subr.bf16.mxu0 %v6148_v21 }
  0x56   :  { %4444 = vmatprep.subr.bf16.mxu1 %v6238_v38  ;;  %817 = vmatprep.mubr.bf16.mxu1 %v4077_v48  ;;  %v5795_v48 = vld [vmem:[%s7915_s0 + $0xb4] ss:$28 sps:$4 sm:$0xff]  }
  0x58   :  { %4425 = vmatpush3.bf16.msra.mxu0 %v6160_v23 }
  0x59   :  { %4445 = vmatpush3.bf16.msra.mxu1 %v6244_v39  ;;  %4426 = vmatprep.subr.bf16.mxu0 %v6172_v25 }
  0x5a   :  { %4446 = vmatprep.subr.bf16.mxu1 %v6258_v43 }
  0x5c   :  { %818 = vmatmul.mubr.bf16.gmra.mrb[16].mxu1 %v4076_v51  ;;  %4427 = vmatpush3.bf16.msra.mxu0 %v6184_v27  ;;  %v4094_v51 = vld [vmem:[%s7915_s0 + $0xe8] sm:$0xff] }
  0x5d   :  { %4447 = vmatpush3.bf16.msra.mxu1 %v6264_v45  ;;  %4428 = vmatprep.subr.bf16.mxu0 %v6196_v29 }
  0x5e   :  { %4448 = vmatprep.subr.bf16.mxu1 %v6277_v47  ;;  %905 = vmatprep.mubr.bf16.mxu1 %v5785_v52  ;;  %v5790_v52 = vld [vmem:[%s7915_s0 + $0xa8] ss:$28 sps:$4 sm:$0xff]  }
  0x60   :  { %4429 = vmatpush3.bf16.msra.mxu0 %v6208_v31 }
  0x61   :  { %4449 = vmatpush3.bf16.msra.mxu1 %v6288_v49  ;;  %5220 = vmatprep.subr.bf16.mxu0 %v6253_v42 }
  0x62   :  { %4450 = vmatprep.subr.bf16.mxu1 %v6295_v50 }
  0x63   :  { %858 = vmatmul.mubr.bf16.vlgmr.msra.gmra.mrb[16].mxu0 %v5776_v55  ;;  %v4093_v55 = vld [vmem:[%s7915_s0 + $0xe0] sm:$0xff] }
  0x64   :  { %5221 = vmatpush3.bf16.msra.mxu0 %v6253_v42  ;;  %865 = vmatprep.mubr.bf16.mxu0 %v4079_v59  ;;  %v4107_v59 = vcombine.high %v4094_v51, %v4094_v51 }
  0x65   :  { %4451 = vmatpush3.bf16.msra.mxu1 %v6308_v53  ;;  %5222 = vmatprep.subr.bf16.mxu0 %v6271_v46 }
  0x66   :  { %4452 = vmatprep.subr.bf16.mxu1 %v6314_v56 }
  0x68   :  { %5223 = vmatpush3.bf16.msra.mxu0 %v6271_v46 }
  0x69   :  { %4453 = vmatpush3.bf16.msra.mxu1 %v6322_v57  ;;  %4474 = vmatprep.subr.bf16.mxu0 %v6023_v0 }
  0x6a   :  { %4454 = vmatprep.subr.bf16.mxu1 %v6329_v58 }
  0x6b   :  { %866 = vmatmul.mubr.bf16.gmra.mrb[20].mxu0 %v4078_v60  ;;  %v4105_v60 = vcombine.high %v4093_v55, %v4093_v55 }
  0x6c   :  { %5224 = vmatprep.mubr.msk.bf16.mxu0 %vm500_vm0, %v5786_v32  ;;  %v4106_v32 = vcombine.low %v4094_v51, %v4094_v51  ;;  %v5826_v51 = vld [vmem:[%s7915_s0 + $0x154] ss:$28 sps:$4 sm:$0xff]  }
  0x6d   :  { %4455 = vmatpush3.bf16.msra.mxu1 %v6342_v61 }
  0x6e   :  { %4456 = vmatprep.subr.bf16.mxu1 %v6349_v62 }
  0x71   :  { %4457 = vmatpush3.bf16.msra.mxu1 %v6356_v63 }
  0x72   :  { %4502 = vmatprep.subr.bf16.mxu1 %v6028_v1 }
  0x73   :  { %5225 = vmatmul.mubr.msk.bf16.vlgmr.msra.gmra.mrb[24].mxu0 %vm500_vm0, %v5787_v34  ;;  %v5798_v34 = vld [vmem:[%s7915_s0 + $0xc0] ss:$28 sps:$4 sm:$0xff]  }
  0x74   :  { %906 = vmatmul.mubr.bf16.vlgmr.msra.gmra.mrb[20].mxu1 %v5783_v33  ;;  %4475 = vmatpush3.bf16.msra.mxu0 %v6034_v2  ;;  %v4104_v33 = vcombine.low %v4093_v55, %v4093_v55  ;;  %v6648_v55 = vld [vmem:[%s7914_s1 + $0x48] sm:$0xff]  }
  0x75   :  { %4503 = vmatpush3.bf16.msra.mxu1 %v6040_v3  ;;  %4476 = vmatprep.subr.bf16.mxu0 %v6046_v4 }
  0x76   :  { %4504 = vmatprep.subr.bf16.mxu1 %v6052_v5  ;;  %913 = vmatprep.mubr.bf16.mxu1 %v4081_v40  ;;  %v5799_v40 = vld [vmem:[%s7915_s0 + $0xf8] ss:$0 sps:$4 sm:$0xff]  }
  0x77   :  { %1082 = vmatprep.mubr.bf16.mxu0 %v5792_v41  ;;  %v4123_v41 = vld [vmem:[%s7915_s0 + $0x144] sm:$0xff] }
  0x78   :  { %4477 = vmatpush3.bf16.msra.mxu0 %v6058_v6 }
  0x79   :  { %4505 = vmatpush3.bf16.msra.mxu1 %v6064_v7  ;;  %4478 = vmatprep.subr.bf16.mxu0 %v6070_v8 }
  0x7a   :  { %4506 = vmatprep.subr.bf16.mxu1 %v6076_v9 }
  0x7c   :  { %914 = vmatmul.mubr.bf16.gmra.mrb[24].mxu1 %v4080_v44  ;;  %4479 = vmatpush3.bf16.msra.mxu0 %v6082_v10  ;;  %v6626_v44 = vld [vmem:[%s7914_s1 + $0xc0] sm:$0xff]  }
  0x7d   :  { %4507 = vmatpush3.bf16.msra.mxu1 %v6088_v11  ;;  %4480 = vmatprep.subr.bf16.mxu0 %v6094_v12 }
  0x7e   :  { %4508 = vmatprep.subr.bf16.mxu1 %v6100_v13  ;;  %1130 = vmatprep.mubr.bf16.mxu1 %v5795_v48  ;;  %v4137_v48 = vcombine.high %v4123_v41, %v4123_v41 }
  0x80   :  { %4481 = vmatpush3.bf16.msra.mxu0 %v6106_v14 }
  0x81   :  { %4509 = vmatpush3.bf16.msra.mxu1 %v6112_v15  ;;  %4482 = vmatprep.subr.bf16.mxu0 %v6118_v16 }
  0x82   :  { %4510 = vmatprep.subr.bf16.mxu1 %v6124_v17 }
  0x84   :  { %4483 = vmatpush3.bf16.msra.mxu0 %v6130_v18 }
  0x85   :  { %4511 = vmatpush3.bf16.msra.mxu1 %v6136_v19  ;;  %4484 = vmatprep.subr.bf16.mxu0 %v6142_v20 }
  0x86   :  { %4512 = vmatprep.subr.bf16.mxu1 %v6148_v21 }
  0x88   :  { %4485 = vmatpush3.bf16.msra.mxu0 %v6154_v22 }
  0x89   :  { %4513 = vmatpush3.bf16.msra.mxu1 %v6160_v23  ;;  %4486 = vmatprep.subr.bf16.mxu0 %v6166_v24 }
  0x8a   :  { %4514 = vmatprep.subr.bf16.mxu1 %v6172_v25 }
  0x8c   :  { %4487 = vmatpush3.bf16.msra.mxu0 %v6178_v26 }
  0x8d   :  { %4515 = vmatpush3.bf16.msra.mxu1 %v6184_v27  ;;  %4488 = vmatprep.subr.bf16.mxu0 %v6190_v28 }
  0x8e   :  { %4516 = vmatprep.subr.bf16.mxu1 %v6196_v29 }
  0x90   :  { %4489 = vmatpush3.bf16.msra.mxu0 %v6202_v30 }
  0x91   :  { %4517 = vmatpush3.bf16.msra.mxu1 %v6208_v31  ;;  %4530 = vmatprep.subr.bf16.mxu0 %v6227_v36 }
  0x92   :  { %5228 = vmatprep.subr.bf16.mxu1 %v6253_v42 }
  0x93   :  { %1083 = vmatmul.mubr.bf16.vlgmr.msra.gmra.mrb[28].mxu0 %v5790_v52  ;;  %v6636_v52 = vld [vmem:[%s7914_s1] sm:$0xff]  }
  0x94   :  { %1131 = vmatmul.mubr.bf16.vlgmr.msra.gmra.mrb[28].mxu1 %v5793_v54  ;;  %4531 = vmatpush3.bf16.msra.mxu0 %v6232_v37  ;;  %v6642_v54 = vld [vmem:[%s7914_s1 + $0x80] sm:$0xff]  }
  0x95   :  { %1138 = vmatprep.mubr.bf16.mxu1 %v4107_v59  ;;  %4532 = vmatprep.subr.bf16.mxu0 %v6238_v38  ;;  %v6654_v59 = vld [vmem:[%s7914_s1 + $0xc8] sm:$0xff]  }
  0x96   :  { %5229 = vmatpush3.bf16.msra.mxu1 %v6253_v42  ;;  %1090 = vmatprep.mubr.bf16.mxu0 %v4105_v60  ;;  %v4136_v60 = vcombine.low %v4123_v41, %v4123_v41 }
  0x97   :  { %5230 = vmatprep.subr.bf16.mxu1 %v6271_v46 }
  0x98   :  { %4533 = vmatpush3.bf16.msra.mxu0 %v6244_v39 }
  0x99   :  { %4534 = vmatprep.subr.bf16.mxu0 %v6258_v43 }
  0x9a   :  { %5231 = vmatpush3.bf16.msra.mxu1 %v6271_v46 }
  0x9b   :  { %4562 = vmatprep.subr.bf16.mxu1 %v6023_v0  ;;  %1091 = vmatmul.mubr.bf16.gmra.mrb[32].mxu0 %v4104_v33  ;;  %v5809_v0 = vld [vmem:[%s7915_s0 + $0x100] ss:$28 sps:$4 sm:$0xff]   ;;  %v6666_v33 = vld [vmem:[%s7914_s1 + $0x88] sm:$0xff]  }
  0x9c   :  { %1139 = vmatmul.mubr.bf16.gmra.mrb[32].mxu1 %v4106_v32  ;;  %4535 = vmatpush3.bf16.msra.mxu0 %v6264_v45  ;;  %v6660_v32 = vld [vmem:[%s7914_s1 + $0x8] sm:$0xff]  }
  0x9d   :  { %5232 = vmatprep.mubr.msk.bf16.mxu1 %vm500_vm0, %v5798_v34  ;;  %4536 = vmatprep.subr.bf16.mxu0 %v6277_v47  ;;  %v6672_v34 = vld [vmem:[%s7914_s1 + $0x50] sm:$0xff]  }
  0x9e   :  { %1178 = vmatprep.mubr.bf16.mxu0 %v5804_v35  ;;  %v6678_v35 = vld [vmem:[%s7914_s1 + $0xd0] sm:$0xff]  }
  0xa0   :  { %4537 = vmatpush3.bf16.msra.mxu0 %v6288_v49 }
  0xa1   :  { %4538 = vmatprep.subr.bf16.mxu0 %v6295_v50 }
  0xa4   :  { %5233 = vmatmul.mubr.msk.bf16.vlgmr.msra.gmra.mrb[36].mxu1 %vm500_vm0, %v5799_v40  ;;  %4539 = vmatpush3.bf16.msra.mxu0 %v6308_v53  ;;  %v5829_v40 = vld [vmem:[%s7915_s0 + $0x15c] ss:$28 sps:$4 sm:$0xff]  }
  0xa5   :  { %4563 = vmatpush3.bf16.msra.mxu1 %v6034_v2  ;;  %4540 = vmatprep.subr.bf16.mxu0 %v6314_v56  ;;  %v5802_v2 = vld [vmem:[%s7915_s0 + $0xb8] ss:$28 sps:$4 sm:$0xff]  }
  0xa6   :  { %4564 = vmatprep.subr.bf16.mxu1 %v6046_v4  ;;  %1355 = vmatprep.mubr.bf16.mxu1 %v5809_v0  ;;  %v4095_v4 = vld [vmem:[%s7915_s0 + $0xf0] sm:$0xff] }
  0xa7   :  { %v6687_v0 = vld [vmem:[%s7914_s1 + $0x10] sm:$0xff]  }
  0xa8   :  { %4541 = vmatpush3.bf16.msra.mxu0 %v6322_v57 }
  0xa9   :  { %4565 = vmatpush3.bf16.msra.mxu1 %v6058_v6  ;;  %4542 = vmatprep.subr.bf16.mxu0 %v6329_v58  ;;  %v4109_v6 = vcombine.high %v4095_v4, %v4095_v4 }
  0xaa   :  { %4566 = vmatprep.subr.bf16.mxu1 %v6070_v8  ;;  %v4108_v8 = vcombine.low %v4095_v4, %v4095_v4  ;;  %v6699_v4 = vld [vmem:[%s7914_s1 + $0x58] sm:$0xff]  }
  0xac   :  { %4543 = vmatpush3.bf16.msra.mxu0 %v6342_v61 }
  0xad   :  { %4567 = vmatpush3.bf16.msra.mxu1 %v6082_v10  ;;  %4544 = vmatprep.subr.bf16.mxu0 %v6349_v62  ;;  %v5819_v10 = vld [vmem:[%s7915_s0 + $0x110] ss:$28 sps:$4 sm:$0xff]  }
  0xae   :  { %4568 = vmatprep.subr.bf16.mxu1 %v6094_v12  ;;  %v5810_v12 = vld [vmem:[%s7915_s0 + $0x104] ss:$28 sps:$4 sm:$0xff]  }
  0xb0   :  { %4545 = vmatpush3.bf16.msra.mxu0 %v6356_v63 }
  0xb1   :  { %4569 = vmatpush3.bf16.msra.mxu1 %v6106_v14  ;;  %4590 = vmatprep.subr.bf16.mxu0 %v6028_v1  ;;  %v5812_v1 = vld [vmem:[%s7915_s0 + $0x108] ss:$28 sps:$4 sm:$0xff]  }
  0xb2   :  { %4570 = vmatprep.subr.bf16.mxu1 %v6118_v16  ;;  %v6607_v16 = vld [vmem:[%s7914_s1 + $0x40] sm:$0xff]  }
  0xb3   :  { %1179 = vmatmul.mubr.bf16.vlgmr.msra.gmra.mrb[36].mxu0 %v5802_v2  ;;  %v6693_v2 = vld [vmem:[%s7914_s1 + $0x90] sm:$0xff]  }
  0xb4   :  { %4591 = vmatpush3.bf16.msra.mxu0 %v6040_v3  ;;  %1186 = vmatprep.mubr.bf16.mxu0 %v4109_v6  ;;  %v5807_v3 = vld [vmem:[%s7915_s0 + $0xfc] ss:$28 sps:$4 sm:$0xff]  }
  0xb5   :  { %4571 = vmatpush3.bf16.msra.mxu1 %v6130_v18  ;;  %4592 = vmatprep.subr.bf16.mxu0 %v6052_v5  ;;  %v4121_v5 = vld [vmem:[%s7915_s0 + $0x134] sm:$0xff]  ;;  %v5821_v18 = vld [vmem:[%s7915_s0 + $0x14c] ss:$0 sps:$4 sm:$0xff]  }
  0xb6   :  { %4572 = vmatprep.subr.bf16.mxu1 %v6142_v20  ;;  %v6705_v6 = vld [vmem:[%s7914_s1 + $0xd8] sm:$0xff]  }
  0xb8   :  { %4593 = vmatpush3.bf16.msra.mxu0 %v6064_v7  ;;  %v4133_v7 = vcombine.high %v4121_v5, %v4121_v5 }
  0xb9   :  { %4573 = vmatpush3.bf16.msra.mxu1 %v6154_v22  ;;  %4594 = vmatprep.subr.bf16.mxu0 %v6076_v9  ;;  %v4132_v9 = vcombine.low %v4121_v5, %v4121_v5  ;;  %v6729_v5 = vld [vmem:[%s7914_s1 + $0xe0] sm:$0xff]  }
  0xba   :  { %4574 = vmatprep.subr.bf16.mxu1 %v6166_v24 }
  0xbb   :  { %1187 = vmatmul.mubr.bf16.gmra.mrb[40].mxu0 %v4108_v8  ;;  %v6711_v8 = vld [vmem:[%s7914_s1 + $0x18] sm:$0xff]  }
  0xbc   :  { %4595 = vmatpush3.bf16.msra.mxu0 %v6088_v11  ;;  %1403 = vmatprep.mubr.bf16.mxu0 %v5812_v1  ;;  %v4122_v11 = vld [vmem:[%s7915_s0 + $0x13c] sm:$0xff] }
  0xbd   :  { %4575 = vmatpush3.bf16.msra.mxu1 %v6178_v26  ;;  %4596 = vmatprep.subr.bf16.mxu0 %v6100_v13  ;;  %v4135_v13 = vcombine.high %v4122_v11, %v4122_v11  ;;  %v4134_v14 = vcombine.low %v4122_v11, %v4122_v11  ;;  %v6717_v1 = vld [vmem:[%s7914_s1 + $0x98] sm:$0xff]  }
  0xbe   :  { %4576 = vmatprep.subr.bf16.mxu1 %v6190_v28 }
  0xc0   :  { %4597 = vmatpush3.bf16.msra.mxu0 %v6112_v15  ;;  %v5820_v15 = vld [vmem:[%s7915_s0 + $0x114] ss:$28 sps:$4 sm:$0xff]  }
  0xc1   :  { %4577 = vmatpush3.bf16.msra.mxu1 %v6202_v30  ;;  %4598 = vmatprep.subr.bf16.mxu0 %v6124_v17  ;;  %v5817_v17 = vld [vmem:[%s7915_s0 + $0x10c] ss:$28 sps:$4 sm:$0xff]  }
  0xc2   :  { %4618 = vmatprep.subr.bf16.mxu1 %v6227_v36 }
  0xc4   :  { %1356 = vmatmul.mubr.bf16.vlgmr.msra.gmra.mrb[40].mxu1 %v5807_v3  ;;  %4599 = vmatpush3.bf16.msra.mxu0 %v6136_v19  ;;  %v6723_v3 = vld [vmem:[%s7914_s1 + $0x60] sm:$0xff]  }
  0xc5   :  { %4619 = vmatpush3.bf16.msra.mxu1 %v6232_v37  ;;  %4600 = vmatprep.subr.bf16.mxu0 %v6148_v21 }
  0xc6   :  { %4620 = vmatprep.subr.bf16.mxu1 %v6238_v38  ;;  %1363 = vmatprep.mubr.bf16.mxu1 %v4133_v7  ;;  %v6735_v7 = vld [vmem:[%s7914_s1 + $0x20] sm:$0xff]  }
  0xc8   :  { %4601 = vmatpush3.bf16.msra.mxu0 %v6160_v23 }
  0xc9   :  { %4621 = vmatpush3.bf16.msra.mxu1 %v6244_v39  ;;  %4602 = vmatprep.subr.bf16.mxu0 %v6172_v25 }
  0xca   :  { %4622 = vmatprep.subr.bf16.mxu1 %v6258_v43 }
  0xcc   :  { %1364 = vmatmul.mubr.bf16.gmra.mrb[44].mxu1 %v4132_v9  ;;  %4603 = vmatpush3.bf16.msra.mxu0 %v6184_v27 }
  0xcd   :  { %4623 = vmatpush3.bf16.msra.mxu1 %v6264_v45  ;;  %4604 = vmatprep.subr.bf16.mxu0 %v6196_v29 }
  0xce   :  { %4624 = vmatprep.subr.bf16.mxu1 %v6277_v47  ;;  %1451 = vmatprep.mubr.bf16.mxu1 %v5819_v10 }
  0xd0   :  { %4605 = vmatpush3.bf16.msra.mxu0 %v6208_v31 }
  0xd1   :  { %4625 = vmatpush3.bf16.msra.mxu1 %v6288_v49  ;;  %5236 = vmatprep.subr.bf16.mxu0 %v6253_v42 }
  0xd2   :  { %4626 = vmatprep.subr.bf16.mxu1 %v6295_v50 }
  0xd3   :  { %1404 = vmatmul.mubr.bf16.vlgmr.msra.gmra.mrb[44].mxu0 %v5810_v12 }
  0xd4   :  { %5237 = vmatpush3.bf16.msra.mxu0 %v6253_v42  ;;  %1411 = vmatprep.mubr.bf16.mxu0 %v4135_v13 }
  0xd5   :  { %4627 = vmatpush3.bf16.msra.mxu1 %v6308_v53  ;;  %5238 = vmatprep.subr.bf16.mxu0 %v6271_v46 }
  0xd6   :  { %4628 = vmatprep.subr.bf16.mxu1 %v6314_v56 }
  0xd8   :  { %5239 = vmatpush3.bf16.msra.mxu0 %v6271_v46 }
  0xd9   :  { %4629 = vmatpush3.bf16.msra.mxu1 %v6322_v57  ;;  %4650 = vmatprep.subr.bf16.mxu0 %v6607_v16 }
  0xda   :  { %4630 = vmatprep.subr.bf16.mxu1 %v6329_v58 }
  0xdb   :  { %1412 = vmatmul.mubr.bf16.gmra.mrb[48].mxu0 %v4134_v14 }
  0xdc   :  { %5240 = vmatprep.mubr.msk.bf16.mxu0 %vm500_vm0, %v5820_v15 }
  0xdd   :  { %4631 = vmatpush3.bf16.msra.mxu1 %v6342_v61 }
  0xde   :  { %4632 = vmatprep.subr.bf16.mxu1 %v6349_v62 }
  0xe1   :  { %4633 = vmatpush3.bf16.msra.mxu1 %v6356_v63 }
  0xe2   :  { %4678 = vmatprep.subr.bf16.mxu1 %v6626_v44 }
  0xe3   :  { %5241 = vmatmul.mubr.msk.bf16.vlgmr.msra.gmra.mrb[52].mxu0 %vm500_vm0, %v5821_v18 }
  0xe4   :  { %1452 = vmatmul.mubr.bf16.vlgmr.msra.gmra.mrb[48].mxu1 %v5817_v17  ;;  %4651 = vmatpush3.bf16.msra.mxu0 %v6636_v52 }
  0xe5   :  { %4679 = vmatpush3.bf16.msra.mxu1 %v6642_v54  ;;  %4652 = vmatprep.subr.bf16.mxu0 %v6648_v55 }
  0xe6   :  { %4680 = vmatprep.subr.bf16.mxu1 %v6654_v59  ;;  %1459 = vmatprep.mubr.bf16.mxu1 %v4137_v48 }
  0xe7   :  { %1628 = vmatprep.mubr.bf16.mxu0 %v5826_v51 }
  0xe8   :  { %4653 = vmatpush3.bf16.msra.mxu0 %v6660_v32 }
  0xe9   :  { %4681 = vmatpush3.bf16.msra.mxu1 %v6666_v33  ;;  %4654 = vmatprep.subr.bf16.mxu0 %v6672_v34 }
  0xea   :  { %4682 = vmatprep.subr.bf16.mxu1 %v6678_v35 }
  0xec   :  { %1460 = vmatmul.mubr.bf16.gmra.mrb[52].mxu1 %v4136_v60  ;;  %4655 = vmatpush3.bf16.msra.mxu0 %v6687_v0 }
  0xed   :  { %4683 = vmatpush3.bf16.msra.mxu1 %v6693_v2  ;;  %4656 = vmatprep.subr.bf16.mxu0 %v6699_v4 }
  0xee   :  { %4684 = vmatprep.subr.bf16.mxu1 %v6705_v6  ;;  %1676 = vmatprep.mubr.bf16.mxu1 %v5829_v40 }
  0xf0   :  { %4657 = vmatpush3.bf16.msra.mxu0 %v6711_v8 }
  0xf1   :  { %4685 = vmatpush3.bf16.msra.mxu1 %v6717_v1  ;;  %4658 = vmatprep.subr.bf16.mxu0 %v6723_v3 }
  0xf2   :  { %4686 = vmatprep.subr.bf16.mxu1 %v6729_v5 }
  0xf4   :  { %4659 = vmatpush3.bf16.msra.mxu0 %v6735_v7 }
  0xf5   :  { %4687 = vmatpush3.bf16.msra.mxu1 %v6136_v19  ;;  %4660 = vmatprep.subr.bf16.mxu0 %v6142_v20 }
  0xf6   :  { %4688 = vmatprep.subr.bf16.mxu1 %v6148_v21  ;;  %v4314_v9 = vpop.f32.mrb[0].mxu0 }
  0xf7   :  { %v4342_v10 = vpop.f32.mrb[0].mxu1  ;;  %v4315_v11 = vpop.f32.mrb[1].mxu0 }
  0xf8   :  { %v4316_v12 = vadd.f32 %v4315_v11, %v4314_v9  ;;  %v4343_v13 = vpop.f32.mrb[1].mxu1  ;;  %v4317_v14 = vpop.f32.mrb[2].mxu0  ;;  %4661 = vmatpush3.bf16.msra.mxu0 %v6154_v22  ;;  %v4150_v22 = vld [vmem:[%s7915_s0 + $0x190] sm:$0xff] }
  0xf9   :  { %4689 = vmatpush3.bf16.msra.mxu1 %v6160_v23  ;;  %v4344_v15 = vadd.f32 %v4343_v13, %v4342_v10  ;;  %v4345_v17 = vpop.f32.mrb[2].mxu1  ;;  %v4318_v18 = vpop.f32.mrb[3].mxu0  ;;  %4662 = vmatprep.subr.bf16.mxu0 %v6166_v24  ;;  %v5824_v24 = vld [vmem:[%s7915_s0 + $0x150] ss:$28 sps:$4 sm:$0xff]  }
  0xfa   :  { %v4319_v41 = vadd.f32 %v4318_v18, %v4317_v14  ;;  %v4346_v48 = vpop.f32.mrb[3].mxu1  ;;  %4690 = vmatprep.subr.bf16.mxu1 %v6172_v25  ;;  %v5827_v25 = vld [vmem:[%s7915_s0 + $0x158] ss:$28 sps:$4 sm:$0xff]  }
  0xfb   :  { %v6745_v19 = vadd.f32 %v4344_v15, %v4316_v12  ;;  %v4347_v20 = vadd.f32 %v4346_v48, %v4345_v17  ;;  %v5838_v15 = vld [vmem:[%s7915_s0 + $0x164] ss:$28 sps:$4 sm:$0xff]  }
  0xfc   :  { %4663 = vmatpush3.bf16.msra.mxu0 %v6178_v26 }
  0xfd   :  { %v6747_v21 = vadd.f32 %v4347_v20, %v4319_v41  ;;  %4691 = vmatpush3.bf16.msra.mxu1 %v6184_v27  ;;  %4664 = vmatprep.subr.bf16.mxu0 %v6190_v28  ;;  %v4149_v27 = vld [vmem:[%s7915_s0 + $0x188] sm:$0xff]  ;;  %v4163_v28 = vcombine.high %v4150_v22, %v4150_v22 }
  0xfe   :  { %4692 = vmatprep.subr.bf16.mxu1 %v6196_v29  ;;  %v4161_v40 = vcombine.high %v4149_v27, %v4149_v27  ;;  %v4160_v10 = vcombine.low %v4149_v27, %v4149_v27 }
  0xff   :  { %v4348_v23 = vpop.f32.mrb[4].mxu1 }
 0x100   :  { %v4349_v26 = vpop.f32.mrb[5].mxu1  ;;  %4665 = vmatpush3.bf16.msra.mxu0 %v6202_v30  ;;  %v4320_v30 = vpop.f32.mrb[4].mxu0 }
 0x101   :  { %4693 = vmatpush3.bf16.msra.mxu1 %v6208_v31  ;;  %v4350_v29 = vadd.f32 %v4349_v26, %v4348_v23  ;;  %v4351_v51 = vpop.f32.mrb[6].mxu1  ;;  %4706 = vmatprep.subr.bf16.mxu0 %v6227_v36  ;;  %v4162_v36 = vcombine.low %v4150_v22, %v4150_v22  ;;  %v4321_v9 = vpop.f32.mrb[5].mxu0 }
 0x102   :  { %5244 = vmatprep.subr.bf16.mxu1 %v6253_v42  ;;  %v4352_v60 = vpop.f32.mrb[7].mxu1  ;;  %v4322_v12 = vadd.f32 %v4321_v9, %v4320_v30  ;;  %v4323_v13 = vpop.f32.mrb[6].mxu0  ;;  %v6864_v9 = vld [vmem:[%s7914_s1 + $0x78] sm:$0xff]  }
 0x103   :  { %1629 = vmatmul.mubr.bf16.vlgmr.msra.gmra.mrb[56].mxu0 %v5824_v24  ;;  %v6847_v60 = vld [vmem:[%s7914_s1 + $0x70] sm:$0xff]   ;;  %v4177_v13 = vld [vmem:[%s7915_s0 + $0x1dc] sm:$0xff] }
 0x104   :  { %1677 = vmatmul.mubr.bf16.vlgmr.msra.gmra.mrb[56].mxu1 %v5827_v25  ;;  %4707 = vmatpush3.bf16.msra.mxu0 %v6232_v37  ;;  %v5832_v37 = vld [vmem:[%s7915_s0 + $0x168] ss:$28 sps:$4 sm:$0xff]   ;;  %v598_v17 = vadd.f32 %v4350_v29, %v4322_v12 }
 0x105   :  { %1684 = vmatprep.mubr.bf16.mxu1 %v4163_v28  ;;  %4708 = vmatprep.subr.bf16.mxu0 %v6238_v38  ;;  %v6840_v28 = vld [vmem:[%s7914_s1 + $0x28] sm:$0xff]  }
 0x106   :  { %5245 = vmatpush3.bf16.msra.mxu1 %v6253_v42  ;;  %1636 = vmatprep.mubr.bf16.mxu0 %v4161_v40  ;;  %v4324_v42 = vpop.f32.mrb[7].mxu0 }
 0x107   :  { %5246 = vmatprep.subr.bf16.mxu1 %v6271_v46  ;;  %v6773_v31 = vpop.f32.mrb[8].mxu1 }
 0x108   :  { %v685_v11 = vpop.f32.mrb[9].mxu1  ;;  %4709 = vmatpush3.bf16.msra.mxu0 %v6244_v39  ;;  %v5833_v39 = vld [vmem:[%s7915_s0 + $0x1a0] ss:$0 sps:$4 sm:$0xff]  }
 0x109   :  { %v5219_v38 = vpop.f32.mrb[10].mxu1  ;;  %4710 = vmatprep.subr.bf16.mxu0 %v6258_v43  ;;  %v5843_v43 = vld [vmem:[%s7915_s0 + $0x1a8] ss:$28 sps:$4 sm:$0xff]  }
 0x10a   :  { %5247 = vmatpush3.bf16.msra.mxu1 %v6271_v46  ;;  %v688_v14 = vpop.f32.mrb[11].mxu1 }
 0x10b   :  { %4738 = vmatprep.subr.bf16.mxu1 %v6607_v16  ;;  %1637 = vmatmul.mubr.bf16.gmra.mrb[60].mxu0 %v4160_v10 }
 0x10c   :  { %1685 = vmatmul.mubr.bf16.gmra.mrb[60].mxu1 %v4162_v36  ;;  %4711 = vmatpush3.bf16.msra.mxu0 %v6264_v45  ;;  %v6857_v36 = vld [vmem:[%s7914_s1 + $0x30] sm:$0xff]  }
 0x10d   :  { %5248 = vmatprep.mubr.msk.bf16.mxu1 %vm500_vm0, %v5832_v37  ;;  %4712 = vmatprep.subr.bf16.mxu0 %v6277_v47  ;;  %v6877_v37 = vld [vmem:[%s7914_s1 + $0x38] sm:$0xff]  }
 0x10e   :  { %1724 = vmatprep.mubr.bf16.mxu0 %v5838_v15 }
 0x110   :  { %4713 = vmatpush3.bf16.msra.mxu0 %v6288_v49 }
 0x111   :  { %4714 = vmatprep.subr.bf16.mxu0 %v6295_v50 }
 0x114   :  { %5249 = vmatmul.mubr.msk.bf16.vlgmr.msra.gmra.mrb[64].mxu1 %vm500_vm0, %v5833_v39  ;;  %4715 = vmatpush3.bf16.msra.mxu0 %v6308_v53  ;;  %v6891_v39 = vld [vmem:[%s7914_s1 + $0x100] sm:$0xff]  }
 0x115   :  { %4739 = vmatpush3.bf16.msra.mxu1 %v6636_v52  ;;  %4716 = vmatprep.subr.bf16.mxu0 %v6314_v56 }
 0x116   :  { %4740 = vmatprep.subr.bf16.mxu1 %v6648_v55  ;;  %v4370_v45 = vpop.f32.mrb[8].mxu0  ;;  %1901 = vmatprep.mubr.bf16.mxu1 %v5843_v43  ;;  %v6897_v43 = vld [vmem:[%s7914_s1 + $0xa0] sm:$0xff]  }
 0x117   :  { %v4371_v46 = vpop.f32.mrb[9].mxu0  ;;  %7943 = vst [vmem:[#allocation4_spill] sm:$0xff] %v6897_v43 }
 0x118   :  { %4717 = vmatpush3.bf16.msra.mxu0 %v6322_v57  ;;  %v4372_v47 = vadd.f32 %v4371_v46, %v4370_v45  ;;  %v4373_v49 = vpop.f32.mrb[10].mxu0  ;;  %v6903_v45 = vld [vmem:[%s7914_s1 + $0x148] sm:$0xff]  }
 0x119   :  { %4741 = vmatpush3.bf16.msra.mxu1 %v6660_v32  ;;  %v4374_v50 = vpop.f32.mrb[11].mxu0  ;;  %4718 = vmatprep.subr.bf16.mxu0 %v6329_v58  ;;  %v5836_v58 = vld [vmem:[%s7915_s0 + $0x160] ss:$28 sps:$4 sm:$0xff]   ;;  %v6909_v46 = vld [vmem:[%s7914_s1 + $0xe8] sm:$0xff]  }
 0x11a   :  { %4742 = vmatprep.subr.bf16.mxu1 %v6672_v34  ;;  %v638_v53 = vadd.f32 %v4372_v47, %v6745_v19  ;;  %v4375_v18 = vadd.f32 %v4374_v50, %v4373_v49  ;;  %v4151_v19 = vld [vmem:[%s7915_s0 + $0x198] sm:$0xff]  ;;  %7944 = vst [vmem:[#allocation5_spill] sm:$0xff] %v6909_v46  ;;  %v4188_v50 = vcombine.low %v4177_v13, %v4177_v13 }
 0x11b   :  { %v4165_v23 = vcombine.high %v4151_v19, %v4151_v19  ;;  %v4164_v26 = vcombine.low %v4151_v19, %v4151_v19  ;;  %v6933_v19 = vld [vmem:[%s7914_s1 + $0xf0] sm:$0xff]  }
 0x11c   :  { %v6806_v41 = vadd.f32 %v685_v11, %v638_v53  ;;  %v641_v56 = vadd.f32 %v4375_v18, %v6747_v21  ;;  %4719 = vmatpush3.bf16.msra.mxu0 %v6342_v61  ;;  %v5841_v11 = vld [vmem:[%s7915_s0 + $0x1a4] ss:$28 sps:$4 sm:$0xff]   ;;  %v6915_v53 = vld [vmem:[%s7914_s1 + $0x108] sm:$0xff]   ;;  %7946 = vst [vmem:[#allocation7_spill] sm:$0xff] %v6933_v19 }
 0x11d   :  { %4743 = vmatpush3.bf16.msra.mxu1 %v6687_v0  ;;  %4720 = vmatprep.subr.bf16.mxu0 %v6349_v62  ;;  %v6921_v18 = vld [vmem:[%s7914_s1 + $0xa8] sm:$0xff]  }
 0x11e   :  { %7942 = vst [vmem:[#allocation3_spill] sm:$0xff] %v6806_v41  ;;  %4744 = vmatprep.subr.bf16.mxu1 %v6699_v4  ;;  %v6813_v57 = vadd.f32 %v688_v14, %v641_v56  ;;  %v4376_v48 = vpop.f32.mrb[12].mxu0  ;;  %v6884_v14 = vld [vmem:[%s7914_s1 + $0x140] sm:$0xff]   ;;  %7945 = vst [vmem:[#allocation6_spill] sm:$0xff] %v6921_v18  ;;  %v5860_v41 = vld [vmem:[%s7915_s0 + $0x1fc] ss:$28 sps:$4 sm:$0xff]  }
 0x11f   :  { %v4377_v20 = vpop.f32.mrb[13].mxu0 }
 0x120   :  { %4721 = vmatpush3.bf16.msra.mxu0 %v6356_v63  ;;  %v4378_v61 = vadd.f32 %v4377_v20, %v4376_v48  ;;  %v4379_v21 = vpop.f32.mrb[14].mxu0  ;;  %v6833_v63 = vld [vmem:[%s7914_s1 + $0x68] sm:$0xff]   ;;  %v6927_v20 = vld [vmem:[%s7914_s1 + $0x150] sm:$0xff]  }
 0x121   :  { %4745 = vmatpush3.bf16.msra.mxu1 %v6711_v8  ;;  %4766 = vmatprep.subr.bf16.mxu0 %v6626_v44  ;;  %v4380_v62 = vpop.f32.mrb[15].mxu0 }
 0x122   :  { %4746 = vmatprep.subr.bf16.mxu1 %v6723_v3  ;;  %v646_v22 = vadd.f32 %v4378_v61, %v598_v17  ;;  %v4189_v17 = vcombine.high %v4177_v13, %v4177_v13  ;;  %v5853_v62 = vld [vmem:[%s7915_s0 + $0x1b8] ss:$28 sps:$4 sm:$0xff]   ;;  %v6984_v13 = vld [vmem:[%s7914_s1 + $0x160] sm:$0xff]  }
 0x123   :  { %1725 = vmatmul.mubr.bf16.vlgmr.msra.gmra.mrb[64].mxu0 %v5836_v58 }
 0x124   :  { %v6826_v24 = vadd.f32 %v6773_v31, %v646_v22  ;;  %4767 = vmatpush3.bf16.msra.mxu0 %v6642_v54  ;;  %1732 = vmatprep.mubr.bf16.mxu0 %v4165_v23  ;;  %v5846_v31 = vld [vmem:[%s7915_s0 + $0x1b0] ss:$28 sps:$4 sm:$0xff]  }
 0x125   :  { %4747 = vmatpush3.bf16.msra.mxu1 %v6735_v7  ;;  %4768 = vmatprep.subr.bf16.mxu0 %v6654_v59  ;;  %v6942_v23 = vld [vmem:[%s7914_s1 + $0x110] sm:$0xff]  }
 0x126   :  { %4748 = vmatprep.subr.bf16.mxu1 %v6833_v63 }
 0x127   :  { %v4402_v25 = vpop.f32.mrb[12].mxu1 }
 0x128   :  { %v4403_v27 = vpop.f32.mrb[13].mxu1  ;;  %4769 = vmatpush3.bf16.msra.mxu0 %v6666_v33 }
 0x129   :  { %4749 = vmatpush3.bf16.msra.mxu1 %v6840_v28  ;;  %v4404_v29 = vadd.f32 %v4403_v27, %v4402_v25  ;;  %v4405_v51 = vpop.f32.mrb[14].mxu1  ;;  %4770 = vmatprep.subr.bf16.mxu0 %v6678_v35  ;;  %v6948_v25 = vld [vmem:[%s7914_s1 + $0xb0] sm:$0xff]   ;;  %v6960_v27 = vld [vmem:[%s7914_s1 + $0xf8] sm:$0xff]  }
 0x12a   :  { %4750 = vmatprep.subr.bf16.mxu1 %v6847_v60  ;;  %v4406_v40 = vpop.f32.mrb[15].mxu1  ;;  %7947 = vst [vmem:[#allocation8_spill] sm:$0xff] %v6948_v25  ;;  %7948 = vst [vmem:[#allocation9_spill] sm:$0xff] %v6960_v27 }
 0x12b   :  { %v4407_v30 = vadd.f32 %v4406_v40, %v4405_v51  ;;  %1733 = vmatmul.mubr.bf16.gmra.mrb[68].mxu0 %v4164_v26  ;;  %v6954_v26 = vld [vmem:[%s7914_s1 + $0x158] sm:$0xff]   ;;  %v4178_v51 = vld [vmem:[%s7915_s0 + $0x1e4] sm:$0xff] }
 0x12c   :  { %4771 = vmatpush3.bf16.msra.mxu0 %v6693_v2  ;;  %1949 = vmatprep.mubr.bf16.mxu0 %v5846_v31  ;;  %v6972_v31 = vld [vmem:[%s7914_s1 + $0x118] sm:$0xff]  }
 0x12d   :  { %4751 = vmatpush3.bf16.msra.mxu1 %v6857_v36  ;;  %4772 = vmatprep.subr.bf16.mxu0 %v6705_v6 }
 0x12e   :  { %4752 = vmatprep.subr.bf16.mxu1 %v6864_v9 }
 0x12f   :  { %v4408_v10 = vpop.f32.mrb[16].mxu1 }
 0x130   :  { %v4409_v12 = vpop.f32.mrb[17].mxu1  ;;  %4773 = vmatpush3.bf16.msra.mxu0 %v6717_v1 }
 0x131   :  { %4753 = vmatpush3.bf16.msra.mxu1 %v6877_v37  ;;  %v4410_v38 = vadd.f32 %v4409_v12, %v4408_v10  ;;  %v4411_v42 = vpop.f32.mrb[18].mxu1  ;;  %4774 = vmatprep.subr.bf16.mxu0 %v6729_v5  ;;  %v6978_v10 = vld [vmem:[%s7914_s1 + $0xb8] sm:$0xff]  }
 0x132   :  { %4794 = vmatprep.subr.bf16.mxu1 %v6884_v14  ;;  %v4412_v15 = vpop.f32.mrb[19].mxu1 }
 0x133   :  { %v6990_v15 = vld [vmem:[%s7914_s1 + $0x180] sm:$0xff]  }
 0x134   :  { %1902 = vmatmul.mubr.bf16.vlgmr.msra.gmra.mrb[68].mxu1 %v5841_v11  ;;  %4775 = vmatpush3.bf16.msra.mxu0 %v6897_v43 }
 0x135   :  { %4795 = vmatpush3.bf16.msra.mxu1 %v6891_v39  ;;  %4776 = vmatprep.subr.bf16.mxu0 %v6909_v46 }
 0x136   :  { %4796 = vmatprep.subr.bf16.mxu1 %v6903_v45  ;;  %v4430_v47 = vpop.f32.mrb[16].mxu0  ;;  %1909 = vmatprep.mubr.bf16.mxu1 %v4189_v17  ;;  %v4191_v17 = vcombine.high %v4178_v51, %v4178_v51 }
 0x137   :  { %v4431_v49 = vpop.f32.mrb[17].mxu0 }
 0x138   :  { %4777 = vmatpush3.bf16.msra.mxu0 %v6921_v18  ;;  %v4432_v56 = vadd.f32 %v4431_v49, %v4430_v47  ;;  %v4433_v48 = vpop.f32.mrb[18].mxu0  ;;  %v6996_v49 = vld [vmem:[%s7914_s1 + $0x120] sm:$0xff]  }
 0x139   :  { %4797 = vmatpush3.bf16.msra.mxu1 %v6915_v53  ;;  %v4434_v58 = vpop.f32.mrb[19].mxu0  ;;  %4778 = vmatprep.subr.bf16.mxu0 %v6933_v19 }
 0x13a   :  { %4798 = vmatprep.subr.bf16.mxu1 %v6927_v20  ;;  %v860_v61 = vadd.f32 %v4432_v56, %v4404_v29  ;;  %v4435_v21 = vadd.f32 %v4434_v58, %v4433_v48  ;;  %v7009_v48 = vld [vmem:[%s7914_s1 + $0x188] sm:$0xff]  }
 0x13c   :  { %1910 = vmatmul.mubr.bf16.gmra.mrb[72].mxu1 %v4188_v50  ;;  %v863_v22 = vadd.f32 %v4435_v21, %v4407_v30  ;;  %4779 = vmatpush3.bf16.msra.mxu0 %v6948_v25  ;;  %v5844_v30 = vld [vmem:[%s7915_s0 + $0x1ac] ss:$28 sps:$4 sm:$0xff]  }
 0x13d   :  { %4799 = vmatpush3.bf16.msra.mxu1 %v6942_v23  ;;  %4780 = vmatprep.subr.bf16.mxu0 %v6960_v27  ;;  %v7003_v50 = vld [vmem:[%s7914_s1 + $0x168] sm:$0xff]  }
 0x13e   :  { %4800 = vmatprep.subr.bf16.mxu1 %v6954_v26  ;;  %v4436_v29 = vpop.f32.mrb[20].mxu0  ;;  %1997 = vmatprep.mubr.bf16.mxu1 %v5853_v62  ;;  %7949 = vst [vmem:[#allocation10_spill] sm:$0xff] %v7003_v50  ;;  %v4190_v62 = vcombine.low %v4178_v51, %v4178_v51  ;;  %v7025_v51 = vld [vmem:[%s7914_s1 + $0x170] sm:$0xff]  }
 0x13f   :  { %v4437_v40 = vpop.f32.mrb[21].mxu0  ;;  %7951 = vst [vmem:[#allocation12_spill] sm:$0xff] %v7025_v51 }
 0x140   :  { %4781 = vmatpush3.bf16.msra.mxu0 %v6978_v10  ;;  %v4438_v11 = vadd.f32 %v4437_v40, %v4436_v29  ;;  %v4439_v12 = vpop.f32.mrb[22].mxu0  ;;  %v7015_v29 = vld [vmem:[%s7914_s1 + $0x128] sm:$0xff]  }
 0x141   :  { %4801 = vmatpush3.bf16.msra.mxu1 %v6972_v31  ;;  %v4440_v42 = vpop.f32.mrb[23].mxu0  ;;  %5252 = vmatprep.subr.bf16.mxu0 %v6990_v15  ;;  %7950 = vst [vmem:[#allocation11_spill] sm:$0xff] %v7015_v29  ;;  %v5854_v12 = vld [vmem:[%s7915_s0 + $0x1bc] ss:$28 sps:$4 sm:$0xff]  }
 0x142   :  { %4802 = vmatprep.subr.bf16.mxu1 %v6984_v13  ;;  %v868_v47 = vadd.f32 %v4438_v11, %v4410_v38 }
 0x143   :  { %1950 = vmatmul.mubr.bf16.vlgmr.msra.gmra.mrb[72].mxu0 %v5844_v30 }
 0x144   :  { %5253 = vmatpush3.bf16.msra.mxu0 %v6990_v15  ;;  %1957 = vmatprep.mubr.bf16.mxu0 %v4191_v17 }
 0x145   :  { %4803 = vmatpush3.bf16.msra.mxu1 %v6996_v49  ;;  %5254 = vmatprep.subr.bf16.mxu0 %v7009_v48 }
 0x146   :  { %4804 = vmatprep.subr.bf16.mxu1 %v7003_v50  ;;  %v5226_v38 = vpop.f32.mrb[24].mxu0  ;;  %v7034_v50 = vld [vmem:[%s7914_s1 + $0x130] sm:$0xff]  }
 0x147   :  { %v4458_v56 = vpop.f32.mrb[20].mxu1  ;;  %v955_v21 = vpop.f32.mrb[25].mxu0 }
 0x148   :  { %v4459_v58 = vpop.f32.mrb[21].mxu1  ;;  %v5227_v11 = vpop.f32.mrb[26].mxu0  ;;  %5255 = vmatpush3.bf16.msra.mxu0 %v7009_v48 }
 0x149   :  { %4805 = vmatpush3.bf16.msra.mxu1 %v7015_v29  ;;  %v4460_v40 = vadd.f32 %v4459_v58, %v4458_v56  ;;  %v4461_v30 = vpop.f32.mrb[22].mxu1  ;;  %v958_v17 = vpop.f32.mrb[27].mxu0  ;;  %4826 = vmatprep.subr.bf16.mxu0 %v6607_v16 }
 0x14a   :  { %v4462_v42 = vpop.f32.mrb[23].mxu1  ;;  %4806 = vmatprep.subr.bf16.mxu1 %v7025_v51  ;;  %v7041_v51 = vld [vmem:[%s7914_s1 + $0x178] sm:$0xff]  }
 0x14b   :  { %v908_v56 = vadd.f32 %v4460_v40, %v860_v61  ;;  %v4463_v58 = vadd.f32 %v4462_v42, %v4461_v30  ;;  %1958 = vmatmul.mubr.bf16.gmra.mrb[76].mxu0 %v4190_v62  ;;  %v5851_v40 = vld [vmem:[%s7915_s0 + $0x1b4] ss:$28 sps:$4 sm:$0xff]  }
 0x14c   :  { %5256 = vmatprep.mubr.msk.bf16.mxu0 %vm500_vm0, %v5854_v12  ;;  %v5855_v30 = vld [vmem:[%s7915_s0 + $0x1f4] ss:$0 sps:$4 sm:$0xff]   ;;  %v4179_v12 = vld [vmem:[%s7915_s0 + $0x1ec] sm:$0xff] }
 0x14d   :  { %v7029_v11 = vadd.f32 %v955_v21, %v908_v56  ;;  %v911_v29 = vadd.f32 %v4463_v58, %v863_v22  ;;  %4807 = vmatpush3.bf16.msra.mxu1 %v7034_v50 }
 0x14e   :  { %4808 = vmatprep.subr.bf16.mxu1 %v7041_v51 }
 0x14f   :  { %7952 = vst [vmem:[#allocation13_spill] sm:$0xff] %v7029_v11  ;;  %v7046_v22 = vadd.f32 %v958_v17, %v911_v29  ;;  %v4464_v21 = vpop.f32.mrb[24].mxu1  ;;  %v7062_v29 = vld [vmem:[%s7914_s1 + $0x138] sm:$0xff]   ;;  %v4193_v11 = vcombine.high %v4179_v12, %v4179_v12 }
 0x150   :  { %v4465_v62 = vpop.f32.mrb[25].mxu1 }
 0x151   :  { %4809 = vmatpush3.bf16.msra.mxu1 %v7062_v29  ;;  %v4466_v17 = vadd.f32 %v4465_v62, %v4464_v21  ;;  %v4467_v56 = vpop.f32.mrb[26].mxu1  ;;  %v4192_v21 = vcombine.low %v4179_v12, %v4179_v12 }
 0x152   :  { %4854 = vmatprep.subr.bf16.mxu1 %v6626_v44  ;;  %v4468_v58 = vpop.f32.mrb[27].mxu1 }
 0x153   :  { %v916_v61 = vadd.f32 %v4466_v17, %v868_v47  ;;  %5257 = vmatmul.mubr.msk.bf16.vlgmr.msra.gmra.mrb[80].mxu0 %vm500_vm0, %v5855_v30 }
 0x154   :  { %1998 = vmatmul.mubr.bf16.vlgmr.msra.gmra.mrb[76].mxu1 %v5851_v40  ;;  %4827 = vmatpush3.bf16.msra.mxu0 %v6636_v52 }
 0x155   :  { %v7070_v42 = vadd.f32 %v5226_v38, %v916_v61  ;;  %4855 = vmatpush3.bf16.msra.mxu1 %v6642_v54  ;;  %4828 = vmatprep.subr.bf16.mxu0 %v6648_v55  ;;  %v5863_v38 = vld [vmem:[%s7915_s0 + $0x204] ss:$28 sps:$4 sm:$0xff]  }
 0x156   :  { %4856 = vmatprep.subr.bf16.mxu1 %v6654_v59  ;;  %2005 = vmatprep.mubr.bf16.mxu1 %v4193_v11 }
 0x157   :  { %2174 = vmatprep.mubr.bf16.mxu0 %v5860_v41 }
 0x158   :  { %4829 = vmatpush3.bf16.msra.mxu0 %v6660_v32 }
 0x159   :  { %4857 = vmatpush3.bf16.msra.mxu1 %v6666_v33  ;;  %4830 = vmatprep.subr.bf16.mxu0 %v6672_v34 }
 0x15a   :  { %4858 = vmatprep.subr.bf16.mxu1 %v6678_v35 }
 0x15c   :  { %2006 = vmatmul.mubr.bf16.gmra.mrb[80].mxu1 %v4192_v21  ;;  %4831 = vmatpush3.bf16.msra.mxu0 %v6687_v0 }
 0x15d   :  { %4859 = vmatpush3.bf16.msra.mxu1 %v6693_v2  ;;  %4832 = vmatprep.subr.bf16.mxu0 %v6699_v4 }
 0x15e   :  { %4860 = vmatprep.subr.bf16.mxu1 %v6705_v6  ;;  %2222 = vmatprep.mubr.bf16.mxu1 %v5863_v38 }
 0x160   :  { %4833 = vmatpush3.bf16.msra.mxu0 %v6711_v8 }
 0x161   :  { %4861 = vmatpush3.bf16.msra.mxu1 %v6717_v1  ;;  %4834 = vmatprep.subr.bf16.mxu0 %v6723_v3 }
 0x162   :  { %4862 = vmatprep.subr.bf16.mxu1 %v6729_v5 }
 0x164   :  { %4835 = vmatpush3.bf16.msra.mxu0 %v6735_v7 }
 0x165   :  { %4863 = vmatpush3.bf16.msra.mxu1 %v6897_v43  ;;  %4836 = vmatprep.subr.bf16.mxu0 %v6833_v63 }
 0x166   :  { %4864 = vmatprep.subr.bf16.mxu1 %v6909_v46  ;;  %v4490_v41 = vpop.f32.mrb[28].mxu0 }
 0x167   :  { %v4518_v11 = vpop.f32.mrb[28].mxu1  ;;  %v4491_v61 = vpop.f32.mrb[29].mxu0 }
 0x168   :  { %v4519_v62 = vpop.f32.mrb[29].mxu1  ;;  %4837 = vmatpush3.bf16.msra.mxu0 %v6840_v28  ;;  %v4492_v40 = vadd.f32 %v4491_v61, %v4490_v41  ;;  %v4493_v12 = vpop.f32.mrb[30].mxu0  ;;  %v4206_v41 = vld [vmem:[%s7915_s0 + $0x238] sm:$0xff] }
 0x169   :  { %4865 = vmatpush3.bf16.msra.mxu1 %v6921_v18  ;;  %v4520_v30 = vadd.f32 %v4519_v62, %v4518_v11  ;;  %v4521_v17 = vpop.f32.mrb[30].mxu1  ;;  %v4494_v56 = vpop.f32.mrb[31].mxu0  ;;  %4838 = vmatprep.subr.bf16.mxu0 %v6847_v60  ;;  %v5858_v11 = vld [vmem:[%s7915_s0 + $0x1f8] ss:$28 sps:$4 sm:$0xff]  }
 0x16a   :  { %v4522_v58 = vpop.f32.mrb[31].mxu1  ;;  %4866 = vmatprep.subr.bf16.mxu1 %v6933_v19  ;;  %v4495_v38 = vadd.f32 %v4494_v56, %v4493_v12  ;;  %v4205_v12 = vld [vmem:[%s7915_s0 + $0x230] sm:$0xff] }
 0x16b   :  { %v7101_v21 = vadd.f32 %v4520_v30, %v4492_v40  ;;  %v4523_v47 = vadd.f32 %v4522_v58, %v4521_v17  ;;  %v4219_v17 = vcombine.high %v4206_v41, %v4206_v41  ;;  %v4217_v43 = vcombine.high %v4205_v12, %v4205_v12 }
 0x16c   :  { %4839 = vmatpush3.bf16.msra.mxu0 %v6857_v36 }
 0x16d   :  { %v7103_v46 = vadd.f32 %v4523_v47, %v4495_v38  ;;  %4867 = vmatpush3.bf16.msra.mxu1 %v6948_v25  ;;  %4840 = vmatprep.subr.bf16.mxu0 %v6864_v9  ;;  %v5861_v47 = vld [vmem:[%s7915_s0 + $0x200] ss:$28 sps:$4 sm:$0xff]  }
 0x16e   :  { %4868 = vmatprep.subr.bf16.mxu1 %v6960_v27  ;;  %v4496_v61 = vpop.f32.mrb[32].mxu0 }
 0x16f   :  { %v4524_v62 = vpop.f32.mrb[32].mxu1  ;;  %v4497_v40 = vpop.f32.mrb[33].mxu0 }
 0x170   :  { %v4525_v30 = vpop.f32.mrb[33].mxu1  ;;  %4841 = vmatpush3.bf16.msra.mxu0 %v6877_v37  ;;  %v4498_v56 = vadd.f32 %v4497_v40, %v4496_v61  ;;  %v4499_v58 = vpop.f32.mrb[34].mxu0  ;;  %v4218_v61 = vcombine.low %v4206_v41, %v4206_v41  ;;  %v5867_v41 = vld [vmem:[%s7915_s0 + $0x248] ss:$0 sps:$4 sm:$0xff]   ;;  %v5877_v40 = vld [vmem:[%s7915_s0 + $0x250] ss:$28 sps:$4 sm:$0xff]  }
 0x171   :  { %4869 = vmatpush3.bf16.msra.mxu1 %v6978_v10  ;;  %v4526_v38 = vadd.f32 %v4525_v30, %v4524_v62  ;;  %v4527_v27 = vpop.f32.mrb[34].mxu1  ;;  %4882 = vmatprep.subr.bf16.mxu0 %v6884_v14  ;;  %v4500_v25 = vpop.f32.mrb[35].mxu0  ;;  %v4216_v62 = vcombine.low %v4205_v12, %v4205_v12  ;;  %v7953_v30 = vld [vmem:[#allocation10_spill] sm:$0xff] }
 0x172   :  { %5260 = vmatprep.subr.bf16.mxu1 %v6990_v15  ;;  %v4528_v19 = vpop.f32.mrb[35].mxu1 }
 0x173   :  { %v7125_v18 = vadd.f32 %v4526_v38, %v4498_v56  ;;  %2175 = vmatmul.mubr.bf16.vlgmr.msra.gmra.mrb[84].mxu0 %v5858_v11  ;;  %v5866_v19 = vld [vmem:[%s7915_s0 + $0x210] ss:$28 sps:$4 sm:$0xff]   ;;  %v7954_v56 = vld [vmem:[#allocation11_spill] sm:$0xff] }
 0x174   :  { %2223 = vmatmul.mubr.bf16.vlgmr.msra.gmra.mrb[84].mxu1 %v5861_v47  ;;  %4883 = vmatpush3.bf16.msra.mxu0 %v6891_v39 }
 0x175   :  { %2230 = vmatprep.mubr.bf16.mxu1 %v4219_v17  ;;  %4884 = vmatprep.subr.bf16.mxu0 %v6903_v45 }
 0x176   :  { %5261 = vmatpush3.bf16.msra.mxu1 %v6990_v15  ;;  %2182 = vmatprep.mubr.bf16.mxu0 %v4217_v43  ;;  %v5872_v43 = vld [vmem:[%s7915_s0 + $0x20c] ss:$28 sps:$4 sm:$0xff]  }
 0x177   :  { %5262 = vmatprep.subr.bf16.mxu1 %v7009_v48  ;;  %v5234_v27 = vpop.f32.mrb[36].mxu1 }
 0x178   :  { %v1228_v25 = vpop.f32.mrb[37].mxu1  ;;  %4885 = vmatpush3.bf16.msra.mxu0 %v6915_v53 }
 0x179   :  { %v5235_v11 = vpop.f32.mrb[38].mxu1  ;;  %4886 = vmatprep.subr.bf16.mxu0 %v6927_v20 }
 0x17a   :  { %5263 = vmatpush3.bf16.msra.mxu1 %v7009_v48  ;;  %v1231_v47 = vpop.f32.mrb[39].mxu1 }
 0x17b   :  { %4914 = vmatprep.subr.bf16.mxu1 %v6607_v16  ;;  %2183 = vmatmul.mubr.bf16.gmra.mrb[88].mxu0 %v4216_v62  ;;  %v7955_v62 = vld [vmem:[#allocation12_spill] sm:$0xff] }
 0x17c   :  { %2231 = vmatmul.mubr.bf16.gmra.mrb[88].mxu1 %v4218_v61  ;;  %4887 = vmatpush3.bf16.msra.mxu0 %v6942_v23 }
 0x17d   :  { %5264 = vmatprep.mubr.msk.bf16.mxu1 %vm500_vm0, %v5866_v19  ;;  %4888 = vmatprep.subr.bf16.mxu0 %v6954_v26 }
 0x17e   :  { %2270 = vmatprep.mubr.bf16.mxu0 %v5872_v43  ;;  %v7957_v43 = vld [vmem:[#allocation13_spill] sm:$0xff] }
 0x180   :  { %4889 = vmatpush3.bf16.msra.mxu0 %v6972_v31 }
 0x181   :  { %4890 = vmatprep.subr.bf16.mxu0 %v6984_v13 }
 0x184   :  { %5265 = vmatmul.mubr.msk.bf16.vlgmr.msra.gmra.mrb[92].mxu1 %vm500_vm0, %v5867_v41  ;;  %4891 = vmatpush3.bf16.msra.mxu0 %v6996_v49 }
 0x185   :  { %4915 = vmatpush3.bf16.msra.mxu1 %v6636_v52  ;;  %4892 = vmatprep.subr.bf16.mxu0 %v7953_v30 }
 0x186   :  { %4916 = vmatprep.subr.bf16.mxu1 %v6648_v55  ;;  %v4546_v12 = vpop.f32.mrb[36].mxu0  ;;  %2447 = vmatprep.mubr.bf16.mxu1 %v5877_v40 }
 0x187   :  { %v4547_v17 = vpop.f32.mrb[37].mxu0 }
 0x188   :  { %4893 = vmatpush3.bf16.msra.mxu0 %v7954_v56  ;;  %v4548_v58 = vadd.f32 %v4547_v17, %v4546_v12  ;;  %v4549_v38 = vpop.f32.mrb[38].mxu0 }
 0x189   :  { %4917 = vmatpush3.bf16.msra.mxu1 %v6660_v32  ;;  %v4550_v61 = vpop.f32.mrb[39].mxu0  ;;  %4894 = vmatprep.subr.bf16.mxu0 %v7955_v62  ;;  %v7956_v32 = vld [vmem:[#allocation3_spill] sm:$0xff] }
 0x18a   :  { %4918 = vmatprep.subr.bf16.mxu1 %v6672_v34  ;;  %v1181_v52 = vadd.f32 %v4548_v58, %v7101_v21  ;;  %v4551_v19 = vadd.f32 %v4550_v61, %v4549_v38  ;;  %v7958_v34 = vmax.f32 %v7956_v32, %v7957_v43  ;;  %v7962_v32 = vld [vmem:[#allocation5_spill] sm:$0xff] }
 0x18c   :  { %v1229_v55 = vadd.f32 %v1228_v25, %v1181_v52  ;;  %v1184_v11 = vadd.f32 %v4551_v19, %v7103_v46  ;;  %4895 = vmatpush3.bf16.msra.mxu0 %v7034_v50  ;;  %v4207_v46 = vld [vmem:[%s7915_s0 + $0x240] sm:$0xff] }
 0x18d   :  { %4919 = vmatpush3.bf16.msra.mxu1 %v6687_v0  ;;  %4896 = vmatprep.subr.bf16.mxu0 %v7041_v51  ;;  %v5870_v0 = vld [vmem:[%s7915_s0 + $0x208] ss:$28 sps:$4 sm:$0xff]   ;;  %v4221_v61 = vcombine.high %v4207_v46, %v4207_v46 }
 0x18e   :  { %4920 = vmatprep.subr.bf16.mxu1 %v6699_v4  ;;  %v7170_v41 = vmax.f32 %v7958_v34, %v1229_v55  ;;  %v1232_v40 = vadd.f32 %v1231_v47, %v1184_v11  ;;  %v4552_v12 = vpop.f32.mrb[40].mxu0  ;;  %v7959_v4 = vmax.f32 %v6813_v57, %v7046_v22  ;;  %v4220_v57 = vcombine.low %v4207_v46, %v4207_v46  ;;  %v7961_v11 = vld [vmem:[#allocation4_spill] sm:$0xff] }
 0x18f   :  { %v4553_v21 = vpop.f32.mrb[41].mxu0 }
 0x190   :  { %v7181_v25 = vmax.f32 %v7959_v4, %v1232_v40  ;;  %4897 = vmatpush3.bf16.msra.mxu0 %v7062_v29  ;;  %v4554_v47 = vadd.f32 %v4553_v21, %v4552_v12  ;;  %v4555_v17 = vpop.f32.mrb[42].mxu0  ;;  %v7963_v40 = vld [vmem:[#allocation6_spill] sm:$0xff] }
 0x191   :  { %4921 = vmatpush3.bf16.msra.mxu1 %v6711_v8  ;;  %4942 = vmatprep.subr.bf16.mxu0 %v6626_v44  ;;  %v4556_v58 = vpop.f32.mrb[43].mxu0  ;;  %v7960_v8 = vmax.f32 %v6826_v24, %v7070_v42  ;;  %v5880_v24 = vld [vmem:[%s7915_s0 + $0x258] ss:$28 sps:$4 sm:$0xff]  }
 0x192   :  { %4922 = vmatprep.subr.bf16.mxu1 %v6723_v3  ;;  %v1189_v38 = vadd.f32 %v4554_v47, %v7125_v18  ;;  %v5887_v47 = vld [vmem:[%s7915_s0 + $0x260] ss:$28 sps:$4 sm:$0xff]   ;;  %v7965_v58 = vld [vmem:[#allocation8_spill] sm:$0xff] }
 0x193   :  { %2271 = vmatmul.mubr.bf16.vlgmr.msra.gmra.mrb[92].mxu0 %v5870_v0  ;;  %v7964_v0 = vld [vmem:[#allocation7_spill] sm:$0xff] }
 0x194   :  { %v1237_v52 = vadd.f32 %v5234_v27, %v1189_v38  ;;  %4943 = vmatpush3.bf16.msra.mxu0 %v6642_v54  ;;  %2278 = vmatprep.mubr.bf16.mxu0 %v4221_v61  ;;  %v4233_v27 = vld [vmem:[%s7915_s0 + $0x284] sm:$0xff]  ;;  %v7966_v38 = vld [vmem:[#allocation9_spill] sm:$0xff] }
 0x195   :  { %4923 = vmatpush3.bf16.msra.mxu1 %v6735_v7  ;;  %4944 = vmatprep.subr.bf16.mxu0 %v6654_v59  ;;  %v4245_v55 = vcombine.high %v4233_v27, %v4233_v27  ;;  %v4244_v34 = vcombine.low %v4233_v27, %v4233_v27 }
 0x196   :  { %4924 = vmatprep.subr.bf16.mxu1 %v6833_v63  ;;  %v7195_v3 = vmax.f32 %v7960_v8, %v1237_v52  ;;  %v4234_v52 = vld [vmem:[%s7915_s0 + $0x28c] sm:$0xff] }
 0x197   :  { %v4578_v44 = vpop.f32.mrb[40].mxu1 }
 0x198   :  { %v4579_v18 = vpop.f32.mrb[41].mxu1  ;;  %4945 = vmatpush3.bf16.msra.mxu0 %v6666_v33 }
 0x199   :  { %4925 = vmatpush3.bf16.msra.mxu1 %v6840_v28  ;;  %v4580_v7 = vadd.f32 %v4579_v18, %v4578_v44  ;;  %v4581_v22 = vpop.f32.mrb[42].mxu1  ;;  %4946 = vmatprep.subr.bf16.mxu0 %v6678_v35  ;;  %v5875_v35 = vld [vmem:[%s7915_s0 + $0x24c] ss:$28 sps:$4 sm:$0xff]   ;;  %v5878_v44 = vld [vmem:[%s7915_s0 + $0x254] ss:$28 sps:$4 sm:$0xff]  }
 0x19a   :  { %4926 = vmatprep.subr.bf16.mxu1 %v6847_v60  ;;  %v4582_v54 = vpop.f32.mrb[43].mxu1 }
 0x19b   :  { %v4583_v59 = vadd.f32 %v4582_v54, %v4581_v22  ;;  %2279 = vmatmul.mubr.bf16.gmra.mrb[96].mxu0 %v4220_v57  ;;  %v4247_v22 = vcombine.high %v4234_v52, %v4234_v52 }
 0x19c   :  { %4947 = vmatpush3.bf16.msra.mxu0 %v6693_v2  ;;  %2495 = vmatprep.mubr.bf16.mxu0 %v5880_v24 }
 0x19d   :  { %4927 = vmatpush3.bf16.msra.mxu1 %v6857_v36  ;;  %4948 = vmatprep.subr.bf16.mxu0 %v6705_v6 }
 0x19e   :  { %4928 = vmatprep.subr.bf16.mxu1 %v6864_v9 }
 0x19f   :  { %v4584_v33 = vpop.f32.mrb[44].mxu1 }
 0x1a0   :  { %v4585_v42 = vpop.f32.mrb[45].mxu1  ;;  %4949 = vmatpush3.bf16.msra.mxu0 %v6717_v1 }
 0x1a1   :  { %4929 = vmatpush3.bf16.msra.mxu1 %v6877_v37  ;;  %v4586_v2 = vadd.f32 %v4585_v42, %v4584_v33  ;;  %v4587_v19 = vpop.f32.mrb[46].mxu1  ;;  %4950 = vmatprep.subr.bf16.mxu0 %v6729_v5  ;;  %v4246_v42 = vcombine.low %v4234_v52, %v4234_v52 }
 0x1a2   :  { %4970 = vmatprep.subr.bf16.mxu1 %v6884_v14  ;;  %v4588_v6 = vpop.f32.mrb[47].mxu1 }
 0x1a3   :  { %v5888_v6 = vld [vmem:[%s7915_s0 + $0x264] ss:$28 sps:$4 sm:$0xff]  }
 0x1a4   :  { %2448 = vmatmul.mubr.bf16.vlgmr.msra.gmra.mrb[96].mxu1 %v5875_v35  ;;  %4951 = vmatpush3.bf16.msra.mxu0 %v7961_v11 }
 0x1a5   :  { %4971 = vmatpush3.bf16.msra.mxu1 %v6891_v39  ;;  %4952 = vmatprep.subr.bf16.mxu0 %v7962_v32 }
 0x1a6   :  { %4972 = vmatprep.subr.bf16.mxu1 %v6903_v45  ;;  %v4606_v43 = vpop.f32.mrb[44].mxu0  ;;  %2455 = vmatprep.mubr.bf16.mxu1 %v4245_v55 }
 0x1a7   :  { %v4607_v1 = vpop.f32.mrb[45].mxu0 }
 0x1a8   :  { %4953 = vmatpush3.bf16.msra.mxu0 %v7963_v40  ;;  %v4608_v5 = vadd.f32 %v4607_v1, %v4606_v43  ;;  %v4609_v12 = vpop.f32.mrb[46].mxu0 }
 0x1a9   :  { %4973 = vmatpush3.bf16.msra.mxu1 %v6915_v53  ;;  %v4610_v21 = vpop.f32.mrb[47].mxu0  ;;  %4954 = vmatprep.subr.bf16.mxu0 %v7964_v0 }
 0x1aa   :  { %4974 = vmatprep.subr.bf16.mxu1 %v6927_v20  ;;  %v1406_v46 = vadd.f32 %v4608_v5, %v4580_v7  ;;  %v4611_v4 = vadd.f32 %v4610_v21, %v4609_v12 }
 0x1ac   :  { %2456 = vmatmul.mubr.bf16.gmra.mrb[100].mxu1 %v4244_v34  ;;  %v1409_v17 = vadd.f32 %v4611_v4, %v4583_v59  ;;  %4955 = vmatpush3.bf16.msra.mxu0 %v7965_v58 }
 0x1ad   :  { %4975 = vmatpush3.bf16.msra.mxu1 %v6942_v23  ;;  %4956 = vmatprep.subr.bf16.mxu0 %v7966_v38 }
 0x1ae   :  { %4976 = vmatprep.subr.bf16.mxu1 %v6954_v26  ;;  %v4612_v61 = vpop.f32.mrb[48].mxu0  ;;  %2543 = vmatprep.mubr.bf16.mxu1 %v5887_v47 }
 0x1af   :  { %v4613_v8 = vpop.f32.mrb[49].mxu0 }
 0x1b0   :  { %4957 = vmatpush3.bf16.msra.mxu0 %v6978_v10  ;;  %v4614_v57 = vadd.f32 %v4613_v8, %v4612_v61  ;;  %v4615_v18 = vpop.f32.mrb[50].mxu0 }
 0x1b1   :  { %4977 = vmatpush3.bf16.msra.mxu1 %v6972_v31  ;;  %v4616_v7 = vpop.f32.mrb[51].mxu0  ;;  %5268 = vmatprep.subr.bf16.mxu0 %v6990_v15 }
 0x1b2   :  { %4978 = vmatprep.subr.bf16.mxu1 %v6984_v13  ;;  %v1414_v54 = vadd.f32 %v4614_v57, %v4586_v2  ;;  %v5959_v57 = vld [vmem:[%s7914_s1 + $0xc0] sm:$0xff]  }
 0x1b3   :  { %2496 = vmatmul.mubr.bf16.vlgmr.msra.gmra.mrb[100].mxu0 %v5878_v44 }
 0x1b4   :  { %5269 = vmatpush3.bf16.msra.mxu0 %v6990_v15  ;;  %2503 = vmatprep.mubr.bf16.mxu0 %v4247_v22 }
 0x1b5   :  { %4979 = vmatpush3.bf16.msra.mxu1 %v6996_v49  ;;  %5270 = vmatprep.subr.bf16.mxu0 %v7009_v48 }
 0x1b6   :  { %4980 = vmatprep.subr.bf16.mxu1 %v7953_v30  ;;  %v5242_v24 = vpop.f32.mrb[52].mxu0 }
 0x1b7   :  { %v4634_v59 = vpop.f32.mrb[48].mxu1  ;;  %v1501_v35 = vpop.f32.mrb[53].mxu0 }
 0x1b8   :  { %v4635_v33 = vpop.f32.mrb[49].mxu1  ;;  %v5243_v2 = vpop.f32.mrb[54].mxu0  ;;  %5271 = vmatpush3.bf16.msra.mxu0 %v7009_v48 }
 0x1b9   :  { %4981 = vmatpush3.bf16.msra.mxu1 %v7954_v56  ;;  %v4636_v27 = vadd.f32 %v4635_v33, %v4634_v59  ;;  %v4637_v19 = vpop.f32.mrb[50].mxu1  ;;  %v1504_v43 = vpop.f32.mrb[55].mxu0  ;;  %5002 = vmatprep.subr.bf16.mxu0 %v6607_v16  ;;  %v5885_v16 = vld [vmem:[%s7915_s0 + $0x25c] ss:$28 sps:$4 sm:$0xff]   ;;  %v5894_v59 = vld [vmem:[%s7915_s0 + $0x2a4] ss:$28 sps:$4 sm:$0xff]  }
 0x1ba   :  { %v4638_v55 = vpop.f32.mrb[51].mxu1  ;;  %4982 = vmatprep.subr.bf16.mxu1 %v7955_v62  ;;  %v5964_v2 = vld [vmem:[%s7914_s1 + $0x8] sm:$0xff]  }
 0x1bb   :  { %v1454_v1 = vadd.f32 %v4636_v27, %v1406_v46  ;;  %v4639_v34 = vadd.f32 %v4638_v55, %v4637_v19  ;;  %2504 = vmatmul.mubr.bf16.gmra.mrb[104].mxu0 %v4246_v42  ;;  %v5889_v46 = vld [vmem:[%s7915_s0 + $0x29c] ss:$0 sps:$4 sm:$0xff]   ;;  %v5961_v42 = vld [vmem:[%s7914_s1 + $0x80] sm:$0xff]   ;;  %v5966_v55 = vld [vmem:[%s7914_s1 + $0x50] sm:$0xff]  }
 0x1bc   :  { %5272 = vmatprep.mubr.msk.bf16.mxu0 %vm500_vm0, %v5888_v6  ;;  %v5965_v6 = vld [vmem:[%s7914_s1 + $0x88] sm:$0xff]  }
 0x1bd   :  { %v7254_v5 = vadd.f32 %v1501_v35, %v1454_v1  ;;  %v1457_v12 = vadd.f32 %v4639_v34, %v1409_v17  ;;  %4983 = vmatpush3.bf16.msra.mxu1 %v7034_v50  ;;  %v4235_v17 = vld [vmem:[%s7915_s0 + $0x294] sm:$0xff]  ;;  %v5960_v35 = vld [vmem:[%s7914_s1] sm:$0xff]   ;;  %v5897_v1 = vld [vmem:[%s7915_s0 + $0x2ac] ss:$28 sps:$4 sm:$0xff]  }
 0x1be   :  { %4984 = vmatprep.subr.bf16.mxu1 %v7041_v51  ;;  %v4249_v22 = vcombine.high %v4235_v17, %v4235_v17  ;;  %v4248_v19 = vcombine.low %v4235_v17, %v4235_v17  ;;  %v5968_v34 = vld [vmem:[%s7914_s1 + $0x10] sm:$0xff]   ;;  %v5974_v17 = vld [vmem:[%s7914_s1 + $0x60] sm:$0xff]  }
 0x1bf   :  { %v1515_v21 = vmax.f32 %v7170_v41, %v7254_v5  ;;  %v7261_v4 = vadd.f32 %v1504_v43, %v1457_v12  ;;  %v4640_v47 = vpop.f32.mrb[52].mxu1  ;;  %v5967_v43 = vld [vmem:[%s7914_s1 + $0xd0] sm:$0xff]  }
 0x1c0   :  { %v4641_v61 = vpop.f32.mrb[53].mxu1  ;;  %v5969_v12 = vld [vmem:[%s7914_s1 + $0x90] sm:$0xff]  }
 0x1c1   :  { %v1516_v52 = vmax.f32 %v7181_v25, %v7261_v4  ;;  %4985 = vmatpush3.bf16.msra.mxu1 %v7062_v29  ;;  %v4642_v8 = vadd.f32 %v4641_v61, %v4640_v47  ;;  %v4643_v44 = vpop.f32.mrb[54].mxu1  ;;  %v5970_v47 = vld [vmem:[%s7914_s1 + $0x58] sm:$0xff]  }
 0x1c2   :  { %5030 = vmatprep.subr.bf16.mxu1 %v5959_v57  ;;  %v4644_v18 = vpop.f32.mrb[55].mxu1  ;;  %v5971_v61 = vld [vmem:[%s7914_s1 + $0xd8] sm:$0xff]   ;;  %v5976_v44 = vld [vmem:[%s7914_s1 + $0x20] sm:$0xff]  }
 0x1c3   :  { %v1462_v7 = vadd.f32 %v4642_v8, %v1414_v54  ;;  %5273 = vmatmul.mubr.msk.bf16.vlgmr.msra.gmra.mrb[108].mxu0 %vm500_vm0, %v5889_v46  ;;  %v5962_v54 = vld [vmem:[%s7914_s1 + $0x48] sm:$0xff]   ;;  %v5973_v46 = vld [vmem:[%s7914_s1 + $0x98] sm:$0xff]   ;;  %v5975_v8 = vld [vmem:[%s7914_s1 + $0xe0] sm:$0xff]  }
 0x1c4   :  { %2544 = vmatmul.mubr.bf16.vlgmr.msra.gmra.mrb[104].mxu1 %v5885_v16  ;;  %5003 = vmatpush3.bf16.msra.mxu0 %v5960_v35  ;;  %v5972_v16 = vld [vmem:[%s7914_s1 + $0x18] sm:$0xff]  }
 0x1c5   :  { %v7282_v33 = vadd.f32 %v5242_v24, %v1462_v7  ;;  %5031 = vmatpush3.bf16.msra.mxu1 %v5961_v42  ;;  %5004 = vmatprep.subr.bf16.mxu0 %v5962_v54  ;;  %v5963_v24 = vld [vmem:[%s7914_s1 + $0xc8] sm:$0xff]  }
 0x1c6   :  { %5032 = vmatprep.subr.bf16.mxu1 %v5963_v24  ;;  %2551 = vmatprep.mubr.bf16.mxu1 %v4249_v22 }
 0x1c7   :  { %v1517_v27 = vmax.f32 %v7195_v3, %v7282_v33  ;;  %2720 = vmatprep.mubr.bf16.mxu0 %v5894_v59 }
 0x1c8   :  { %5005 = vmatpush3.bf16.msra.mxu0 %v5964_v2 }
 0x1c9   :  { %5033 = vmatpush3.bf16.msra.mxu1 %v5965_v6  ;;  %5006 = vmatprep.subr.bf16.mxu0 %v5966_v55 }
 0x1ca   :  { %5034 = vmatprep.subr.bf16.mxu1 %v5967_v43 }
 0x1cc   :  { %2552 = vmatmul.mubr.bf16.gmra.mrb[108].mxu1 %v4248_v19  ;;  %5007 = vmatpush3.bf16.msra.mxu0 %v5968_v34 }
 0x1cd   :  { %5035 = vmatpush3.bf16.msra.mxu1 %v5969_v12  ;;  %5008 = vmatprep.subr.bf16.mxu0 %v5970_v47 }
 0x1ce   :  { %5036 = vmatprep.subr.bf16.mxu1 %v5971_v61  ;;  %2768 = vmatprep.mubr.bf16.mxu1 %v5897_v1 }
 0x1d0   :  { %5009 = vmatpush3.bf16.msra.mxu0 %v5972_v16 }
 0x1d1   :  { %5037 = vmatpush3.bf16.msra.mxu1 %v5973_v46  ;;  %5010 = vmatprep.subr.bf16.mxu0 %v5974_v17 }
 0x1d2   :  { %5038 = vmatprep.subr.bf16.mxu1 %v5975_v8  ;;  %v5904_v8 = vld [vmem:[%s7915_s0 + $0x2b4] ss:$28 sps:$4 sm:$0xff]  }
 0x1d4   :  { %5011 = vmatpush3.bf16.msra.mxu0 %v5976_v44 }
 0x1d5   :  { %5039 = vmatpush3.bf16.msra.mxu1 %v7961_v11  ;;  %5012 = vmatprep.subr.bf16.mxu0 %v6833_v63 }
 0x1d6   :  { %5040 = vmatprep.subr.bf16.mxu1 %v7962_v32  ;;  %v4666_v57 = vpop.f32.mrb[56].mxu0 }
 0x1d7   :  { %v4694_v18 = vpop.f32.mrb[56].mxu1  ;;  %v4667_v7 = vpop.f32.mrb[57].mxu0 }
 0x1d8   :  { %v4695_v22 = vpop.f32.mrb[57].mxu1  ;;  %5013 = vmatpush3.bf16.msra.mxu0 %v6840_v28  ;;  %v4668_v59 = vadd.f32 %v4667_v7, %v4666_v57  ;;  %v4669_v42 = vpop.f32.mrb[58].mxu0  ;;  %v4261_v28 = vld [vmem:[%s7915_s0 + $0x2d8] sm:$0xff]  ;;  %v5902_v7 = vld [vmem:[%s7915_s0 + $0x2b0] ss:$28 sps:$4 sm:$0xff]  }
 0x1d9   :  { %5041 = vmatpush3.bf16.msra.mxu1 %v7963_v40  ;;  %v4696_v35 = vadd.f32 %v4695_v22, %v4694_v18  ;;  %v4697_v54 = vpop.f32.mrb[58].mxu1  ;;  %v4670_v24 = vpop.f32.mrb[59].mxu0  ;;  %5014 = vmatprep.subr.bf16.mxu0 %v6847_v60  ;;  %v5892_v60 = vld [vmem:[%s7915_s0 + $0x2a0] ss:$28 sps:$4 sm:$0xff]   ;;  %v4273_v34 = vcombine.high %v4261_v28, %v4261_v28 }
 0x1da   :  { %v4698_v19 = vpop.f32.mrb[59].mxu1  ;;  %5042 = vmatprep.subr.bf16.mxu1 %v7964_v0  ;;  %v4671_v11 = vadd.f32 %v4670_v24, %v4669_v42 }
 0x1db   :  { %v7347_v63 = vadd.f32 %v4696_v35, %v4668_v59  ;;  %v4699_v32 = vadd.f32 %v4698_v19, %v4697_v54 }
 0x1dc   :  { %5015 = vmatpush3.bf16.msra.mxu0 %v6857_v36  ;;  %v5895_v36 = vld [vmem:[%s7915_s0 + $0x2a8] ss:$28 sps:$4 sm:$0xff]  }
 0x1dd   :  { %v7349_v2 = vadd.f32 %v4699_v32, %v4671_v11  ;;  %5043 = vmatpush3.bf16.msra.mxu1 %v7965_v58  ;;  %5016 = vmatprep.subr.bf16.mxu0 %v6864_v9  ;;  %v4262_v9 = vld [vmem:[%s7915_s0 + $0x2e0] sm:$0xff] }
 0x1de   :  { %5044 = vmatprep.subr.bf16.mxu1 %v7966_v38  ;;  %v4672_v40 = vpop.f32.mrb[60].mxu0  ;;  %v4275_v16 = vcombine.high %v4262_v9, %v4262_v9  ;;  %v4274_v46 = vcombine.low %v4262_v9, %v4262_v9 }
 0x1df   :  { %v4700_v0 = vpop.f32.mrb[60].mxu1  ;;  %v4673_v6 = vpop.f32.mrb[61].mxu0 }
 0x1e0   :  { %v4701_v58 = vpop.f32.mrb[61].mxu1  ;;  %5017 = vmatpush3.bf16.msra.mxu0 %v6877_v37  ;;  %v4674_v38 = vadd.f32 %v4673_v6, %v4672_v40  ;;  %v4675_v55 = vpop.f32.mrb[62].mxu0 }
 0x1e1   :  { %5045 = vmatpush3.bf16.msra.mxu1 %v6978_v10  ;;  %v4702_v43 = vadd.f32 %v4701_v58, %v4700_v0  ;;  %v4703_v1 = vpop.f32.mrb[62].mxu1  ;;  %5058 = vmatprep.subr.bf16.mxu0 %v6884_v14  ;;  %v4676_v12 = vpop.f32.mrb[63].mxu0  ;;  %v4272_v14 = vcombine.low %v4261_v28, %v4261_v28 }
 0x1e2   :  { %v4704_v47 = vpop.f32.mrb[63].mxu1  ;;  %5276 = vmatprep.subr.bf16.mxu1 %v6990_v15 }
 0x1e3   :  { %v1687_v61 = vadd.f32 %v4702_v43, %v4674_v38  ;;  %2721 = vmatmul.mubr.bf16.vlgmr.msra.gmra.mrb[112].mxu0 %v5892_v60 }
 0x1e4   :  { %2769 = vmatmul.mubr.bf16.vlgmr.msra.gmra.mrb[112].mxu1 %v5895_v36  ;;  %5059 = vmatpush3.bf16.msra.mxu0 %v6891_v39 }
 0x1e5   :  { %2728 = vmatprep.mubr.bf16.mxu0 %v4273_v34  ;;  %5060 = vmatprep.subr.bf16.mxu0 %v6903_v45  ;;  %v5905_v45 = vld [vmem:[%s7915_s0 + $0x2b8] ss:$28 sps:$4 sm:$0xff]  }
 0x1e6   :  { %5277 = vmatpush3.bf16.msra.mxu1 %v6990_v15  ;;  %2776 = vmatprep.mubr.bf16.mxu1 %v4275_v16 }
 0x1e7   :  { %v5250_v37 = vpop.f32.mrb[64].mxu1  ;;  %5278 = vmatprep.subr.bf16.mxu1 %v7009_v48 }
 0x1e8   :  { %v1774_v10 = vpop.f32.mrb[65].mxu1  ;;  %5061 = vmatpush3.bf16.msra.mxu0 %v6915_v53  ;;  %v5906_v53 = vld [vmem:[%s7915_s0 + $0x2f0] ss:$0 sps:$4 sm:$0xff]  }
 0x1e9   :  { %v5251_v17 = vpop.f32.mrb[66].mxu1  ;;  %5062 = vmatprep.subr.bf16.mxu0 %v6927_v20 }
 0x1ea   :  { %v1777_v39 = vpop.f32.mrb[67].mxu1  ;;  %5279 = vmatpush3.bf16.msra.mxu1 %v7009_v48 }
 0x1eb   :  { %2729 = vmatmul.mubr.bf16.gmra.mrb[116].mxu0 %v4272_v14 }
 0x1ec   :  { %2777 = vmatmul.mubr.bf16.gmra.mrb[116].mxu1 %v4274_v46  ;;  %5063 = vmatpush3.bf16.msra.mxu0 %v6942_v23 }
 0x1ed   :  { %2816 = vmatprep.mubr.bf16.mxu0 %v5904_v8  ;;  %5064 = vmatprep.subr.bf16.mxu0 %v6954_v26 }
 0x1ee   :  { %5280 = vmatprep.mubr.msk.bf16.mxu1 %vm500_vm0, %v5905_v45 }
 0x1f0   :  { %5065 = vmatpush3.bf16.msra.mxu0 %v6972_v31 }
 0x1f1   :  { %5066 = vmatprep.subr.bf16.mxu0 %v6984_v13 }
 0x1f4   :  { %5281 = vmatmul.mubr.msk.bf16.vlgmr.msra.gmra.mrb[120].mxu1 %vm500_vm0, %v5906_v53  ;;  %5067 = vmatpush3.bf16.msra.mxu0 %v6996_v49  ;;  %v4263_v49 = vld [vmem:[%s7915_s0 + $0x2e8] sm:$0xff] }
 0x1f5   :  { %5068 = vmatprep.subr.bf16.mxu0 %v7953_v30  ;;  %v4277_v22 = vcombine.high %v4263_v49, %v4263_v49  ;;  %v4276_v54 = vcombine.low %v4263_v49, %v4263_v49  ;;  %v5977_v49 = vmov 0.0|0.0  }
 0x1f6   :  { %v4722_v20 = vpop.f32.mrb[64].mxu0  ;;  %5541 = vmatprep.subr.bf16.mxu1 %v5977_v49 }
 0x1f7   :  { %v4723_v23 = vpop.f32.mrb[65].mxu0 }
 0x1f8   :  { %5069 = vmatpush3.bf16.msra.mxu0 %v7954_v56  ;;  %v4724_v26 = vadd.f32 %v4723_v23, %v4722_v20  ;;  %v4725_v15 = vpop.f32.mrb[66].mxu0 }
 0x1f9   :  { %v4726_v48 = vpop.f32.mrb[67].mxu0  ;;  %5070 = vmatprep.subr.bf16.mxu0 %v7955_v62 }
 0x1fa   :  { %v1727_v44 = vadd.f32 %v4724_v26, %v7347_v63  ;;  %v4727_v31 = vadd.f32 %v4726_v48, %v4725_v15 }
 0x1fc   :  { %v1775_v57 = vadd.f32 %v1774_v10, %v1727_v44  ;;  %v1730_v13 = vadd.f32 %v4727_v31, %v7349_v2  ;;  %5071 = vmatpush3.bf16.msra.mxu0 %v7034_v50 }
 0x1fd   :  { %5072 = vmatprep.subr.bf16.mxu0 %v7041_v51 }
 0x1fe   :  { %v7407_v30 = vmax.f32 %v1515_v21, %v1775_v57  ;;  %v1778_v56 = vadd.f32 %v1777_v39, %v1730_v13  ;;  %v4728_v62 = vpop.f32.mrb[68].mxu0 }
 0x1ff   :  { %v4729_v18 = vpop.f32.mrb[69].mxu0 }
 0x200   :  { %v7415_v50 = vmax.f32 %v1516_v52, %v1778_v56  ;;  %5073 = vmatpush3.bf16.msra.mxu0 %v7062_v29  ;;  %v4730_v51 = vadd.f32 %v4729_v18, %v4728_v62  ;;  %v4731_v59 = vpop.f32.mrb[70].mxu0  ;;  %v2896_v56 = vld [vmem:[%s7916_s3] sm:$0xff]  ;;  %v2897_v62 = vld [vmem:[%s7916_s3 + $0x8] sm:$0xff] }
 0x201   :  { %v4732_v41 = vpop.f32.mrb[71].mxu0  ;;  %5553 = vmatprep.subr.bf16.mxu0 %v5977_v49  ;;  %v5554_v18 = vpack.c.bf16 %v2897_v62, %v2896_v56 }
 0x202   :  { %v1735_v5 = vadd.f32 %v4730_v51, %v1687_v61 }
 0x203   :  { %2817 = vmatmul.mubr.bf16.vlgmr.msra.gmra.mrb[120].mxu0 %v5902_v7 }
 0x204   :  { %v1783_v21 = vadd.f32 %v5250_v37, %v1735_v5  ;;  %2824 = vmatprep.mubr.bf16.mxu0 %v4277_v22  ;;  %5555 = vmatpush3.bf16.msra.mxu0 %v5554_v18 }
 0x205   :  { %5556 = vmatprep.subr.bf16.mxu0 %v5977_v49 }
 0x206   :  { %v7421_v35 = vmax.f32 %v1517_v27, %v1783_v21 }
 0x207   :  { %v4754_v42 = vpop.f32.mrb[68].mxu1 }
 0x208   :  { %v4755_v25 = vpop.f32.mrb[69].mxu1 }
 0x209   :  { %v4756_v4 = vadd.f32 %v4755_v25, %v4754_v42  ;;  %v4757_v52 = vpop.f32.mrb[70].mxu1 }
 0x20a   :  { %v4758_v24 = vpop.f32.mrb[71].mxu1 }
 0x20b   :  { %v4759_v29 = vadd.f32 %v4758_v24, %v4757_v52  ;;  %2825 = vmatmul.mubr.bf16.gmra.mrb[124].mxu0 %v4276_v54 }
 0x20f   :  { %v4760_v19 = vpop.f32.mrb[72].mxu1 }
 0x210   :  { %v4761_v63 = vpop.f32.mrb[73].mxu1 }
 0x211   :  { %v4762_v11 = vadd.f32 %v4761_v63, %v4760_v19  ;;  %v4763_v32 = vpop.f32.mrb[74].mxu1 }
 0x212   :  { %v4764_v2 = vpop.f32.mrb[75].mxu1 }
 0x216   :  { %v4782_v28 = vpop.f32.mrb[72].mxu0 }
 0x217   :  { %v4783_v60 = vpop.f32.mrb[73].mxu0 }
 0x218   :  { %v4784_v40 = vadd.f32 %v4783_v60, %v4782_v28  ;;  %v4785_v0 = vpop.f32.mrb[74].mxu0 }
 0x219   :  { %v4786_v3 = vpop.f32.mrb[75].mxu0 }
 0x21a   :  { %v1952_v33 = vadd.f32 %v4784_v40, %v4756_v4  ;;  %v4787_v27 = vadd.f32 %v4786_v3, %v4785_v0 }
 0x21c   :  { %v1955_v36 = vadd.f32 %v4787_v27, %v4759_v29  ;;  %v2904_v27 = vld [vmem:[%s7916_s3 + $0x40] sm:$0xff] }
 0x21e   :  { %v4788_v6 = vpop.f32.mrb[76].mxu0 }
 0x21f   :  { %v4789_v58 = vpop.f32.mrb[77].mxu0 }
 0x220   :  { %v4790_v9 = vadd.f32 %v4789_v58, %v4788_v6  ;;  %v4791_v38 = vpop.f32.mrb[78].mxu0  ;;  %v2898_v58 = vld [vmem:[%s7916_s3 + $0x10] sm:$0xff] }
 0x221   :  { %v4792_v55 = vpop.f32.mrb[79].mxu0 }
 0x222   :  { %v1960_v43 = vadd.f32 %v4790_v9, %v4762_v11  ;;  %v2899_v9 = vld [vmem:[%s7916_s3 + $0x18] sm:$0xff] }
 0x223   :  { %v5557_v55 = vpack.c.bf16 %v2899_v9, %v2898_v58 }
 0x225   :  { %5558 = vmatpush3.bf16.msra.mxu0 %v5557_v55 }
 0x226   :  { %v5258_v34 = vpop.f32.mrb[80].mxu0  ;;  %5559 = vmatprep.subr.bf16.mxu0 %v5977_v49 }
 0x227   :  { %v4810_v1 = vpop.f32.mrb[76].mxu1  ;;  %v2047_v47 = vpop.f32.mrb[81].mxu0 }
 0x228   :  { %v4811_v12 = vpop.f32.mrb[77].mxu1  ;;  %v5259_v37 = vpop.f32.mrb[82].mxu0 }
 0x229   :  { %v4812_v61 = vadd.f32 %v4811_v12, %v4810_v1  ;;  %v4813_v16 = vpop.f32.mrb[78].mxu1  ;;  %v2050_v10 = vpop.f32.mrb[83].mxu0  ;;  %v2906_v1 = vld [vmem:[%s7916_s3 + $0x50] sm:$0xff]  ;;  %v2901_v37 = vld [vmem:[%s7916_s3 + $0x28] sm:$0xff] }
 0x22a   :  { %v4814_v14 = vpop.f32.mrb[79].mxu1 }
 0x22b   :  { %v2000_v46 = vadd.f32 %v4812_v61, %v1952_v33  ;;  %v4815_v17 = vadd.f32 %v4814_v14, %v4813_v16  ;;  %v2900_v16 = vld [vmem:[%s7916_s3 + $0x20] sm:$0xff] }
 0x22c   :  { %v5560_v14 = vpack.c.bf16 %v2901_v37, %v2900_v16 }
 0x22d   :  { %v7423_v8 = vadd.f32 %v2047_v47, %v2000_v46  ;;  %v2003_v39 = vadd.f32 %v4815_v17, %v1955_v36  ;;  %v2905_v36 = vld [vmem:[%s7916_s3 + $0x48] sm:$0xff] }
 0x22e   :  { %v5542_v6 = vpack.c.bf16 %v2905_v36, %v2904_v27  ;;  %v2909_v46 = vld [vmem:[%s7916_s3 + $0x68] sm:$0xff]  ;;  %5561 = vmatpush3.bf16.msra.mxu0 %v5560_v14 }
 0x22f   :  { %v2061_v45 = vmax.f32 %v7407_v30, %v7423_v8  ;;  %v7427_v53 = vadd.f32 %v2050_v10, %v2003_v39  ;;  %v4816_v20 = vpop.f32.mrb[80].mxu1  ;;  %v2908_v10 = vld [vmem:[%s7916_s3 + $0x60] sm:$0xff]  ;;  %5562 = vmatprep.subr.bf16.mxu0 %v5977_v49  ;;  %v2902_v39 = vld [vmem:[%s7916_s3 + $0x30] sm:$0xff] }
 0x230   :  { %v4817_v23 = vpop.f32.mrb[81].mxu1  ;;  %5543 = vmatpush3.bf16.msra.mxu1 %v5542_v6  ;;  %v5548_v17 = vpack.c.bf16 %v2909_v46, %v2908_v10 }
 0x231   :  { %v2062_v26 = vmax.f32 %v7415_v50, %v7427_v53  ;;  %v4818_v15 = vadd.f32 %v4817_v23, %v4816_v20  ;;  %v4819_v48 = vpop.f32.mrb[82].mxu1  ;;  %5544 = vmatprep.subr.bf16.mxu1 %v5977_v49  ;;  %v2903_v20 = vld [vmem:[%s7916_s3 + $0x38] sm:$0xff] }
 0x232   :  { %v4820_v44 = vpop.f32.mrb[83].mxu1  ;;  %v5563_v23 = vpack.c.bf16 %v2903_v20, %v2902_v39  ;;  %v2911_v48 = vld [vmem:[%s7916_s3 + $0x78] sm:$0xff] }
 0x233   :  { %v2008_v31 = vadd.f32 %v4818_v15, %v1960_v43  ;;  %v2910_v15 = vld [vmem:[%s7916_s3 + $0x70] sm:$0xff] }
 0x234   :  { %5564 = vmatpush3.bf16.msra.mxu0 %v5563_v23  ;;  %v5551_v44 = vpack.c.bf16 %v2911_v48, %v2910_v15 }
 0x235   :  { %v7431_v57 = vadd.f32 %v5258_v34, %v2008_v31  ;;  %v2907_v34 = vld [vmem:[%s7916_s3 + $0x58] sm:$0xff]  ;;  %5577 = vmatprep.subr.bf16.mxu0 %v5977_v49  ;;  %v5979_v31 = vmov 0.0  }
 0x236   :  { %v5545_v47 = vpack.c.bf16 %v2907_v34, %v2906_v1  ;;  %5319 = vmatprep.mubr.msk.f32.mxu0 %vm5978_vm1, %v5979_v31  ;;  %5300 = vmatprep.mubr.msk.f32.mxu1 %vm5978_vm1, %v5979_v31 }
 0x237   :  { %v2063_v13 = vmax.f32 %v7421_v35, %v7431_v57 }
 0x238   :  { %5546 = vmatpush3.bf16.msra.mxu1 %v5545_v47 }
 0x239   :  { %5547 = vmatprep.subr.bf16.mxu1 %v5977_v49 }
 0x23c   :  { %5549 = vmatpush3.bf16.msra.mxu1 %v5548_v17 }
 0x23d   :  { %5550 = vmatprep.subr.bf16.mxu1 %v5977_v49 }
 0x240   :  { %5552 = vmatpush3.bf16.msra.mxu1 %v5551_v44 }
 0x241   :  { %5565 = vmatprep.subr.bf16.mxu1 %v5977_v49 }
 0x246   :  { %v4842_v7 = vpop.f32.mrb[84].mxu0 }
 0x247   :  { %v4870_v51 = vpop.f32.mrb[84].mxu1  ;;  %v4843_v22 = vpop.f32.mrb[85].mxu0 }
 0x248   :  { %v4871_v59 = vpop.f32.mrb[85].mxu1  ;;  %v4844_v41 = vadd.f32 %v4843_v22, %v4842_v7  ;;  %v4845_v21 = vpop.f32.mrb[86].mxu0 }
 0x249   :  { %v4872_v5 = vadd.f32 %v4871_v59, %v4870_v51  ;;  %v4873_v42 = vpop.f32.mrb[86].mxu1  ;;  %v4846_v54 = vpop.f32.mrb[87].mxu0 }
 0x24a   :  { %v4874_v25 = vpop.f32.mrb[87].mxu1  ;;  %v4847_v52 = vadd.f32 %v4846_v54, %v4845_v21 }
 0x24b   :  { %v7444_v4 = vadd.f32 %v4872_v5, %v4844_v41  ;;  %v4875_v24 = vadd.f32 %v4874_v25, %v4873_v42 }
 0x24d   :  { %v7446_v29 = vadd.f32 %v4875_v24, %v4847_v52 }
 0x24e   :  { %v4848_v19 = vpop.f32.mrb[88].mxu0 }
 0x24f   :  { %v4876_v63 = vpop.f32.mrb[88].mxu1  ;;  %v4849_v11 = vpop.f32.mrb[89].mxu0 }
 0x250   :  { %v4877_v32 = vpop.f32.mrb[89].mxu1  ;;  %v4850_v2 = vadd.f32 %v4849_v11, %v4848_v19  ;;  %v4851_v28 = vpop.f32.mrb[90].mxu0 }
 0x251   :  { %v4878_v60 = vadd.f32 %v4877_v32, %v4876_v63  ;;  %v4879_v40 = vpop.f32.mrb[90].mxu1  ;;  %v4852_v0 = vpop.f32.mrb[91].mxu0 }
 0x252   :  { %v4880_v3 = vpop.f32.mrb[91].mxu1 }
 0x253   :  { %v2233_v33 = vadd.f32 %v4878_v60, %v4850_v2 }
 0x257   :  { %v5266_v38 = vpop.f32.mrb[92].mxu1 }
 0x258   :  { %v2320_v43 = vpop.f32.mrb[93].mxu1 }
 0x259   :  { %v5267_v12 = vpop.f32.mrb[94].mxu1 }
 0x25a   :  { %v2323_v61 = vpop.f32.mrb[95].mxu1 }
 0x266   :  { %v4898_v56 = vpop.f32.mrb[92].mxu0 }
 0x267   :  { %v4899_v62 = vpop.f32.mrb[93].mxu0 }
 0x268   :  { %v4900_v18 = vadd.f32 %v4899_v62, %v4898_v56  ;;  %v4901_v7 = vpop.f32.mrb[94].mxu0 }
 0x269   :  { %v4902_v51 = vpop.f32.mrb[95].mxu0 }
 0x26a   :  { %v2273_v22 = vadd.f32 %v4900_v18, %v7444_v4  ;;  %v4903_v59 = vadd.f32 %v4902_v51, %v4901_v7 }
 0x26c   :  { %v2321_v41 = vadd.f32 %v2320_v43, %v2273_v22  ;;  %v2276_v5 = vadd.f32 %v4903_v59, %v7446_v29 }
 0x26e   :  { %v7506_v21 = vmax.f32 %v2061_v45, %v2321_v41  ;;  %v2324_v42 = vadd.f32 %v2323_v61, %v2276_v5  ;;  %v4904_v54 = vpop.f32.mrb[96].mxu0 }
 0x26f   :  { %v4905_v25 = vpop.f32.mrb[97].mxu0 }
 0x270   :  { %v7511_v52 = vmax.f32 %v2062_v26, %v2324_v42  ;;  %v4906_v24 = vadd.f32 %v4905_v25, %v4904_v54  ;;  %v4907_v19 = vpop.f32.mrb[98].mxu0 }
 0x271   :  { %v4908_v4 = vpop.f32.mrb[99].mxu0 }
 0x272   :  { %v2281_v63 = vadd.f32 %v4906_v24, %v2233_v33 }
 0x274   :  { %v2329_v11 = vadd.f32 %v5266_v38, %v2281_v63 }
 0x276   :  { %v7516_v29 = vmax.f32 %v2063_v13, %v2329_v11 }
 0x277   :  { %v4930_v30 = vpop.f32.mrb[96].mxu1 }
 0x278   :  { %v4931_v8 = vpop.f32.mrb[97].mxu1 }
 0x279   :  { %v4932_v45 = vadd.f32 %v4931_v8, %v4930_v30  ;;  %v4933_v32 = vpop.f32.mrb[98].mxu1 }
 0x27a   :  { %v4934_v2 = vpop.f32.mrb[99].mxu1 }
 0x27b   :  { %v4935_v28 = vadd.f32 %v4934_v2, %v4933_v32 }
 0x27f   :  { %v4936_v60 = vpop.f32.mrb[100].mxu1 }
 0x280   :  { %v4937_v50 = vpop.f32.mrb[101].mxu1 }
 0x281   :  { %v4938_v53 = vadd.f32 %v4937_v50, %v4936_v60  ;;  %v4939_v26 = vpop.f32.mrb[102].mxu1 }
 0x282   :  { %v4940_v40 = vpop.f32.mrb[103].mxu1 }
 0x286   :  { %v4958_v0 = vpop.f32.mrb[100].mxu0 }
 0x287   :  { %v4959_v3 = vpop.f32.mrb[101].mxu0 }
 0x288   :  { %v4960_v33 = vadd.f32 %v4959_v3, %v4958_v0  ;;  %v4961_v27 = vpop.f32.mrb[102].mxu0 }
 0x289   :  { %v4962_v36 = vpop.f32.mrb[103].mxu0 }
 0x28a   :  { %v2498_v6 = vadd.f32 %v4960_v33, %v4932_v45  ;;  %v4963_v35 = vadd.f32 %v4962_v36, %v4961_v27 }
 0x28c   :  { %v2501_v57 = vadd.f32 %v4963_v35, %v4935_v28 }
 0x28e   :  { %v4964_v13 = vpop.f32.mrb[104].mxu0 }
 0x28f   :  { %v4965_v58 = vpop.f32.mrb[105].mxu0 }
 0x290   :  { %v4966_v9 = vadd.f32 %v4965_v58, %v4964_v13  ;;  %v4967_v38 = vpop.f32.mrb[106].mxu0 }
 0x291   :  { %v4968_v55 = vpop.f32.mrb[107].mxu0 }
 0x292   :  { %v2506_v43 = vadd.f32 %v4966_v9, %v4938_v53 }
 0x296   :  { %v5274_v34 = vpop.f32.mrb[108].mxu0 }
 0x297   :  { %v4986_v1 = vpop.f32.mrb[104].mxu1  ;;  %v2593_v47 = vpop.f32.mrb[109].mxu0 }
 0x298   :  { %v4987_v12 = vpop.f32.mrb[105].mxu1  ;;  %v5275_v37 = vpop.f32.mrb[110].mxu0 }
 0x299   :  { %v4988_v61 = vadd.f32 %v4987_v12, %v4986_v1  ;;  %v4989_v16 = vpop.f32.mrb[106].mxu1  ;;  %v2596_v10 = vpop.f32.mrb[111].mxu0  ;;  %v2921_v37 = vld [vmem:[%s7916_s3 + $0xc8] sm:$0xff] }
 0x29a   :  { %v4990_v14 = vpop.f32.mrb[107].mxu1 }
 0x29b   :  { %v2546_v46 = vadd.f32 %v4988_v61, %v2498_v6  ;;  %v4991_v17 = vadd.f32 %v4990_v14, %v4989_v16  ;;  %v2920_v16 = vld [vmem:[%s7916_s3 + $0xc0] sm:$0xff] }
 0x29d   :  { %v2594_v39 = vadd.f32 %v2593_v47, %v2546_v46  ;;  %v2549_v20 = vadd.f32 %v4991_v17, %v2501_v57 }
 0x29f   :  { %v2607_v23 = vmax.f32 %v7506_v21, %v2594_v39  ;;  %v2597_v15 = vadd.f32 %v2596_v10, %v2549_v20  ;;  %v4992_v48 = vpop.f32.mrb[108].mxu1  ;;  %v2912_v39 = vld [vmem:[%s7916_s3 + $0x80] sm:$0xff]  ;;  %v2913_v20 = vld [vmem:[%s7916_s3 + $0x88] sm:$0xff] }
 0x2a0   :  { %v4993_v44 = vpop.f32.mrb[109].mxu1 }
 0x2a1   :  { %v2608_v56 = vmax.f32 %v7511_v52, %v2597_v15  ;;  %v4994_v62 = vadd.f32 %v4993_v44, %v4992_v48  ;;  %v4995_v18 = vpop.f32.mrb[110].mxu1  ;;  %v5578_v15 = vpack.c.bf16 %v2921_v37, %v2920_v16  ;;  %v2952_v37 = vld [vmem:[%s7916_s3 + $0x1c0] sm:$0xff] }
 0x2a2   :  { %v4996_v7 = vpop.f32.mrb[111].mxu1  ;;  %v2923_v18 = vld [vmem:[%s7916_s3 + $0xd8] sm:$0xff] }
 0x2a3   :  { %v2554_v51 = vadd.f32 %v4994_v62, %v2506_v43  ;;  %v5566_v7 = vpack.c.bf16 %v2913_v20, %v2912_v39 }
 0x2a5   :  { %v7520_v22 = vadd.f32 %v5274_v34, %v2554_v51  ;;  %v7527_v34 = vld [vmem:[%s7917_s2] ss:$0 sm:$0xff] }
 0x2a7   :  { %v2609_v59 = vmax.f32 %v7516_v29, %v7520_v22  ;;  %v2916_v29 = vld [vmem:[%s7916_s3 + $0xa0] sm:$0xff]  ;;  %v2917_v22 = vld [vmem:[%s7916_s3 + $0xa8] sm:$0xff] }
 0x2b6   :  { %v5018_v41 = vpop.f32.mrb[112].mxu0 }
 0x2b7   :  { %v5046_v5 = vpop.f32.mrb[112].mxu1  ;;  %v5019_v42 = vpop.f32.mrb[113].mxu0 }
 0x2b8   :  { %v5047_v54 = vpop.f32.mrb[113].mxu1  ;;  %v5020_v25 = vadd.f32 %v5019_v42, %v5018_v41  ;;  %v5021_v24 = vpop.f32.mrb[114].mxu0  ;;  %v2915_v42 = vld [vmem:[%s7916_s3 + $0x98] sm:$0xff] }
 0x2b9   :  { %v5048_v21 = vadd.f32 %v5047_v54, %v5046_v5  ;;  %v5049_v19 = vpop.f32.mrb[114].mxu1  ;;  %v5022_v4 = vpop.f32.mrb[115].mxu0  ;;  %v2914_v5 = vld [vmem:[%s7916_s3 + $0x90] sm:$0xff] }
 0x2ba   :  { %v5050_v63 = vpop.f32.mrb[115].mxu1  ;;  %v5023_v11 = vadd.f32 %v5022_v4, %v5021_v24  ;;  %v2925_v24 = vld [vmem:[%s7916_s3 + $0xe8] sm:$0xff]  ;;  %v2926_v4 = vld [vmem:[%s7916_s3 + $0xf0] sm:$0xff] }
 0x2bb   :  { %v2771_v52 = vadd.f32 %v5048_v21, %v5020_v25  ;;  %v5051_v30 = vadd.f32 %v5050_v63, %v5049_v19  ;;  %v2924_v21 = vld [vmem:[%s7916_s3 + $0xe0] sm:$0xff]  ;;  %v5569_v19 = vpack.c.bf16 %v2915_v42, %v2914_v5  ;;  %v2927_v63 = vld [vmem:[%s7916_s3 + $0xf8] sm:$0xff]  ;;  %v2949_v5 = vld [vmem:[%s7916_s3 + $0x1a8] sm:$0xff] }
 0x2bd   :  { %v2774_v8 = vadd.f32 %v5051_v30, %v5023_v11  ;;  %v2918_v11 = vld [vmem:[%s7916_s3 + $0xb0] sm:$0xff]  ;;  %v2919_v30 = vld [vmem:[%s7916_s3 + $0xb8] sm:$0xff] }
 0x2be   :  { %v5024_v45 = vpop.f32.mrb[116].mxu0 }
 0x2bf   :  { %v5052_v32 = vpop.f32.mrb[116].mxu1  ;;  %v5025_v2 = vpop.f32.mrb[117].mxu0 }
 0x2c0   :  { %v5053_v28 = vpop.f32.mrb[117].mxu1  ;;  %v5026_v60 = vadd.f32 %v5025_v2, %v5024_v45  ;;  %v5027_v50 = vpop.f32.mrb[118].mxu0  ;;  %v2936_v45 = vld [vmem:[%s7916_s3 + $0x140] sm:$0xff]  ;;  %v5575_v2 = vpack.c.bf16 %v2919_v30, %v2918_v11  ;;  %v2961_v11 = vld [vmem:[%s7916_s3 + $0x208] sm:$0xff] }
 0x2c1   :  { %v5054_v53 = vadd.f32 %v5053_v28, %v5052_v32  ;;  %v5055_v26 = vpop.f32.mrb[118].mxu1  ;;  %v5028_v40 = vpop.f32.mrb[119].mxu0  ;;  %v2937_v32 = vld [vmem:[%s7916_s3 + $0x148] sm:$0xff]  ;;  %v2928_v28 = vld [vmem:[%s7916_s3 + $0x100] sm:$0xff] }
 0x2c2   :  { %v5056_v0 = vpop.f32.mrb[119].mxu1  ;;  %v5602_v50 = vpack.c.bf16 %v2937_v32, %v2936_v45  ;;  %v2938_v26 = vld [vmem:[%s7916_s3 + $0x150] sm:$0xff]  ;;  %v2939_v40 = vld [vmem:[%s7916_s3 + $0x158] sm:$0xff] }
 0x2c3   :  { %v2779_v3 = vadd.f32 %v5054_v53, %v5026_v60  ;;  %v2929_v60 = vld [vmem:[%s7916_s3 + $0x108] sm:$0xff]  ;;  %v2970_v45 = vld [vmem:[%s7916_s3 + $0x250] sm:$0xff]  ;;  %v2971_v32 = vld [vmem:[%s7916_s3 + $0x258] sm:$0xff] }
 0x2c4   :  { %v5590_v0 = vpack.c.bf16 %v2929_v60, %v2928_v28  ;;  %v2962_v60 = vld [vmem:[%s7916_s3 + $0x210] sm:$0xff] }
 0x2c7   :  { %v5282_v33 = vpop.f32.mrb[120].mxu1 }
 0x2c8   :  { %v2866_v27 = vpop.f32.mrb[121].mxu1 }
 0x2c9   :  { %v5283_v36 = vpop.f32.mrb[122].mxu1 }
 0x2ca   :  { %v2869_v6 = vpop.f32.mrb[123].mxu1  ;;  %v5605_v36 = vpack.c.bf16 %v2939_v40, %v2938_v26  ;;  %v2972_v26 = vld [vmem:[%s7916_s3 + $0x260] sm:$0xff]  ;;  %v2973_v40 = vld [vmem:[%s7916_s3 + $0x268] sm:$0xff] }
 0x2d6   :  { %v5074_v35 = vpop.f32.mrb[120].mxu0 }
 0x2d7   :  { %v5075_v57 = vpop.f32.mrb[121].mxu0 }
 0x2d8   :  { %v5076_v13 = vadd.f32 %v5075_v57, %v5074_v35  ;;  %v5077_v58 = vpop.f32.mrb[122].mxu0  ;;  %v2941_v35 = vld [vmem:[%s7916_s3 + $0x168] sm:$0xff] }
 0x2d9   :  { %v5078_v9 = vpop.f32.mrb[123].mxu0 }
 0x2da   :  { %v5079_v38 = vadd.f32 %v5078_v9, %v5077_v58  ;;  %v2819_v55 = vadd.f32 %v5076_v13, %v2771_v52  ;;  %v5572_v52 = vpack.c.bf16 %v2917_v22, %v2916_v29  ;;  %v2932_v13 = vld [vmem:[%s7916_s3 + $0x120] sm:$0xff]  ;;  %v2933_v58 = vld [vmem:[%s7916_s3 + $0x128] sm:$0xff]  ;;  %v2951_v29 = vld [vmem:[%s7916_s3 + $0x1b8] sm:$0xff] }
 0x2dc   :  { %v2867_v43 = vadd.f32 %v2866_v27, %v2819_v55  ;;  %v2822_v1 = vadd.f32 %v5079_v38, %v2774_v8  ;;  %v5587_v8 = vpack.c.bf16 %v2927_v63, %v2926_v4  ;;  %v2931_v27 = vld [vmem:[%s7916_s3 + $0x118] sm:$0xff]  ;;  %v2942_v55 = vld [vmem:[%s7916_s3 + $0x170] sm:$0xff]  ;;  %v2969_v4 = vld [vmem:[%s7916_s3 + $0x248] sm:$0xff] }
 0x2de   :  { %v2880_v12 = vmax.f32 %v2607_v23, %v2867_v43  ;;  %v2870_v47 = vadd.f32 %v2869_v6, %v2822_v1  ;;  %v5080_v61 = vpop.f32.mrb[124].mxu0  ;;  %v2940_v6 = vld [vmem:[%s7916_s3 + $0x160] sm:$0xff]  ;;  %v2943_v43 = vld [vmem:[%s7916_s3 + $0x178] sm:$0xff]  ;;  %v5596_v1 = vpack.c.bf16 %v2933_v58, %v2932_v13  ;;  %v2966_v13 = vld [vmem:[%s7916_s3 + $0x230] sm:$0xff] }
 0x2df   :  { %v5081_v14 = vpop.f32.mrb[125].mxu0  ;;  %v5608_v9 = vpack.c.bf16 %v2941_v35, %v2940_v6  ;;  %v2974_v6 = vld [vmem:[%s7916_s3 + $0x270] sm:$0xff]  ;;  %v2975_v35 = vld [vmem:[%s7916_s3 + $0x278] sm:$0xff] }
 0x2e0   :  { %v2890_v10 = vadd.f32 %v7527_v34, %v2880_v12  ;;  %v7536_v46 = vmax.f32 %v2608_v56, %v2870_v47  ;;  %v5082_v17 = vadd.f32 %v5081_v14, %v5080_v61  ;;  %v5083_v23 = vpop.f32.mrb[126].mxu0  ;;  %v2922_v56 = vld [vmem:[%s7916_s3 + $0xd0] sm:$0xff]  ;;  %v2935_v47 = vld [vmem:[%s7916_s3 + $0x138] sm:$0xff]  ;;  %v5611_v61 = vpack.c.bf16 %v2943_v43, %v2942_v55  ;;  %v2953_v14 = vld [vmem:[%s7916_s3 + $0x1c8] sm:$0xff] }
 0x2e1   :  { %v5084_v48 = vpop.f32.mrb[127].mxu0  ;;  %v5581_v54 = vpack.c.bf16 %v2923_v18, %v2922_v56  ;;  %v2934_v12 = vld [vmem:[%s7916_s3 + $0x130] sm:$0xff]  ;;  %v5626_v39 = vpack.c.bf16 %v2953_v14, %v2952_v37  ;;  %v2956_v18 = vld [vmem:[%s7916_s3 + $0x1e0] sm:$0xff] }
 0x2e2   :  { %v2893_v44 = vmax.f32 %v2890_v10, 0.0  ;;  %v2827_v62 = vadd.f32 %v5082_v17, %v2779_v3  ;;  %v2891_v38 = vadd.f32 %v7527_v34, %v7536_v46  ;;  %v5599_v10 = vpack.c.bf16 %v2935_v47, %v2934_v12  ;;  %v2944_v46 = vld [vmem:[%s7916_s3 + $0x180] sm:$0xff]  ;;  %v2945_v17 = vld [vmem:[%s7916_s3 + $0x188] sm:$0xff]  ;;  %v2954_v23 = vld [vmem:[%s7916_s3 + $0x1d0] sm:$0xff] }
 0x2e3   :  { %v5614_v48 = vpack.c.bf16 %v2945_v17, %v2944_v46  ;;  %v2976_v43 = vld [vmem:[%s7916_s3 + $0x280] sm:$0xff]  ;;  %v2978_v14 = vld [vmem:[%s7916_s3 + $0x290] sm:$0xff] }
 0x2e4   :  { %v2875_v51 = vadd.f32 %v5282_v33, %v2827_v62  ;;  %5320 = vmatmul.mubr.msk.f32.vlgmr.msra.gmra.mrb[128].mxu0 %vm2994_vm2, %v2893_v44  ;;  %v2993_v41 = vrot.slane %v2893_v44, 2  ;;  %v3213_v53 = vrot.slane %v2893_v44, 6  ;;  %v3139_v3 = vrot.slane %v2893_v44, 4  ;;  %v2930_v33 = vld [vmem:[%s7916_s3 + $0x110] sm:$0xff]  ;;  %v2947_v62 = vld [vmem:[%s7916_s3 + $0x198] sm:$0xff]  ;;  %v2988_v17 = vld [vmem:[%s7916_s3 + $0x2e0] sm:$0xff] }
 0x2e5   :  { %5579 = vmatpush3.bf16.msra.mxu0 %v5578_v15  ;;  %5357 = vmatprep.mubr.msk.f32.mxu0 %vm5978_vm1, %v5979_v31  ;;  %v5593_v57 = vpack.c.bf16 %v2931_v27, %v2930_v33  ;;  %v7659_v16 = vmax.f32 %v2891_v38, 0.0  ;;  %v2955_v15 = vld [vmem:[%s7916_s3 + $0x1d8] sm:$0xff]  ;;  %v2946_v44 = vld [vmem:[%s7916_s3 + $0x190] sm:$0xff]  ;;  %v2965_v33 = vld [vmem:[%s7916_s3 + $0x228] sm:$0xff]  ;;  %v5656_v27 = vpack.c.bf16 %v2973_v40, %v2972_v26 }
 0x2e6   :  { %v7562_v25 = vmax.f32 %v2609_v59, %v2875_v51  ;;  %5301 = vmatmul.mubr.msk.f32.vlgmr.msra.gmra.mrb[124].mxu1 %vm2994_vm2, %v2993_v41  ;;  %5580 = vmatprep.subr.bf16.mxu0 %v5977_v49  ;;  %v5584_v59 = vpack.c.bf16 %v2925_v24, %v2924_v21  ;;  %v5629_v56 = vpack.c.bf16 %v2955_v15, %v2954_v23  ;;  %v2948_v41 = vld [vmem:[%s7916_s3 + $0x1a0] sm:$0xff]  ;;  %v2959_v21 = vld [vmem:[%s7916_s3 + $0x1f8] sm:$0xff]  ;;  %v2985_v38 = vld [vmem:[%s7916_s3 + $0x2c8] sm:$0xff] }
 0x2e7   :  { %5567 = vmatpush3.bf16.msra.mxu1 %v5566_v7  ;;  %5338 = vmatprep.mubr.msk.f32.mxu1 %vm5978_vm1, %v5979_v31  ;;  %v3361_v20 = vrot.slane %v7659_v16, 2  ;;  %v2957_v7 = vld [vmem:[%s7916_s3 + $0x1e8] sm:$0xff]  ;;  %v5617_v51 = vpack.c.bf16 %v2947_v62, %v2946_v44  ;;  %v5620_v24 = vpack.c.bf16 %v2949_v5, %v2948_v41  ;;  %v3435_v28 = vrot.slane %v7659_v16, 4  ;;  %v2980_v23 = vld [vmem:[%s7916_s3 + $0x2a0] sm:$0xff]  ;;  %v2990_v44 = vld [vmem:[%s7916_s3 + $0x2f0] sm:$0xff] }
 0x2e8   :  { %5568 = vmatprep.subr.bf16.mxu1 %v5977_v49  ;;  %v5632_v42 = vpack.c.bf16 %v2957_v7, %v2956_v18  ;;  %v2981_v15 = vld [vmem:[%s7916_s3 + $0x2a8] sm:$0xff]  ;;  %v2991_v62 = vld [vmem:[%s7916_s3 + $0x2f8] sm:$0xff]  ;;  %v2982_v18 = vld [vmem:[%s7916_s3 + $0x2b0] sm:$0xff] }
 0x2e9   :  { %5582 = vmatpush3.bf16.msra.mxu0 %v5581_v54  ;;  %v2958_v54 = vld [vmem:[%s7916_s3 + $0x1f0] sm:$0xff]  ;;  %v2983_v7 = vld [vmem:[%s7916_s3 + $0x2b8] sm:$0xff] }
 0x2ea   :  { %5583 = vmatprep.subr.bf16.mxu0 %v5977_v49  ;;  %v5635_v22 = vpack.c.bf16 %v2959_v21, %v2958_v54  ;;  %v5671_v41 = vpack.c.bf16 %v2983_v7, %v2982_v18  ;;  %v3887_v54 = vld [vmem:[%s7918_s5] sm:$0xff]  ;;  %v3888_v21 = vld [vmem:[%s7918_s5 + $0x8] sm:$0xff] }
 0x2eb   :  { %5570 = vmatpush3.bf16.msra.mxu1 %v5569_v19  ;;  %v2950_v19 = vld [vmem:[%s7916_s3 + $0x1b0] sm:$0xff] }
 0x2ec   :  { %5571 = vmatprep.subr.bf16.mxu1 %v5977_v49  ;;  %v5623_v63 = vpack.c.bf16 %v2951_v29, %v2950_v19  ;;  %v3889_v19 = vld [vmem:[%s7918_s5 + $0x10] sm:$0xff]  ;;  %v3890_v29 = vld [vmem:[%s7918_s5 + $0x18] sm:$0xff] }
 0x2ed   :  { %5585 = vmatpush3.bf16.msra.mxu0 %v5584_v59  ;;  %v2968_v59 = vld [vmem:[%s7916_s3 + $0x240] sm:$0xff] }
 0x2ee   :  { %5586 = vmatprep.subr.bf16.mxu0 %v5977_v49  ;;  %v5650_v30 = vpack.c.bf16 %v2969_v4, %v2968_v59  ;;  %v3891_v59 = vld [vmem:[%s7918_s5 + $0x20] sm:$0xff]  ;;  %v3892_v4 = vld [vmem:[%s7918_s5 + $0x28] sm:$0xff] }
 0x2ef   :  { %5573 = vmatpush3.bf16.msra.mxu1 %v5572_v52  ;;  %v2960_v52 = vld [vmem:[%s7916_s3 + $0x200] sm:$0xff] }
 0x2f0   :  { %5574 = vmatprep.subr.bf16.mxu1 %v5977_v49 }
 0x2f1   :  { %5588 = vmatpush3.bf16.msra.mxu0 %v5587_v8  ;;  %v3509_v8 = vrot.slane %v7659_v16, 6 }
 0x2f2   :  { %5601 = vmatprep.subr.bf16.mxu0 %v5977_v49 }
 0x2f3   :  { %5576 = vmatpush3.bf16.msra.mxu1 %v5575_v2  ;;  %v5638_v2 = vpack.c.bf16 %v2961_v11, %v2960_v52  ;;  %v3893_v52 = vld [vmem:[%s7918_s5 + $0x30] sm:$0xff]  ;;  %v3894_v11 = vld [vmem:[%s7918_s5 + $0x38] sm:$0xff] }
 0x2f4   :  { %5358 = vmatmul.mubr.msk.f32.vlgmr.msra.gmra.mrb[130].mxu0 %vm2994_vm2, %v3213_v53  ;;  %5589 = vmatprep.subr.bf16.mxu1 %v5977_v49  ;;  %v5653_v53 = vpack.c.bf16 %v2971_v32, %v2970_v45  ;;  %v3896_v45 = vld [vmem:[%s7918_s5 + $0x48] sm:$0xff] }
 0x2f5   :  { %5603 = vmatpush3.bf16.msra.mxu0 %v5602_v50  ;;  %5395 = vmatprep.mubr.msk.f32.mxu0 %vm5978_vm1, %v5979_v31  ;;  %v2963_v50 = vld [vmem:[%s7916_s3 + $0x218] sm:$0xff] }
 0x2f6   :  { %5339 = vmatmul.mubr.msk.f32.vlgmr.msra.gmra.mrb[126].mxu1 %vm2994_vm2, %v3139_v3  ;;  %5604 = vmatprep.subr.bf16.mxu0 %v5977_v49  ;;  %v2964_v3 = vld [vmem:[%s7916_s3 + $0x220] sm:$0xff] }
 0x2f7   :  { %5591 = vmatpush3.bf16.msra.mxu1 %v5590_v0  ;;  %5376 = vmatprep.mubr.msk.f32.mxu1 %vm5978_vm1, %v5979_v31  ;;  %v5641_v0 = vpack.c.bf16 %v2963_v50, %v2962_v60  ;;  %v3899_v50 = vld [vmem:[%s7918_s5 + $0x60] sm:$0xf] }
 0x2f8   :  { %5592 = vmatprep.subr.bf16.mxu1 %v5977_v49 }
 0x2f9   :  { %5606 = vmatpush3.bf16.msra.mxu0 %v5605_v36  ;;  %v2892_v36 = vadd.f32 %v7527_v34, %v7562_v25  ;;  %v2967_v34 = vld [vmem:[%s7916_s3 + $0x238] sm:$0xff]  ;;  %v5659_v25 = vpack.c.bf16 %v2975_v35, %v2974_v6 }
 0x2fa   :  { %5607 = vmatprep.subr.bf16.mxu0 %v5977_v49  ;;  %v5647_v55 = vpack.c.bf16 %v2967_v34, %v2966_v13 }
 0x2fb   :  { %5594 = vmatpush3.bf16.msra.mxu1 %v5593_v57  ;;  %v5644_v57 = vpack.c.bf16 %v2965_v33, %v2964_v3  ;;  %v2895_v58 = vmax.f32 %v2892_v36, 0.0 }
 0x2fc   :  { %5595 = vmatprep.subr.bf16.mxu1 %v5977_v49 }
 0x2fd   :  { %5609 = vmatpush3.bf16.msra.mxu0 %v5608_v9  ;;  %v2984_v9 = vld [vmem:[%s7916_s3 + $0x2c0] sm:$0xff]  ;;  %v3657_v47 = vrot.slane %v2895_v58, 2  ;;  %v3805_v5 = vrot.slane %v2895_v58, 6 }
 0x2fe   :  { %5610 = vmatprep.subr.bf16.mxu0 %v5977_v49  ;;  %v5674_v12 = vpack.c.bf16 %v2985_v38, %v2984_v9 }
 0x2ff   :  { %5597 = vmatpush3.bf16.msra.mxu1 %v5596_v1  ;;  %v2977_v1 = vld [vmem:[%s7916_s3 + $0x288] sm:$0xff] }
 0x300   :  { %5598 = vmatprep.subr.bf16.mxu1 %v5977_v49  ;;  %v5662_v37 = vpack.c.bf16 %v2977_v1, %v2976_v43 }
 0x301   :  { %5612 = vmatpush3.bf16.msra.mxu0 %v5611_v61  ;;  %v2986_v61 = vld [vmem:[%s7916_s3 + $0x2d0] sm:$0xff] }
 0x302   :  { %5625 = vmatprep.subr.bf16.mxu0 %v5977_v49 }
 0x303   :  { %5600 = vmatpush3.bf16.msra.mxu1 %v5599_v10  ;;  %v2979_v10 = vld [vmem:[%s7916_s3 + $0x298] sm:$0xff] }
 0x304   :  { %5396 = vmatmul.mubr.msk.f32.vlgmr.msra.gmra.mrb[132].mxu0 %vm2994_vm2, %v3361_v20  ;;  %5613 = vmatprep.subr.bf16.mxu1 %v5977_v49  ;;  %v5665_v20 = vpack.c.bf16 %v2979_v10, %v2978_v14 }
 0x305   :  { %5627 = vmatpush3.bf16.msra.mxu0 %v5626_v39  ;;  %5433 = vmatprep.mubr.msk.f32.mxu0 %vm5978_vm1, %v5979_v31  ;;  %v2989_v39 = vld [vmem:[%s7916_s3 + $0x2e8] sm:$0xff] }
 0x306   :  { %5377 = vmatmul.mubr.msk.f32.vlgmr.msra.gmra.mrb[128].mxu1 %vm2994_vm2, %v7659_v16  ;;  %5628 = vmatprep.subr.bf16.mxu0 %v5977_v49  ;;  %v2987_v16 = vld [vmem:[%s7916_s3 + $0x2d8] sm:$0xff] }
 0x307   :  { %5615 = vmatpush3.bf16.msra.mxu1 %v5614_v48  ;;  %5414 = vmatprep.mubr.msk.f32.mxu1 %vm5978_vm1, %v5979_v31  ;;  %v5677_v46 = vpack.c.bf16 %v2987_v16, %v2986_v61  ;;  %v5680_v48 = vpack.c.bf16 %v2989_v39, %v2988_v17 }
 0x308   :  { %5616 = vmatprep.subr.bf16.mxu1 %v5977_v49 }
 0x309   :  { %5630 = vmatpush3.bf16.msra.mxu0 %v5629_v56  ;;  %v5668_v56 = vpack.c.bf16 %v2981_v15, %v2980_v23 }
 0x30a   :  { %5631 = vmatprep.subr.bf16.mxu0 %v5977_v49 }
 0x30b   :  { %5618 = vmatpush3.bf16.msra.mxu1 %v5617_v51  ;;  %v5683_v51 = vpack.c.bf16 %v2991_v62, %v2990_v44 }
 0x30c   :  { %5619 = vmatprep.subr.bf16.mxu1 %v5977_v49 }
 0x30d   :  { %5633 = vmatpush3.bf16.msra.mxu0 %v5632_v42  ;;  %v3731_v42 = vrot.slane %v2895_v58, 4 }
 0x30e   :  { %5634 = vmatprep.subr.bf16.mxu0 %v5977_v49 }
 0x30f   :  { %5621 = vmatpush3.bf16.msra.mxu1 %v5620_v24  ;;  %v5686_v24 = vpack.c.bf16 %v3888_v21, %v3887_v54 }
 0x310   :  { %5622 = vmatprep.subr.bf16.mxu1 %v5977_v49 }
 0x311   :  { %5636 = vmatpush3.bf16.msra.mxu0 %v5635_v22  ;;  %v5689_v22 = vpack.c.bf16 %v3890_v29, %v3889_v19 }
 0x312   :  { %5649 = vmatprep.subr.bf16.mxu0 %v5977_v49 }
 0x313   :  { %5624 = vmatpush3.bf16.msra.mxu1 %v5623_v63  ;;  %v5692_v63 = vpack.c.bf16 %v3892_v4, %v3891_v59 }
 0x314   :  { %5434 = vmatmul.mubr.msk.f32.vlgmr.msra.gmra.mrb[134].mxu0 %vm2994_vm2, %v3509_v8  ;;  %5637 = vmatprep.subr.bf16.mxu1 %v5977_v49  ;;  %v3895_v8 = vld [vmem:[%s7918_s5 + $0x40] sm:$0xff] }
 0x315   :  { %5651 = vmatpush3.bf16.msra.mxu0 %v5650_v30  ;;  %5471 = vmatprep.mubr.msk.f32.mxu0 %vm5978_vm1, %v5979_v31  ;;  %v5695_v30 = vpack.c.bf16 %v3894_v11, %v3893_v52  ;;  %v5698_v32 = vpack.c.bf16 %v3896_v45, %v3895_v8 }
 0x316   :  { %5415 = vmatmul.mubr.msk.f32.vlgmr.msra.gmra.mrb[130].mxu1 %vm2994_vm2, %v3435_v28  ;;  %5652 = vmatprep.subr.bf16.mxu0 %v5977_v49  ;;  %v3898_v28 = vld [vmem:[%s7918_s5 + $0x58] sm:$0xff] }
 0x317   :  { %5639 = vmatpush3.bf16.msra.mxu1 %v5638_v2  ;;  %5452 = vmatprep.mubr.msk.f32.mxu1 %vm5978_vm1, %v5979_v31  ;;  %v3897_v2 = vld [vmem:[%s7918_s5 + $0x50] sm:$0xff] }
 0x318   :  { %5640 = vmatprep.subr.bf16.mxu1 %v5977_v49  ;;  %v5701_v60 = vpack.c.bf16 %v3898_v28, %v3897_v2 }
 0x319   :  { %5654 = vmatpush3.bf16.msra.mxu0 %v5653_v53 }
 0x31a   :  { %5655 = vmatprep.subr.bf16.mxu0 %v5977_v49 }
 0x31b   :  { %5642 = vmatpush3.bf16.msra.mxu1 %v5641_v0 }
 0x31c   :  { %5643 = vmatprep.subr.bf16.mxu1 %v5977_v49 }
 0x31d   :  { %5657 = vmatpush3.bf16.msra.mxu0 %v5656_v27 }
 0x31e   :  { %5658 = vmatprep.subr.bf16.mxu0 %v5977_v49 }
 0x31f   :  { %5645 = vmatpush3.bf16.msra.mxu1 %v5644_v57 }
 0x320   :  { %5646 = vmatprep.subr.bf16.mxu1 %v5977_v49 }
 0x321   :  { %5660 = vmatpush3.bf16.msra.mxu0 %v5659_v25 }
 0x322   :  { %5673 = vmatprep.subr.bf16.mxu0 %v5977_v49 }
 0x323   :  { %5648 = vmatpush3.bf16.msra.mxu1 %v5647_v55 }
 0x324   :  { %5472 = vmatmul.mubr.msk.f32.vlgmr.msra.gmra.mrb[136].mxu0 %vm2994_vm2, %v3657_v47  ;;  %5661 = vmatprep.subr.bf16.mxu1 %v5977_v49 }
 0x325   :  { %5675 = vmatpush3.bf16.msra.mxu0 %v5674_v12  ;;  %5509 = vmatprep.mubr.msk.f32.mxu0 %vm5978_vm1, %v5979_v31 }
 0x326   :  { %5453 = vmatmul.mubr.msk.f32.vlgmr.msra.gmra.mrb[132].mxu1 %vm2994_vm2, %v2895_v58  ;;  %5676 = vmatprep.subr.bf16.mxu0 %v5977_v49 }
 0x327   :  { %5663 = vmatpush3.bf16.msra.mxu1 %v5662_v37  ;;  %5490 = vmatprep.mubr.msk.f32.mxu1 %vm5978_vm1, %v5979_v31 }
 0x328   :  { %5664 = vmatprep.subr.bf16.mxu1 %v5977_v49 }
 0x329   :  { %5678 = vmatpush3.bf16.msra.mxu0 %v5677_v46 }
 0x32a   :  { %5679 = vmatprep.subr.bf16.mxu0 %v5977_v49 }
 0x32b   :  { %5666 = vmatpush3.bf16.msra.mxu1 %v5665_v20 }
 0x32c   :  { %5667 = vmatprep.subr.bf16.mxu1 %v5977_v49 }
 0x32d   :  { %5681 = vmatpush3.bf16.msra.mxu0 %v5680_v48  ;;  %v4294_v48 = vld [vmem:[%s7920_s4] ss:$0 sm:$0xff] }
 0x32e   :  { %5682 = vmatprep.subr.bf16.mxu0 %v5977_v49 }
 0x32f   :  { %5669 = vmatpush3.bf16.msra.mxu1 %v5668_v56 }
 0x330   :  { %5670 = vmatprep.subr.bf16.mxu1 %v5977_v49 }
 0x331   :  { %5684 = vmatpush3.bf16.msra.mxu0 %v5683_v51 }
 0x333   :  { %5672 = vmatpush3.bf16.msra.mxu1 %v5671_v41 }
 0x334   :  { %5510 = vmatmul.mubr.msk.f32.vlgmr.msra.gmra.mrb[138].mxu0 %vm2994_vm2, %v3805_v5  ;;  %5685 = vmatprep.subr.bf16.mxu1 %v5977_v49 }
 0x336   :  { %5491 = vmatmul.mubr.msk.f32.vlgmr.msra.gmra.mrb[134].mxu1 %vm2994_vm2, %v3731_v42 }
 0x337   :  { %5538 = vmatprep.mubr.msk.f32.mxu1 %vm5978_vm1, %v5979_v31  ;;  %5687 = vmatpush3.bf16.msra.mxu1 %v5686_v24 }
 0x338   :  { %5688 = vmatprep.subr.bf16.mxu1 %v5977_v49 }
 0x33b   :  { %5690 = vmatpush3.bf16.msra.mxu1 %v5689_v22 }
 0x33c   :  { %5691 = vmatprep.subr.bf16.mxu1 %v5977_v49 }
 0x33f   :  { %5693 = vmatpush3.bf16.msra.mxu1 %v5692_v63 }
 0x340   :  { %5694 = vmatprep.subr.bf16.mxu1 %v5977_v49 }
 0x343   :  { %5696 = vmatpush3.bf16.msra.mxu1 %v5695_v30 }
 0x344   :  { %5697 = vmatprep.subr.bf16.mxu1 %v5977_v49 }
 0x347   :  { %5699 = vmatpush3.bf16.msra.mxu1 %v5698_v32 }
 0x348   :  { %5700 = vmatprep.subr.bf16.mxu1 %v5977_v49  ;;  %v12_v49 = vstv %s7919_s6 }
 0x349   :  { %13 = vst [vmem:[#allocation2] sm:$0x1] %v12_v49 }
 0x34b   :  { %5702 = vmatpush3.bf16.msra.mxu1 %v5701_v60 }
 0x34c   :  { %5536 = vmatprep.subr.mxu1 %v5979_v31 }
 0x34f   :  { %5537 = vmatpush3.msk.msra.mxu1 %vm3911_vm3, %v3899_v50 }
 0x350   :  { %v4295_v56 = vld [vmem:[#allocation2] ss:$0 sm:$0xff] }
 0x3b7   :  { %v3135_v53 = vpop.f32.mrb[128].mxu0 }
 0x3b8   :  { %v5321_v26 = vpop.f32.mrb[129].mxu0 }
 0x3b9   :  { %v3063_v40 = vpop.f32.mrb[124].mxu1 }
 0x3ba   :  { %v3136_v0 = vadd.f32 %v3135_v53, %v3063_v40  ;;  %v5302_v3 = vpop.f32.mrb[125].mxu1 }
 0x3c7   :  { %v3282_v33 = vpop.f32.mrb[130].mxu0 }
 0x3c8   :  { %v5359_v27 = vpop.f32.mrb[131].mxu0 }
 0x3c9   :  { %v3208_v36 = vpop.f32.mrb[126].mxu1 }
 0x3ca   :  { %v3212_v31 = vadd.f32 %v3208_v36, %v3136_v0  ;;  %v5340_v6 = vpop.f32.mrb[127].mxu1 }
 0x3cc   :  { %v3286_v35 = vadd.f32 %v3282_v33, %v3212_v31 }
 0x3d7   :  { %v3430_v57 = vpop.f32.mrb[132].mxu0 }
 0x3d8   :  { %v5397_v13 = vpop.f32.mrb[133].mxu0 }
 0x3d9   :  { %v3356_v34 = vpop.f32.mrb[128].mxu1 }
 0x3da   :  { %v3360_v25 = vadd.f32 %v3356_v34, %v3286_v35  ;;  %v5378_v58 = vpop.f32.mrb[129].mxu1 }
 0x3dc   :  { %v3434_v9 = vadd.f32 %v3430_v57, %v3360_v25 }
 0x3e7   :  { %v3578_v38 = vpop.f32.mrb[134].mxu0 }
 0x3e8   :  { %v5435_v55 = vpop.f32.mrb[135].mxu0 }
 0x3e9   :  { %v3504_v43 = vpop.f32.mrb[130].mxu1 }
 0x3ea   :  { %v3508_v1 = vadd.f32 %v3504_v43, %v3434_v9  ;;  %v5416_v12 = vpop.f32.mrb[131].mxu1 }
 0x3ec   :  { %v3582_v47 = vadd.f32 %v3578_v38, %v3508_v1 }
 0x3f7   :  { %v3726_v61 = vpop.f32.mrb[136].mxu0 }
 0x3f8   :  { %v5473_v16 = vpop.f32.mrb[137].mxu0 }
 0x3f9   :  { %v3652_v37 = vpop.f32.mrb[132].mxu1 }
 0x3fa   :  { %v3656_v14 = vadd.f32 %v3652_v37, %v3582_v47  ;;  %v5454_v10 = vpop.f32.mrb[133].mxu1 }
 0x3fc   :  { %v3730_v46 = vadd.f32 %v3726_v61, %v3656_v14 }
 0x407   :  { %v3874_v17 = vpop.f32.mrb[138].mxu0 }
 0x408   :  { %v5511_v39 = vpop.f32.mrb[139].mxu0 }
 0x409   :  { %v3800_v20 = vpop.f32.mrb[134].mxu1 }
 0x40a   :  { %v3804_v23 = vadd.f32 %v3800_v20, %v3730_v46  ;;  %v5492_v15 = vpop.f32.mrb[135].mxu1 }
 0x40c   :  { %v3878_v44 = vadd.f32 %v3874_v17, %v3804_v23 }
 0x40e   :  { %v3886_v62 = vadd.f32 %v4294_v48, %v3878_v44 }
 0x410   :  { %5539 = vmatmul.mubr.msk.f32.vlgmr.msra.gmra.mrb[136].mxu1 %vm3907_vm4, %v3886_v62 }
 0x4e3   :  { %v3981_v18 = vpop.f32.mrb[136].mxu1 }
 0x4e4   :  { %v3982_v7 = vadd.f32 %v4295_v56, %v3981_v18  ;;  %v5540_v51 = vpop.f32.mrb[137].mxu1 }
 0x4e6   :  { %3986 = vst.msk [vmem:[%s7921_s7] sm:$0x3] %vm3985_vm5, %v3982_v7 }

</bundles_post_ra>
